<compile_context>
chip_gen: v6e
topology: v6e:2x2x1
jax: 0.10.0
libtpu: 0.0.40
codegen_flags: <defaults>
</compile_context>

<pallas_src>
import math

import jax
import jax.numpy as jnp
from jax.experimental import pallas as pl
from jax.experimental.pallas import tpu as pltpu


def _round_up(x, m):
    return (x + m - 1) // m * m


def _choose_tiles(batch, desired_tile_b):
    """Return (b_pad, tile_b, chunk).

    b_pad : batch padded only to the next 128-lane multiple (padding costs real
            sin work in this VALU-bound kernel).
    tile_b: 128-multiple that exactly divides b_pad (no per-tile padding) and,
            when >=2 lane groups exist, leaves >=2 grid steps (v7x megacore).
    chunk : static lane width processed per inner iteration (bounds vregs).
    """
    b_pad = _round_up(max(batch, 1), 128)
    m = b_pad // 128                      # number of 128-lane groups
    t_max = max(1, desired_tile_b // 128)
    if m >= 2:
        t_max = min(t_max, max(1, m // 2))   # guarantee >=2 grid steps
    t = max(d for d in range(1, t_max + 1) if m % d == 0)
    tile_b = 128 * t
    chunk = 256 if tile_b % 256 == 0 else 128
    return b_pad, tile_b, chunk


def wave_kernel(x_ref, a_ref, omega_ref, phi_ref, bias_ref, out_ref):
    # x_ref:            (n_in, tile_b)      batch on the lane axis
    # a/omega/phi_ref:  (n_in, n_out, C)    pre-broadcast, lane-dense, f32, resident
    # bias_ref:         (n_out, C)          pre-broadcast, f32, resident
    # out_ref:          (n_out, tile_b)
    n_in, tile_b = x_ref.shape
    n_out, C = bias_ref.shape
    n_chunks = tile_b // C

    bias0 = bias_ref[...]                                    # (n_out, C), f32

    # Static chunk loop: static slices only (trivially lowerable); each chunk
    # ends with its store, so live vregs stay small (acc is 4-8 vregs).
    for c in range(n_chunks):
        lo = c * C
        acc = bias0                                          # bias folded into init
        for i in range(n_in):                                # small static reduction axis
            # Replicate the x row across sublanes; the params need NO runtime
            # broadcast (already lane-dense at width C).
            x_i = jnp.broadcast_to(
                x_ref[i:i + 1, lo:lo + C].astype(jnp.float32), (n_out, C))
            acc = acc + a_ref[i] * jnp.sin(omega_ref[i] * x_i + phi_ref[i])
        out_ref[:, lo:lo + C] = acc.astype(out_ref.dtype)


def wave_layer(x, A, omega, phi, bias, *, tile_b=1024):
    """out[b, o] = sum_i A[i,o] * sin(omega[i,o] * x[b,i] + phi[i,o]) + bias[o]."""
    B, n_in = x.shape
    n_in2, n_out = A.shape
    assert n_in == n_in2
    assert omega.shape == (n_in, n_out) and phi.shape == (n_in, n_out)
    assert bias.shape == (n_out,)

    b_pad, tile_b, chunk = _choose_tiles(B, tile_b)

    # Wrapper-side layout plumbing (not compute):
    #   * batch -> lanes, padded only to a 128 multiple,
    #   * params pre-broadcast to lane-dense (n_in, n_out, chunk) and cast to
    #     f32 once (no per-iteration converts or cross-lane broadcasts in-kernel),
    #   * bias pre-broadcast to (n_out, chunk).
    x_t = jnp.pad(x, ((0, b_pad - B), (0, 0))).T                                  # (n_in, b_pad)
    a3 = jnp.broadcast_to(A.astype(jnp.float32)[:, :, None], (n_in, n_out, chunk))
    w3 = jnp.broadcast_to(omega.astype(jnp.float32)[:, :, None], (n_in, n_out, chunk))
    p3 = jnp.broadcast_to(phi.astype(jnp.float32)[:, :, None], (n_in, n_out, chunk))
    b2 = jnp.broadcast_to(bias.astype(jnp.float32)[:, None], (n_out, chunk))

    grid = (b_pad // tile_b,)
    cost = pl.CostEstimate(
        flops=4 * b_pad * n_in * n_out,
        transcendentals=b_pad * n_in * n_out,
        bytes_accessed=4 * (n_in * b_pad + n_out * b_pad
                            + 3 * n_in * n_out * chunk + n_out * chunk),
    )

    out_t = pl.pallas_call(
        wave_kernel,
        out_shape=jax.ShapeDtypeStruct((n_out, b_pad), x.dtype),
        grid_spec=pltpu.PrefetchScalarGridSpec(
            num_scalar_prefetch=0,
            grid=grid,
            in_specs=[
                pl.BlockSpec((n_in, tile_b), lambda i: (0, i)),           # x tile (batch lanes)
                pl.BlockSpec((n_in, n_out, chunk), lambda i: (0, 0, 0)),  # A     (resident)
                pl.BlockSpec((n_in, n_out, chunk), lambda i: (0, 0, 0)),  # omega (resident)
                pl.BlockSpec((n_in, n_out, chunk), lambda i: (0, 0, 0)),  # phi   (resident)
                pl.BlockSpec((n_out, chunk), lambda i: (0, 0)),           # bias  (resident)
            ],
            out_specs=pl.BlockSpec((n_out, tile_b), lambda i: (0, i)),
        ),
        compiler_params=pltpu.CompilerParams(
            dimension_semantics=("parallel",),        # shards batch tiles across TCs on v7x
            vmem_limit_bytes=32 * 1024 * 1024,        # ~10x headroom, safe on v5e/v6e/v7x
        ),
        cost_estimate=cost,
    )(x_t, a3, w3, p3, b2)

    return out_t.T[:B]                                # (B, n_out)


def wave_layer_ref(x, A, omega, phi, bias):
    wave_arg = omega[None] * x[:, :, None] + phi[None]
    wave_term = A[None] * jnp.sin(wave_arg)
    return jnp.sum(wave_term, axis=1) + bias[None]


if __name__ == "__main__":
    # Small shapes consistent with the module: batch=8, n_in=16, n_out=32.
    B, n_in, n_out = 8, 16, 32

    key = jax.random.PRNGKey(0)
    kx, kA, kw, kp, kb = jax.random.split(key, 5)

    # Deterministic parameter init mirroring reset_parameters().
    stdv_a = math.sqrt(2.0 / n_in)
    A = jax.random.uniform(kA, (n_in, n_out), jnp.float32, -stdv_a, stdv_a)
    omega = jax.random.uniform(kw, (n_in, n_out), jnp.float32, 0.5, 1.5)
    phi = jax.random.uniform(kp, (n_in, n_out), jnp.float32, 0.0, 2.0 * math.pi)
    bound = 1.0 / math.sqrt(n_in)
    bias = jax.random.uniform(kb, (n_out,), jnp.float32, -bound, bound)

    x = jax.random.normal(kx, (B, n_in), jnp.float32)

    out = wave_layer(x, A, omega, phi, bias)
    out = jax.block_until_ready(out)

    ref = wave_layer_ref(x, A, omega, phi, bias)
    assert out.shape == (B, n_out)
    assert jnp.allclose(out, ref, atol=1e-5, rtol=1e-5), "mismatch vs reference"

    print("KERNEL_OK")
</pallas_src>

<mosaic_0001>
module attributes {stable_mosaic.version = 11 : i64} {
  func.func @wave_kernel(%arg0: i32, %arg1: memref<16x128xf32, #tpu.memory_space<vmem>>, %arg2: memref<16x32x128xf32, #tpu.memory_space<vmem>>, %arg3: memref<16x32x128xf32, #tpu.memory_space<vmem>>, %arg4: memref<16x32x128xf32, #tpu.memory_space<vmem>>, %arg5: memref<32x128xf32, #tpu.memory_space<vmem>>, %arg6: memref<32x128xf32, #tpu.memory_space<vmem>>) attributes {dimension_semantics = [#tpu.dimension_semantics<parallel>], iteration_bounds = array<i64: 1>, scalar_prefetch = 0 : i64, scratch_operands = 0 : i64, tpu.core_type = #tpu.core_type<tc>, window_params = [{transform_indices = @transform_0, window_bounds = array<i64: 16, 128>}, {pipeline_mode = #tpu.pipeline_mode<synchronous>, transform_indices = @transform_1, window_bounds = array<i64: 16, 32, 128>}, {pipeline_mode = #tpu.pipeline_mode<synchronous>, transform_indices = @transform_2, window_bounds = array<i64: 16, 32, 128>}, {pipeline_mode = #tpu.pipeline_mode<synchronous>, transform_indices = @transform_3, window_bounds = array<i64: 16, 32, 128>}, {pipeline_mode = #tpu.pipeline_mode<synchronous>, transform_indices = @transform_4, window_bounds = array<i64: 32, 128>}, {transform_indices = @transform_5, window_bounds = array<i64: 32, 128>}]} {
    %c0 = arith.constant 0 : index
    %c0_0 = arith.constant 0 : index
    %0 = vector.load %arg5[%c0, %c0_0] : memref<32x128xf32, #tpu.memory_space<vmem>>, vector<32x128xf32>
    %c0_1 = arith.constant 0 : index
    %c0_2 = arith.constant 0 : index
    %1 = vector.load %arg1[%c0_1, %c0_2] : memref<16x128xf32, #tpu.memory_space<vmem>>, vector<1x128xf32>
    %2 = vector.shape_cast %1 : vector<1x128xf32> to vector<1x128xf32>
    %3 = vector.broadcast %2 : vector<1x128xf32> to vector<32x128xf32>
    %c0_3 = arith.constant 0 : index
    %c0_4 = arith.constant 0 : index
    %c0_5 = arith.constant 0 : index
    %4 = vector.load %arg2[%c0_3, %c0_4, %c0_5] : memref<16x32x128xf32, #tpu.memory_space<vmem>>, vector<1x32x128xf32>
    %5 = vector.shape_cast %4 : vector<1x32x128xf32> to vector<32x128xf32>
    %c0_6 = arith.constant 0 : index
    %c0_7 = arith.constant 0 : index
    %c0_8 = arith.constant 0 : index
    %6 = vector.load %arg3[%c0_6, %c0_7, %c0_8] : memref<16x32x128xf32, #tpu.memory_space<vmem>>, vector<1x32x128xf32>
    %7 = vector.shape_cast %6 : vector<1x32x128xf32> to vector<32x128xf32>
    %8 = arith.mulf %7, %3 : vector<32x128xf32>
    %c0_9 = arith.constant 0 : index
    %c0_10 = arith.constant 0 : index
    %c0_11 = arith.constant 0 : index
    %9 = vector.load %arg4[%c0_9, %c0_10, %c0_11] : memref<16x32x128xf32, #tpu.memory_space<vmem>>, vector<1x32x128xf32>
    %10 = vector.shape_cast %9 : vector<1x32x128xf32> to vector<32x128xf32>
    %11 = arith.addf %8, %10 : vector<32x128xf32>
    %12 = math.sin %11 : vector<32x128xf32>
    %13 = arith.mulf %5, %12 : vector<32x128xf32>
    %14 = arith.addf %0, %13 : vector<32x128xf32>
    %c1 = arith.constant 1 : index
    %c0_12 = arith.constant 0 : index
    %15 = vector.load %arg1[%c1, %c0_12] : memref<16x128xf32, #tpu.memory_space<vmem>>, vector<1x128xf32>
    %16 = vector.shape_cast %15 : vector<1x128xf32> to vector<1x128xf32>
    %17 = vector.broadcast %16 : vector<1x128xf32> to vector<32x128xf32>
    %c1_13 = arith.constant 1 : index
    %c0_14 = arith.constant 0 : index
    %c0_15 = arith.constant 0 : index
    %18 = vector.load %arg2[%c1_13, %c0_14, %c0_15] : memref<16x32x128xf32, #tpu.memory_space<vmem>>, vector<1x32x128xf32>
    %19 = vector.shape_cast %18 : vector<1x32x128xf32> to vector<32x128xf32>
    %c1_16 = arith.constant 1 : index
    %c0_17 = arith.constant 0 : index
    %c0_18 = arith.constant 0 : index
    %20 = vector.load %arg3[%c1_16, %c0_17, %c0_18] : memref<16x32x128xf32, #tpu.memory_space<vmem>>, vector<1x32x128xf32>
    %21 = vector.shape_cast %20 : vector<1x32x128xf32> to vector<32x128xf32>
    %22 = arith.mulf %21, %17 : vector<32x128xf32>
    %c1_19 = arith.constant 1 : index
    %c0_20 = arith.constant 0 : index
    %c0_21 = arith.constant 0 : index
    %23 = vector.load %arg4[%c1_19, %c0_20, %c0_21] : memref<16x32x128xf32, #tpu.memory_space<vmem>>, vector<1x32x128xf32>
    %24 = vector.shape_cast %23 : vector<1x32x128xf32> to vector<32x128xf32>
    %25 = arith.addf %22, %24 : vector<32x128xf32>
    %26 = math.sin %25 : vector<32x128xf32>
    %27 = arith.mulf %19, %26 : vector<32x128xf32>
    %28 = arith.addf %14, %27 : vector<32x128xf32>
    %c2 = arith.constant 2 : index
    %c0_22 = arith.constant 0 : index
    %29 = vector.load %arg1[%c2, %c0_22] : memref<16x128xf32, #tpu.memory_space<vmem>>, vector<1x128xf32>
    %30 = vector.shape_cast %29 : vector<1x128xf32> to vector<1x128xf32>
    %31 = vector.broadcast %30 : vector<1x128xf32> to vector<32x128xf32>
    %c2_23 = arith.constant 2 : index
    %c0_24 = arith.constant 0 : index
    %c0_25 = arith.constant 0 : index
    %32 = vector.load %arg2[%c2_23, %c0_24, %c0_25] : memref<16x32x128xf32, #tpu.memory_space<vmem>>, vector<1x32x128xf32>
    %33 = vector.shape_cast %32 : vector<1x32x128xf32> to vector<32x128xf32>
    %c2_26 = arith.constant 2 : index
    %c0_27 = arith.constant 0 : index
    %c0_28 = arith.constant 0 : index
    %34 = vector.load %arg3[%c2_26, %c0_27, %c0_28] : memref<16x32x128xf32, #tpu.memory_space<vmem>>, vector<1x32x128xf32>
    %35 = vector.shape_cast %34 : vector<1x32x128xf32> to vector<32x128xf32>
    %36 = arith.mulf %35, %31 : vector<32x128xf32>
    %c2_29 = arith.constant 2 : index
    %c0_30 = arith.constant 0 : index
    %c0_31 = arith.constant 0 : index
    %37 = vector.load %arg4[%c2_29, %c0_30, %c0_31] : memref<16x32x128xf32, #tpu.memory_space<vmem>>, vector<1x32x128xf32>
    %38 = vector.shape_cast %37 : vector<1x32x128xf32> to vector<32x128xf32>
    %39 = arith.addf %36, %38 : vector<32x128xf32>
    %40 = math.sin %39 : vector<32x128xf32>
    %41 = arith.mulf %33, %40 : vector<32x128xf32>
    %42 = arith.addf %28, %41 : vector<32x128xf32>
    %c3 = arith.constant 3 : index
    %c0_32 = arith.constant 0 : index
    %43 = vector.load %arg1[%c3, %c0_32] : memref<16x128xf32, #tpu.memory_space<vmem>>, vector<1x128xf32>
    %44 = vector.shape_cast %43 : vector<1x128xf32> to vector<1x128xf32>
    %45 = vector.broadcast %44 : vector<1x128xf32> to vector<32x128xf32>
    %c3_33 = arith.constant 3 : index
    %c0_34 = arith.constant 0 : index
    %c0_35 = arith.constant 0 : index
    %46 = vector.load %arg2[%c3_33, %c0_34, %c0_35] : memref<16x32x128xf32, #tpu.memory_space<vmem>>, vector<1x32x128xf32>
    %47 = vector.shape_cast %46 : vector<1x32x128xf32> to vector<32x128xf32>
    %c3_36 = arith.constant 3 : index
    %c0_37 = arith.constant 0 : index
    %c0_38 = arith.constant 0 : index
    %48 = vector.load %arg3[%c3_36, %c0_37, %c0_38] : memref<16x32x128xf32, #tpu.memory_space<vmem>>, vector<1x32x128xf32>
    %49 = vector.shape_cast %48 : vector<1x32x128xf32> to vector<32x128xf32>
    %50 = arith.mulf %49, %45 : vector<32x128xf32>
    %c3_39 = arith.constant 3 : index
    %c0_40 = arith.constant 0 : index
    %c0_41 = arith.constant 0 : index
    %51 = vector.load %arg4[%c3_39, %c0_40, %c0_41] : memref<16x32x128xf32, #tpu.memory_space<vmem>>, vector<1x32x128xf32>
    %52 = vector.shape_cast %51 : vector<1x32x128xf32> to vector<32x128xf32>
    %53 = arith.addf %50, %52 : vector<32x128xf32>
    %54 = math.sin %53 : vector<32x128xf32>
    %55 = arith.mulf %47, %54 : vector<32x128xf32>
    %56 = arith.addf %42, %55 : vector<32x128xf32>
    %c4 = arith.constant 4 : index
    %c0_42 = arith.constant 0 : index
    %57 = vector.load %arg1[%c4, %c0_42] : memref<16x128xf32, #tpu.memory_space<vmem>>, vector<1x128xf32>
    %58 = vector.shape_cast %57 : vector<1x128xf32> to vector<1x128xf32>
    %59 = vector.broadcast %58 : vector<1x128xf32> to vector<32x128xf32>
    %c4_43 = arith.constant 4 : index
    %c0_44 = arith.constant 0 : index
    %c0_45 = arith.constant 0 : index
    %60 = vector.load %arg2[%c4_43, %c0_44, %c0_45] : memref<16x32x128xf32, #tpu.memory_space<vmem>>, vector<1x32x128xf32>
    %61 = vector.shape_cast %60 : vector<1x32x128xf32> to vector<32x128xf32>
    %c4_46 = arith.constant 4 : index
    %c0_47 = arith.constant 0 : index
    %c0_48 = arith.constant 0 : index
    %62 = vector.load %arg3[%c4_46, %c0_47, %c0_48] : memref<16x32x128xf32, #tpu.memory_space<vmem>>, vector<1x32x128xf32>
    %63 = vector.shape_cast %62 : vector<1x32x128xf32> to vector<32x128xf32>
    %64 = arith.mulf %63, %59 : vector<32x128xf32>
    %c4_49 = arith.constant 4 : index
    %c0_50 = arith.constant 0 : index
    %c0_51 = arith.constant 0 : index
    %65 = vector.load %arg4[%c4_49, %c0_50, %c0_51] : memref<16x32x128xf32, #tpu.memory_space<vmem>>, vector<1x32x128xf32>
    %66 = vector.shape_cast %65 : vector<1x32x128xf32> to vector<32x128xf32>
    %67 = arith.addf %64, %66 : vector<32x128xf32>
    %68 = math.sin %67 : vector<32x128xf32>
    %69 = arith.mulf %61, %68 : vector<32x128xf32>
    %70 = arith.addf %56, %69 : vector<32x128xf32>
    %c5 = arith.constant 5 : index
    %c0_52 = arith.constant 0 : index
    %71 = vector.load %arg1[%c5, %c0_52] : memref<16x128xf32, #tpu.memory_space<vmem>>, vector<1x128xf32>
    %72 = vector.shape_cast %71 : vector<1x128xf32> to vector<1x128xf32>
    %73 = vector.broadcast %72 : vector<1x128xf32> to vector<32x128xf32>
    %c5_53 = arith.constant 5 : index
    %c0_54 = arith.constant 0 : index
    %c0_55 = arith.constant 0 : index
    %74 = vector.load %arg2[%c5_53, %c0_54, %c0_55] : memref<16x32x128xf32, #tpu.memory_space<vmem>>, vector<1x32x128xf32>
    %75 = vector.shape_cast %74 : vector<1x32x128xf32> to vector<32x128xf32>
    %c5_56 = arith.constant 5 : index
    %c0_57 = arith.constant 0 : index
    %c0_58 = arith.constant 0 : index
    %76 = vector.load %arg3[%c5_56, %c0_57, %c0_58] : memref<16x32x128xf32, #tpu.memory_space<vmem>>, vector<1x32x128xf32>
    %77 = vector.shape_cast %76 : vector<1x32x128xf32> to vector<32x128xf32>
    %78 = arith.mulf %77, %73 : vector<32x128xf32>
    %c5_59 = arith.constant 5 : index
    %c0_60 = arith.constant 0 : index
    %c0_61 = arith.constant 0 : index
    %79 = vector.load %arg4[%c5_59, %c0_60, %c0_61] : memref<16x32x128xf32, #tpu.memory_space<vmem>>, vector<1x32x128xf32>
    %80 = vector.shape_cast %79 : vector<1x32x128xf32> to vector<32x128xf32>
    %81 = arith.addf %78, %80 : vector<32x128xf32>
    %82 = math.sin %81 : vector<32x128xf32>
    %83 = arith.mulf %75, %82 : vector<32x128xf32>
    %84 = arith.addf %70, %83 : vector<32x128xf32>
    %c6 = arith.constant 6 : index
    %c0_62 = arith.constant 0 : index
    %85 = vector.load %arg1[%c6, %c0_62] : memref<16x128xf32, #tpu.memory_space<vmem>>, vector<1x128xf32>
    %86 = vector.shape_cast %85 : vector<1x128xf32> to vector<1x128xf32>
    %87 = vector.broadcast %86 : vector<1x128xf32> to vector<32x128xf32>
    %c6_63 = arith.constant 6 : index
    %c0_64 = arith.constant 0 : index
    %c0_65 = arith.constant 0 : index
    %88 = vector.load %arg2[%c6_63, %c0_64, %c0_65] : memref<16x32x128xf32, #tpu.memory_space<vmem>>, vector<1x32x128xf32>
    %89 = vector.shape_cast %88 : vector<1x32x128xf32> to vector<32x128xf32>
    %c6_66 = arith.constant 6 : index
    %c0_67 = arith.constant 0 : index
    %c0_68 = arith.constant 0 : index
    %90 = vector.load %arg3[%c6_66, %c0_67, %c0_68] : memref<16x32x128xf32, #tpu.memory_space<vmem>>, vector<1x32x128xf32>
    %91 = vector.shape_cast %90 : vector<1x32x128xf32> to vector<32x128xf32>
    %92 = arith.mulf %91, %87 : vector<32x128xf32>
    %c6_69 = arith.constant 6 : index
    %c0_70 = arith.constant 0 : index
    %c0_71 = arith.constant 0 : index
    %93 = vector.load %arg4[%c6_69, %c0_70, %c0_71] : memref<16x32x128xf32, #tpu.memory_space<vmem>>, vector<1x32x128xf32>
    %94 = vector.shape_cast %93 : vector<1x32x128xf32> to vector<32x128xf32>
    %95 = arith.addf %92, %94 : vector<32x128xf32>
    %96 = math.sin %95 : vector<32x128xf32>
    %97 = arith.mulf %89, %96 : vector<32x128xf32>
    %98 = arith.addf %84, %97 : vector<32x128xf32>
    %c7 = arith.constant 7 : index
    %c0_72 = arith.constant 0 : index
    %99 = vector.load %arg1[%c7, %c0_72] : memref<16x128xf32, #tpu.memory_space<vmem>>, vector<1x128xf32>
    %100 = vector.shape_cast %99 : vector<1x128xf32> to vector<1x128xf32>
    %101 = vector.broadcast %100 : vector<1x128xf32> to vector<32x128xf32>
    %c7_73 = arith.constant 7 : index
    %c0_74 = arith.constant 0 : index
    %c0_75 = arith.constant 0 : index
    %102 = vector.load %arg2[%c7_73, %c0_74, %c0_75] : memref<16x32x128xf32, #tpu.memory_space<vmem>>, vector<1x32x128xf32>
    %103 = vector.shape_cast %102 : vector<1x32x128xf32> to vector<32x128xf32>
    %c7_76 = arith.constant 7 : index
    %c0_77 = arith.constant 0 : index
    %c0_78 = arith.constant 0 : index
    %104 = vector.load %arg3[%c7_76, %c0_77, %c0_78] : memref<16x32x128xf32, #tpu.memory_space<vmem>>, vector<1x32x128xf32>
    %105 = vector.shape_cast %104 : vector<1x32x128xf32> to vector<32x128xf32>
    %106 = arith.mulf %105, %101 : vector<32x128xf32>
    %c7_79 = arith.constant 7 : index
    %c0_80 = arith.constant 0 : index
    %c0_81 = arith.constant 0 : index
    %107 = vector.load %arg4[%c7_79, %c0_80, %c0_81] : memref<16x32x128xf32, #tpu.memory_space<vmem>>, vector<1x32x128xf32>
    %108 = vector.shape_cast %107 : vector<1x32x128xf32> to vector<32x128xf32>
    %109 = arith.addf %106, %108 : vector<32x128xf32>
    %110 = math.sin %109 : vector<32x128xf32>
    %111 = arith.mulf %103, %110 : vector<32x128xf32>
    %112 = arith.addf %98, %111 : vector<32x128xf32>
    %c8 = arith.constant 8 : index
    %c0_82 = arith.constant 0 : index
    %113 = vector.load %arg1[%c8, %c0_82] : memref<16x128xf32, #tpu.memory_space<vmem>>, vector<1x128xf32>
    %114 = vector.shape_cast %113 : vector<1x128xf32> to vector<1x128xf32>
    %115 = vector.broadcast %114 : vector<1x128xf32> to vector<32x128xf32>
    %c8_83 = arith.constant 8 : index
    %c0_84 = arith.constant 0 : index
    %c0_85 = arith.constant 0 : index
    %116 = vector.load %arg2[%c8_83, %c0_84, %c0_85] : memref<16x32x128xf32, #tpu.memory_space<vmem>>, vector<1x32x128xf32>
    %117 = vector.shape_cast %116 : vector<1x32x128xf32> to vector<32x128xf32>
    %c8_86 = arith.constant 8 : index
    %c0_87 = arith.constant 0 : index
    %c0_88 = arith.constant 0 : index
    %118 = vector.load %arg3[%c8_86, %c0_87, %c0_88] : memref<16x32x128xf32, #tpu.memory_space<vmem>>, vector<1x32x128xf32>
    %119 = vector.shape_cast %118 : vector<1x32x128xf32> to vector<32x128xf32>
    %120 = arith.mulf %119, %115 : vector<32x128xf32>
    %c8_89 = arith.constant 8 : index
    %c0_90 = arith.constant 0 : index
    %c0_91 = arith.constant 0 : index
    %121 = vector.load %arg4[%c8_89, %c0_90, %c0_91] : memref<16x32x128xf32, #tpu.memory_space<vmem>>, vector<1x32x128xf32>
    %122 = vector.shape_cast %121 : vector<1x32x128xf32> to vector<32x128xf32>
    %123 = arith.addf %120, %122 : vector<32x128xf32>
    %124 = math.sin %123 : vector<32x128xf32>
    %125 = arith.mulf %117, %124 : vector<32x128xf32>
    %126 = arith.addf %112, %125 : vector<32x128xf32>
    %c9 = arith.constant 9 : index
    %c0_92 = arith.constant 0 : index
    %127 = vector.load %arg1[%c9, %c0_92] : memref<16x128xf32, #tpu.memory_space<vmem>>, vector<1x128xf32>
    %128 = vector.shape_cast %127 : vector<1x128xf32> to vector<1x128xf32>
    %129 = vector.broadcast %128 : vector<1x128xf32> to vector<32x128xf32>
    %c9_93 = arith.constant 9 : index
    %c0_94 = arith.constant 0 : index
    %c0_95 = arith.constant 0 : index
    %130 = vector.load %arg2[%c9_93, %c0_94, %c0_95] : memref<16x32x128xf32, #tpu.memory_space<vmem>>, vector<1x32x128xf32>
    %131 = vector.shape_cast %130 : vector<1x32x128xf32> to vector<32x128xf32>
    %c9_96 = arith.constant 9 : index
    %c0_97 = arith.constant 0 : index
    %c0_98 = arith.constant 0 : index
    %132 = vector.load %arg3[%c9_96, %c0_97, %c0_98] : memref<16x32x128xf32, #tpu.memory_space<vmem>>, vector<1x32x128xf32>
    %133 = vector.shape_cast %132 : vector<1x32x128xf32> to vector<32x128xf32>
    %134 = arith.mulf %133, %129 : vector<32x128xf32>
    %c9_99 = arith.constant 9 : index
    %c0_100 = arith.constant 0 : index
    %c0_101 = arith.constant 0 : index
    %135 = vector.load %arg4[%c9_99, %c0_100, %c0_101] : memref<16x32x128xf32, #tpu.memory_space<vmem>>, vector<1x32x128xf32>
    %136 = vector.shape_cast %135 : vector<1x32x128xf32> to vector<32x128xf32>
    %137 = arith.addf %134, %136 : vector<32x128xf32>
    %138 = math.sin %137 : vector<32x128xf32>
    %139 = arith.mulf %131, %138 : vector<32x128xf32>
    %140 = arith.addf %126, %139 : vector<32x128xf32>
    %c10 = arith.constant 10 : index
    %c0_102 = arith.constant 0 : index
    %141 = vector.load %arg1[%c10, %c0_102] : memref<16x128xf32, #tpu.memory_space<vmem>>, vector<1x128xf32>
    %142 = vector.shape_cast %141 : vector<1x128xf32> to vector<1x128xf32>
    %143 = vector.broadcast %142 : vector<1x128xf32> to vector<32x128xf32>
    %c10_103 = arith.constant 10 : index
    %c0_104 = arith.constant 0 : index
    %c0_105 = arith.constant 0 : index
    %144 = vector.load %arg2[%c10_103, %c0_104, %c0_105] : memref<16x32x128xf32, #tpu.memory_space<vmem>>, vector<1x32x128xf32>
    %145 = vector.shape_cast %144 : vector<1x32x128xf32> to vector<32x128xf32>
    %c10_106 = arith.constant 10 : index
    %c0_107 = arith.constant 0 : index
    %c0_108 = arith.constant 0 : index
    %146 = vector.load %arg3[%c10_106, %c0_107, %c0_108] : memref<16x32x128xf32, #tpu.memory_space<vmem>>, vector<1x32x128xf32>
    %147 = vector.shape_cast %146 : vector<1x32x128xf32> to vector<32x128xf32>
    %148 = arith.mulf %147, %143 : vector<32x128xf32>
    %c10_109 = arith.constant 10 : index
    %c0_110 = arith.constant 0 : index
    %c0_111 = arith.constant 0 : index
    %149 = vector.load %arg4[%c10_109, %c0_110, %c0_111] : memref<16x32x128xf32, #tpu.memory_space<vmem>>, vector<1x32x128xf32>
    %150 = vector.shape_cast %149 : vector<1x32x128xf32> to vector<32x128xf32>
    %151 = arith.addf %148, %150 : vector<32x128xf32>
    %152 = math.sin %151 : vector<32x128xf32>
    %153 = arith.mulf %145, %152 : vector<32x128xf32>
    %154 = arith.addf %140, %153 : vector<32x128xf32>
    %c11 = arith.constant 11 : index
    %c0_112 = arith.constant 0 : index
    %155 = vector.load %arg1[%c11, %c0_112] : memref<16x128xf32, #tpu.memory_space<vmem>>, vector<1x128xf32>
    %156 = vector.shape_cast %155 : vector<1x128xf32> to vector<1x128xf32>
    %157 = vector.broadcast %156 : vector<1x128xf32> to vector<32x128xf32>
    %c11_113 = arith.constant 11 : index
    %c0_114 = arith.constant 0 : index
    %c0_115 = arith.constant 0 : index
    %158 = vector.load %arg2[%c11_113, %c0_114, %c0_115] : memref<16x32x128xf32, #tpu.memory_space<vmem>>, vector<1x32x128xf32>
    %159 = vector.shape_cast %158 : vector<1x32x128xf32> to vector<32x128xf32>
    %c11_116 = arith.constant 11 : index
    %c0_117 = arith.constant 0 : index
    %c0_118 = arith.constant 0 : index
    %160 = vector.load %arg3[%c11_116, %c0_117, %c0_118] : memref<16x32x128xf32, #tpu.memory_space<vmem>>, vector<1x32x128xf32>
    %161 = vector.shape_cast %160 : vector<1x32x128xf32> to vector<32x128xf32>
    %162 = arith.mulf %161, %157 : vector<32x128xf32>
    %c11_119 = arith.constant 11 : index
    %c0_120 = arith.constant 0 : index
    %c0_121 = arith.constant 0 : index
    %163 = vector.load %arg4[%c11_119, %c0_120, %c0_121] : memref<16x32x128xf32, #tpu.memory_space<vmem>>, vector<1x32x128xf32>
    %164 = vector.shape_cast %163 : vector<1x32x128xf32> to vector<32x128xf32>
    %165 = arith.addf %162, %164 : vector<32x128xf32>
    %166 = math.sin %165 : vector<32x128xf32>
    %167 = arith.mulf %159, %166 : vector<32x128xf32>
    %168 = arith.addf %154, %167 : vector<32x128xf32>
    %c12 = arith.constant 12 : index
    %c0_122 = arith.constant 0 : index
    %169 = vector.load %arg1[%c12, %c0_122] : memref<16x128xf32, #tpu.memory_space<vmem>>, vector<1x128xf32>
    %170 = vector.shape_cast %169 : vector<1x128xf32> to vector<1x128xf32>
    %171 = vector.broadcast %170 : vector<1x128xf32> to vector<32x128xf32>
    %c12_123 = arith.constant 12 : index
    %c0_124 = arith.constant 0 : index
    %c0_125 = arith.constant 0 : index
    %172 = vector.load %arg2[%c12_123, %c0_124, %c0_125] : memref<16x32x128xf32, #tpu.memory_space<vmem>>, vector<1x32x128xf32>
    %173 = vector.shape_cast %172 : vector<1x32x128xf32> to vector<32x128xf32>
    %c12_126 = arith.constant 12 : index
    %c0_127 = arith.constant 0 : index
    %c0_128 = arith.constant 0 : index
    %174 = vector.load %arg3[%c12_126, %c0_127, %c0_128] : memref<16x32x128xf32, #tpu.memory_space<vmem>>, vector<1x32x128xf32>
    %175 = vector.shape_cast %174 : vector<1x32x128xf32> to vector<32x128xf32>
    %176 = arith.mulf %175, %171 : vector<32x128xf32>
    %c12_129 = arith.constant 12 : index
    %c0_130 = arith.constant 0 : index
    %c0_131 = arith.constant 0 : index
    %177 = vector.load %arg4[%c12_129, %c0_130, %c0_131] : memref<16x32x128xf32, #tpu.memory_space<vmem>>, vector<1x32x128xf32>
    %178 = vector.shape_cast %177 : vector<1x32x128xf32> to vector<32x128xf32>
    %179 = arith.addf %176, %178 : vector<32x128xf32>
    %180 = math.sin %179 : vector<32x128xf32>
    %181 = arith.mulf %173, %180 : vector<32x128xf32>
    %182 = arith.addf %168, %181 : vector<32x128xf32>
    %c13 = arith.constant 13 : index
    %c0_132 = arith.constant 0 : index
    %183 = vector.load %arg1[%c13, %c0_132] : memref<16x128xf32, #tpu.memory_space<vmem>>, vector<1x128xf32>
    %184 = vector.shape_cast %183 : vector<1x128xf32> to vector<1x128xf32>
    %185 = vector.broadcast %184 : vector<1x128xf32> to vector<32x128xf32>
    %c13_133 = arith.constant 13 : index
    %c0_134 = arith.constant 0 : index
    %c0_135 = arith.constant 0 : index
    %186 = vector.load %arg2[%c13_133, %c0_134, %c0_135] : memref<16x32x128xf32, #tpu.memory_space<vmem>>, vector<1x32x128xf32>
    %187 = vector.shape_cast %186 : vector<1x32x128xf32> to vector<32x128xf32>
    %c13_136 = arith.constant 13 : index
    %c0_137 = arith.constant 0 : index
    %c0_138 = arith.constant 0 : index
    %188 = vector.load %arg3[%c13_136, %c0_137, %c0_138] : memref<16x32x128xf32, #tpu.memory_space<vmem>>, vector<1x32x128xf32>
    %189 = vector.shape_cast %188 : vector<1x32x128xf32> to vector<32x128xf32>
    %190 = arith.mulf %189, %185 : vector<32x128xf32>
    %c13_139 = arith.constant 13 : index
    %c0_140 = arith.constant 0 : index
    %c0_141 = arith.constant 0 : index
    %191 = vector.load %arg4[%c13_139, %c0_140, %c0_141] : memref<16x32x128xf32, #tpu.memory_space<vmem>>, vector<1x32x128xf32>
    %192 = vector.shape_cast %191 : vector<1x32x128xf32> to vector<32x128xf32>
    %193 = arith.addf %190, %192 : vector<32x128xf32>
    %194 = math.sin %193 : vector<32x128xf32>
    %195 = arith.mulf %187, %194 : vector<32x128xf32>
    %196 = arith.addf %182, %195 : vector<32x128xf32>
    %c14 = arith.constant 14 : index
    %c0_142 = arith.constant 0 : index
    %197 = vector.load %arg1[%c14, %c0_142] : memref<16x128xf32, #tpu.memory_space<vmem>>, vector<1x128xf32>
    %198 = vector.shape_cast %197 : vector<1x128xf32> to vector<1x128xf32>
    %199 = vector.broadcast %198 : vector<1x128xf32> to vector<32x128xf32>
    %c14_143 = arith.constant 14 : index
    %c0_144 = arith.constant 0 : index
    %c0_145 = arith.constant 0 : index
    %200 = vector.load %arg2[%c14_143, %c0_144, %c0_145] : memref<16x32x128xf32, #tpu.memory_space<vmem>>, vector<1x32x128xf32>
    %201 = vector.shape_cast %200 : vector<1x32x128xf32> to vector<32x128xf32>
    %c14_146 = arith.constant 14 : index
    %c0_147 = arith.constant 0 : index
    %c0_148 = arith.constant 0 : index
    %202 = vector.load %arg3[%c14_146, %c0_147, %c0_148] : memref<16x32x128xf32, #tpu.memory_space<vmem>>, vector<1x32x128xf32>
    %203 = vector.shape_cast %202 : vector<1x32x128xf32> to vector<32x128xf32>
    %204 = arith.mulf %203, %199 : vector<32x128xf32>
    %c14_149 = arith.constant 14 : index
    %c0_150 = arith.constant 0 : index
    %c0_151 = arith.constant 0 : index
    %205 = vector.load %arg4[%c14_149, %c0_150, %c0_151] : memref<16x32x128xf32, #tpu.memory_space<vmem>>, vector<1x32x128xf32>
    %206 = vector.shape_cast %205 : vector<1x32x128xf32> to vector<32x128xf32>
    %207 = arith.addf %204, %206 : vector<32x128xf32>
    %208 = math.sin %207 : vector<32x128xf32>
    %209 = arith.mulf %201, %208 : vector<32x128xf32>
    %210 = arith.addf %196, %209 : vector<32x128xf32>
    %c15 = arith.constant 15 : index
    %c0_152 = arith.constant 0 : index
    %211 = vector.load %arg1[%c15, %c0_152] : memref<16x128xf32, #tpu.memory_space<vmem>>, vector<1x128xf32>
    %212 = vector.shape_cast %211 : vector<1x128xf32> to vector<1x128xf32>
    %213 = vector.broadcast %212 : vector<1x128xf32> to vector<32x128xf32>
    %c15_153 = arith.constant 15 : index
    %c0_154 = arith.constant 0 : index
    %c0_155 = arith.constant 0 : index
    %214 = vector.load %arg2[%c15_153, %c0_154, %c0_155] : memref<16x32x128xf32, #tpu.memory_space<vmem>>, vector<1x32x128xf32>
    %215 = vector.shape_cast %214 : vector<1x32x128xf32> to vector<32x128xf32>
    %c15_156 = arith.constant 15 : index
    %c0_157 = arith.constant 0 : index
    %c0_158 = arith.constant 0 : index
    %216 = vector.load %arg3[%c15_156, %c0_157, %c0_158] : memref<16x32x128xf32, #tpu.memory_space<vmem>>, vector<1x32x128xf32>
    %217 = vector.shape_cast %216 : vector<1x32x128xf32> to vector<32x128xf32>
    %218 = arith.mulf %217, %213 : vector<32x128xf32>
    %c15_159 = arith.constant 15 : index
    %c0_160 = arith.constant 0 : index
    %c0_161 = arith.constant 0 : index
    %219 = vector.load %arg4[%c15_159, %c0_160, %c0_161] : memref<16x32x128xf32, #tpu.memory_space<vmem>>, vector<1x32x128xf32>
    %220 = vector.shape_cast %219 : vector<1x32x128xf32> to vector<32x128xf32>
    %221 = arith.addf %218, %220 : vector<32x128xf32>
    %222 = math.sin %221 : vector<32x128xf32>
    %223 = arith.mulf %215, %222 : vector<32x128xf32>
    %224 = arith.addf %210, %223 : vector<32x128xf32>
    %c0_162 = arith.constant 0 : index
    %c0_163 = arith.constant 0 : index
    %225 = vector.load %arg6[%c0_162, %c0_163] : memref<32x128xf32, #tpu.memory_space<vmem>>, vector<32x128xf32>
    tpu.vector_store %arg6[%c0_162, %c0_163], %224 {strides = array<i32>} : memref<32x128xf32, #tpu.memory_space<vmem>>, vector<32x128xf32>,
    return
  }
  func.func @transform_0(%arg0: i32) -> (i32, i32) {
    %c0_i32 = arith.constant 0 : i32
    %c0_i32_0 = arith.constant 0 : i32
    return %c0_i32, %arg0 : i32, i32
  }
  func.func @transform_1(%arg0: i32) -> (i32, i32, i32) {
    %c0_i32 = arith.constant 0 : i32
    %c0_i32_0 = arith.constant 0 : i32
    %c0_i32_1 = arith.constant 0 : i32
    %c0_i32_2 = arith.constant 0 : i32
    return %c0_i32, %c0_i32_0, %c0_i32_1 : i32, i32, i32
  }
  func.func @transform_2(%arg0: i32) -> (i32, i32, i32) {
    %c0_i32 = arith.constant 0 : i32
    %c0_i32_0 = arith.constant 0 : i32
    %c0_i32_1 = arith.constant 0 : i32
    %c0_i32_2 = arith.constant 0 : i32
    return %c0_i32, %c0_i32_0, %c0_i32_1 : i32, i32, i32
  }
  func.func @transform_3(%arg0: i32) -> (i32, i32, i32) {
    %c0_i32 = arith.constant 0 : i32
    %c0_i32_0 = arith.constant 0 : i32
    %c0_i32_1 = arith.constant 0 : i32
    %c0_i32_2 = arith.constant 0 : i32
    return %c0_i32, %c0_i32_0, %c0_i32_1 : i32, i32, i32
  }
  func.func @transform_4(%arg0: i32) -> (i32, i32) {
    %c0_i32 = arith.constant 0 : i32
    %c0_i32_0 = arith.constant 0 : i32
    %c0_i32_1 = arith.constant 0 : i32
    return %c0_i32, %c0_i32_0 : i32, i32
  }
  func.func @transform_5(%arg0: i32) -> (i32, i32) {
    %c0_i32 = arith.constant 0 : i32
    %c0_i32_0 = arith.constant 0 : i32
    return %c0_i32, %arg0 : i32, i32
  }
}

</mosaic_0001>

<bundles_post_ra>
// kernel: tpu_custom_call.1
= control target key start
LH: loop header
LB: loop body
LE: loop exit
PB: predicated region body
PF: predicated region fallthrough
CT: control target
= control target key end

     0   :  { %10 = vsyncpa [#allocation3], 0  ;;  %s17173_s0 = inlined_call_operand.hbm [shape: f32[16,128], index: 0, kind: input, shape index: {}]   ;;  %s17174_s1 = inlined_call_operand.hbm [shape: f32[16,32,128], index: 1, kind: input, shape index: {}]   ;;  %s17175_s2 = inlined_call_operand.hbm [shape: f32[16,32,128], index: 2, kind: input, shape index: {}]   ;;  %s17176_s3 = inlined_call_operand.hbm [shape: f32[16,32,128], index: 3, kind: input, shape index: {}]   ;;  %s17177_s4 = inlined_call_operand.hbm [shape: f32[32,128], index: 4, kind: input, shape index: {}]   ;;  %s17178_s5 = inlined_call_operand.hbm [shape: f32[32,128], index: 5, kind: output, shape index: {}]  }
   0x1   :  { %11 = vsyncpa [#allocation6], 0 }
   0x2   :  { %12 = vsyncpa [#allocation9], 0 }
   0x3   :  { %13 = vsyncpa [#allocation4], 0  ;;  %s8271_s18 = smov [#allocation5]   ;;  %s8272_s20 = smov [#allocation8]  }
   0x4   :  { %s31_s19 = sshll.u32 %s8271_s18, 4  ;;  %s55_s21 = sshll.u32 %s8272_s20, 4  ;;  %s32_s19 = int_to_ptr.vmem [resolvable:$true] %s31_s19  ;;  %s56_s21 = int_to_ptr.vmem [resolvable:$true] %s55_s21 }
   0x5   :  { %s8151_s22 = scalar_lea.vmem %s32_s19, 8192  ;;  %p8156_p1 = scmp.lt.s32.totalorder %s32_s19, %s32_s19 }
   0x6   :  { %p8152_p0 = scmp.ne.s32.totalorder %s32_s19, %s8151_s22  ;;  %p8157_p2 = scmp.lt.s32.totalorder %s8151_s22, %s8151_s22 }
   0x8   :  { %p8158_p3 = por %p8157_p2, %p8156_p1 }
   0xa   :  { %p8159_p4 = pnand %p8158_p3, %p8152_p0 }
   0xc   :  { %8162 = shalt.err (!%p8159_p4)
}
   0xd   :  { %s8273_s23 = smov 128   ;;  %s8274_s24 = smov 8  }
   0xe   :  { %37 = dma.hbm_to_vmem [thread:$0]  %s17174_s1, 8192, %s32_s19, [#allocation6], %s8273_s23, %s8273_s23, %s8274_s24  }
   0xf   :  { %s8171_s27 = scalar_lea.vmem %s56_s21, 8192  ;;  %p8176_p6 = scmp.lt.s32.totalorder %s56_s21, %s56_s21 }
  0x10   :  { %p8172_p5 = scmp.ne.s32.totalorder %s56_s21, %s8171_s27  ;;  %p8177_p7 = scmp.lt.s32.totalorder %s8171_s27, %s8171_s27 }
  0x12   :  { %p8178_p8 = por %p8177_p7, %p8176_p6 }
  0x14   :  { %p8179_p9 = pnand %p8178_p8, %p8172_p5 }
  0x16   :  { %8182 = shalt.err (!%p8179_p9)
}
  0x17   :  { %61 = dma.hbm_to_vmem [thread:$0]  %s17176_s3, 8192, %s56_s21, [#allocation9], %s8273_s23, %s8273_s23, %s8274_s24  }
  0x18   :  { %s8275_s30 = smov [#allocation2]   ;;  %s8276_s7 = smov [#allocation7]  }
  0x19   :  { %s19_s6 = sshll.u32 %s8275_s30, 4  ;;  %s43_s8 = sshll.u32 %s8276_s7, 4  ;;  %s20_s6 = int_to_ptr.vmem [resolvable:$true] %s19_s6  ;;  %s44_s8 = int_to_ptr.vmem [resolvable:$true] %s43_s8 }
  0x1a   :  { %s8191_s1 = scalar_lea.vmem %s20_s6, 256  ;;  %p8196_p11 = scmp.lt.s32.totalorder %s20_s6, %s20_s6 }
  0x1b   :  { %p8192_p10 = scmp.ne.s32.totalorder %s20_s6, %s8191_s1  ;;  %p8197_p12 = scmp.lt.s32.totalorder %s8191_s1, %s8191_s1 }
  0x1d   :  { %p8198_p13 = por %p8197_p12, %p8196_p11 }
  0x1f   :  { %p8199_p0 = pnand %p8198_p13, %p8192_p10 }
  0x21   :  { %8202 = shalt.err (!%p8199_p0)
}
  0x22   :  { %25 = dma.hbm_to_vmem [thread:$0]  %s17173_s0, 256, %s20_s6, [#allocation3], %s8273_s23, %s8273_s23, %s8274_s24  }
  0x23   :  { %s8211_s3 = scalar_lea.vmem %s44_s8, 8192  ;;  %p8216_p2 = scmp.lt.s32.totalorder %s44_s8, %s44_s8 }
  0x24   :  { %p8212_p1 = scmp.ne.s32.totalorder %s44_s8, %s8211_s3  ;;  %p8217_p3 = scmp.lt.s32.totalorder %s8211_s3, %s8211_s3 }
  0x26   :  { %p8218_p4 = por %p8217_p3, %p8216_p2 }
  0x28   :  { %p8219_p5 = pnand %p8218_p4, %p8212_p1 }
  0x2a   :  { %8222 = shalt.err (!%p8219_p5)
}
  0x2b   :  { %49 = dma.hbm_to_vmem [thread:$0]  %s17175_s2, 8192, %s44_s8, [#allocation6], %s8273_s23, %s8273_s23, %s8274_s24  }
  0x2c   :  { %s8277_s13 = smov [#allocation10]  }
  0x2d   :  { %s67_s14 = sshll.u32 %s8277_s13, 4  ;;  %s68_s14 = int_to_ptr.vmem [resolvable:$true] %s67_s14 }
  0x2e   :  { %s8231_s15 = scalar_lea.vmem %s68_s14, 512  ;;  %p8236_p7 = scmp.lt.s32.totalorder %s68_s14, %s68_s14 }
  0x2f   :  { %p8232_p6 = scmp.ne.s32.totalorder %s68_s14, %s8231_s15  ;;  %p8237_p8 = scmp.lt.s32.totalorder %s8231_s15, %s8231_s15 }
  0x31   :  { %p8238_p9 = por %p8237_p8, %p8236_p7 }
  0x33   :  { %p8239_p10 = pnand %p8238_p9, %p8232_p6 }
  0x35   :  { %8242 = shalt.err (!%p8239_p10)
}
  0x36   :  { %73 = dma.hbm_to_vmem [thread:$0]  %s17177_s4, 512, %s68_s14, [#allocation9], %s8273_s23, %s8273_s23, %s8274_s24  }
  0x37   :  { %8263 = dma.done.wait [#allocation3], 256  }
  0x38   :  { %8264 = vsyncadd [#allocation3], 4294967040 }
  0x39   :  { %8265 = dma.done.wait [#allocation6], 16384  }
  0x3a   :  { %8266 = vsyncadd [#allocation6], 4294950912 }
  0x3b   :  { %8267 = dma.done.wait [#allocation9], 8704  }
  0x3c   :  { %8268 = vsyncadd [#allocation9], 4294958592  ;;  %v8345_v0 = vld [vmem:[#allocation2] ss:$0 sm:$0xff]  ;;  %v102_v1 = vld [vmem:[#allocation7] sm:$0xff]  ;;  %s8284_s2 = smov [#allocation11]  }
  0x3d   :  { %v106_v2 = vmul.f32 %v8345_v0, %v102_v1  ;;  %v110_v3 = vld [vmem:[#allocation8] sm:$0xff]  ;;  %v103_v6 = vld [vmem:[#allocation7 + $0x8] sm:$0xff]  ;;  %v104_v14 = vld [vmem:[#allocation7 + $0x10] sm:$0xff]  ;;  %v17197_v25 = vmov 2102212464   ;;  %s7331_s4 = sshll.u32 %s8284_s2, 4  ;;  %s7332_s4 = int_to_ptr.vmem [resolvable:$true] %s7331_s4 }
  0x3e   :  { %v107_v8 = vmul.f32 %v8345_v0, %v103_v6  ;;  %v111_v9 = vld [vmem:[#allocation8 + $0x8] sm:$0xff]  ;;  %v108_v17 = vmul.f32 %v8345_v0, %v104_v14  ;;  %v112_v18 = vld [vmem:[#allocation8 + $0x10] sm:$0xff]  ;;  %v17190_v27 = vmov 920167782   ;;  %v17188_v32 = vmov 1326507024   ;;  %p8248_p12 = scmp.lt.s32.totalorder %s7332_s4, %s7332_s4 }
  0x3f   :  { %v8348_v4 = vadd.f32 %v110_v3, %v106_v2  ;;  %v17193_v34 = vmov 683565275   ;;  %v17186_v36 = vmov 2475754826   ;;  %v17181_v41 = vmov 2131351028  }
  0x40   :  { %v8352_v11 = vadd.f32 %v111_v9, %v107_v8  ;;  %v8356_v21 = vadd.f32 %v112_v18, %v108_v17  ;;  %v105_v54 = vld [vmem:[#allocation7 + $0x18] sm:$0xff]  ;;  %s8243_s17 = scalar_lea.vmem %s7332_s4, 512 }
  0x41   :  { %v121_v5 = vand.u32 2139095040, %v8348_v4  ;;  %v118_v29 = vand.u32 2147483647, %v8348_v4  ;;  %v109_v61 = vmul.f32 %v8345_v0, %v105_v54  ;;  %p8244_p11 = scmp.ne.s32.totalorder %s7332_s4, %s8243_s17  ;;  %p8249_p13 = scmp.lt.s32.totalorder %s8243_s17, %s8243_s17 }
  0x42   :  { %v225_v13 = vand.u32 2139095040, %v8352_v11  ;;  %v329_v24 = vand.u32 2139095040, %v8356_v21  ;;  %v222_v2 = vand.u32 2147483647, %v8352_v11 }
  0x43   :  { %v122_v7 = vshrl.u32 %v121_v5, 23  ;;  %v125_v46 = vand.u32 8388607, %v118_v29  ;;  %p8250_p0 = por %p8249_p13, %p8248_p12 }
  0x44   :  { %v226_v15 = vshrl.u32 %v225_v13, 23  ;;  %v330_v39 = vshrl.u32 %v329_v24, 23  ;;  %v113_v13 = vld [vmem:[#allocation8 + $0x18] sm:$0xff] }
  0x45   :  { %v7346_v10 = vadd.s32 4294967169, %v122_v7  ;;  %v126_v55 = vor.u32 8388608, %v125_v46  ;;  %p8251_p1 = pnand %p8250_p0, %p8244_p11 }
  0x46   :  { %v7350_v19 = vadd.s32 4294967169, %v226_v15  ;;  %v7354_v52 = vadd.s32 4294967169, %v330_v39 }
  0x47   :  { %v128_v12 = vadd.s32 1, %v7346_v10  ;;  %v8400_v1 = vshll.u32 %v126_v55, 8 }
  0x48   :  { %v232_v22 = vadd.s32 1, %v7350_v19  ;;  %v336_v60 = vadd.s32 1, %v7354_v52 }
  0x49   :  { %vm129_vm0 = vcmp.gt.s32.totalorder %v128_v12, 0 }
  0x4a   :  { %v130_v16 = vsel %vm129_vm0, %v128_v12, 0  ;;  %vm233_vm1 = vcmp.gt.s32.totalorder %v232_v22, 0  ;;  %vm337_vm6 = vcmp.gt.s32.totalorder %v336_v60, 0 }
  0x4b   :  { %v132_v20 = vand.u32 31, %v130_v16  ;;  %v8365_v30 = vshrl.u32 %v130_v16, 5  ;;  %v234_v38 = vsel %vm233_vm1, %v232_v22, 0 }
  0x4c   :  { %v236_v48 = vand.u32 31, %v234_v38  ;;  %v8408_v7 = vshrl.u32 %v234_v38, 5 }
  0x4d   :  { %v8358_v23 = vsub.s32 32, %v132_v20  ;;  %v144_v26 = vshll.u32 %v17197_v25, %v132_v20  ;;  %v147_v31 = vshll.u32 %v17190_v27, %v132_v20  ;;  %v135_v35 = vshll.u32 %v17193_v34, %v132_v20 }
  0x4e   :  { %v138_v37 = vshll.u32 %v17186_v36, %v132_v20  ;;  %v141_v43 = vshll.u32 %v17181_v41, %v132_v20  ;;  %vm153_vm2 = vcmp.lt.s32.totalorder %v8365_v30, 4  ;;  %vm150_vm3 = vcmp.lt.s32.totalorder %v8365_v30, 1 }
  0x4f   :  { %v145_v28 = vshrl.u32 %v17190_v27, %v8358_v23  ;;  %v148_v33 = vshrl.u32 %v17188_v32, %v8358_v23  ;;  %v136_v40 = vshrl.u32 %v17186_v36, %v8358_v23  ;;  %v139_v42 = vshrl.u32 %v17181_v41, %v8358_v23 }
  0x50   :  { %v142_v44 = vshrl.u32 %v17197_v25, %v8358_v23  ;;  %vm152_vm4 = vcmp.lt.s32.totalorder %v8365_v30, 3  ;;  %v8388_v57 = vsub.s32 32, %v236_v48  ;;  %vm151_vm5 = vcmp.lt.s32.totalorder %v8365_v30, 2 }
  0x51   :  { %v146_v45 = vor.u32 %v145_v28, %v144_v26  ;;  %v149_v47 = vor.u32 %v148_v33, %v147_v31  ;;  %v137_v49 = vor.u32 %v136_v40, %v135_v35  ;;  %v140_v50 = vor.u32 %v139_v42, %v138_v37 }
  0x52   :  { %v143_v51 = vor.u32 %v142_v44, %v141_v43  ;;  %v248_v3 = vshll.u32 %v17197_v25, %v236_v48  ;;  %v249_v5 = vshrl.u32 %v17190_v27, %v8388_v57  ;;  %v251_v0 = vshll.u32 %v17190_v27, %v236_v48 }
  0x53   :  { %v159_v53 = vsel %vm153_vm2, %v146_v45, 920167782  ;;  %v163_v56 = vsel %vm153_vm2, %v149_v47, 1326507024  ;;  %v158_v58 = vsel %vm150_vm3, %v137_v49, %v140_v50  ;;  %v252_v8 = vshrl.u32 %v17188_v32, %v8388_v57 }
  0x54   :  { %v160_v59 = vsel %vm152_vm4, %v143_v51, %v159_v53  ;;  %v162_v62 = vsel %vm150_vm3, %v140_v50, %v143_v51  ;;  %v164_v63 = vsel %vm152_vm4, %v146_v45, %v163_v56  ;;  %v239_v10 = vshll.u32 %v17193_v34, %v236_v48 }
  0x55   :  { %v161_v6 = vsel %vm151_vm5, %v158_v58, %v160_v59  ;;  %v165_v9 = vsel %vm151_vm5, %v162_v62, %v164_v63  ;;  %v242_v12 = vshll.u32 %v17186_v36, %v236_v48  ;;  %v240_v14 = vshrl.u32 %v17186_v36, %v8388_v57 }
  0x56   :  { %v243_v15 = vshrl.u32 %v17181_v41, %v8388_v57  ;;  %v245_v16 = vshll.u32 %v17181_v41, %v236_v48  ;;  %v246_v17 = vshrl.u32 %v17197_v25, %v8388_v57  ;;  %v229_v20 = vand.u32 8388607, %v222_v2 }
  0x57   :  { %v8425_v18 = vmul.u32.u64.low %v8400_v1, %v161_v6  ;;  %v8426_v19 = vmul.u32.u64.high %v8400_v1, %v161_v6, %v8425_v18  ;;  %v250_v22 = vor.u32 %v249_v5, %v248_v3  ;;  %v253_v28 = vor.u32 %v252_v8, %v251_v0 }
  0x58   :  { %v8432_v24 = vmul.u32.u64.low %v8400_v1, %v165_v9  ;;  %v8433_v26 = vmul.u32.u64.high %v8400_v1, %v165_v9, %v8432_v24  ;;  %vm257_vm7 = vcmp.lt.s32.totalorder %v8408_v7, 4  ;;  %v8436_v31 = vadd.f32 %v113_v13, %v109_v61 }
  0x59   :  { %v134_v33 = vshrl.u32 %v17193_v34, %v8358_v23  ;;  %v338_v35 = vsel %vm337_vm6, %v336_v60, 0  ;;  %v155_v37 = vsel %vm153_vm2, %v143_v51, 2102212464  ;;  %v241_v38 = vor.u32 %v240_v14, %v239_v10 }
  0x5a   :  { %v244_v39 = vor.u32 %v243_v15, %v242_v12  ;;  %v247_v40 = vor.u32 %v246_v17, %v245_v16  ;;  %vm254_vm8 = vcmp.lt.s32.totalorder %v8408_v7, 1  ;;  %vm256_vm9 = vcmp.lt.s32.totalorder %v8408_v7, 3 }
  0x5b   :  { %v263_v42 = vsel %vm257_vm7, %v250_v22, 920167782  ;;  %v230_v43 = vor.u32 8388608, %v229_v20  ;;  %v267_v44 = vsel %vm257_vm7, %v253_v28, 1326507024  ;;  %v340_v45 = vand.u32 31, %v338_v35 }
  0x5c   :  { %v154_v23 = vsel %vm150_vm3, %v134_v33, %v137_v49  ;;  %v156_v46 = vsel %vm152_vm4, %v140_v50, %v155_v37  ;;  %v433_v47 = vand.u32 2139095040, %v8436_v31  ;;  %vm255_vm10 = vcmp.lt.s32.totalorder %v8408_v7, 2 }
  0x5d   :  { %v262_v48 = vsel %vm254_vm8, %v241_v38, %v244_v39  ;;  %v264_v51 = vsel %vm256_vm9, %v247_v40, %v263_v42  ;;  %v176_v52 = vadd.s32 1, %v8426_v19  ;;  %v266_v53 = vsel %vm254_vm8, %v244_v39, %v247_v40 }
  0x5e   :  { %v268_v49 = vsel %vm256_vm9, %v250_v22, %v267_v44  ;;  %v157_v50 = vsel %vm151_vm5, %v154_v23, %v156_v46  ;;  %vm175_vm11 = vc.u32 %v8433_v26, %v8425_v18  ;;  %v270_v54 = vshll.u32 %v230_v43, 8 }
  0x5f   :  { %v8467_v55 = vsub.s32 32, %v340_v45  ;;  %v265_v56 = vsel %vm255_vm10, %v262_v48, %v264_v51  ;;  %v434_v58 = vshrl.u32 %v433_v47, 23  ;;  %v269_v59 = vsel %vm255_vm10, %v266_v53, %v268_v49 }
  0x60   :  { %v326_v60 = vand.u32 2147483647, %v8356_v21  ;;  %v173_v61 = vmul.u32 %v8400_v1, %v157_v50  ;;  %v177_v30 = vsel %vm175_vm11, %v176_v52, %v8426_v19  ;;  %v238_v62 = vshrl.u32 %v17193_v34, %v8388_v57 }
  0x61   :  { %v259_v63 = vsel %vm257_vm7, %v247_v40, 2102212464  ;;  %v8480_v3 = vmul.u32.u64.low %v270_v54, %v265_v56  ;;  %v8481_v5 = vmul.u32.u64.high %v270_v54, %v265_v56, %v8480_v3  ;;  %v352_v6 = vshll.u32 %v17197_v25, %v340_v45 }
  0x62   :  { %v353_v0 = vshrl.u32 %v17190_v27, %v8467_v55  ;;  %v8487_v8 = vmul.u32.u64.low %v270_v54, %v269_v59  ;;  %v8488_v9 = vmul.u32.u64.high %v270_v54, %v269_v59, %v8487_v8  ;;  %v8490_v1 = vshrl.u32 %v338_v35, 5 }
  0x63   :  { %v7358_v10 = vadd.s32 4294967169, %v434_v58  ;;  %v343_v57 = vshll.u32 %v17193_v34, %v340_v45  ;;  %v346_v12 = vshll.u32 %v17186_v36, %v340_v45  ;;  %v355_v13 = vshll.u32 %v17190_v27, %v340_v45 }
  0x64   :  { %v356_v14 = vshrl.u32 %v17188_v32, %v8467_v55  ;;  %v344_v15 = vshrl.u32 %v17186_v36, %v8467_v55  ;;  %v347_v16 = vshrl.u32 %v17181_v41, %v8467_v55  ;;  %v349_v17 = vshll.u32 %v17181_v41, %v340_v45 }
  0x65   :  { %v350_v19 = vshrl.u32 %v17197_v25, %v8467_v55  ;;  %v354_v20 = vor.u32 %v353_v0, %v352_v6  ;;  %v333_v22 = vand.u32 8388607, %v326_v60  ;;  %vm361_vm12 = vcmp.lt.s32.totalorder %v8490_v1, 4 }
  0x66   :  { %v440_v24 = vadd.s32 1, %v7358_v10  ;;  %v178_v28 = vadd.s32 %v177_v30, %v173_v61  ;;  %v258_v33 = vsel %vm254_vm8, %v238_v62, %v241_v38  ;;  %v260_v35 = vsel %vm256_vm9, %v244_v39, %v259_v63  ;;  %v8536_v61 = vld [vmem:[#allocation2 + $0x1] ss:$0 sm:$0xff]  ;;  %v553_v30 = vld [vmem:[#allocation7 + $0x20] sm:$0xff] }
  0x67   :  { %v357_v37 = vor.u32 %v356_v14, %v355_v13  ;;  %v345_v40 = vor.u32 %v344_v15, %v343_v57  ;;  %v348_v42 = vor.u32 %v347_v16, %v346_v12  ;;  %v351_v43 = vor.u32 %v350_v19, %v349_v17  ;;  %v562_v15 = vld [vmem:[#allocation8 + $0x20] sm:$0xff] }
  0x68   :  { %vm358_vm13 = vcmp.lt.s32.totalorder %v8490_v1, 1  ;;  %vm360_vm14 = vcmp.lt.s32.totalorder %v8490_v1, 3  ;;  %v367_v44 = vsel %vm361_vm12, %v354_v20, 920167782  ;;  %v261_v45 = vsel %vm255_vm10, %v258_v33, %v260_v35 }
  0x69   :  { %v280_v23 = vadd.s32 1, %v8481_v5  ;;  %v334_v38 = vor.u32 8388608, %v333_v22  ;;  %vm441_vm15 = vcmp.gt.s32.totalorder %v440_v24, 0  ;;  %v179_v46 = vadd.s32 536870912, %v178_v28 }
  0x6a   :  { %vm279_vm0 = vc.u32 %v8488_v9, %v8480_v3  ;;  %v371_v39 = vsel %vm361_vm12, %v357_v37, 1326507024  ;;  %vm359_vm1 = vcmp.lt.s32.totalorder %v8490_v1, 2  ;;  %v366_v47 = vsel %vm358_vm13, %v345_v40, %v348_v42 }
  0x6b   :  { %v368_v7 = vsel %vm360_vm14, %v351_v43, %v367_v44  ;;  %v277_v48 = vmul.u32 %v270_v54, %v261_v45  ;;  %v442_v51 = vsel %vm441_vm15, %v440_v24, 0  ;;  %v281_v52 = vsel %vm279_vm0, %v280_v23, %v8481_v5 }
  0x6c   :  { %v370_v53 = vsel %vm358_vm13, %v348_v42, %v351_v43  ;;  %v372_v49 = vsel %vm360_vm14, %v354_v20, %v371_v39  ;;  %v374_v50 = vshll.u32 %v334_v38, 8  ;;  %v8532_v56 = vshrl.u32 %v179_v46, 30 }
  0x6d   :  { %v369_v58 = vsel %vm359_vm1, %v366_v47, %v368_v7  ;;  %v444_v59 = vand.u32 31, %v442_v51  ;;  %v282_v54 = vadd.s32 %v281_v52, %v277_v48  ;;  %v373_v62 = vsel %vm359_vm1, %v370_v53, %v372_v49 }
  0x6e   :  { %v8540_v63 = vmul.u32.u64.low %v374_v50, %v369_v58  ;;  %v8541_v5 = vmul.u32.u64.high %v374_v50, %v369_v58, %v8540_v63  ;;  %v181_v6 = vshll.u32 %v8532_v56, 30  ;;  %v342_v0 = vshrl.u32 %v17193_v34, %v8467_v55 }
  0x6f   :  { %v557_v8 = vmul.f32 %v8536_v61, %v553_v30  ;;  %v363_v10 = vsel %vm361_vm12, %v351_v43, 2102212464  ;;  %v8550_v57 = vmul.u32.u64.low %v374_v50, %v373_v62  ;;  %v8551_v12 = vmul.u32.u64.high %v374_v50, %v373_v62, %v8550_v57 }
  0x70   :  { %v8553_v13 = vsub.s32 32, %v444_v59  ;;  %v283_v14 = vadd.s32 536870912, %v282_v54  ;;  %v362_v16 = vsel %vm358_vm13, %v342_v0, %v345_v40  ;;  %v364_v17 = vsel %vm360_vm14, %v348_v42, %v363_v10 }
  0x71   :  { %v430_v55 = vand.u32 2147483647, %v8436_v31  ;;  %v8560_v19 = vsub.s32 %v178_v28, %v181_v6  ;;  %v456_v20 = vshll.u32 %v17197_v25, %v444_v59  ;;  %v8565_v24 = vadd.f32 %v562_v15, %v557_v8 }
  0x72   :  { %v457_v22 = vshrl.u32 %v17190_v27, %v8553_v13  ;;  %v8567_v33 = vshrl.u32 %v283_v14, 30  ;;  %v8569_v35 = vshrl.u32 %v442_v51, 5  ;;  %v459_v37 = vshll.u32 %v17190_v27, %v444_v59 }
  0x73   :  { %v460_v40 = vshrl.u32 %v17188_v32, %v8553_v13  ;;  %v365_v28 = vsel %vm359_vm1, %v362_v16, %v364_v17  ;;  %v384_v42 = vadd.s32 1, %v8541_v5  ;;  %v447_v43 = vshll.u32 %v17193_v34, %v444_v59 }
  0x74   :  { %v450_v44 = vshll.u32 %v17186_v36, %v444_v59  ;;  %v448_v45 = vshrl.u32 %v17186_v36, %v8553_v13  ;;  %v451_v23 = vshrl.u32 %v17181_v41, %v8553_v13  ;;  %v453_v38 = vshll.u32 %v17181_v41, %v444_v59 }
  0x75   :  { %v454_v46 = vshrl.u32 %v17197_v25, %v8553_v13  ;;  %vm383_vm2 = vc.u32 %v8551_v12, %v8540_v63  ;;  %v437_v1 = vand.u32 8388607, %v430_v55  ;;  %v458_v39 = vor.u32 %v457_v22, %v456_v20 }
  0x76   :  { %v573_v47 = vand.u32 2139095040, %v8565_v24  ;;  %v184_v7 = vsub.s32 0, %v8560_v19  ;;  %v285_v48 = vshll.u32 %v8567_v33, 30  ;;  %v461_v51 = vor.u32 %v460_v40, %v459_v37 }
  0x77   :  { %vm465_vm3 = vcmp.lt.s32.totalorder %v8569_v35, 4  ;;  %v381_v52 = vmul.u32 %v374_v50, %v365_v28  ;;  %v385_v53 = vsel %vm383_vm2, %v384_v42, %v8541_v5  ;;  %v449_v49 = vor.u32 %v448_v45, %v447_v43 }
  0x78   :  { %v452_v58 = vor.u32 %v451_v23, %v450_v44  ;;  %v455_v59 = vor.u32 %v454_v46, %v453_v38  ;;  %vm462_vm4 = vcmp.lt.s32.totalorder %v8569_v35, 1  ;;  %vm464_vm5 = vcmp.lt.s32.totalorder %v8569_v35, 3 }
  0x79   :  { %v471_v30 = vsel %vm465_vm3, %v458_v39, 920167782  ;;  %v574_v62 = vshrl.u32 %v573_v47, 23  ;;  %v7347_v6 = vmin.u32 %v184_v7, %v8560_v19  ;;  %v8600_v0 = vsub.s32 %v282_v54, %v285_v48 }
  0x7a   :  { %v438_v8 = vor.u32 8388608, %v437_v1  ;;  %v475_v50 = vsel %vm465_vm3, %v461_v51, 1326507024  ;;  %v386_v5 = vadd.s32 %v385_v53, %v381_v52  ;;  %vm463_vm6 = vcmp.lt.s32.totalorder %v8569_v35, 2 }
  0x7b   :  { %v470_v10 = vsel %vm462_vm4, %v449_v49, %v452_v58  ;;  %v472_v57 = vsel %vm464_vm5, %v455_v59, %v471_v30  ;;  %v474_v14 = vsel %vm462_vm4, %v452_v58, %v455_v59  ;;  %v476_v54 = vsel %vm464_vm5, %v458_v39, %v475_v50 }
  0x7c   :  { %v7363_v15 = vadd.s32 4294967169, %v574_v62  ;;  %v186_v16 = vclz %v7347_v6  ;;  %v288_v17 = vsub.s32 0, %v8600_v0  ;;  %v478_v20 = vshll.u32 %v438_v8, 8  ;;  %v554_v8 = vld [vmem:[#allocation7 + $0x28] sm:$0xff] }
  0x7d   :  { %v387_v22 = vadd.s32 536870912, %v386_v5  ;;  %v473_v37 = vsel %vm463_vm6, %v470_v10, %v472_v57  ;;  %v477_v40 = vsel %vm463_vm6, %v474_v14, %v476_v54  ;;  %v446_v38 = vshrl.u32 %v17193_v34, %v8553_v13  ;;  %v563_v54 = vld [vmem:[#allocation8 + $0x28] sm:$0xff] }
  0x7e   :  { %v580_v28 = vadd.s32 1, %v7363_v15  ;;  %v7348_v42 = vadd.s32 4294967294, %v186_v16  ;;  %v7351_v43 = vmin.u32 %v288_v17, %v8600_v0  ;;  %v467_v39 = vsel %vm465_vm3, %v455_v59, 2102212464 }
  0x7f   :  { %v8619_v44 = vmul.u32.u64.low %v478_v20, %v473_v37  ;;  %v8620_v45 = vmul.u32.u64.high %v478_v20, %v473_v37, %v8619_v44  ;;  %v8623_v23 = vshrl.u32 %v387_v22, 30  ;;  %v466_v48 = vsel %vm462_vm4, %v446_v38, %v449_v49 }
  0x80   :  { %v8627_v46 = vmul.u32.u64.low %v478_v20, %v477_v40  ;;  %v8628_v1 = vmul.u32.u64.high %v478_v20, %v477_v40, %v8627_v46  ;;  %vm581_vm7 = vcmp.gt.s32.totalorder %v580_v28, 0  ;;  %vm7349_vm8 = vcmp.lt.s32.totalorder %v7348_v42, 0 }
  0x81   :  { %v290_v47 = vclz %v7351_v43  ;;  %v389_v7 = vshll.u32 %v8623_v23, 30  ;;  %v468_v51 = vsel %vm464_vm5, %v452_v58, %v467_v39  ;;  %v582_v52 = vsel %vm581_vm7, %v580_v28, 0  ;;  %v555_v28 = vld [vmem:[#allocation7 + $0x30] sm:$0xff] }
  0x82   :  { %v189_v53 = vsel %vm7349_vm8, 0, %v7348_v42  ;;  %v469_v13 = vsel %vm463_vm6, %v466_v48, %v468_v51  ;;  %v488_v30 = vadd.s32 1, %v8620_v45  ;;  %vm487_vm9 = vc.u32 %v8628_v1, %v8619_v44 }
  0x83   :  { %v7352_v62 = vadd.s32 4294967294, %v290_v47  ;;  %v8640_v59 = vsub.s32 %v386_v5, %v389_v7  ;;  %v584_v6 = vand.u32 31, %v582_v52  ;;  %v485_v50 = vmul.u32 %v478_v20, %v469_v13 }
  0x84   :  { %v174_v49 = vadd.s32 %v8425_v18, %v8433_v26  ;;  %v190_v58 = vsub.s32 32, %v189_v53  ;;  %v194_v10 = vsub.s32 4294967266, %v189_v53  ;;  %v489_v57 = vsel %vm487_vm9, %v488_v30, %v8620_v45 }
  0x85   :  { %vm7353_vm10 = vcmp.lt.s32.totalorder %v7352_v62, 0  ;;  %v392_v35 = vsub.s32 0, %v8640_v59  ;;  %v558_v14 = vmul.f32 %v8536_v61, %v554_v8  ;;  %v8649_v5 = vsub.s32 32, %v584_v6 }
  0x86   :  { %v490_v15 = vadd.s32 %v489_v57, %v485_v50  ;;  %v191_v16 = vshll.u32 %v8560_v19, %v189_v53  ;;  %v192_v17 = vshrl.u32 %v174_v49, %v190_v58  ;;  %v195_v20 = vadd.s32 127, %v194_v10 }
  0x87   :  { %v293_v22 = vsel %vm7353_vm10, 0, %v7352_v62  ;;  %v7355_v18 = vmin.u32 %v392_v35, %v8640_v59  ;;  %v8653_v26 = vadd.f32 %v563_v54, %v558_v14  ;;  %v596_v37 = vshll.u32 %v17197_v25, %v584_v6 }
  0x88   :  { %v597_v40 = vshrl.u32 %v17190_v27, %v8649_v5  ;;  %v17180_v42 = vand.u32 2147483647, %v8565_v24  ;;  %v8659_v43 = vshrl.u32 %v582_v52, 5  ;;  %v599_v45 = vshll.u32 %v17190_v27, %v584_v6 }
  0x89   :  { %v600_v19 = vshrl.u32 %v17188_v32, %v8649_v5  ;;  %v298_v38 = vsub.s32 4294967266, %v293_v22  ;;  %v491_v46 = vadd.s32 536870912, %v490_v15  ;;  %v587_v39 = vshll.u32 %v17193_v34, %v584_v6 }
  0x8a   :  { %v590_v47 = vshll.u32 %v17186_v36, %v584_v6  ;;  %v588_v7 = vshrl.u32 %v17186_v36, %v8649_v5  ;;  %v591_v48 = vshrl.u32 %v17181_v41, %v8649_v5  ;;  %v593_v51 = vshll.u32 %v17181_v41, %v584_v6 }
  0x8b   :  { %v594_v52 = vshrl.u32 %v17197_v25, %v8649_v5  ;;  %v196_v53 = vshll.u32 %v195_v20, 23  ;;  %v394_v13 = vclz %v7355_v18  ;;  %v559_v30 = vmul.f32 %v8536_v61, %v555_v28 }
  0x8c   :  { %v598_v62 = vor.u32 %v597_v40, %v596_v37  ;;  %v577_v8 = vand.u32 8388607, %v17180_v42  ;;  %v601_v50 = vor.u32 %v600_v19, %v599_v45  ;;  %vm605_vm11 = vcmp.lt.s32.totalorder %v8659_v43, 4  ;;  %v564_v19 = vld [vmem:[#allocation8 + $0x30] sm:$0xff] }
  0x8d   :  { %v677_v49 = vand.u32 2139095040, %v8653_v26  ;;  %v193_v58 = vor.u32 %v192_v17, %v191_v16  ;;  %v278_v6 = vadd.s32 %v8480_v3, %v8488_v9  ;;  %v294_v10 = vsub.s32 32, %v293_v22 }
  0x8e   :  { %v8680_v57 = vshrl.u32 %v491_v46, 30  ;;  %v299_v35 = vadd.s32 127, %v298_v38  ;;  %v589_v14 = vor.u32 %v588_v7, %v587_v39  ;;  %v592_v54 = vor.u32 %v591_v48, %v590_v47 }
  0x8f   :  { %v595_v20 = vor.u32 %v594_v52, %v593_v51  ;;  %v197_v18 = vor.u32 4788187, %v196_v53  ;;  %vm602_vm12 = vcmp.lt.s32.totalorder %v8659_v43, 1  ;;  %vm604_vm13 = vcmp.lt.s32.totalorder %v8659_v43, 3 }
  0x90   :  { %v611_v37 = vsel %vm605_vm11, %v598_v62, 920167782  ;;  %v7356_v40 = vadd.s32 4294967294, %v394_v13  ;;  %v578_v16 = vor.u32 8388608, %v577_v8  ;;  %v615_v3 = vsel %vm605_vm11, %v601_v50, 1326507024 }
  0x91   :  { %v678_v9 = vshrl.u32 %v677_v49, 23  ;;  %v295_v17 = vshll.u32 %v8600_v0, %v293_v22  ;;  %v296_v28 = vshrl.u32 %v278_v6, %v294_v10  ;;  %v493_v45 = vshll.u32 %v8680_v57, 30 }
  0x92   :  { %v300_v38 = vshll.u32 %v299_v35, 23  ;;  %vm603_vm14 = vcmp.lt.s32.totalorder %v8659_v43, 2  ;;  %v610_v46 = vsel %vm602_vm12, %v589_v14, %v592_v54  ;;  %v612_v39 = vsel %vm604_vm13, %v595_v20, %v611_v37 }
  0x93   :  { %v198_v47 = vand.u32 2147483647, %v197_v18  ;;  %v200_v7 = vcvt.s32.f32 %v193_v58  ;;  %v614_v48 = vsel %vm602_vm12, %v592_v54, %v595_v20  ;;  %v616_v0 = vsel %vm604_vm13, %v598_v62, %v615_v3 }
  0x94   :  { %vm7357_vm15 = vcmp.lt.s32.totalorder %v7356_v40, 0  ;;  %v8699_v22 = vadd.f32 %v564_v19, %v559_v30  ;;  %v8701_v51 = vshll.u32 %v578_v16, 8  ;;  %v7367_v52 = vadd.s32 4294967169, %v678_v9 }
  0x95   :  { %v8703_v53 = vsub.s32 %v490_v15, %v493_v45  ;;  %v613_v13 = vsel %vm603_vm14, %v610_v46, %v612_v39  ;;  %vm120_vm0 = vcmp.lt.s32.totalorder %v8348_v4, 0  ;;  %v297_v8 = vor.u32 %v296_v28, %v295_v17 }
  0x96   :  { %v301_v50 = vor.u32 4788187, %v300_v38  ;;  %v617_v49 = vsel %vm603_vm14, %v614_v48, %v616_v0  ;;  %v201_v58 = vmul.f32 %v200_v7, %v198_v47  ;;  %v204_v62 = vsub.s32 4, %v8532_v56 }
  0x97   :  { %v308_v30 = vsub.s32 4, %v8567_v33  ;;  %v397_v6 = vsel %vm7357_vm15, 0, %v7356_v40  ;;  %v8713_v10 = vmul.u32.u64.low %v8701_v51, %v613_v13  ;;  %v8714_v15 = vmul.u32.u64.high %v8701_v51, %v613_v13, %v8713_v10 }
  0x98   :  { %v684_v35 = vadd.s32 1, %v7367_v52  ;;  %v781_v18 = vand.u32 2139095040, %v8699_v22  ;;  %v496_v37 = vsub.s32 0, %v8703_v53  ;;  %v586_v16 = vshrl.u32 %v17193_v34, %v8649_v5 }
  0x99   :  { %v8722_v3 = vmul.u32.u64.low %v8701_v51, %v617_v49  ;;  %v8723_v9 = vmul.u32.u64.high %v8701_v51, %v617_v49, %v8722_v3  ;;  %vm224_vm1 = vcmp.lt.s32.totalorder %v8352_v11, 0  ;;  %v302_v40 = vand.u32 2147483647, %v301_v50 }
  0x9a   :  { %v304_v17 = vcvt.s32.f32 %v297_v8  ;;  %v607_v28 = vsel %vm605_vm11, %v595_v20, 2102212464  ;;  %v205_v45 = vsel %vm120_vm0, %v204_v62, %v8532_v56  ;;  %v309_v19 = vsel %vm224_vm1, %v308_v30, %v8567_v33 }
  0x9b   :  { %v402_v5 = vsub.s32 4294967266, %v397_v6  ;;  %v202_v38 = vxor.u32 2147483648, %v201_v58  ;;  %v382_v46 = vadd.s32 %v8540_v63, %v8551_v12  ;;  %vm685_vm2 = vcmp.gt.s32.totalorder %v684_v35, 0 }
  0x9c   :  { %v782_v39 = vshrl.u32 %v781_v18, 23  ;;  %v398_v47 = vsub.s32 32, %v397_v6  ;;  %v7359_v7 = vmin.u32 %v496_v37, %v8703_v53  ;;  %v606_v20 = vsel %vm602_vm12, %v586_v16, %v589_v14 }
  0x9d   :  { %v608_v56 = vsel %vm604_vm13, %v592_v54, %v607_v28  ;;  %vm8743_vm3 = vcmp.le.f32.partialorder %v118_v29, 0.7853982  ;;  %vm8749_vm4 = vcmp.le.f32.partialorder %v222_v2, 0.7853982  ;;  %v305_v12 = vmul.f32 %v304_v17, %v302_v40  ;;  %v556_v17 = vld [vmem:[#allocation7 + $0x38] sm:$0xff] }
  0x9e   :  { %v207_v48 = vsel %vm8743_vm3, 0, %v205_v45  ;;  %v311_v14 = vsel %vm8749_vm4, 0, %v309_v19  ;;  %v403_v54 = vadd.s32 127, %v402_v5  ;;  %v686_v0 = vsel %vm685_vm2, %v684_v35, 0 }
  0x9f   :  { %v203_v29 = vsel %vm120_vm0, %v202_v38, %v201_v58  ;;  %v609_v52 = vsel %vm603_vm14, %v606_v20, %v608_v56  ;;  %v628_v2 = vadd.s32 1, %v8714_v15  ;;  %v7371_v13 = vadd.s32 4294967169, %v782_v39 }
  0xa0   :  { %v399_v8 = vshll.u32 %v8640_v59, %v397_v6  ;;  %v400_v50 = vshrl.u32 %v382_v46, %v398_v47  ;;  %v498_v49 = vclz %v7359_v7  ;;  %vm627_vm5 = vc.u32 %v8723_v9, %v8713_v10 }
  0xa1   :  { %v306_v62 = vxor.u32 2147483648, %v305_v12  ;;  %v688_v30 = vand.u32 31, %v686_v0  ;;  %v211_v18 = vadd.s32 3, %v207_v48  ;;  %v404_v35 = vshll.u32 %v403_v54, 23 }
  0xa2   :  { %v625_v37 = vmul.u32 %v8701_v51, %v609_v52  ;;  %v206_v43 = vsel %vm8743_vm3, %v8348_v4, %v203_v29  ;;  %v315_v58 = vadd.s32 3, %v311_v14  ;;  %v629_v16 = vsel %vm627_vm5, %v628_v2, %v8714_v15  ;;  %v565_v52 = vld [vmem:[#allocation8 + $0x38] sm:$0xff] }
  0xa3   :  { %v788_v3 = vadd.s32 1, %v7371_v13  ;;  %v401_v59 = vor.u32 %v400_v50, %v399_v8  ;;  %v7360_v6 = vadd.s32 4294967294, %v498_v49  ;;  %v307_v40 = vsel %vm224_vm1, %v306_v62, %v305_v12 }
  0xa4   :  { %v8772_v28 = vsub.s32 32, %v688_v30  ;;  %7887 = vcosq.f32 %v206_v43  ;;  %v8774_v45 = vand.u32 3, %v211_v18  ;;  %v405_v51 = vor.u32 4788187, %v404_v35 }
  0xa5   :  { %v8776_v19 = vadd.s32 %v629_v16, %v625_v37  ;;  %7889 = vsinq.f32 %v206_v43  ;;  %v8778_v5 = vand.u32 3, %v315_v58  ;;  %v17179_v15 = vand.u32 2147483647, %v8653_v26 }
  0xa6   :  { %vm789_vm6 = vcmp.gt.s32.totalorder %v788_v3, 0  ;;  %v310_v38 = vsel %vm8749_vm4, %v8352_v11, %v307_v40  ;;  %v408_v46 = vcvt.s32.f32 %v401_v59  ;;  %vm7361_vm7 = vcmp.lt.s32.totalorder %v7360_v6, 0 }
  0xa7   :  { %v560_v39 = vmul.f32 %v8536_v61, %v556_v17  ;;  %v700_v47 = vshll.u32 %v17197_v25, %v688_v30  ;;  %v701_v7 = vshrl.u32 %v17190_v27, %v8772_v28  ;;  %v703_v20 = vshll.u32 %v17190_v27, %v688_v30 }
  0xa8   :  { %v704_v56 = vshrl.u32 %v17188_v32, %v8772_v28  ;;  %v406_v33 = vand.u32 2147483647, %v405_v51  ;;  %v631_v12 = vadd.s32 536870912, %v8776_v19  ;;  %v8792_v48 = vshrl.u32 %v686_v0, 5 }
  0xa9   :  { %v790_v63 = vsel %vm789_vm6, %v788_v3, 0  ;;  %v8794_v14 = vsel %vm7361_vm7, 0, %v7360_v6  ;;  %v681_v61 = vand.u32 8388607, %v17179_v15  ;;  %v691_v54 = vshll.u32 %v17193_v34, %v688_v30 }
  0xaa   :  { %v694_v29 = vshll.u32 %v17186_v36, %v688_v30  ;;  %v692_v2 = vshrl.u32 %v17186_v36, %v8772_v28  ;;  %v695_v13 = vshrl.u32 %v17181_v41, %v8772_v28  ;;  %v697_v0 = vshll.u32 %v17181_v41, %v688_v30 }
  0xab   :  { %v698_v8 = vshrl.u32 %v17197_v25, %v8772_v28  ;;  %v412_v50 = vsub.s32 4, %v8623_v23  ;;  %v702_v49 = vor.u32 %v701_v7, %v700_v47  ;;  %v705_v62 = vor.u32 %v704_v56, %v703_v20 }
  0xac   :  { %v792_v18 = vand.u32 31, %v790_v63  ;;  %7891 = vcosq.f32 %v310_v38  ;;  %v8808_v35 = vmul.f32 %v408_v46, %v406_v33  ;;  %v8810_v37 = vshrl.u32 %v631_v12, 30 }
  0xad   :  { %vm709_vm8 = vcmp.lt.s32.totalorder %v8792_v48, 4  ;;  %7893 = vsinq.f32 %v310_v38  ;;  %v506_v43 = vsub.s32 4294967266, %v8794_v14  ;;  %v8814_v58 = vadd.f32 %v565_v52, %v560_v39 }
  0xae   :  { %v682_v30 = vor.u32 8388608, %v681_v61  ;;  %v8816_v16 = vor.u32 %v692_v2, %v691_v54  ;;  %v8818_v3 = vor.u32 %v695_v13, %v694_v29  ;;  %v699_v59 = vor.u32 %v698_v8, %v697_v0 }
  0xaf   :  { %17377 = vst [vmem:[#allocation16_spill] sm:$0xff] %v8814_v58  ;;  %vm706_vm9 = vcmp.lt.s32.totalorder %v8792_v48, 1  ;;  %vm708_vm10 = vcmp.lt.s32.totalorder %v8792_v48, 3  ;;  %v715_v6 = vsel %vm709_vm8, %v702_v49, 920167782  ;;  %v8826_v17 = vsub.s32 32, %v792_v18 }
  0xb0   :  { %v719_v40 = vsel %vm709_vm8, %v705_v62, 1326507024  ;;  %v410_v51 = vxor.u32 2147483648, %v8808_v35  ;;  %v486_v38 = vadd.s32 %v8619_v44, %v8628_v1  ;;  %v502_v46 = vsub.s32 32, %v8794_v14 }
  0xb1   :  { %v633_v39 = vshll.u32 %v8810_v37, 30  ;;  %v8833_v47 = vpop.eup %7887  ;;  %v503_v7 = vshll.u32 %v8703_v53, %v8794_v14  ;;  %v8837_v20 = vadd.s32 127, %v506_v43  ;;  %vm707_vm11 = vcmp.lt.s32.totalorder %v8792_v48, 2 }
  0xb2   :  { %v17185_v56 = vand.u32 2147483647, %v8699_v22  ;;  %v8841_v33 = vpop.eup %7889  ;;  %vm328_vm12 = vcmp.lt.s32.totalorder %v8356_v21, 0  ;;  %v714_v44 = vsel %vm706_vm9, %v8816_v16, %v8818_v3  ;;  %v716_v1 = vsel %vm708_vm10, %v699_v59, %v715_v6 }
  0xb3   :  { %v718_v53 = vsel %vm706_vm9, %v8818_v3, %v699_v59  ;;  %v720_v12 = vsel %vm708_vm10, %v702_v49, %v719_v40  ;;  %v8855_v14 = vshll.u32 %v682_v30, 8  ;;  %v804_v61 = vshll.u32 %v17197_v25, %v792_v18 }
  0xb4   :  { %v805_v54 = vshrl.u32 %v17190_v27, %v8826_v17  ;;  %v885_v29 = vand.u32 2139095040, %v8814_v58  ;;  %v8862_v52 = vsub.s32 %v8776_v19, %v633_v39  ;;  %v8864_v2 = vshrl.u32 %v790_v63, 5 }
  0xb5   :  { %v807_v13 = vshll.u32 %v17190_v27, %v792_v18  ;;  %v808_v0 = vshrl.u32 %v17188_v32, %v8826_v17  ;;  %vm8871_vm13 = vcmp.le.f32.partialorder %v326_v60, 0.7853982  ;;  %v717_v49 = vsel %vm707_vm11, %v714_v44, %v716_v1 }
  0xb6   :  { %v721_v19 = vsel %vm707_vm11, %v718_v53, %v720_v12  ;;  %v795_v63 = vshll.u32 %v17193_v34, %v792_v18  ;;  %v798_v62 = vshll.u32 %v17186_v36, %v792_v18  ;;  %v796_v43 = vshrl.u32 %v17186_v36, %v8826_v17 }
  0xb7   :  { %v799_v30 = vshrl.u32 %v17181_v41, %v8826_v17  ;;  %v801_v60 = vshll.u32 %v17181_v41, %v792_v18  ;;  %v802_v6 = vshrl.u32 %v17197_v25, %v8826_v17  ;;  %v504_v40 = vshrl.u32 %v486_v38, %v502_v46 }
  0xb8   :  { %v508_v39 = vshll.u32 %v8837_v20, 23  ;;  %v806_v44 = vor.u32 %v805_v54, %v804_v61  ;;  %v886_v1 = vshrl.u32 %v885_v29, 23  ;;  %v636_v53 = vsub.s32 0, %v8862_v52 }
  0xb9   :  { %v785_v12 = vand.u32 8388607, %v17185_v56  ;;  %v809_v15 = vor.u32 %v808_v0, %v807_v13  ;;  %vm813_vm14 = vcmp.lt.s32.totalorder %v8864_v2, 4  ;;  %v8893_v42 = vpop.eup %7891  ;;  %v690_v61 = vshrl.u32 %v17193_v34, %v8772_v28 }
  0xba   :  { %v8896_v18 = vmul.u32.u64.low %v8855_v14, %v721_v19  ;;  %v8897_v41 = vmul.u32.u64.high %v8855_v14, %v721_v19, %v8896_v18  ;;  %v8900_v38 = vmul.u32.u64.low %v8855_v14, %v717_v49  ;;  %v8901_v46 = vmul.u32.u64.high %v8855_v14, %v717_v49, %v8900_v38  ;;  %v8904_v20 = vpop.eup %7893 }
  0xbb   :  { %v8908_v54 = vor.u32 %v796_v43, %v795_v63  ;;  %v8910_v29 = vor.u32 %v799_v30, %v798_v62  ;;  %v803_v13 = vor.u32 %v802_v6, %v801_v60  ;;  %vm810_vm15 = vcmp.lt.s32.totalorder %v8864_v2, 1 }
  0xbc   :  { %vm812_vm0 = vcmp.lt.s32.totalorder %v8864_v2, 3  ;;  %v819_v0 = vsel %vm813_vm14, %v806_v44, 920167782  ;;  %v7375_v49 = vadd.s32 4294967169, %v886_v1  ;;  %vm214_vm1 = vcmp.eq.s32.totalorder %v8774_v45, 0 }
  0xbd   :  { %vm217_vm2 = vcmp.eq.s32.totalorder %v8774_v45, 2  ;;  %v7364_v19 = vmin.u32 %v636_v53, %v8862_v52  ;;  %v711_v28 = vsel %vm709_vm8, %v699_v59, 2102212464  ;;  %v786_v63 = vor.u32 8388608, %v785_v12 }
  0xbe   :  { %v823_v62 = vsel %vm813_vm14, %v809_v15, 1326507024  ;;  %vm318_vm3 = vcmp.eq.s32.totalorder %v8778_v5, 0  ;;  %vm321_vm4 = vcmp.eq.s32.totalorder %v8778_v5, 2  ;;  %v411_v43 = vsel %vm328_vm12, %v410_v51, %v8808_v35 }
  0xbf   :  { %v413_v30 = vsel %vm328_vm12, %v412_v50, %v8623_v23  ;;  %v505_v60 = vor.u32 %v504_v40, %v503_v7  ;;  %v710_v59 = vsel %vm706_vm9, %v690_v61, %v8816_v16  ;;  %vm811_vm5 = vcmp.lt.s32.totalorder %v8864_v2, 2 }
  0xc0   :  { %v818_v15 = vsel %vm810_vm15, %v8908_v54, %v8910_v29  ;;  %v820_v35 = vsel %vm812_vm0, %v803_v13, %v819_v0  ;;  %v712_v51 = vsel %vm708_vm10, %v8818_v3, %v711_v28  ;;  %v822_v23 = vsel %vm810_vm15, %v8910_v29, %v803_v13  ;;  %v1005_v28 = vld [vmem:[#allocation7 + $0x40] sm:$0xff] }
  0xc1   :  { %v824_v50 = vsel %vm812_vm0, %v806_v44, %v823_v62  ;;  %v892_v16 = vadd.s32 1, %v7375_v49  ;;  %vm213_vm6 = vcmp.lt.s32.totalorder %v8774_v45, 2  ;;  %vm317_vm7 = vcmp.lt.s32.totalorder %v8778_v5, 2 }
  0xc2   :  { %v414_v7 = vsel %vm8871_vm13, %v8356_v21, %v411_v43  ;;  %v509_v6 = vor.u32 4788187, %v508_v39  ;;  %v638_v40 = vclz %v7364_v19  ;;  %v8956_v1 = vshll.u32 %v786_v63, 8  ;;  %v8972_v19 = vld [vmem:[#allocation2 + $0x2] ss:$0 sm:$0xff] }
  0xc3   :  { %v215_v3 = vxor.u32 2147483648, %v8841_v33  ;;  %v218_v53 = vxor.u32 2147483648, %v8833_v47  ;;  %v322_v12 = vxor.u32 2147483648, %v8893_v42  ;;  %v821_v44 = vsel %vm811_vm5, %v818_v15, %v820_v35 }
  0xc4   :  { %v319_v18 = vxor.u32 2147483648, %v8904_v20  ;;  %v713_v61 = vsel %vm707_vm11, %v710_v59, %v712_v51  ;;  %v732_v0 = vadd.s32 1, %v8901_v46  ;;  %v825_v39 = vsel %vm811_vm5, %v822_v23, %v824_v50 }
  0xc5   :  { %vm210_vm8 = vweird.f32 %v8348_v4  ;;  %7895 = vcosq.f32 %v414_v7  ;;  %v512_v49 = vcvt.s32.f32 %v505_v60  ;;  %vm731_vm9 = vc.u32 %v8897_v41, %v8900_v38 }
  0xc6   :  { %vm893_vm10 = vcmp.gt.s32.totalorder %v892_v16, 0  ;;  %v510_v63 = vand.u32 2147483647, %v509_v6  ;;  %v7365_v62 = vadd.s32 4294967294, %v638_v40  ;;  %v729_v59 = vmul.u32 %v8855_v14, %v713_v61 }
  0xc7   :  { %v8975_v48 = vmul.u32.u64.low %v8956_v1, %v821_v44  ;;  %v8976_v43 = vmul.u32.u64.high %v8956_v1, %v821_v44, %v8975_v48  ;;  %v794_v15 = vshrl.u32 %v17193_v34, %v8826_v17  ;;  %v733_v51 = vsel %vm731_vm9, %v732_v0, %v8901_v46  ;;  %v1014_v46 = vld [vmem:[#allocation8 + $0x40] sm:$0xff] }
  0xc8   :  { %v8983_v60 = vmul.u32.u64.low %v8956_v1, %v825_v39  ;;  %v8984_v35 = vmul.u32.u64.high %v8956_v1, %v825_v39, %v8983_v60  ;;  %v815_v23 = vsel %vm813_vm14, %v803_v13, 2102212464  ;;  %v894_v50 = vsel %vm893_vm10, %v892_v16, 0 }
  0xc9   :  { %v1009_v6 = vmul.f32 %v8972_v19, %v1005_v28  ;;  %v216_v40 = vsel %vm214_vm1, %v8833_v47, %v215_v3  ;;  %v219_v17 = vsel %vm217_vm2, %v218_v53, %v8841_v33  ;;  %v415_v14 = vsel %vm8871_vm13, 0, %v413_v30 }
  0xca   :  { %v516_v44 = vsub.s32 4, %v8680_v57  ;;  %v320_v13 = vsel %vm318_vm3, %v8893_v42, %v319_v18  ;;  %v323_v16 = vsel %vm321_vm4, %v322_v12, %v8904_v20  ;;  %v513_v61 = vmul.f32 %v512_v49, %v510_v63 }
  0xcb   :  { %vm7366_vm11 = vcmp.lt.s32.totalorder %v7365_v62, 0  ;;  %v9005_v47 = vadd.s32 %v733_v51, %v729_v59  ;;  %v814_v33 = vsel %vm810_vm15, %v794_v15, %v8908_v54  ;;  %v816_v8 = vsel %vm812_vm0, %v8910_v29, %v815_v23 }
  0xcc   :  { %v896_v30 = vand.u32 31, %v894_v50  ;;  %vm314_vm12 = vweird.f32 %v8352_v11  ;;  %v419_v42 = vadd.s32 3, %v415_v14  ;;  %vm432_vm13 = vcmp.lt.s32.totalorder %v8436_v31, 0 }
  0xcd   :  { %v9015_v3 = vadd.f32 %v1014_v46, %v1009_v6  ;;  %v220_v20 = vsel %vm213_vm6, %v216_v40, %v219_v17  ;;  %v324_v53 = vsel %vm317_vm7, %v320_v13, %v323_v16  ;;  %7897 = vsinq.f32 %v414_v7 }
  0xce   :  { %v9024_v54 = vsel %vm432_vm13, %v516_v44, %v8680_v57  ;;  %v514_v29 = vxor.u32 2147483648, %v513_v61  ;;  %v9027_v12 = vsel %vm7366_vm11, 0, %v7365_v62  ;;  %v817_v18 = vsel %vm811_vm5, %v814_v33, %v816_v8  ;;  %v1006_v33 = vld [vmem:[#allocation7 + $0x48] sm:$0xff] }
  0xcf   :  { %17380 = vst [vmem:[#allocation17_spill] sm:$0xff] %v9015_v3  ;;  %v836_v0 = vadd.s32 1, %v8976_v43  ;;  %v735_v45 = vadd.s32 536870912, %v9005_v47  ;;  %vm835_vm14 = vc.u32 %v8984_v35, %v8975_v48  ;;  %v9035_v5 = vsub.s32 32, %v896_v30 }
  0xd0   :  { %v9039_v57 = vsel %vm210_vm8, nan, %v220_v20  ;;  %v9041_v7 = vand.u32 3, %v419_v42  ;;  %vm9045_vm15 = vcmp.le.f32.partialorder %v430_v55, 0.7853982  ;;  %v1025_v39 = vand.u32 2139095040, %v9015_v3 }
  0xd1   :  { %v9052_v49 = vsel %vm314_vm12, nan, %v324_v53  ;;  %v519_v4 = vsel %vm9045_vm15, 0, %v9024_v54  ;;  %v646_v28 = vsub.s32 4294967266, %v9027_v12  ;;  %v833_v63 = vmul.u32 %v8956_v1, %v817_v18 }
  0xd2   :  { %v9059_v62 = vpop.eup %7895  ;;  %v515_v55 = vsel %vm432_vm13, %v514_v29, %v513_v61  ;;  %v626_v59 = vadd.s32 %v8713_v10, %v8723_v9  ;;  %v837_v11 = vsel %vm835_vm14, %v836_v0, %v8976_v43  ;;  %v17184_v15 = vand.u32 2147483647, %v8814_v58 }
  0xd3   :  { %v642_v60 = vsub.s32 32, %v9027_v12  ;;  %v9068_v51 = vshrl.u32 %v735_v45, 30  ;;  %v908_v23 = vshll.u32 %v17197_v25, %v896_v30  ;;  %v909_v1 = vshrl.u32 %v17190_v27, %v9035_v5 }
  0xd4   :  { %v9073_v6 = vshrl.u32 %v894_v50, 5  ;;  %v911_v40 = vshll.u32 %v17190_v27, %v896_v30  ;;  %v912_v10 = vshrl.u32 %v17188_v32, %v9035_v5  ;;  %v1026_v9 = vshrl.u32 %v1025_v39, 23 }
  0xd5   :  { %v647_v43 = vadd.s32 127, %v646_v28  ;;  %v9078_v17 = vadd.s32 %v837_v11, %v833_v63  ;;  %v899_v14 = vshll.u32 %v17193_v34, %v896_v30  ;;  %v902_v44 = vshll.u32 %v17186_v36, %v896_v30 }
  0xd6   :  { %vm422_vm0 = vcmp.eq.s32.totalorder %v9041_v7, 0  ;;  %vm425_vm1 = vcmp.eq.s32.totalorder %v9041_v7, 2  ;;  %v900_v50 = vshrl.u32 %v17186_v36, %v9035_v5  ;;  %v17383_v46 = vmov 2131351028  }
  0xd7   :  { %v903_v13 = vshrl.u32 %v17383_v46, %v9035_v5  ;;  %v905_v16 = vshll.u32 %v17383_v46, %v896_v30  ;;  %v906_v61 = vshrl.u32 %v17197_v25, %v9035_v5  ;;  %v426_v8 = vxor.u32 2147483648, %v9059_v62 }
  0xd8   :  { %v518_v42 = vsel %vm9045_vm15, %v8436_v31, %v515_v55  ;;  %v737_v20 = vshll.u32 %v9068_v51, 30  ;;  %v910_v53 = vor.u32 %v909_v1, %v908_v23  ;;  %v889_v29 = vand.u32 8388607, %v17184_v15 }
  0xd9   :  { %v913_v18 = vor.u32 %v912_v10, %v911_v40  ;;  %vm917_vm2 = vcmp.lt.s32.totalorder %v9073_v6, 4  ;;  %v7380_v30 = vadd.s32 4294967169, %v1026_v9  ;;  %vm421_vm3 = vcmp.lt.s32.totalorder %v9041_v7, 2  ;;  %v1015_v40 = vld [vmem:[#allocation8 + $0x48] sm:$0xff]  ;;  %v98_v9 = vld [vmem:[#allocation5] sm:$0xff] }
  0xda   :  { %v643_v0 = vshll.u32 %v8862_v52, %v9027_v12  ;;  %v644_v45 = vshrl.u32 %v626_v59, %v642_v60  ;;  %v648_v39 = vshll.u32 %v647_v43, 23  ;;  %v1010_v28 = vmul.f32 %v8972_v19, %v1006_v33  ;;  %v7898_v63 = vpop.eup %7897  ;;  %v90_v7 = vld [vmem:[#allocation10 + $0x8] sm:$0xff] }
  0xdb   :  { %v839_v55 = vadd.s32 536870912, %v9078_v17  ;;  %v9104_v11 = vor.u32 %v900_v50, %v899_v14  ;;  %v9106_v23 = vor.u32 %v903_v13, %v902_v44  ;;  %v907_v1 = vor.u32 %v906_v61, %v905_v16  ;;  %v99_v16 = vld [vmem:[#allocation5 + $0x8] sm:$0xff] }
  0xdc   :  { %v9109_v10 = vsub.s32 %v9005_v47, %v737_v20  ;;  %vm914_vm4 = vcmp.lt.s32.totalorder %v9073_v6, 1  ;;  %vm916_vm5 = vcmp.lt.s32.totalorder %v9073_v6, 3  ;;  %v923_v52 = vsel %vm917_vm2, %v910_v53, 920167782 }
  0xdd   :  { %7899 = vcosq.f32 %v518_v42  ;;  %vm572_vm6 = vcmp.lt.s32.totalorder %v8565_v24, 0  ;;  %v890_v12 = vor.u32 8388608, %v889_v29  ;;  %v927_v59 = vsel %vm917_vm2, %v913_v18, 1326507024 }
  0xde   :  { %v1032_v60 = vadd.s32 1, %v7380_v30  ;;  %vm418_vm7 = vweird.f32 %v8356_v21  ;;  %v423_v47 = vxor.u32 2147483648, %v7898_v63  ;;  %7901 = vsinq.f32 %v518_v42 }
  0xdf   :  { %v645_v43 = vor.u32 %v644_v45, %v643_v0  ;;  %v9119_v14 = vadd.f32 %v1015_v40, %v1010_v28  ;;  %v9121_v44 = vshrl.u32 %v839_v55, 30  ;;  %vm915_vm8 = vcmp.lt.s32.totalorder %v9073_v6, 2 }
  0xe0   :  { %v922_v50 = vsel %vm914_vm4, %v9104_v11, %v9106_v23  ;;  %v924_v13 = vsel %vm916_vm5, %v907_v1, %v923_v52  ;;  %v649_v61 = vor.u32 4788187, %v648_v39  ;;  %v740_v33 = vsub.s32 0, %v9109_v10 }
  0xe1   :  { %17384 = vst [vmem:[#allocation18_spill] sm:$0xff] %v9119_v14  ;;  %v926_v42 = vsel %vm914_vm4, %v9106_v23, %v907_v1  ;;  %v928_v20 = vsel %vm916_vm5, %v910_v53, %v927_v59  ;;  %v523_v29 = vadd.s32 3, %v519_v4  ;;  %v534_v18 = vmul.f32 %v9039_v57, %v98_v9 }
  0xe2   :  { %v9141_v30 = vshll.u32 %v890_v12, 8  ;;  %vm1033_vm9 = vcmp.gt.s32.totalorder %v1032_v60, 0  ;;  %v424_v0 = vsel %vm422_vm0, %v9059_v62, %v423_v47  ;;  %v427_v45 = vsel %vm425_vm1, %v426_v8, %v7898_v63  ;;  %v89_v12 = vld [vmem:[#allocation10] sm:$0xff] }
  0xe3   :  { %v656_v39 = vsub.s32 4, %v8810_v37  ;;  %v925_v2 = vsel %vm915_vm8, %v922_v50, %v924_v13  ;;  %v535_v54 = vmul.f32 %v9052_v49, %v99_v16  ;;  %v841_v4 = vshll.u32 %v9121_v44, 30 }
  0xe4   :  { %v929_v57 = vsel %vm915_vm8, %v926_v42, %v928_v20  ;;  %v1129_v53 = vand.u32 2139095040, %v9119_v14  ;;  %v650_v28 = vand.u32 2147483647, %v649_v61  ;;  %v652_v55 = vcvt.s32.f32 %v645_v43  ;;  %v100_v42 = vld [vmem:[#allocation5 + $0x10] sm:$0xff] }
  0xe5   :  { %v7368_v62 = vmin.u32 %v740_v33, %v9109_v10  ;;  %v1034_v40 = vsel %vm1033_vm9, %v1032_v60, 0  ;;  %v428_v8 = vsel %vm421_vm3, %v424_v0, %v427_v45  ;;  %v9159_v63 = vand.u32 3, %v523_v29 }
  0xe6   :  { %v9162_v52 = vmul.u32.u64.low %v9141_v30, %v925_v2  ;;  %v9163_v49 = vmul.u32.u64.high %v9141_v30, %v925_v2, %v9162_v52  ;;  %v657_v59 = vsel %vm572_vm6, %v656_v39, %v8810_v37  ;;  %v898_v9 = vshrl.u32 %v17193_v34, %v9035_v5 }
  0xe7   :  { %v9172_v60 = vmul.u32.u64.low %v9141_v30, %v929_v57  ;;  %v9173_v47 = vmul.u32.u64.high %v9141_v30, %v929_v57, %v9172_v60  ;;  %v9176_v43 = vsub.s32 %v9078_v17, %v841_v4  ;;  %v919_v50 = vsel %vm917_vm2, %v907_v1, 2102212464 }
  0xe8   :  { %v1036_v13 = vand.u32 31, %v1034_v40  ;;  %v1130_v16 = vshrl.u32 %v1129_v53, 23  ;;  %v653_v61 = vmul.f32 %v652_v55, %v650_v28  ;;  %v742_v33 = vclz %v7368_v62 }
  0xe9   :  { %v429_v37 = vsel %vm418_vm7, nan, %v428_v8  ;;  %v9182_v5 = vadd.f32 %v534_v18, %v89_v12  ;;  %v17386_v20 = vand.u32 2147483647, %v8565_v24  ;;  %v9190_v0 = vadd.f32 %v535_v54, %v90_v7  ;;  %v1007_v18 = vld [vmem:[#allocation7 + $0x50] sm:$0xff] }
  0xea   :  { %v7900_v17 = vpop.eup %7899  ;;  %v918_v45 = vsel %vm914_vm4, %v898_v9, %v9104_v11  ;;  %v920_v21 = vsel %vm916_vm5, %v9106_v23, %v919_v50  ;;  %vm526_vm11 = vcmp.eq.s32.totalorder %v9159_v63, 0  ;;  %v844_v2 = vsub.s32 0, %v9176_v43 }
  0xeb   :  { %17385 = vst [vmem:[#allocation19_spill] sm:$0xff] %v9182_v5  ;;  %vm9186_vm10 = vcmp.le.f32.partialorder %v17386_v20, 0.7853982  ;;  %17389 = vst [vmem:[#allocation20_spill] sm:$0xff] %v9190_v0  ;;  %v7902_v39 = vpop.eup %7901  ;;  %v9202_v4 = vsub.s32 32, %v1036_v13  ;;  %v7384_v54 = vadd.s32 4294967169, %v1130_v16  ;;  %v9205_v57 = vmul.f32 %v429_v37, %v100_v42 }
  0xec   :  { %v659_v1 = vsel %vm9186_vm10, 0, %v657_v59  ;;  %vm529_vm12 = vcmp.eq.s32.totalorder %v9159_v63, 2  ;;  %v654_v53 = vxor.u32 2147483648, %v653_v61  ;;  %v7369_v28 = vadd.s32 4294967294, %v742_v33  ;;  %v1016_v59 = vld [vmem:[#allocation8 + $0x50] sm:$0xff] }
  0xed   :  { %v663_v11 = vadd.s32 3, %v659_v1  ;;  %v921_v55 = vsel %vm915_vm8, %v918_v45, %v920_v21  ;;  %v940_v23 = vadd.s32 1, %v9163_v49  ;;  %v1011_v62 = vmul.f32 %v8972_v19, %v1007_v18 }
  0xee   :  { %v527_v8 = vxor.u32 2147483648, %v7902_v39  ;;  %v530_v12 = vxor.u32 2147483648, %v7900_v17  ;;  %vm939_vm13 = vc.u32 %v9173_v47, %v9162_v52  ;;  %v17183_v9 = vand.u32 2147483647, %v9015_v3 }
  0xef   :  { %v7372_v60 = vmin.u32 %v844_v2, %v9176_v43  ;;  %v1051_v7 = vshll.u32 %v17190_v27, %v1036_v13  ;;  %v1052_v6 = vshrl.u32 %v17188_v32, %v9202_v4  ;;  %v1136_v50 = vadd.s32 1, %v7384_v54 }
  0xf0   :  { %vm525_vm14 = vcmp.lt.s32.totalorder %v9159_v63, 2  ;;  %v655_v16 = vsel %vm572_vm6, %v654_v53, %v653_v61  ;;  %vm7370_vm15 = vcmp.lt.s32.totalorder %v7369_v28, 0  ;;  %v937_v33 = vmul.u32 %v9141_v30, %v921_v55 }
  0xf1   :  { %v9222_v42 = vshrl.u32 %v1034_v40, 5  ;;  %v941_v37 = vsel %vm939_vm13, %v940_v23, %v9163_v49  ;;  %v9225_v20 = vadd.f32 %v1016_v59, %v1011_v62  ;;  %v1042_v1 = vshll.u32 %v17186_v36, %v1036_v13 }
  0xf2   :  { %v1043_v45 = vshrl.u32 %v17383_v46, %v9202_v4  ;;  %v1045_v21 = vshll.u32 %v17383_v46, %v1036_v13  ;;  %v1046_v18 = vshrl.u32 %v17197_v25, %v9202_v4  ;;  %v1048_v61 = vshll.u32 %v17197_v25, %v1036_v13 }
  0xf3   :  { %v1049_v30 = vshrl.u32 %v17190_v27, %v9202_v4  ;;  %v846_v40 = vclz %v7372_v60  ;;  %v1029_v49 = vand.u32 8388607, %v17183_v9  ;;  %v1053_v2 = vor.u32 %v1052_v6, %v1051_v7 }
  0xf4   :  { %vm1137_vm0 = vcmp.gt.s32.totalorder %v1136_v50, 0  ;;  %v9238_v54 = vadd.s32 %v941_v37, %v937_v33  ;;  %v1039_v53 = vshll.u32 %v17193_v34, %v1036_v13  ;;  %v1040_v55 = vshrl.u32 %v17186_v36, %v9202_v4 }
  0xf5   :  { %vm1057_vm1 = vcmp.lt.s32.totalorder %v9222_v42, 4  ;;  %v528_v23 = vsel %vm526_vm11, %v7900_v17, %v527_v8  ;;  %v531_v62 = vsel %vm529_vm12, %v530_v12, %v7902_v39  ;;  %v658_v59 = vsel %vm9186_vm10, %v8565_v24, %v655_v16 }
  0xf6   :  { %v1233_v60 = vand.u32 2139095040, %v9225_v20  ;;  %v9252_v7 = vor.u32 %v1043_v45, %v1042_v1  ;;  %v1047_v13 = vor.u32 %v1046_v18, %v1045_v21  ;;  %v1050_v6 = vor.u32 %v1049_v30, %v1048_v61  ;;  %v1008_v61 = vld [vmem:[#allocation7 + $0x58] sm:$0xff] }
  0xf7   :  { %v1138_v33 = vsel %vm1137_vm0, %v1136_v50, 0  ;;  %v9255_v37 = vsel %vm7370_vm15, 0, %v7369_v28  ;;  %vm1054_vm2 = vcmp.lt.s32.totalorder %v9222_v42, 1  ;;  %vm1056_vm3 = vcmp.lt.s32.totalorder %v9222_v42, 3 }
  0xf8   :  { %v1067_v17 = vsel %vm1057_vm1, %v1053_v2, 1326507024  ;;  %v7373_v39 = vadd.s32 4294967294, %v846_v40  ;;  %v943_v29 = vadd.s32 536870912, %v9238_v54  ;;  %v1030_v8 = vor.u32 8388608, %v1029_v49 }
  0xf9   :  { %v1041_v12 = vor.u32 %v1040_v55, %v1039_v53  ;;  %v9262_v16 = vand.u32 3, %v663_v11  ;;  %v730_v50 = vadd.s32 %v8900_v38, %v8897_v41  ;;  %v1140_v1 = vand.u32 31, %v1138_v33 }
  0xfa   :  { %v1234_v28 = vshrl.u32 %v1233_v60, 23  ;;  %vm1055_vm4 = vcmp.lt.s32.totalorder %v9222_v42, 2  ;;  %v1063_v45 = vsel %vm1057_vm1, %v1050_v6, 920167782  ;;  %v1066_v21 = vsel %vm1054_vm2, %v9252_v7, %v1047_v13 }
  0xfb   :  { %v1068_v18 = vsel %vm1056_vm3, %v1050_v6, %v1067_v17  ;;  %v9276_v11 = vsel %vm525_vm14, %v528_v23, %v531_v62  ;;  %7903 = vcosq.f32 %v658_v59  ;;  %v746_v41 = vsub.s32 32, %v9255_v37 }
  0xfc   :  { %v750_v38 = vsub.s32 4294967266, %v9255_v37  ;;  %vm7374_vm5 = vcmp.lt.s32.totalorder %v7373_v39, 0  ;;  %v9280_v30 = vshrl.u32 %v943_v29, 30  ;;  %v1062_v40 = vsel %vm1054_vm2, %v1041_v12, %v9252_v7 }
  0xfd   :  { %v9285_v49 = vshll.u32 %v1030_v8, 8  ;;  %v1064_v63 = vsel %vm1056_vm3, %v1047_v13, %v1063_v45  ;;  %v1069_v2 = vsel %vm1055_vm4, %v1066_v21, %v1068_v18  ;;  %v9291_v53 = vsub.s32 32, %v1140_v1 }
  0xfe   :  { %v7388_v55 = vadd.s32 4294967169, %v1234_v28  ;;  %7905 = vsinq.f32 %v658_v59  ;;  %v747_v23 = vshll.u32 %v9109_v10, %v9255_v37  ;;  %v760_v62 = vsub.s32 4, %v9068_v51 }
  0xff   :  { %v1012_v60 = vmul.f32 %v8972_v19, %v1008_v61  ;;  %v748_v6 = vshrl.u32 %v730_v50, %v746_v41  ;;  %v751_v17 = vadd.s32 127, %v750_v38  ;;  %v9297_v29 = vsel %vm7374_vm5, 0, %v7373_v39 }
 0x100   :  { %v17192_v8 = vand.u32 2147483647, %v9119_v14  ;;  %v945_v45 = vshll.u32 %v9280_v30, 30  ;;  %v1065_v21 = vsel %vm1055_vm4, %v1062_v40, %v1064_v63  ;;  %v1038_v10 = vshrl.u32 %v17193_v34, %v9202_v4 }
 0x101   :  { %v9304_v59 = vmul.u32.u64.low %v9285_v49, %v1069_v2  ;;  %v9305_v28 = vmul.u32.u64.high %v9285_v49, %v1069_v2, %v9304_v59  ;;  %v1152_v19 = vshll.u32 %v17197_v25, %v1140_v1  ;;  %v1153_v37 = vshrl.u32 %v17190_v27, %v9291_v53 }
 0x102   :  { %v1240_v39 = vadd.s32 1, %v7388_v55  ;;  %v1059_v50 = vsel %vm1057_vm1, %v1047_v13, 2102212464  ;;  %v9314_v18 = vshrl.u32 %v1138_v33, 5  ;;  %v1155_v41 = vshll.u32 %v17190_v27, %v1140_v1  ;;  %v1017_v27 = vld [vmem:[#allocation8 + $0x58] sm:$0xff] }
 0x103   :  { %v1156_v38 = vshrl.u32 %v17188_v32, %v9291_v53  ;;  %v9320_v61 = vmul.u32.u64.low %v9285_v49, %v1065_v21  ;;  %v9321_v40 = vmul.u32.u64.high %v9285_v49, %v1065_v21, %v9320_v61  ;;  %v1143_v4 = vshll.u32 %v17193_v34, %v1140_v1 }
 0x104   :  { %v1146_v63 = vshll.u32 %v17186_v36, %v1140_v1  ;;  %v1144_v2 = vshrl.u32 %v17186_v36, %v9291_v53  ;;  %v1147_v13 = vshrl.u32 %v17383_v46, %v9291_v53  ;;  %v1149_v33 = vshll.u32 %v17383_v46, %v1140_v1 }
 0x105   :  { %v1150_v55 = vshrl.u32 %v17197_v25, %v9291_v53  ;;  %vm676_vm6 = vcmp.lt.s32.totalorder %v8653_v26, 0  ;;  %v834_v21 = vadd.s32 %v8975_v48, %v8984_v35  ;;  %v9337_v59 = vsub.s32 %v9238_v54, %v945_v45 }
 0x106   :  { %v1154_v9 = vor.u32 %v1153_v37, %v1152_v19  ;;  %vm1241_vm7 = vcmp.gt.s32.totalorder %v1240_v39, 0  ;;  %v752_v15 = vshll.u32 %v751_v17, 23  ;;  %v1133_v56 = vand.u32 8388607, %v17192_v8 }
 0x107   :  { %v1157_v36 = vor.u32 %v1156_v38, %v1155_v41  ;;  %vm1161_vm8 = vcmp.lt.s32.totalorder %v9314_v18, 4  ;;  %v9342_v1 = vor.u32 %v748_v6, %v747_v23  ;;  %v854_v32 = vsub.s32 4294967266, %v9297_v29 }
 0x108   :  { %v1058_v48 = vsel %vm1054_vm2, %v1038_v10, %v1041_v12  ;;  %v1060_v35 = vsel %vm1056_vm3, %v9252_v7, %v1059_v50  ;;  %v9350_v54 = vpop.eup %7903  ;;  %v1145_v17 = vor.u32 %v1144_v2, %v1143_v4  ;;  %v1148_v45 = vor.u32 %v1147_v13, %v1146_v63 }
 0x109   :  { %v1151_v19 = vor.u32 %v1150_v55, %v1149_v33  ;;  %v1242_v37 = vsel %vm1241_vm7, %v1240_v39, 0  ;;  %v948_v23 = vsub.s32 0, %v9337_v59  ;;  %vm1158_vm9 = vcmp.lt.s32.totalorder %v9314_v18, 1 }
 0x10a   :  { %vm1160_vm10 = vcmp.lt.s32.totalorder %v9314_v18, 3  ;;  %v1167_v12 = vsel %vm1161_vm8, %v1154_v9, 920167782  ;;  %v753_v6 = vor.u32 4788187, %v752_v15  ;;  %v9358_v10 = vadd.f32 %v1017_v27, %v1012_v60 }
 0x10b   :  { %v1134_v7 = vor.u32 8388608, %v1133_v56  ;;  %v1171_v50 = vsel %vm1161_vm8, %v1157_v36, 1326507024  ;;  %v9362_v41 = vpop.eup %7905  ;;  %v850_v39 = vsub.s32 32, %v9297_v29  ;;  %v1061_v38 = vsel %vm1055_vm4, %v1058_v48, %v1060_v35 }
 0x10c   :  { %17390 = vst [vmem:[#allocation21_spill] sm:$0xff] %v9358_v10  ;;  %v1080_v4 = vadd.s32 1, %v9321_v40  ;;  %v1244_v63 = vand.u32 31, %v1242_v37  ;;  %vm1079_vm11 = vc.u32 %v9305_v28, %v9320_v61  ;;  %vm1159_vm12 = vcmp.lt.s32.totalorder %v9314_v18, 2 }
 0x10d   :  { %v1166_v27 = vsel %vm1158_vm9, %v1145_v17, %v1148_v45  ;;  %v1168_v36 = vsel %vm1160_vm10, %v1151_v19, %v1167_v12  ;;  %v855_v56 = vadd.s32 127, %v854_v32  ;;  %v7376_v15 = vmin.u32 %v948_v23, %v9337_v59 }
 0x10e   :  { %v1170_v42 = vsel %vm1158_vm9, %v1148_v45, %v1151_v19  ;;  %v1172_v60 = vsel %vm1160_vm10, %v1154_v9, %v1171_v50  ;;  %v756_v2 = vcvt.s32.f32 %v9342_v1  ;;  %v9386_v13 = vsel %vm676_vm6, %v760_v62, %v9068_v51 }
 0x10f   :  { %v1077_v33 = vmul.u32 %v9285_v49, %v1061_v38  ;;  %v9389_v32 = vshll.u32 %v1134_v7, 8  ;;  %v754_v55 = vand.u32 2147483647, %v753_v6  ;;  %v1081_v48 = vsel %vm1079_vm11, %v1080_v4, %v9321_v40 }
 0x110   :  { %v1169_v35 = vsel %vm1159_vm12, %v1166_v27, %v1168_v36  ;;  %v9394_v9 = vsub.s32 32, %v1244_v63  ;;  %v851_v1 = vshll.u32 %v9176_v43, %v9297_v29  ;;  %v852_v23 = vshrl.u32 %v834_v21, %v850_v39 }
 0x111   :  { %v1142_v51 = vshrl.u32 %v17193_v34, %v9291_v53  ;;  %v1173_v49 = vsel %vm1159_vm12, %v1170_v42, %v1172_v60  ;;  %v856_v62 = vshll.u32 %v855_v56, 23  ;;  %v950_v12 = vclz %v7376_v15 }
 0x112   :  { %v1337_v40 = vand.u32 2139095040, %v9358_v10  ;;  %v9404_v7 = vadd.s32 %v1081_v48, %v1077_v33  ;;  %v1163_v50 = vsel %vm1161_vm8, %v1151_v19, 2102212464  ;;  %v1256_v39 = vshll.u32 %v17197_v25, %v1244_v63 }
 0x113   :  { %v9409_v43 = vmul.u32.u64.low %v9389_v32, %v1169_v35  ;;  %v9410_v29 = vmul.u32.u64.high %v9389_v32, %v1169_v35, %v9409_v43  ;;  %v9414_v53 = vmul.u32.u64.low %v9389_v32, %v1173_v49  ;;  %v9415_v21 = vmul.u32.u64.high %v9389_v32, %v1173_v49, %v9414_v53 }
 0x114   :  { %v17391_v38 = vmov 920167782   ;;  %v1162_v27 = vsel %vm1158_vm9, %v1142_v51, %v1145_v17  ;;  %v9422_v36 = vshrl.u32 %v1242_v37, 5  ;;  %v17392_v56 = vmov 1326507024  }
 0x115   :  { %v1257_v4 = vshrl.u32 %v17391_v38, %v9394_v9  ;;  %v1259_v19 = vshll.u32 %v17391_v38, %v1244_v63  ;;  %v1260_v15 = vshrl.u32 %v17392_v56, %v9394_v9  ;;  %v1164_v42 = vsel %vm1160_vm10, %v1148_v45, %v1163_v50 }
 0x116   :  { %v1247_v60 = vshll.u32 %v17193_v34, %v1244_v63  ;;  %v17393_v33 = vmov 2475754826   ;;  %v1338_v35 = vshrl.u32 %v1337_v40, 23  ;;  %vm522_vm13 = vweird.f32 %v8436_v31 }
 0x117   :  { %v1250_v48 = vshll.u32 %v17393_v33, %v1244_v63  ;;  %vm669_vm14 = vcmp.eq.s32.totalorder %v9262_v16, 2  ;;  %v1248_v17 = vshrl.u32 %v17393_v33, %v9394_v9  ;;  %v1251_v37 = vshrl.u32 %v17383_v46, %v9394_v9 }
 0x118   :  { %v1253_v51 = vshll.u32 %v17383_v46, %v1244_v63  ;;  %v1254_v45 = vshrl.u32 %v17197_v25, %v9394_v9  ;;  %v667_v49 = vxor.u32 2147483648, %v9362_v41  ;;  %v670_v50 = vxor.u32 2147483648, %v9350_v54 }
 0x119   :  { %v757_v40 = vmul.f32 %v756_v2, %v754_v55  ;;  %v1258_v53 = vor.u32 %v1257_v4, %v1256_v39  ;;  %v17394_v8 = vand.u32 2147483647, %v8653_v26  ;;  %v853_v6 = vor.u32 %v852_v23, %v851_v1 }
 0x11a   :  { %v17397_v0 = vand.u32 2147483647, %v9225_v20  ;;  %v1261_v63 = vor.u32 %v1260_v15, %v1259_v19  ;;  %vm1265_vm0 = vcmp.lt.s32.totalorder %v9422_v36, 4  ;;  %v857_v25 = vor.u32 4788187, %v856_v62 }
 0x11b   :  { %vm9444_vm15 = vcmp.le.f32.partialorder %v17394_v8, 0.7853982  ;;  %v7377_v3 = vadd.s32 4294967294, %v950_v12  ;;  %v1083_v5 = vadd.s32 536870912, %v9404_v7  ;;  %v1165_v2 = vsel %vm1159_vm12, %v1162_v27, %v1164_v42 }
 0x11c   :  { %v1237_v14 = vand.u32 8388607, %v17397_v0  ;;  %v9454_v55 = vor.u32 %v1248_v17, %v1247_v60  ;;  %v9456_v8 = vor.u32 %v1251_v37, %v1250_v48  ;;  %v1255_v39 = vor.u32 %v1254_v45, %v1253_v51 }
 0x11d   :  { %v7392_v4 = vadd.s32 4294967169, %v1338_v35  ;;  %vm780_vm1 = vcmp.lt.s32.totalorder %v8699_v22, 0  ;;  %v1184_v0 = vadd.s32 1, %v9410_v29  ;;  %vm1262_vm2 = vcmp.lt.s32.totalorder %v9422_v36, 1 }
 0x11e   :  { %vm1264_vm3 = vcmp.lt.s32.totalorder %v9422_v36, 3  ;;  %v1271_v1 = vsel %vm1265_vm0, %v1258_v53, 920167782  ;;  %v758_v23 = vxor.u32 2147483648, %v757_v40  ;;  %vm1183_vm4 = vc.u32 %v9415_v21, %v9409_v43 }
 0x11f   :  { %v1238_v18 = vor.u32 8388608, %v1237_v14  ;;  %v1275_v62 = vsel %vm1265_vm0, %v1261_v63, 1326507024  ;;  %vm665_vm5 = vcmp.lt.s32.totalorder %v9262_v16, 2  ;;  %v858_v12 = vand.u32 2147483647, %v857_v25 }
 0x120   :  { %v860_v27 = vcvt.s32.f32 %v853_v6  ;;  %vm7378_vm7 = vcmp.lt.s32.totalorder %v7377_v3, 0  ;;  %v1181_v19 = vmul.u32 %v9389_v32, %v1165_v2  ;;  %vm1263_vm8 = vcmp.lt.s32.totalorder %v9422_v36, 2 }
 0x121   :  { %v1270_v15 = vsel %vm1262_vm2, %v9454_v55, %v9456_v8  ;;  %v1272_v14 = vsel %vm1264_vm3, %v1255_v39, %v1271_v1  ;;  %v1344_v42 = vadd.s32 1, %v7392_v4  ;;  %v9477_v60 = vshrl.u32 %v1083_v5, 30 }
 0x122   :  { %v1185_v48 = vsel %vm1183_vm4, %v1184_v0, %v9410_v29  ;;  %v1274_v25 = vsel %vm1262_vm2, %v9456_v8, %v1255_v39  ;;  %v1276_v32 = vsel %vm1264_vm3, %v1258_v53, %v1275_v62  ;;  %vm666_vm9 = vcmp.eq.s32.totalorder %v9262_v16, 0 }
 0x123   :  { %v864_v6 = vsub.s32 4, %v9121_v44  ;;  %v9487_v35 = vsel %vm7378_vm7, 0, %v7377_v3  ;;  %v9489_v17 = vshll.u32 %v1238_v18, 8  ;;  %v533_v5 = vsel %vm522_vm13, nan, %v9276_v11 }
 0x124   :  { %v671_v29 = vsel %vm669_vm14, %v670_v50, %v9362_v41  ;;  %v763_v37 = vsel %vm9444_vm15, 0, %v9386_v13  ;;  %v17398_v51 = vand.u32 2147483647, %v8699_v22  ;;  %v1273_v3 = vsel %vm1263_vm8, %v1270_v15, %v1272_v14  ;;  %v9512_v41 = vld [vmem:[#allocation2 + $0x3] ss:$0 sm:$0xff]  ;;  %v1457_v50 = vld [vmem:[#allocation7 + $0x60] sm:$0xff] }
 0x125   :  { %v861_v53 = vmul.f32 %v860_v27, %v858_v12  ;;  %v9508_v31 = vadd.s32 %v1185_v48, %v1181_v19  ;;  %v1277_v11 = vsel %vm1263_vm8, %v1274_v25, %v1276_v32  ;;  %vm1345_vm11 = vcmp.gt.s32.totalorder %v1344_v42, 0  ;;  %v1466_v14 = vld [vmem:[#allocation8 + $0x60] sm:$0xff] }
 0x126   :  { %vm9502_vm10 = vcmp.le.f32.partialorder %v17398_v51, 0.7853982  ;;  %vm662_vm12 = vweird.f32 %v8565_v24  ;;  %v668_v13 = vsel %vm666_vm9, %v9350_v54, %v667_v49  ;;  %v759_v63 = vsel %vm676_vm6, %v758_v23, %v757_v40  ;;  %v101_v54 = vld [vmem:[#allocation5 + $0x18] sm:$0xff] }
 0x127   :  { %v958_v2 = vsub.s32 4294967266, %v9487_v35  ;;  %v1085_v4 = vshll.u32 %v9477_v60, 30  ;;  %v865_v0 = vsel %vm780_vm1, %v864_v6, %v9121_v44  ;;  %v17401_v1 = vmov 683565275  }
 0x128   :  { %v1246_v18 = vshrl.u32 %v17401_v1, %v9394_v9  ;;  %v9528_v62 = vmul.u32.u64.low %v9489_v17, %v1273_v3  ;;  %v9529_v12 = vmul.u32.u64.high %v9489_v17, %v1273_v3, %v9528_v62  ;;  %v1346_v23 = vsel %vm1345_vm11, %v1344_v42, 0 }
 0x129   :  { %v9533_v49 = vmul.u32.u64.low %v9489_v17, %v1277_v11  ;;  %v9534_v40 = vmul.u32.u64.high %v9489_v17, %v1277_v11, %v9533_v49  ;;  %v1461_v27 = vmul.f32 %v9512_v41, %v1457_v50  ;;  %v762_v44 = vsel %vm9444_vm15, %v8653_v26, %v759_v63  ;;  %v91_v11 = vld [vmem:[#allocation10 + $0x10] sm:$0xff] }
 0x12a   :  { %v862_v19 = vxor.u32 2147483648, %v861_v53  ;;  %v1187_v9 = vadd.s32 536870912, %v9508_v31  ;;  %v1267_v15 = vsel %vm1265_vm0, %v1255_v39, 2102212464  ;;  %v938_v48 = vadd.s32 %v9162_v52, %v9173_v47 }
 0x12b   :  { %v954_v25 = vsub.s32 32, %v9487_v35  ;;  %v959_v32 = vadd.s32 127, %v958_v2  ;;  %v9547_v42 = vsub.s32 %v9404_v7, %v1085_v4  ;;  %v537_v6 = vmul.f32 %v533_v5, %v101_v54  ;;  %v92_v7 = vld [vmem:[#allocation10 + $0x18] sm:$0xff] }
 0x12c   :  { %v672_v34 = vsel %vm665_vm5, %v668_v13, %v671_v29  ;;  %v767_v51 = vadd.s32 3, %v763_v37  ;;  %v1348_v3 = vand.u32 31, %v1346_v23  ;;  %7907 = vcosq.f32 %v762_v44 }
 0x12d   :  { %v1266_v39 = vsel %vm1262_vm2, %v1246_v18, %v9454_v55  ;;  %v1268_v52 = vsel %vm1264_vm3, %v9456_v8, %v1267_v15  ;;  %v9557_v47 = vadd.f32 %v1466_v14, %v1461_v27  ;;  %7909 = vsinq.f32 %v762_v44 }
 0x12e   :  { %v863_v16 = vsel %vm780_vm1, %v862_v19, %v861_v53  ;;  %v867_v5 = vsel %vm9502_vm10, 0, %v865_v0  ;;  %v9563_v29 = vshrl.u32 %v1187_v9, 30  ;;  %v955_v37 = vshll.u32 %v9337_v59, %v9487_v35 }
 0x12f   :  { %17402 = vst [vmem:[#allocation22_spill] sm:$0xff] %v9557_v47  ;;  %v956_v55 = vshrl.u32 %v938_v48, %v954_v25  ;;  %v960_v50 = vshll.u32 %v959_v32, 23  ;;  %v1088_v13 = vsub.s32 0, %v9547_v42  ;;  %v9569_v8 = vadd.f32 %v9205_v57, %v91_v11 }
 0x130   :  { %v1269_v63 = vsel %vm1263_vm8, %v1266_v39, %v1268_v52  ;;  %v1288_v53 = vadd.s32 1, %v9529_v12  ;;  %v9574_v2 = vsub.s32 32, %v1348_v3  ;;  %v9576_v4 = vadd.f32 %v537_v6, %v92_v7 }
 0x131   :  { %17403 = vst [vmem:[#allocation23_spill] sm:$0xff] %v9569_v8  ;;  %v9578_v0 = vand.u32 3, %v767_v51  ;;  %vm1287_vm6 = vc.u32 %v9534_v40, %v9528_v62  ;;  %v1477_v59 = vand.u32 2139095040, %v9557_v47  ;;  %v9585_v57 = vsel %vm662_vm12, nan, %v672_v34 }
 0x132   :  { %17404 = vst [vmem:[#allocation24_spill] sm:$0xff] %v9576_v4  ;;  %v9590_v36 = vsel %vm9502_vm10, %v8699_v22, %v863_v16  ;;  %v9592_v35 = vadd.s32 3, %v867_v5  ;;  %v1189_v18 = vshll.u32 %v9563_v29, 30  ;;  %v9595_v54 = vor.u32 %v956_v55, %v955_v37  ;;  %v1458_v16 = vld [vmem:[#allocation7 + $0x68] sm:$0xff] }
 0x133   :  { %v9597_v49 = vor.u32 4788187, %v960_v50  ;;  %v7381_v27 = vmin.u32 %v1088_v13, %v9547_v42  ;;  %v1285_v44 = vmul.u32 %v9489_v17, %v1269_v63  ;;  %v1289_v24 = vsel %vm1287_vm6, %v1288_v53, %v9529_v12 }
 0x134   :  { %v17201_v19 = vand.u32 2147483647, %v9358_v10  ;;  %v17405_v9 = vmov 2102212464   ;;  %v1361_v15 = vshrl.u32 %v17391_v38, %v9574_v2  ;;  %vm884_vm13 = vcmp.lt.s32.totalorder %v8814_v58, 0 }
 0x135   :  { %v1360_v45 = vshll.u32 %v17405_v9, %v1348_v3  ;;  %v9607_v14 = vshrl.u32 %v1346_v23, 5  ;;  %v1363_v48 = vshll.u32 %v17391_v38, %v1348_v3  ;;  %v1364_v25 = vshrl.u32 %v17392_v56, %v9574_v2 }
 0x136   :  { %v1478_v32 = vshrl.u32 %v1477_v59, 23  ;;  %vm773_vm14 = vcmp.eq.s32.totalorder %v9578_v0, 2  ;;  %v9614_v17 = vsub.s32 %v9508_v31, %v1189_v18  ;;  %v1351_v12 = vshll.u32 %v17401_v1, %v1348_v3 }
 0x137   :  { %v1352_v6 = vshrl.u32 %v17393_v33, %v9574_v2  ;;  %v1354_v34 = vshll.u32 %v17393_v33, %v1348_v3  ;;  %vm770_vm15 = vcmp.eq.s32.totalorder %v9578_v0, 0  ;;  %v9621_v23 = vadd.s32 %v1289_v24, %v1285_v44 }
 0x138   :  { %v1355_v51 = vshrl.u32 %v17383_v46, %v9574_v2  ;;  %v1357_v11 = vshll.u32 %v17383_v46, %v1348_v3  ;;  %v1358_v31 = vshrl.u32 %v17405_v9, %v9574_v2  ;;  %7911 = vcosq.f32 %v9590_v36 }
 0x139   :  { %v968_v39 = vsub.s32 4, %v9280_v30  ;;  %v1090_v52 = vclz %v7381_v27  ;;  %v1362_v7 = vor.u32 %v1361_v15, %v1360_v45  ;;  %v17406_v5 = vand.u32 2147483647, %v8814_v58  ;;  %v7908_v13 = vpop.eup %7907 }
 0x13a   :  { %v1341_v55 = vand.u32 8388607, %v17201_v19  ;;  %v1365_v3 = vor.u32 %v1364_v25, %v1363_v48  ;;  %vm1369_vm1 = vcmp.lt.s32.totalorder %v9607_v14, 4  ;;  %v7397_v50 = vadd.s32 4294967169, %v1478_v32  ;;  %v7910_v27 = vpop.eup %7909 }
 0x13b   :  { %vm9632_vm0 = vcmp.le.f32.partialorder %v17406_v5, 0.7853982  ;;  %v962_v63 = vand.u32 2147483647, %v9597_v49  ;;  %v964_v53 = vcvt.s32.f32 %v9595_v54  ;;  %v1192_v59 = vsub.s32 0, %v9614_v17  ;;  %v1467_v49 = vld [vmem:[#allocation8 + $0x68] sm:$0xff] }
 0x13c   :  { %v1353_v18 = vor.u32 %v1352_v6, %v1351_v12  ;;  %v1291_v44 = vadd.s32 536870912, %v9621_v23  ;;  %v1356_v24 = vor.u32 %v1355_v51, %v1354_v34  ;;  %v1359_v45 = vor.u32 %v1358_v31, %v1357_v11  ;;  %v548_v34 = vld [vmem:[#allocation5 + $0x20] sm:$0xff] }
 0x13d   :  { %v1462_v15 = vmul.f32 %v9512_v41, %v1458_v16  ;;  %vm769_vm2 = vcmp.lt.s32.totalorder %v9578_v0, 2  ;;  %v7382_v48 = vadd.s32 4294967294, %v1090_v52  ;;  %vm1366_vm3 = vcmp.lt.s32.totalorder %v9607_v14, 1  ;;  %v17411_v0 = vld [vmem:[#allocation19_spill] sm:$0xff] }
 0x13e   :  { %vm1368_vm4 = vcmp.lt.s32.totalorder %v9607_v14, 3  ;;  %v1375_v54 = vsel %vm1369_vm1, %v1362_v7, 920167782  ;;  %v774_v25 = vxor.u32 2147483648, %v7908_v13  ;;  %v1342_v32 = vor.u32 8388608, %v1341_v55 }
 0x13f   :  { %v1379_v12 = vsel %vm1369_vm1, %v1365_v3, 1326507024  ;;  %v1484_v6 = vadd.s32 1, %v7397_v50  ;;  %v771_v51 = vxor.u32 2147483648, %v7910_v27  ;;  %v969_v11 = vsel %vm884_vm13, %v968_v39, %v9280_v30 }
 0x140   :  { %v7385_v31 = vmin.u32 %v1192_v59, %v9614_v17  ;;  %vm1367_vm5 = vcmp.lt.s32.totalorder %v9607_v14, 2  ;;  %vm766_vm7 = vweird.f32 %v8653_v26  ;;  %v9657_v52 = vshrl.u32 %v1291_v44, 30 }
 0x141   :  { %v1374_v16 = vsel %vm1366_vm3, %v1353_v18, %v1356_v24  ;;  %v1376_v5 = vsel %vm1368_vm4, %v1359_v45, %v1375_v54  ;;  %v9663_v55 = vadd.f32 %v1467_v49, %v1462_v15  ;;  %v965_v3 = vmul.f32 %v964_v53, %v962_v63 }
 0x142   :  { %17409 = vst [vmem:[#allocation25_spill] sm:$0xff] %v9657_v52  ;;  %vm7383_vm8 = vcmp.lt.s32.totalorder %v7382_v48, 0  ;;  %v1378_v30 = vsel %vm1366_vm3, %v1356_v24, %v1359_v45  ;;  %v1380_v39 = vsel %vm1368_vm4, %v1362_v7, %v1379_v12  ;;  %v775_v50 = vsel %vm773_vm14, %v774_v25, %v7910_v27 }
 0x143   :  { %17410 = vst [vmem:[#allocation26_spill] sm:$0xff] %v9663_v55  ;;  %v986_v59 = vmul.f32 %v9585_v57, %v548_v34  ;;  %v9672_v44 = vshll.u32 %v1342_v32, 8  ;;  %vm1485_vm9 = vcmp.gt.s32.totalorder %v1484_v6, 0  ;;  %v772_v15 = vsel %vm770_vm15, %v7908_v13, %v771_v51 }
 0x144   :  { %v971_v63 = vsel %vm9632_vm0, 0, %v969_v11  ;;  %v1194_v53 = vclz %v7385_v31  ;;  %v1377_v54 = vsel %vm1367_vm5, %v1374_v16, %v1376_v5  ;;  %v1093_v49 = vsel %vm7383_vm8, 0, %v7382_v48 }
 0x145   :  { %v1293_v7 = vshll.u32 %v9657_v52, 30  ;;  %v1381_v27 = vsel %vm1367_vm5, %v1378_v30, %v1380_v39  ;;  %v1581_v57 = vand.u32 2139095040, %v9663_v55  ;;  %v966_v25 = vxor.u32 2147483648, %v965_v3  ;;  %v9688_v34 = vpop.eup %7911 }
 0x146   :  { %v1078_v32 = vadd.s32 %v9320_v61, %v9305_v28  ;;  %v1350_v13 = vshrl.u32 %v17401_v1, %v9574_v2  ;;  %v1486_v12 = vsel %vm1485_vm9, %v1484_v6, 0  ;;  %v1094_v51 = vsub.s32 32, %v1093_v49 }
 0x147   :  { %v1371_v48 = vsel %vm1369_vm1, %v1359_v45, 2102212464  ;;  %v9693_v11 = vmul.u32.u64.low %v9672_v44, %v1377_v54  ;;  %v9694_v31 = vmul.u32.u64.high %v9672_v44, %v1377_v54, %v9693_v11  ;;  %v1098_v16 = vsub.s32 4294967266, %v1093_v49 }
 0x148   :  { %v7386_v5 = vadd.s32 4294967294, %v1194_v53  ;;  %v9698_v30 = vmul.u32.u64.low %v9672_v44, %v1381_v27  ;;  %v9699_v28 = vmul.u32.u64.high %v9672_v44, %v1381_v27, %v9698_v30  ;;  %v776_v61 = vsel %vm769_vm2, %v772_v15, %v775_v50 }
 0x149   :  { %v9704_v2 = vsub.s32 %v9621_v23, %v1293_v7  ;;  %v1488_v6 = vand.u32 31, %v1486_v12  ;;  %v1582_v39 = vshrl.u32 %v1581_v57, 23  ;;  %v9707_v45 = vand.u32 3, %v9592_v35 }
 0x14a   :  { %v975_v54 = vadd.s32 3, %v971_v63  ;;  %v1370_v19 = vsel %vm1366_vm3, %v1350_v13, %v1353_v18  ;;  %v1372_v53 = vsel %vm1368_vm4, %v1356_v24, %v1371_v48  ;;  %v967_v27 = vsel %vm884_vm13, %v966_v25, %v965_v3  ;;  %v1459_v18 = vld [vmem:[#allocation7 + $0x70] sm:$0xff] }
 0x14b   :  { %v9716_v50 = vadd.f32 %v986_v59, %v17411_v0  ;;  %v1095_v23 = vshll.u32 %v9547_v42, %v1093_v49  ;;  %v1096_v15 = vshrl.u32 %v1078_v32, %v1094_v51  ;;  %v9721_v35 = vsel %vm766_vm7, nan, %v776_v61  ;;  %v1468_v51 = vld [vmem:[#allocation8 + $0x70] sm:$0xff] }
 0x14c   :  { %7913 = vsinq.f32 %v9590_v36  ;;  %v1099_v63 = vadd.s32 127, %v1098_v16  ;;  %vm7387_vm10 = vcmp.lt.s32.totalorder %v7386_v5, 0  ;;  %v1296_v24 = vsub.s32 0, %v9704_v2 }
 0x14d   :  { %17412 = vst [vmem:[#allocation19_spill] sm:$0xff] %v9716_v50  ;;  %v1373_v3 = vsel %vm1367_vm5, %v1370_v19, %v1372_v53  ;;  %v9727_v7 = vsub.s32 32, %v1488_v6  ;;  %v7401_v59 = vadd.s32 4294967169, %v1582_v39  ;;  %v9733_v26 = vsel %vm9632_vm0, %v8814_v58, %v967_v27 }
 0x14e   :  { %v9735_v49 = vand.u32 3, %v975_v54  ;;  %v9738_v57 = vor.u32 %v1096_v15, %v1095_v23  ;;  %v1182_v14 = vadd.s32 %v9409_v43, %v9415_v21  ;;  %v1392_v19 = vadd.s32 1, %v9694_v31 }
 0x14f   :  { %v1463_v25 = vmul.f32 %v9512_v41, %v1459_v18  ;;  %v1100_v32 = vshll.u32 %v1099_v63, 23  ;;  %v9745_v13 = vsel %vm7387_vm10, 0, %v7386_v5  ;;  %v1389_v37 = vmul.u32 %v9672_v44, %v1373_v3 }
 0x150   :  { %vm1391_vm11 = vc.u32 %v9699_v28, %v9693_v11  ;;  %v7389_v48 = vmin.u32 %v1296_v24, %v9704_v2  ;;  %v1500_v16 = vshll.u32 %v17405_v9, %v1488_v6  ;;  %v1501_v43 = vshrl.u32 %v17391_v38, %v9727_v7  ;;  %v17414_v24 = vld [vmem:[#allocation17_spill] sm:$0xff] }
 0x151   :  { %v1588_v21 = vadd.s32 1, %v7401_v59  ;;  %v17202_v30 = vand.u32 2147483647, %v9557_v47  ;;  %v9755_v61 = vshrl.u32 %v1486_v12, 5  ;;  %v1503_v5 = vshll.u32 %v17391_v38, %v1488_v6 }
 0x152   :  { %v1504_v44 = vshrl.u32 %v17392_v56, %v9727_v7  ;;  %vm877_vm12 = vcmp.eq.s32.totalorder %v9707_v45, 2  ;;  %v1393_v39 = vsel %vm1391_vm11, %v1392_v19, %v9694_v31  ;;  %v9762_v54 = vadd.f32 %v1468_v51, %v1463_v25 }
 0x153   :  { %v1491_v53 = vshll.u32 %v17401_v1, %v1488_v6  ;;  %v1492_v27 = vshrl.u32 %v17393_v33, %v9727_v7  ;;  %v1494_v0 = vshll.u32 %v17393_v33, %v1488_v6  ;;  %v1495_v12 = vshrl.u32 %v17383_v46, %v9727_v7 }
 0x154   :  { %17413 = vst [vmem:[#allocation27_spill] sm:$0xff] %v9762_v54  ;;  %v1497_v23 = vshll.u32 %v17383_v46, %v1488_v6  ;;  %v1498_v15 = vshrl.u32 %v17405_v9, %v9727_v7  ;;  %v1202_v63 = vsub.s32 4294967266, %v9745_v13  ;;  %v1298_v31 = vclz %v7389_v48 }
 0x155   :  { %v1502_v18 = vor.u32 %v1501_v43, %v1500_v16  ;;  %vm1589_vm6 = vcmp.gt.s32.totalorder %v1588_v21, 0  ;;  %vm1024_vm13 = vcmp.lt.s32.totalorder %v17414_v24, 0  ;;  %v9775_v3 = vadd.s32 %v1393_v39, %v1389_v37 }
 0x156   :  { %v1481_v59 = vand.u32 8388607, %v17202_v30  ;;  %v1505_v19 = vor.u32 %v1504_v44, %v1503_v5  ;;  %vm1509_vm14 = vcmp.lt.s32.totalorder %v9755_v61, 4  ;;  %v1101_v25 = vor.u32 4788187, %v1100_v32 }
 0x157   :  { %v1104_v6 = vcvt.s32.f32 %v9738_v57  ;;  %v1198_v51 = vsub.s32 32, %v9745_v13  ;;  %v1493_v36 = vor.u32 %v1492_v27, %v1491_v53  ;;  %v1496_v42 = vor.u32 %v1495_v12, %v1494_v0 }
 0x158   :  { %v1499_v48 = vor.u32 %v1498_v15, %v1497_v23  ;;  %v1590_v16 = vsel %vm1589_vm6, %v1588_v21, 0  ;;  %v1685_v43 = vand.u32 2139095040, %v9762_v54  ;;  %v1203_v37 = vadd.s32 127, %v1202_v63 }
 0x159   :  { %v9783_v50 = vpop.eup %7913  ;;  %vm1506_vm15 = vcmp.lt.s32.totalorder %v9755_v61, 1  ;;  %vm1508_vm0 = vcmp.lt.s32.totalorder %v9755_v61, 3  ;;  %v1515_v32 = vsel %vm1509_vm14, %v1502_v18, 920167782  ;;  %v7390_v5 = vadd.s32 4294967294, %v1298_v31 }
 0x15a   :  { %v1395_v57 = vadd.s32 536870912, %v9775_v3  ;;  %v1482_v44 = vor.u32 8388608, %v1481_v59  ;;  %v1519_v39 = vsel %vm1509_vm14, %v1505_v19, 1326507024  ;;  %v1102_v21 = vand.u32 2147483647, %v1101_v25 }
 0x15b   :  { %v1199_v53 = vshll.u32 %v9614_v17, %v9745_v13  ;;  %v1200_v27 = vshrl.u32 %v1182_v14, %v1198_v51  ;;  %v1592_v0 = vand.u32 31, %v1590_v16  ;;  %vm1507_vm1 = vcmp.lt.s32.totalorder %v9755_v61, 2 }
 0x15c   :  { %v1514_v12 = vsel %vm1506_vm15, %v1493_v36, %v1496_v42  ;;  %v1516_v23 = vsel %vm1508_vm0, %v1499_v48, %v1515_v32  ;;  %v1686_v15 = vshrl.u32 %v1685_v43, 23  ;;  %v1204_v31 = vshll.u32 %v1203_v37, 23 }
 0x15d   :  { %v1518_v59 = vsel %vm1506_vm15, %v1496_v42, %v1499_v48  ;;  %v1520_v17 = vsel %vm1508_vm0, %v1502_v18, %v1519_v39  ;;  %v17415_v14 = vxor.u32 2147483648, %v9688_v34  ;;  %vm7391_vm2 = vcmp.lt.s32.totalorder %v7390_v5, 0 }
 0x15e   :  { %v9811_v19 = vshrl.u32 %v1395_v57, 30  ;;  %v9813_v25 = vshll.u32 %v1482_v44, 8  ;;  %7915 = vcosq.f32 %v9733_v26  ;;  %v17417_v51 = vsub.s32 4, %v9477_v60 }
 0x15f   :  { %v9809_v13 = vsel %vm877_vm12, %v17415_v14, %v9783_v50  ;;  %v1517_v43 = vsel %vm1507_vm1, %v1514_v12, %v1516_v23  ;;  %v9825_v37 = vsub.s32 32, %v1592_v0  ;;  %v9827_v32 = vmul.f32 %v1104_v6, %v1102_v21 }
 0x160   :  { %17416 = vst [vmem:[#allocation17_spill] sm:$0xff] %v9811_v19  ;;  %v9821_v18 = vsel %vm1024_vm13, %v17417_v51, %v9477_v60  ;;  %v9829_v57 = vor.u32 %v1200_v27, %v1199_v53  ;;  %v1521_v44 = vsel %vm1507_vm1, %v1518_v59, %v1520_v17  ;;  %v7405_v39 = vadd.s32 4294967169, %v1686_v15 }
 0x161   :  { %v1205_v14 = vor.u32 4788187, %v1204_v31  ;;  %v9833_v30 = vsel %vm7391_vm2, 0, %v7390_v5  ;;  %v1490_v60 = vshrl.u32 %v17401_v1, %v9727_v7  ;;  %v1397_v12 = vshll.u32 %v9811_v19, 30 }
 0x162   :  { %v1511_v6 = vsel %vm1509_vm14, %v1499_v48, 2102212464  ;;  %v9842_v21 = vmul.u32.u64.low %v9813_v25, %v1517_v43  ;;  %v9843_v53 = vmul.u32.u64.high %v9813_v25, %v1517_v43, %v9842_v21  ;;  %v1604_v5 = vshll.u32 %v17405_v9, %v1592_v0 }
 0x163   :  { %v9847_v27 = vmul.u32.u64.low %v9813_v25, %v1521_v44  ;;  %v9848_v23 = vmul.u32.u64.high %v9813_v25, %v1521_v44, %v9847_v27  ;;  %v1605_v7 = vshrl.u32 %v17391_v38, %v9825_v37  ;;  %v17418_v15 = vand.u32 2147483647, %v17414_v24 }
 0x164   :  { %v9859_v48 = vshrl.u32 %v1590_v16, 5  ;;  %v1607_v59 = vshll.u32 %v17391_v38, %v1592_v0  ;;  %v1608_v17 = vshrl.u32 %v17392_v56, %v9825_v37  ;;  %v1692_v43 = vadd.s32 1, %v7405_v39 }
 0x165   :  { %vm9855_vm3 = vcmp.le.f32.partialorder %v17418_v15, 0.7853982  ;;  %v1510_v44 = vsel %vm1506_vm15, %v1490_v60, %v1493_v36  ;;  %v1512_v27 = vsel %vm1508_vm0, %v1496_v42, %v1511_v6  ;;  %v1595_v63 = vshll.u32 %v17401_v1, %v1592_v0 }
 0x166   :  { %v1598_v15 = vshll.u32 %v17393_v33, %v1592_v0  ;;  %vm874_vm4 = vcmp.eq.s32.totalorder %v9707_v45, 0  ;;  %v1596_v16 = vshrl.u32 %v17393_v33, %v9825_v37  ;;  %v1599_v51 = vshrl.u32 %v17383_v46, %v9825_v37 }
 0x167   :  { %v1601_v39 = vshll.u32 %v17383_v46, %v1592_v0  ;;  %v1602_v36 = vshrl.u32 %v17405_v9, %v9825_v37  ;;  %v1106_v60 = vxor.u32 2147483648, %v9827_v32  ;;  %v1208_v42 = vcvt.s32.f32 %v9829_v57 }
 0x168   :  { %v1286_v6 = vadd.s32 %v9528_v62, %v9534_v40  ;;  %v1606_v4 = vor.u32 %v1605_v7, %v1604_v5  ;;  %v17421_v47 = vand.u32 2147483647, %v9663_v55  ;;  %v1609_v8 = vor.u32 %v1608_v17, %v1607_v59 }
 0x169   :  { %vm1613_vm5 = vcmp.lt.s32.totalorder %v9859_v48, 4  ;;  %vm1693_vm7 = vcmp.gt.s32.totalorder %v1692_v43, 0  ;;  %v1206_v19 = vand.u32 2147483647, %v1205_v14  ;;  %v1306_v0 = vsub.s32 4294967266, %v9833_v30 }
 0x16a   :  { %v1585_v10 = vand.u32 8388607, %v17421_v47  ;;  %v9887_v58 = vsub.s32 %v9775_v3, %v1397_v12  ;;  %v1513_v57 = vsel %vm1507_vm1, %v1510_v44, %v1512_v27  ;;  %v1532_v52 = vadd.s32 1, %v9843_v53  ;;  %v17422_v27 = vld [vmem:[#allocation18_spill] sm:$0xff] }
 0x16b   :  { %v1597_v62 = vor.u32 %v1596_v16, %v1595_v63  ;;  %v1600_v40 = vor.u32 %v1599_v51, %v1598_v15  ;;  %v1603_v5 = vor.u32 %v1602_v36, %v1601_v39  ;;  %vm1610_vm8 = vcmp.lt.s32.totalorder %v9859_v48, 1  ;;  %v9896_v7 = vpop.eup %7915 }
 0x16c   :  { %vm1612_vm9 = vcmp.lt.s32.totalorder %v9859_v48, 3  ;;  %v1619_v47 = vsel %vm1613_vm5, %v1606_v4, 920167782  ;;  %v1694_v14 = vsel %vm1693_vm7, %v1692_v43, 0  ;;  %v1302_v3 = vsub.s32 32, %v9833_v30 }
 0x16d   :  { %vm1531_vm10 = vc.u32 %v9848_v23, %v9842_v21  ;;  %v1586_v61 = vor.u32 8388608, %v1585_v10  ;;  %v1623_v63 = vsel %vm1613_vm5, %v1609_v8, 1326507024  ;;  %v1111_v51 = vsel %vm9855_vm3, 0, %v9821_v18 }
 0x16e   :  { %v1307_v12 = vadd.s32 127, %v1306_v0  ;;  %v1400_v59 = vsub.s32 0, %v9887_v58  ;;  %v1529_v17 = vmul.u32 %v9813_v25, %v1513_v57  ;;  %vm1611_vm11 = vcmp.lt.s32.totalorder %v9859_v48, 2 }
 0x16f   :  { %v1618_v43 = vsel %vm1610_vm8, %v1597_v62, %v1600_v40  ;;  %v1620_v10 = vsel %vm1612_vm9, %v1603_v5, %v1619_v47  ;;  %v1696_v44 = vand.u32 31, %v1694_v14  ;;  %vm1128_vm12 = vcmp.lt.s32.totalorder %v17422_v27, 0 }
 0x170   :  { %v1209_v8 = vmul.f32 %v1208_v42, %v1206_v19  ;;  %v1533_v15 = vsel %vm1531_vm10, %v1532_v52, %v9843_v53  ;;  %v1622_v18 = vsel %vm1610_vm8, %v1600_v40, %v1603_v5  ;;  %v1624_v25 = vsel %vm1612_vm9, %v1606_v4, %v1623_v63 }
 0x171   :  { %v1107_v16 = vsel %vm1024_vm13, %v1106_v60, %v9827_v32  ;;  %v1303_v39 = vshll.u32 %v9704_v2, %v9833_v30  ;;  %v1304_v36 = vshrl.u32 %v1286_v6, %v1302_v3  ;;  %v9924_v0 = vshll.u32 %v1586_v61, 8 }
 0x172   :  { %v17423_v19 = vxor.u32 2147483648, %v9783_v50  ;;  %7917 = vsinq.f32 %v9733_v26  ;;  %v1308_v4 = vshll.u32 %v1307_v12, 23  ;;  %v1621_v53 = vsel %vm1611_vm11, %v1618_v43, %v1620_v10 }
 0x173   :  { %v7393_v32 = vmin.u32 %v1400_v59, %v9887_v58  ;;  %v9937_v60 = vadd.s32 %v1533_v15, %v1529_v17  ;;  %v1625_v2 = vsel %vm1611_vm11, %v1622_v18, %v1624_v25  ;;  %v9941_v30 = vsub.s32 32, %v1696_v44  ;;  %v1460_v15 = vld [vmem:[#allocation7 + $0x78] sm:$0xff] }
 0x174   :  { %v9931_v52 = vsel %vm874_vm4, %v9688_v34, %v17423_v19  ;;  %v9946_v34 = vsel %vm9855_vm3, %v17414_v24, %v1107_v16  ;;  %v9948_v50 = vadd.s32 3, %v1111_v51  ;;  %v1210_v26 = vxor.u32 2147483648, %v1209_v8 }
 0x175   :  { %v1305_v6 = vor.u32 %v1304_v36, %v1303_v39  ;;  %v1594_v57 = vshrl.u32 %v17401_v1, %v9825_v37  ;;  %v9954_v47 = vmul.u32.u64.low %v9924_v0, %v1621_v53  ;;  %v9955_v3 = vmul.u32.u64.high %v9924_v0, %v1621_v53, %v9954_v47 }
 0x176   :  { %v17424_v61 = vand.u32 2147483647, %v17422_v27  ;;  %v1309_v63 = vor.u32 4788187, %v1308_v4  ;;  %v1615_v51 = vsel %vm1613_vm5, %v1603_v5, 2102212464  ;;  %v1402_v37 = vclz %v7393_v32 }
 0x177   :  { %v9967_v12 = vmul.u32.u64.low %v9924_v0, %v1625_v2  ;;  %v9968_v59 = vmul.u32.u64.high %v9924_v0, %v1625_v2, %v9967_v12  ;;  %v1535_v17 = vadd.s32 536870912, %v9937_v60  ;;  %v1708_v43 = vshll.u32 %v17405_v9, %v1696_v44 }
 0x178   :  { %vm9960_vm6 = vcmp.le.f32.partialorder %v17424_v61, 0.7853982  ;;  %v1709_v10 = vshrl.u32 %v17391_v38, %v9941_v30  ;;  %v17217_v18 = vand.u32 2147483647, %v9762_v54  ;;  %v9975_v25 = vshrl.u32 %v1694_v14, 5 }
 0x179   :  { %v1711_v16 = vshll.u32 %v17391_v38, %v1696_v44  ;;  %v1712_v5 = vshrl.u32 %v17392_v56, %v9941_v30  ;;  %vm873_vm13 = vcmp.lt.s32.totalorder %v9707_v45, 2  ;;  %v1614_v39 = vsel %vm1610_vm8, %v1594_v57, %v1597_v62 }
 0x17a   :  { %v1616_v36 = vsel %vm1612_vm9, %v1600_v40, %v1615_v51  ;;  %v1699_v19 = vshll.u32 %v17401_v1, %v1696_v44  ;;  %v1702_v4 = vshll.u32 %v17393_v33, %v1696_v44  ;;  %v1700_v14 = vshrl.u32 %v17393_v33, %v9941_v30 }
 0x17b   :  { %v1703_v53 = vshrl.u32 %v17383_v46, %v9941_v30  ;;  %v1705_v32 = vshll.u32 %v17383_v46, %v1696_v44  ;;  %v1706_v2 = vshrl.u32 %v17405_v9, %v9941_v30  ;;  %v1211_v62 = vsel %vm1128_vm12, %v1210_v26, %v1209_v8 }
 0x17c   :  { %v1464_v40 = vmul.f32 %v9512_v41, %v1460_v15  ;;  %v9997_v57 = vshrl.u32 %v1535_v17, 30  ;;  %v1710_v61 = vor.u32 %v1709_v10, %v1708_v43  ;;  %vm870_vm14 = vweird.f32 %v8699_v22  ;;  %v1469_v41 = vld [vmem:[#allocation8 + $0x78] sm:$0xff] }
 0x17d   :  { %v7394_v51 = vadd.s32 4294967294, %v1402_v37  ;;  %v1689_v12 = vand.u32 8388607, %v17217_v18  ;;  %v1713_v42 = vor.u32 %v1712_v5, %v1711_v16  ;;  %vm1717_vm15 = vcmp.lt.s32.totalorder %v9975_v25, 4 }
 0x17e   :  { %v1310_v44 = vand.u32 2147483647, %v1309_v63  ;;  %v1312_v55 = vcvt.s32.f32 %v1305_v6  ;;  %v1617_v46 = vsel %vm1611_vm11, %v1614_v39, %v1616_v36  ;;  %v1636_v8 = vadd.s32 1, %v9955_v3 }
 0x17f   :  { %vm1635_vm0 = vc.u32 %v9968_v59, %v9954_v47  ;;  %v10008_v26 = vor.u32 %v1700_v14, %v1699_v19  ;;  %v10010_v37 = vor.u32 %v1703_v53, %v1702_v4  ;;  %v1707_v17 = vor.u32 %v1706_v2, %v1705_v32  ;;  %v10012_v43 = vpop.eup %7917 }
 0x180   :  { %v1537_v10 = vshll.u32 %v9997_v57, 30  ;;  %vm1714_vm1 = vcmp.lt.s32.totalorder %v9975_v25, 1  ;;  %vm1716_vm2 = vcmp.lt.s32.totalorder %v9975_v25, 3  ;;  %v1723_v48 = vsel %vm1717_vm15, %v1710_v61, 920167782 }
 0x181   :  { %vm7395_vm3 = vcmp.lt.s32.totalorder %v7394_v51, 0  ;;  %v1633_v6 = vmul.u32 %v9924_v0, %v1617_v46  ;;  %v1690_v63 = vor.u32 8388608, %v1689_v12  ;;  %v1727_v15 = vsel %vm1717_vm15, %v1713_v42, 1326507024 }
 0x182   :  { %7919 = vcosq.f32 %v9946_v34  ;;  %v1214_v16 = vsel %vm9960_vm6, %v17422_v27, %v1211_v62  ;;  %v10026_v5 = vadd.f32 %v1469_v41, %v1464_v40  ;;  %v1637_v39 = vsel %vm1635_vm0, %v1636_v8, %v9955_v3  ;;  %v550_v41 = vld [vmem:[#allocation5 + $0x30] sm:$0xff] }
 0x183   :  { %v1313_v36 = vmul.f32 %v1312_v55, %v1310_v44  ;;  %vm1715_vm4 = vcmp.lt.s32.totalorder %v9975_v25, 2  ;;  %v1722_v46 = vsel %vm1714_vm1, %v10008_v26, %v10010_v37  ;;  %v1724_v0 = vsel %vm1716_vm2, %v1707_v17, %v1723_v48 }
 0x184   :  { %17427 = vst [vmem:[#allocation18_spill] sm:$0xff] %v10026_v5  ;;  %v10039_v42 = vsel %vm7395_vm3, 0, %v7394_v51  ;;  %v10042_v19 = vsub.s32 %v9937_v60, %v1537_v10  ;;  %v1726_v3 = vsel %vm1714_vm1, %v10010_v37, %v1707_v17  ;;  %v1728_v55 = vsel %vm1716_vm2, %v1710_v61, %v1727_v15  ;;  %v549_v61 = vld [vmem:[#allocation5 + $0x28] sm:$0xff] }
 0x185   :  { %v880_v4 = vsel %vm873_vm13, %v9931_v52, %v9809_v13  ;;  %7921 = vsinq.f32 %v9946_v34  ;;  %v10054_v14 = vadd.s32 %v1637_v39, %v1633_v6  ;;  %v10056_v53 = vshll.u32 %v1690_v63, 8 }
 0x186   :  { %v17428_v60 = vsub.s32 4, %v9563_v29  ;;  %7923 = vcosq.f32 %v1214_v16  ;;  %v1725_v2 = vsel %vm1715_vm4, %v1722_v46, %v1724_v0  ;;  %v1789_v62 = vand.u32 2139095040, %v10026_v5  ;;  %v1909_v0 = vld [vmem:[#allocation7 + $0x80] sm:$0xff] }
 0x187   :  { %7925 = vsinq.f32 %v1214_v16  ;;  %vm1232_vm5 = vcmp.lt.s32.totalorder %v9225_v20, 0  ;;  %v1410_v45 = vsub.s32 4294967266, %v10039_v42  ;;  %v1729_v13 = vsel %vm1715_vm4, %v1726_v3, %v1728_v55 }
 0x188   :  { %v1213_v32 = vsel %vm1128_vm12, %v17428_v60, %v9563_v29  ;;  %v881_v52 = vsel %vm870_vm14, nan, %v880_v4  ;;  %v10073_v34 = vand.u32 3, %v9948_v50  ;;  %v1314_v29 = vxor.u32 2147483648, %v1313_v36 }
 0x189   :  { %v1540_v40 = vsub.s32 0, %v10042_v19  ;;  %v1215_v51 = vsel %vm9960_vm6, 0, %v1213_v32  ;;  %v1639_v12 = vadd.s32 536870912, %v10054_v14  ;;  %v1698_v22 = vshrl.u32 %v17401_v1, %v9941_v30  ;;  %v17435_v30 = vld [vmem:[#allocation20_spill] sm:$0xff] }
 0x18a   :  { %v10080_v44 = vmul.u32.u64.low %v10056_v53, %v1725_v2  ;;  %v10081_v8 = vmul.u32.u64.high %v10056_v53, %v1725_v2, %v10080_v44  ;;  %v10087_v50 = vmul.u32.u64.low %v10056_v53, %v1729_v13  ;;  %v10088_v10 = vmul.u32.u64.high %v10056_v53, %v1729_v13, %v10087_v50 }
 0x18b   :  { %v1790_v48 = vshrl.u32 %v1789_v62, 23  ;;  %v1390_v31 = vadd.s32 %v9693_v11, %v9699_v28  ;;  %v1406_v6 = vsub.s32 32, %v10039_v42  ;;  %v1411_v63 = vadd.s32 127, %v1410_v45 }
 0x18c   :  { %v1719_v15 = vsel %vm1717_vm15, %v1707_v17, 2102212464  ;;  %v10096_v16 = vmul.f32 %v9721_v35, %v549_v61  ;;  %v17429_v39 = vand.u32 2147483647, %v9225_v20  ;;  %v1315_v46 = vsel %vm1232_vm5, %v1314_v29, %v1313_v36  ;;  %v10111_v35 = vld [vmem:[#allocation2 + $0x4] ss:$0 sm:$0xff] }
 0x18d   :  { %v7398_v11 = vmin.u32 %v1540_v40, %v10042_v19  ;;  %vm978_vm8 = vcmp.eq.s32.totalorder %v9735_v49, 0  ;;  %vm981_vm9 = vcmp.eq.s32.totalorder %v9735_v49, 2  ;;  %v10109_v28 = vmul.f32 %v881_v52, %v550_v41  ;;  %v17432_v40 = vld [vmem:[#allocation25_spill] sm:$0xff]  ;;  %v1918_v41 = vld [vmem:[#allocation8 + $0x80] sm:$0xff] }
 0x18e   :  { %vm10100_vm7 = vcmp.le.f32.partialorder %v17429_v39, 0.7853982  ;;  %v1219_v17 = vadd.s32 3, %v1215_v51  ;;  %vm977_vm10 = vcmp.lt.s32.totalorder %v9735_v49, 2  ;;  %v10114_v3 = vshrl.u32 %v1639_v12, 30 }
 0x18f   :  { %v1718_v36 = vsel %vm1714_vm1, %v1698_v22, %v10008_v26  ;;  %v1720_v55 = vsel %vm1716_vm2, %v10010_v37, %v1719_v15  ;;  %v7409_v4 = vadd.s32 4294967169, %v1790_v48  ;;  %v7920_v60 = vpop.eup %7919  ;;  %vm1118_vm11 = vcmp.eq.s32.totalorder %v10073_v34, 0 }
 0x190   :  { %v1318_v32 = vsel %vm10100_vm7, %v9225_v20, %v1315_v46  ;;  %v1407_v2 = vshll.u32 %v9887_v58, %v10039_v42  ;;  %v1408_v62 = vshrl.u32 %v1390_v31, %v1406_v6  ;;  %v1412_v45 = vshll.u32 %v1411_v63, 23  ;;  %v17433_v58 = vld [vmem:[#allocation16_spill] sm:$0xff] }
 0x191   :  { %v979_v13 = vxor.u32 2147483648, %v10012_v43  ;;  %v982_v26 = vxor.u32 2147483648, %v9896_v7  ;;  %v1542_v52 = vclz %v7398_v11  ;;  %v1913_v37 = vmul.f32 %v10111_v35, %v1909_v0 }
 0x192   :  { %v1220_v29 = vand.u32 3, %v1219_v17  ;;  %v1316_v61 = vsub.s32 4, %v17432_v40  ;;  %v1721_v51 = vsel %vm1715_vm4, %v1718_v36, %v1720_v55  ;;  %v1740_v12 = vadd.s32 1, %v10081_v8  ;;  %v7922_v22 = vpop.eup %7921 }
 0x193   :  { %vm974_vm12 = vweird.f32 %v17433_v58  ;;  %7927 = vcosq.f32 %v1318_v32  ;;  %v1641_v42 = vshll.u32 %v10114_v3, 30  ;;  %vm1739_vm6 = vc.u32 %v10088_v10, %v10080_v44  ;;  %v7924_v48 = vpop.eup %7923  ;;  %v17438_v58 = vld [vmem:[#allocation23_spill] sm:$0xff] }
 0x194   :  { %v1796_v50 = vadd.s32 1, %v7409_v4  ;;  %vm1121_vm13 = vcmp.eq.s32.totalorder %v10073_v34, 2  ;;  %7929 = vsinq.f32 %v1318_v32  ;;  %v1409_v31 = vor.u32 %v1408_v62, %v1407_v2  ;;  %v7926_v6 = vpop.eup %7925 }
 0x195   :  { %v1413_v25 = vor.u32 4788187, %v1412_v45  ;;  %v983_v63 = vsel %vm981_vm9, %v982_v26, %v10012_v43  ;;  %v7399_v15 = vadd.s32 4294967294, %v1542_v52  ;;  %v1737_v39 = vmul.u32 %v10056_v53, %v1721_v51 }
 0x196   :  { %v10144_v46 = vadd.f32 %v1918_v41, %v1913_v37  ;;  %v980_v11 = vsel %vm978_vm8, %v9896_v7, %v979_v13  ;;  %v1122_v17 = vxor.u32 2147483648, %v7920_v60  ;;  %vm1222_vm14 = vcmp.eq.s32.totalorder %v1220_v29, 0  ;;  %v551_v41 = vld [vmem:[#allocation5 + $0x38] sm:$0xff] }
 0x197   :  { %v1741_v0 = vsel %vm1739_vm6, %v1740_v12, %v10081_v8  ;;  %vm1114_vm15 = vweird.f32 %v17414_v24  ;;  %v1119_v36 = vxor.u32 2147483648, %v7922_v22  ;;  %v1317_v43 = vsel %vm1232_vm5, %v1316_v61, %v17432_v40 }
 0x198   :  { %17434 = vst [vmem:[#allocation25_spill] sm:$0xff] %v10144_v46  ;;  %v10155_v55 = vsub.s32 %v10054_v14, %v1641_v42  ;;  %vm1797_vm0 = vcmp.gt.s32.totalorder %v1796_v50, 0  ;;  %v1223_v53 = vxor.u32 2147483648, %v7926_v6  ;;  %v1226_v4 = vxor.u32 2147483648, %v7924_v48 }
 0x199   :  { %v1414_v32 = vand.u32 2147483647, %v1413_v25  ;;  %v1416_v2 = vcvt.s32.f32 %v1409_v31  ;;  %vm1225_vm1 = vcmp.eq.s32.totalorder %v1220_v29, 2  ;;  %vm7400_vm2 = vcmp.lt.s32.totalorder %v7399_v15, 0 }
 0x19a   :  { %v10157_v7 = vadd.s32 %v1741_v0, %v1737_v39  ;;  %v1929_v8 = vand.u32 2139095040, %v10144_v46  ;;  %v984_v62 = vsel %vm977_vm10, %v980_v11, %v983_v63  ;;  %vm1117_vm3 = vcmp.lt.s32.totalorder %v10073_v34, 2 }
 0x19b   :  { %vm1221_vm4 = vcmp.lt.s32.totalorder %v1220_v29, 2  ;;  %v1798_v45 = vsel %vm1797_vm0, %v1796_v50, 0  ;;  %v1120_v14 = vsel %vm1118_vm11, %v7920_v60, %v1119_v36  ;;  %v1123_v13 = vsel %vm1121_vm13, %v1122_v17, %v7922_v22 }
 0x19c   :  { %v1319_v26 = vsel %vm10100_vm7, 0, %v1317_v43  ;;  %v1644_v52 = vsub.s32 0, %v10155_v55  ;;  %v1224_v37 = vsel %vm1222_vm14, %v7924_v48, %v1223_v53  ;;  %v1227_v40 = vsel %vm1225_vm1, %v1226_v4, %v7926_v6  ;;  %v17437_v48 = vld [vmem:[#allocation17_spill] sm:$0xff] }
 0x19d   :  { %v1417_v49 = vmul.f32 %v1416_v2, %v1414_v32  ;;  %v10171_v61 = vsel %vm7400_vm2, 0, %v7399_v15  ;;  %vm1218_vm5 = vweird.f32 %v17422_v27  ;;  %v1743_v51 = vadd.s32 536870912, %v10157_v7 }
 0x19e   :  { %v1800_v12 = vand.u32 31, %v1798_v45  ;;  %v1930_v60 = vshrl.u32 %v1929_v8, 23  ;;  %v985_v22 = vsel %vm974_vm12, nan, %v984_v62  ;;  %v10179_v42 = vadd.f32 %v10096_v16, %v17435_v30  ;;  %v17440_v16 = vld [vmem:[#allocation21_spill] sm:$0xff] }
 0x19f   :  { %v1323_v50 = vadd.s32 3, %v1319_v26  ;;  %v1420_v31 = vsub.s32 4, %v17437_v48  ;;  %v1124_v25 = vsel %vm1117_vm3, %v1120_v14, %v1123_v13  ;;  %v1228_v6 = vsel %vm1221_vm4, %v1224_v37, %v1227_v40 }
 0x1a0   :  { %17436 = vst [vmem:[#allocation16_spill] sm:$0xff] %v10179_v42  ;;  %v1550_v63 = vsub.s32 4294967266, %v10171_v61  ;;  %v7402_v15 = vmin.u32 %v1644_v52, %v10155_v55  ;;  %v10187_v39 = vpop.eup %7927  ;;  %v10191_v11 = vadd.f32 %v10109_v28, %v17438_v58  ;;  %v17441_v17 = vand.u32 2147483647, %v17440_v16 }
 0x1a1   :  { %vm1336_vm8 = vcmp.lt.s32.totalorder %v17440_v16, 0  ;;  %v1418_v34 = vxor.u32 2147483648, %v1417_v49  ;;  %v10200_v29 = vpop.eup %7929  ;;  %v10202_v36 = vmul.f32 %v985_v22, %v551_v41  ;;  %v10204_v43 = vshrl.u32 %v1743_v51, 30 }
 0x1a2   :  { %17439 = vst [vmem:[#allocation20_spill] sm:$0xff] %v10191_v11  ;;  %vm10195_vm7 = vcmp.le.f32.partialorder %v17441_v17, 0.7853982  ;;  %v10206_v53 = vsub.s32 32, %v1800_v12  ;;  %v7414_v4 = vadd.s32 4294967169, %v1930_v60  ;;  %v10210_v28 = vsel %vm1114_vm15, nan, %v1124_v25 }
 0x1a3   :  { %17444 = vst [vmem:[#allocation17_spill] sm:$0xff] %v10202_v36  ;;  %v10214_v32 = vsel %vm1218_vm5, nan, %v1228_v6  ;;  %v10216_v2 = vand.u32 3, %v1323_v50  ;;  %v10221_v8 = vsel %vm1336_vm8, %v1420_v31, %v17437_v48  ;;  %v1530_v62 = vadd.s32 %v9842_v21, %v9848_v23 }
 0x1a4   :  { %v1546_v14 = vsub.s32 32, %v10171_v61  ;;  %v1551_v13 = vadd.s32 127, %v1550_v63  ;;  %v1646_v24 = vclz %v7402_v15  ;;  %v1327_v26 = vxor.u32 2147483648, %v10200_v29  ;;  %v1910_v63 = vld [vmem:[#allocation7 + $0x88] sm:$0xff] }
 0x1a5   :  { %v1330_v27 = vxor.u32 2147483648, %v10187_v39  ;;  %v1419_v52 = vsel %vm1336_vm8, %v1418_v34, %v1417_v49  ;;  %v17216_v37 = vand.u32 2147483647, %v10026_v5  ;;  %v1745_v40 = vshll.u32 %v10204_v43, 30 }
 0x1a6   :  { %v1815_v51 = vshll.u32 %v17391_v38, %v1800_v12  ;;  %v1816_v21 = vshrl.u32 %v17392_v56, %v10206_v53  ;;  %v1936_v23 = vadd.s32 1, %v7414_v4  ;;  %v1547_v60 = vshll.u32 %v10042_v19, %v10171_v61 }
 0x1a7   :  { %v10237_v41 = vshrl.u32 %v1798_v45, 5  ;;  %v1812_v22 = vshll.u32 %v17405_v9, %v1800_v12  ;;  %v1813_v49 = vshrl.u32 %v17391_v38, %v10206_v53  ;;  %vm1329_vm9 = vcmp.eq.s32.totalorder %v10216_v2, 2 }
 0x1a8   :  { %v1548_v30 = vshrl.u32 %v1530_v62, %v1546_v14  ;;  %v1552_v50 = vshll.u32 %v1551_v13, 23  ;;  %v7403_v48 = vadd.s32 4294967294, %v1646_v24  ;;  %v1803_v31 = vshll.u32 %v17401_v1, %v1800_v12 }
 0x1a9   :  { %vm1326_vm10 = vcmp.eq.s32.totalorder %v10216_v2, 0  ;;  %v1806_v25 = vshll.u32 %v17393_v33, %v1800_v12  ;;  %v17445_v19 = vmov 2131351028   ;;  %v1810_v6 = vshrl.u32 %v17405_v9, %v10206_v53 }
 0x1aa   :  { %v1807_v45 = vshrl.u32 %v17445_v19, %v10206_v53  ;;  %v1809_v61 = vshll.u32 %v17445_v19, %v1800_v12  ;;  %v10252_v15 = vsub.s32 %v10157_v7, %v1745_v40  ;;  %v1804_v58 = vshrl.u32 %v17393_v33, %v10206_v53 }
 0x1ab   :  { %v1817_v17 = vor.u32 %v1816_v21, %v1815_v51  ;;  %vm1937_vm11 = vcmp.gt.s32.totalorder %v1936_v23, 0  ;;  %v1422_v34 = vsel %vm10195_vm7, %v17440_v16, %v1419_v52  ;;  %v1793_v4 = vand.u32 8388607, %v17216_v37 }
 0x1ac   :  { %v1814_v12 = vor.u32 %v1813_v49, %v1812_v22  ;;  %vm1821_vm12 = vcmp.lt.s32.totalorder %v10237_v41, 4  ;;  %v1549_v62 = vor.u32 %v1548_v30, %v1547_v60  ;;  %v1553_v14 = vor.u32 4788187, %v1552_v50  ;;  %v1919_v22 = vld [vmem:[#allocation8 + $0x88] sm:$0xff] }
 0x1ad   :  { %vm7404_vm6 = vcmp.lt.s32.totalorder %v7403_v48, 0  ;;  %v1914_v7 = vmul.f32 %v10111_v35, %v1910_v63  ;;  %v10263_v13 = vor.u32 %v1807_v45, %v1806_v25  ;;  %v1811_v24 = vor.u32 %v1810_v6, %v1809_v61 }
 0x1ae   :  { %vm1818_vm13 = vcmp.lt.s32.totalorder %v10237_v41, 1  ;;  %v1938_v40 = vsel %vm1937_vm11, %v1936_v23, 0  ;;  %v1748_v51 = vsub.s32 0, %v10252_v15  ;;  %v1805_v52 = vor.u32 %v1804_v58, %v1803_v31 }
 0x1af   :  { %vm1820_vm14 = vcmp.lt.s32.totalorder %v10237_v41, 3  ;;  %v1831_v21 = vsel %vm1821_vm12, %v1817_v17, 1326507024  ;;  %v1634_v60 = vadd.s32 %v9954_v47, %v9968_v59  ;;  %v10272_v49 = vsel %vm7404_vm6, 0, %v7403_v48 }
 0x1b0   :  { %v1794_v30 = vor.u32 8388608, %v1793_v4  ;;  %v1827_v50 = vsel %vm1821_vm12, %v1814_v12, 920167782  ;;  %v1554_v25 = vand.u32 2147483647, %v1553_v14  ;;  %v1556_v23 = vcvt.s32.f32 %v1549_v62 }
 0x1b1   :  { %v1650_v45 = vsub.s32 32, %v10272_v49  ;;  %v1940_v31 = vand.u32 31, %v1938_v40  ;;  %vm1819_vm15 = vcmp.lt.s32.totalorder %v10237_v41, 2  ;;  %v1830_v61 = vsel %vm1818_vm13, %v10263_v13, %v1811_v24 }
 0x1b2   :  { %v1832_v47 = vsel %vm1820_vm14, %v1814_v12, %v1831_v21  ;;  %v10283_v59 = vadd.f32 %v1919_v22, %v1914_v7  ;;  %v1654_v48 = vsub.s32 4294967266, %v10272_v49  ;;  %v7406_v6 = vmin.u32 %v1748_v51, %v10252_v15 }
 0x1b3   :  { %v1826_v63 = vsel %vm1818_vm13, %v1805_v52, %v10263_v13  ;;  %v1828_v58 = vsel %vm1820_vm14, %v1811_v24, %v1827_v50  ;;  %v10295_v17 = vsel %vm1329_vm9, %v1330_v27, %v10200_v29  ;;  %7931 = vcosq.f32 %v1422_v34 }
 0x1b4   :  { %17446 = vst [vmem:[#allocation23_spill] sm:$0xff] %v10283_v59  ;;  %v10300_v12 = vshll.u32 %v1794_v30, 8  ;;  %v10307_v62 = vsel %vm1326_vm10, %v10187_v39, %v1327_v26  ;;  %7933 = vsinq.f32 %v1422_v34  ;;  %v1833_v14 = vsel %vm1819_vm15, %v1830_v61, %v1832_v47  ;;  %v17447_v26 = vld [vmem:[#allocation22_spill] sm:$0xff] }
 0x1b5   :  { %v10311_v27 = vsub.s32 32, %v1940_v31  ;;  %v1557_v7 = vmul.f32 %v1556_v23, %v1554_v25  ;;  %v1651_v51 = vshll.u32 %v10155_v55, %v10272_v49  ;;  %v1829_v21 = vsel %vm1819_vm15, %v1826_v63, %v1828_v58 }
 0x1b6   :  { %v2033_v29 = vand.u32 2139095040, %v10283_v59  ;;  %v1652_v22 = vshrl.u32 %v1634_v60, %v1650_v45  ;;  %v1655_v30 = vadd.s32 127, %v1654_v48  ;;  %v1750_v50 = vclz %v7406_v6 }
 0x1b7   :  { %vm1325_vm0 = vcmp.lt.s32.totalorder %v10216_v2, 2  ;;  %vm1476_vm1 = vcmp.lt.s32.totalorder %v17447_v26, 0  ;;  %v1802_v34 = vshrl.u32 %v17401_v1, %v10206_v53  ;;  %v1823_v55 = vsel %vm1821_vm12, %v1811_v24, 2102212464 }
 0x1b8   :  { %v10326_v49 = vmul.u32.u64.low %v10300_v12, %v1833_v14  ;;  %v10327_v25 = vmul.u32.u64.high %v10300_v12, %v1833_v14, %v10326_v49  ;;  %v10330_v60 = vmul.u32.u64.low %v10300_v12, %v1829_v21  ;;  %v10331_v23 = vmul.u32.u64.high %v10300_v12, %v1829_v21, %v10330_v60 }
 0x1b9   :  { %v1952_v45 = vshll.u32 %v17405_v9, %v1940_v31  ;;  %v1953_v61 = vshrl.u32 %v17391_v38, %v10311_v27  ;;  %v10337_v47 = vshrl.u32 %v1938_v40, 5  ;;  %v1955_v53 = vshll.u32 %v17391_v38, %v1940_v31 }
 0x1ba   :  { %v1956_v24 = vshrl.u32 %v17392_v56, %v10311_v27  ;;  %v2034_v48 = vshrl.u32 %v2033_v29, 23  ;;  %v1656_v6 = vshll.u32 %v1655_v30, 23  ;;  %v7407_v63 = vadd.s32 4294967294, %v1750_v50 }
 0x1bb   :  { %v1943_v58 = vshll.u32 %v17401_v1, %v1940_v31  ;;  %v1946_v14 = vshll.u32 %v17393_v33, %v1940_v31  ;;  %v1944_v21 = vshrl.u32 %v17393_v33, %v10311_v27  ;;  %v1947_v49 = vshrl.u32 %v17445_v19, %v10311_v27 }
 0x1bc   :  { %v1949_v40 = vshll.u32 %v17445_v19, %v1940_v31  ;;  %v1950_v37 = vshrl.u32 %v17405_v9, %v10311_v27  ;;  %vm1322_vm2 = vweird.f32 %v9225_v20  ;;  %v1560_v29 = vsub.s32 4, %v9997_v57 }
 0x1bd   :  { %v1822_v30 = vsel %vm1818_vm13, %v1802_v34, %v1805_v52  ;;  %v1824_v50 = vsel %vm1820_vm14, %v10263_v13, %v1823_v55  ;;  %v1954_v18 = vor.u32 %v1953_v61, %v1952_v45  ;;  %v17448_v4 = vand.u32 2147483647, %v17447_v26 }
 0x1be   :  { %v17451_v31 = vand.u32 2147483647, %v10144_v46  ;;  %v1957_v11 = vor.u32 %v1956_v24, %v1955_v53  ;;  %vm1961_vm4 = vcmp.lt.s32.totalorder %v10337_v47, 4  ;;  %v7418_v42 = vadd.s32 4294967169, %v2034_v48 }
 0x1bf   :  { %vm10360_vm3 = vcmp.le.f32.partialorder %v17448_v4, 0.7853982  ;;  %v1558_v36 = vxor.u32 2147483648, %v1557_v7  ;;  %v1653_v52 = vor.u32 %v1652_v22, %v1651_v51  ;;  %v1657_v34 = vor.u32 4788187, %v1656_v6 }
 0x1c0   :  { %v1933_v5 = vand.u32 8388607, %v17451_v31  ;;  %vm7408_vm5 = vcmp.lt.s32.totalorder %v7407_v63, 0  ;;  %v1825_v13 = vsel %vm1819_vm15, %v1822_v30, %v1824_v50  ;;  %v10369_v55 = vor.u32 %v1944_v21, %v1943_v58  ;;  %v10373_v61 = vpop.eup %7931 }
 0x1c1   :  { %v10371_v4 = vor.u32 %v1947_v49, %v1946_v14  ;;  %v1951_v45 = vor.u32 %v1950_v37, %v1949_v40  ;;  %v1844_v31 = vadd.s32 1, %v10331_v23  ;;  %vm1958_vm8 = vcmp.lt.s32.totalorder %v10337_v47, 1  ;;  %v10380_v22 = vpop.eup %7933  ;;  %v1000_v14 = vld [vmem:[#allocation5 + $0x40] sm:$0xff] }
 0x1c2   :  { %vm1960_vm9 = vcmp.lt.s32.totalorder %v10337_v47, 3  ;;  %v1967_v51 = vsel %vm1961_vm4, %v1954_v18, 920167782  ;;  %vm1843_vm10 = vc.u32 %v10327_v25, %v10330_v60  ;;  %v1934_v41 = vor.u32 8388608, %v1933_v5 }
 0x1c3   :  { %v1971_v37 = vsel %vm1961_vm4, %v1957_v11, 1326507024  ;;  %v2040_v53 = vadd.s32 1, %v7418_v42  ;;  %v1332_v24 = vsel %vm1325_vm0, %v10307_v62, %v10295_v17  ;;  %v17452_v48 = vsel %vm10195_vm7, 0, %v10221_v8  ;;  %v1001_v11 = vld [vmem:[#allocation5 + $0x48] sm:$0xff] }
 0x1c4   :  { %v1427_v6 = vadd.s32 3, %v17452_v48  ;;  %v1559_v58 = vsel %vm1476_vm1, %v1558_v36, %v1557_v7  ;;  %v1561_v5 = vsel %vm1476_vm1, %v1560_v29, %v9997_v57  ;;  %v1841_v42 = vmul.u32 %v10300_v12, %v1825_v13  ;;  %v1911_v7 = vld [vmem:[#allocation7 + $0x90] sm:$0xff]  ;;  %v1912_v48 = vld [vmem:[#allocation7 + $0x98] sm:$0xff] }
 0x1c5   :  { %vm1959_vm11 = vcmp.lt.s32.totalorder %v10337_v47, 2  ;;  %v1966_v0 = vsel %vm1958_vm8, %v10369_v55, %v10371_v4  ;;  %v1968_v2 = vsel %vm1960_vm9, %v1951_v45, %v1967_v51  ;;  %v10408_v36 = vsel %vm7408_vm5, 0, %v7407_v63  ;;  %v17453_v29 = vld [vmem:[#allocation26_spill] sm:$0xff] }
 0x1c6   :  { %v1845_v8 = vsel %vm1843_vm10, %v1844_v31, %v10331_v23  ;;  %v1970_v57 = vsel %vm1958_vm8, %v10371_v4, %v1951_v45  ;;  %v1972_v17 = vsel %vm1960_vm9, %v1954_v18, %v1971_v37  ;;  %v1658_v12 = vand.u32 2147483647, %v1657_v34  ;;  %v1002_v13 = vld [vmem:[#allocation5 + $0x50] sm:$0xff] }
 0x1c7   :  { %v1660_v62 = vcvt.s32.f32 %v1653_v52  ;;  %v10416_v21 = vshll.u32 %v1934_v41, 8  ;;  %vm2041_vm7 = vcmp.gt.s32.totalorder %v2040_v53, 0  ;;  %v10418_v49 = vand.u32 3, %v1427_v6  ;;  %v1920_v6 = vld [vmem:[#allocation8 + $0x90] sm:$0xff] }
 0x1c8   :  { %v10421_v63 = vmul.f32 %v10210_v28, %v1000_v14  ;;  %v10424_v23 = vmul.f32 %v10214_v32, %v1001_v11  ;;  %v1969_v40 = vsel %vm1959_vm11, %v1966_v0, %v1968_v2  ;;  %v1333_v18 = vsel %vm1322_vm2, nan, %v1332_v24 }
 0x1c9   :  { %vm1580_vm12 = vcmp.lt.s32.totalorder %v17453_v29, 0  ;;  %v1758_v30 = vsub.s32 4294967266, %v10408_v36  ;;  %v10432_v50 = vadd.s32 %v1845_v8, %v1841_v42  ;;  %v1973_v52 = vsel %vm1959_vm11, %v1970_v57, %v1972_v17 }
 0x1ca   :  { %v1562_v28 = vsel %vm10360_vm3, %v17447_v26, %v1559_v58  ;;  %v1563_v32 = vsel %vm10360_vm3, 0, %v1561_v5  ;;  %v1915_v34 = vmul.f32 %v10111_v35, %v1911_v7  ;;  %v2042_v20 = vsel %vm2041_vm7, %v2040_v53, 0 }
 0x1cb   :  { %v1661_v31 = vmul.f32 %v1660_v62, %v1658_v12  ;;  %v1738_v51 = vadd.s32 %v10080_v44, %v10088_v10  ;;  %v10445_v41 = vmul.u32.u64.low %v10416_v21, %v1969_v40  ;;  %v10446_v37 = vmul.u32.u64.high %v10416_v21, %v1969_v40, %v10445_v41  ;;  %v1921_v62 = vld [vmem:[#allocation8 + $0x98] sm:$0xff] }
 0x1cc   :  { %v1754_v24 = vsub.s32 32, %v10408_v36  ;;  %v1942_v39 = vshrl.u32 %v17401_v1, %v10311_v27  ;;  %v10453_v58 = vmul.u32.u64.low %v10416_v21, %v1973_v52  ;;  %v10454_v53 = vmul.u32.u64.high %v10416_v21, %v1973_v52, %v10453_v58 }
 0x1cd   :  { %v1759_v5 = vadd.s32 127, %v1758_v30  ;;  %v1847_v14 = vadd.s32 536870912, %v10432_v50  ;;  %v1963_v44 = vsel %vm1961_vm4, %v1951_v45, 2102212464  ;;  %v2044_v10 = vand.u32 31, %v2042_v20 }
 0x1ce   :  { %vm1430_vm6 = vcmp.eq.s32.totalorder %v10418_v49, 0  ;;  %vm1433_vm13 = vcmp.eq.s32.totalorder %v10418_v49, 2  ;;  %v1434_v11 = vxor.u32 2147483648, %v10373_v61  ;;  %v10462_v42 = vmul.f32 %v1333_v18, %v1002_v13 }
 0x1cf   :  { %v1567_v27 = vadd.s32 3, %v1563_v32  ;;  %7935 = vcosq.f32 %v1562_v28  ;;  %v1662_v0 = vxor.u32 2147483648, %v1661_v31  ;;  %v1916_v2 = vmul.f32 %v10111_v35, %v1912_v48 }
 0x1d0   :  { %v10465_v8 = vadd.f32 %v1920_v6, %v1915_v34  ;;  %v17455_v57 = vand.u32 2147483647, %v17453_v29  ;;  %v1755_v17 = vshll.u32 %v10252_v15, %v10408_v36  ;;  %v1756_v12 = vshrl.u32 %v1738_v51, %v1754_v24 }
 0x1d1   :  { %v1962_v7 = vsel %vm1958_vm8, %v1942_v39, %v10369_v55  ;;  %v1964_v35 = vsel %vm1960_vm9, %v10371_v4, %v1963_v44  ;;  %7937 = vsinq.f32 %v1562_v28  ;;  %v1760_v40 = vshll.u32 %v1759_v5, 23 }
 0x1d2   :  { %17454 = vst [vmem:[#allocation21_spill] sm:$0xff] %v10465_v8  ;;  %vm10469_vm14 = vcmp.le.f32.partialorder %v17455_v57, 0.7853982  ;;  %v10481_v18 = vshrl.u32 %v1847_v14, 30  ;;  %v10483_v30 = vsub.s32 32, %v2044_v10  ;;  %v1431_v52 = vxor.u32 2147483648, %v10380_v22 }
 0x1d3   :  { %v10489_v15 = vsel %vm1433_vm13, %v1434_v11, %v10380_v22  ;;  %v10491_v36 = vand.u32 3, %v1567_v27  ;;  %v1664_v55 = vsub.s32 4, %v10114_v3  ;;  %v10494_v32 = vadd.f32 %v1921_v62, %v1916_v2 }
 0x1d4   :  { %v1965_v4 = vsel %vm1959_vm11, %v1962_v7, %v1964_v35  ;;  %v1984_v28 = vadd.s32 1, %v10446_v37  ;;  %v2137_v34 = vand.u32 2139095040, %v10465_v8  ;;  %v1663_v13 = vsel %vm1580_vm12, %v1662_v0, %v1661_v31 }
 0x1d5   :  { %17458 = vst [vmem:[#allocation22_spill] sm:$0xff] %v10494_v32  ;;  %v1757_v51 = vor.u32 %v1756_v12, %v1755_v17  ;;  %vm1983_vm15 = vc.u32 %v10454_v53, %v10445_v41  ;;  %v17221_v22 = vand.u32 2147483647, %v10283_v59  ;;  %v1761_v24 = vor.u32 4788187, %v1760_v40 }
 0x1d6   :  { %v1849_v48 = vshll.u32 %v10481_v18, 30  ;;  %v2056_v6 = vshll.u32 %v17405_v9, %v2044_v10  ;;  %v2057_v47 = vshrl.u32 %v17391_v38, %v10483_v30  ;;  %v1981_v39 = vmul.u32 %v10416_v21, %v1965_v4 }
 0x1d7   :  { %v10510_v58 = vshrl.u32 %v2042_v20, 5  ;;  %v2059_v31 = vshll.u32 %v17391_v38, %v2044_v10  ;;  %v2060_v5 = vshrl.u32 %v17392_v56, %v10483_v30  ;;  %v1985_v14 = vsel %vm1983_vm15, %v1984_v28, %v10446_v37 }
 0x1d8   :  { %v2047_v44 = vshll.u32 %v17401_v1, %v2044_v10  ;;  %v2050_v11 = vshll.u32 %v17393_v33, %v2044_v10  ;;  %v2138_v27 = vshrl.u32 %v2137_v34, 23  ;;  %vm1429_vm0 = vcmp.lt.s32.totalorder %v10418_v49, 2 }
 0x1d9   :  { %v2048_v0 = vshrl.u32 %v17393_v33, %v10483_v30  ;;  %v2051_v21 = vshrl.u32 %v17445_v19, %v10483_v30  ;;  %v2053_v20 = vshll.u32 %v17445_v19, %v2044_v10  ;;  %v2054_v2 = vshrl.u32 %v17405_v9, %v10483_v30 }
 0x1da   :  { %v1432_v37 = vsel %vm1430_vm6, %v10373_v61, %v1431_v52  ;;  %v10532_v57 = vsel %vm1580_vm12, %v1664_v55, %v10114_v3  ;;  %vm1684_vm1 = vcmp.lt.s32.totalorder %v9762_v54, 0  ;;  %v10536_v17 = vsub.s32 %v10432_v50, %v1849_v48  ;;  %v10666_v55 = vld [vmem:[#allocation2 + $0x5] ss:$0 sm:$0xff] }
 0x1db   :  { %v2058_v12 = vor.u32 %v2057_v47, %v2056_v6  ;;  %vm1570_vm2 = vcmp.eq.s32.totalorder %v10491_v36, 0  ;;  %v10539_v10 = vadd.s32 %v1985_v14, %v1981_v39  ;;  %v2037_v62 = vand.u32 8388607, %v17221_v22 }
 0x1dc   :  { %v2061_v7 = vor.u32 %v2060_v5, %v2059_v31  ;;  %vm2065_vm3 = vcmp.lt.s32.totalorder %v10510_v58, 4  ;;  %v10547_v3 = vsel %vm10469_vm14, %v17453_v29, %v1663_v13  ;;  %v1762_v61 = vand.u32 2147483647, %v1761_v24  ;;  %v7936_v40 = vpop.eup %7935 }
 0x1dd   :  { %v1764_v35 = vcvt.s32.f32 %v1757_v51  ;;  %v7422_v50 = vadd.s32 4294967169, %v2138_v27  ;;  %vm1426_vm4 = vweird.f32 %v17440_v16  ;;  %v17459_v52 = vand.u32 2147483647, %v9762_v54 }
 0x1de   :  { %v10556_v4 = vor.u32 %v2048_v0, %v2047_v44  ;;  %v10558_v28 = vor.u32 %v2051_v21, %v2050_v11  ;;  %v2055_v34 = vor.u32 %v2054_v2, %v2053_v20  ;;  %v2241_v13 = vand.u32 2139095040, %v10494_v32  ;;  %v7938_v48 = vpop.eup %7937 }
 0x1df   :  { %vm10552_vm5 = vcmp.le.f32.partialorder %v17459_v52, 0.7853982  ;;  %v1852_v24 = vsub.s32 0, %v10536_v17  ;;  %vm2062_vm8 = vcmp.lt.s32.totalorder %v10510_v58, 1  ;;  %vm2064_vm9 = vcmp.lt.s32.totalorder %v10510_v58, 3 }
 0x1e0   :  { %v2071_v51 = vsel %vm2065_vm3, %v2058_v12, 920167782  ;;  %v1768_v6 = vsub.s32 4, %v10204_v43  ;;  %v1987_v47 = vadd.s32 536870912, %v10539_v10  ;;  %v2038_v39 = vor.u32 8388608, %v2037_v62 }
 0x1e1   :  { %v2075_v31 = vsel %vm2065_vm3, %v2061_v7, 1326507024  ;;  %v1574_v5 = vxor.u32 2147483648, %v7936_v40  ;;  %7939 = vcosq.f32 %v10547_v3  ;;  %v1765_v14 = vmul.f32 %v1764_v35, %v1762_v61 }
 0x1e2   :  { %v2144_v44 = vadd.s32 1, %v7422_v50  ;;  %vm2063_vm10 = vcmp.lt.s32.totalorder %v10510_v58, 2  ;;  %v2070_v11 = vsel %vm2062_vm8, %v10556_v4, %v10558_v28  ;;  %v2072_v27 = vsel %vm2064_vm9, %v2055_v34, %v2071_v51  ;;  %v2370_v58 = vld [vmem:[#allocation8 + $0xa0] sm:$0xff] }
 0x1e3   :  { %v2242_v0 = vshrl.u32 %v2241_v13, 23  ;;  %vm1566_vm11 = vweird.f32 %v17447_v26  ;;  %v1571_v21 = vxor.u32 2147483648, %v7938_v48  ;;  %v7410_v20 = vmin.u32 %v1852_v24, %v10536_v17 }
 0x1e4   :  { %v2074_v2 = vsel %vm2062_vm8, %v10558_v28, %v2055_v34  ;;  %v2076_v62 = vsel %vm2064_vm9, %v2058_v12, %v2075_v31  ;;  %vm1573_vm7 = vcmp.eq.s32.totalorder %v10491_v36, 2  ;;  %v1769_v7 = vsel %vm1684_vm1, %v1768_v6, %v10204_v43 }
 0x1e5   :  { %v10589_v61 = vshrl.u32 %v1987_v47, 30  ;;  %v10591_v35 = vshll.u32 %v2038_v39, 8  ;;  %v1436_v50 = vsel %vm1429_vm0, %v1432_v37, %v10489_v15  ;;  %vm1569_vm12 = vcmp.lt.s32.totalorder %v10491_v36, 2  ;;  %v17469_v36 = vld [vmem:[#allocation20_spill] sm:$0xff] }
 0x1e6   :  { %v2073_v52 = vsel %vm2063_vm10, %v2070_v11, %v2072_v27  ;;  %vm2145_vm6 = vcmp.gt.s32.totalorder %v2144_v44, 0  ;;  %v1667_v12 = vsel %vm10469_vm14, 0, %v10532_v57  ;;  %v1766_v13 = vxor.u32 2147483648, %v1765_v14 }
 0x1e7   :  { %v2077_v43 = vsel %vm2063_vm10, %v2074_v2, %v2076_v62  ;;  %v7426_v24 = vadd.s32 4294967169, %v2242_v0  ;;  %v1572_v51 = vsel %vm1570_vm2, %v7936_v40, %v1571_v21  ;;  %v1575_v49 = vsel %vm1573_vm7, %v1574_v5, %v7938_v48  ;;  %v1003_v21 = vld [vmem:[#allocation5 + $0x58] sm:$0xff]  ;;  %v17463_v62 = vld [vmem:[#allocation17_spill] sm:$0xff] }
 0x1e8   :  { %v1771_v15 = vsel %vm10552_vm5, 0, %v1769_v7  ;;  %v1854_v37 = vclz %v7410_v20  ;;  %v1989_v6 = vshll.u32 %v10589_v61, 30  ;;  %v2146_v45 = vsel %vm2145_vm6, %v2144_v44, 0 }
 0x1e9   :  { %v10610_v47 = vmul.u32.u64.low %v10591_v35, %v2073_v52  ;;  %v10611_v39 = vmul.u32.u64.high %v10591_v35, %v2073_v52, %v10610_v47  ;;  %v1437_v57 = vsel %vm1426_vm4, nan, %v1436_v50  ;;  %v2046_v31 = vshrl.u32 %v17401_v1, %v10483_v30  ;;  %v17462_v30 = vld [vmem:[#allocation24_spill] sm:$0xff]  ;;  %v17465_v50 = vld [vmem:[#allocation19_spill] sm:$0xff] }
 0x1ea   :  { %v10619_v40 = vmul.u32.u64.low %v10591_v35, %v2077_v43  ;;  %v10620_v48 = vmul.u32.u64.high %v10591_v35, %v2077_v43, %v10619_v40  ;;  %v1671_v5 = vadd.s32 3, %v1667_v12  ;;  %v1767_v11 = vsel %vm1684_vm1, %v1766_v13, %v1765_v14  ;;  %v17467_v14 = vld [vmem:[#allocation16_spill] sm:$0xff] }
 0x1eb   :  { %v2067_v27 = vsel %vm2065_vm3, %v2055_v34, 2102212464  ;;  %v2248_v0 = vadd.s32 1, %v7426_v24  ;;  %v1576_v16 = vsel %vm1569_vm12, %v1572_v51, %v1575_v49  ;;  %v1775_v44 = vadd.s32 3, %v1771_v15  ;;  %v2361_v49 = vld [vmem:[#allocation7 + $0xa0] sm:$0xff] }
 0x1ec   :  { %v7411_v20 = vadd.s32 4294967294, %v1854_v37  ;;  %v2148_v2 = vand.u32 31, %v2146_v45  ;;  %v10630_v7 = vadd.f32 %v17463_v62, %v17462_v30  ;;  %v10634_v52 = vadd.f32 %v10421_v63, %v17465_v50 }
 0x1ed   :  { %v10638_v12 = vadd.f32 %v10424_v23, %v17467_v14  ;;  %v10641_v34 = vsub.s32 %v10539_v10, %v1989_v6  ;;  %v10645_v13 = vadd.f32 %v10462_v42, %v17469_v36  ;;  %v1770_v43 = vsel %vm10552_vm5, %v9762_v54, %v1767_v11 }
 0x1ee   :  { %17464 = vst [vmem:[#allocation26_spill] sm:$0xff] %v10630_v7  ;;  %17466 = vst [vmem:[#allocation24_spill] sm:$0xff] %v10634_v52  ;;  %v2066_v63 = vsel %vm2062_vm8, %v2046_v31, %v10556_v4  ;;  %v2068_v23 = vsel %vm2064_vm9, %v10558_v28, %v2067_v27  ;;  %v10656_v24 = vpop.eup %7939  ;;  %v10658_v10 = vmul.f32 %v1437_v57, %v1003_v21  ;;  %v10662_v42 = vsel %vm1566_vm11, nan, %v1576_v16 }
 0x1ef   :  { %17468 = vst [vmem:[#allocation17_spill] sm:$0xff] %v10638_v12  ;;  %17470 = vst [vmem:[#allocation19_spill] sm:$0xff] %v10645_v13  ;;  %v10664_v51 = vand.u32 3, %v1671_v5  ;;  %vm2249_vm13 = vcmp.gt.s32.totalorder %v2248_v0, 0  ;;  %7941 = vsinq.f32 %v10547_v3  ;;  %v10669_v4 = vand.u32 3, %v1775_v44 }
 0x1f0   :  { %17471 = vst [vmem:[#allocation16_spill] sm:$0xff] %v10658_v10  ;;  %17472 = vst [vmem:[#allocation20_spill] sm:$0xff] %v10662_v42  ;;  %vm7412_vm14 = vcmp.lt.s32.totalorder %v7411_v20, 0  ;;  %v10671_v28 = vsub.s32 32, %v2148_v2  ;;  %7943 = vcosq.f32 %v1770_v43  ;;  %v1992_v15 = vsub.s32 0, %v10641_v34  ;;  %v2362_v42 = vld [vmem:[#allocation7 + $0xa8] sm:$0xff] }
 0x1f1   :  { %v2069_v26 = vsel %vm2063_vm10, %v2066_v63, %v2068_v23  ;;  %v2088_v37 = vadd.s32 1, %v10611_v39  ;;  %vm2087_vm15 = vc.u32 %v10620_v48, %v10610_v47  ;;  %v17220_v6 = vand.u32 2147483647, %v10465_v8 }
 0x1f2   :  { %v2250_v57 = vsel %vm2249_vm13, %v2248_v0, 0  ;;  %v2365_v3 = vmul.f32 %v10666_v55, %v2361_v49  ;;  %7945 = vsinq.f32 %v1770_v43  ;;  %v1842_v40 = vadd.s32 %v10330_v60, %v10327_v25 }
 0x1f3   :  { %v10684_v5 = vsel %vm7412_vm14, 0, %v7411_v20  ;;  %v2085_v27 = vmul.u32 %v10591_v35, %v2069_v26  ;;  %v2160_v21 = vshll.u32 %v17405_v9, %v2148_v2  ;;  %v2161_v0 = vshrl.u32 %v17391_v38, %v10671_v28 }
 0x1f4   :  { %v1858_v11 = vsub.s32 32, %v10684_v5  ;;  %v7415_v16 = vmin.u32 %v1992_v15, %v10641_v34  ;;  %v2089_v44 = vsel %vm2087_vm15, %v2088_v37, %v10611_v39  ;;  %v10693_v30 = vshrl.u32 %v2146_v45, 5 }
 0x1f5   :  { %v2252_v62 = vand.u32 31, %v2250_v57  ;;  %v2141_v25 = vand.u32 8388607, %v17220_v6  ;;  %v2151_v60 = vshll.u32 %v17401_v1, %v2148_v2  ;;  %v2154_v20 = vshll.u32 %v17393_v33, %v2148_v2 }
 0x1f6   :  { %v10699_v35 = vadd.f32 %v2370_v58, %v2365_v3  ;;  %v2152_v50 = vshrl.u32 %v17393_v33, %v10671_v28  ;;  %v2155_v14 = vshrl.u32 %v17445_v19, %v10671_v28  ;;  %v2157_v39 = vshll.u32 %v17445_v19, %v2148_v2 }
 0x1f7   :  { %v2158_v45 = vshrl.u32 %v17405_v9, %v10671_v28  ;;  %v1862_v43 = vsub.s32 4294967266, %v10684_v5  ;;  %v10711_v63 = vadd.s32 %v2089_v44, %v2085_v27  ;;  %v2162_v23 = vor.u32 %v2161_v0, %v2160_v21 }
 0x1f8   :  { %17473 = vst [vmem:[#allocation28_spill] sm:$0xff] %v10699_v35  ;;  %v2163_v49 = vshll.u32 %v17391_v38, %v2148_v2  ;;  %v2164_v15 = vshrl.u32 %v17392_v56, %v10671_v28  ;;  %vm2169_vm0 = vcmp.lt.s32.totalorder %v10693_v30, 4  ;;  %v10717_v26 = vsub.s32 32, %v2252_v62 }
 0x1f9   :  { %v10719_v37 = vshrl.u32 %v1842_v40, %v1858_v11  ;;  %v1994_v3 = vclz %v7415_v16  ;;  %v2381_v6 = vand.u32 2139095040, %v10699_v35  ;;  %v2142_v22 = vor.u32 8388608, %v2141_v25 }
 0x1fa   :  { %v10723_v27 = vor.u32 %v2152_v50, %v2151_v60  ;;  %v10725_v21 = vor.u32 %v2155_v14, %v2154_v20  ;;  %v10727_v2 = vor.u32 %v2158_v45, %v2157_v39  ;;  %v2091_v0 = vadd.s32 536870912, %v10711_v63 }
 0x1fb   :  { %vm2166_vm1 = vcmp.lt.s32.totalorder %v10693_v30, 1  ;;  %vm2168_vm2 = vcmp.lt.s32.totalorder %v10693_v30, 3  ;;  %v2175_v40 = vsel %vm2169_vm0, %v2162_v23, 920167782  ;;  %v2165_v16 = vor.u32 %v2164_v15, %v2163_v49 }
 0x1fc   :  { %v10734_v11 = vpop.eup %7941  ;;  %vm2167_vm3 = vcmp.lt.s32.totalorder %v10693_v30, 2  ;;  %v2264_v44 = vshll.u32 %v17405_v9, %v2252_v62  ;;  %v2265_v25 = vshrl.u32 %v17391_v38, %v10717_v26  ;;  %v10742_v20 = vshrl.u32 %v2250_v57, 5 }
 0x1fd   :  { %v10740_v60 = vpop.eup %7943  ;;  %v2267_v50 = vshll.u32 %v17391_v38, %v2252_v62  ;;  %v2268_v14 = vshrl.u32 %v17392_v56, %v10717_v26  ;;  %v2382_v39 = vshrl.u32 %v2381_v6, 23  ;;  %v2174_v45 = vsel %vm2166_vm1, %v10723_v27, %v10725_v21 }
 0x1fe   :  { %v2176_v49 = vsel %vm2168_vm2, %v10727_v2, %v2175_v40  ;;  %v2255_v15 = vshll.u32 %v17401_v1, %v2252_v62  ;;  %v2258_v57 = vshll.u32 %v17393_v33, %v2252_v62  ;;  %v2256_v31 = vshrl.u32 %v17393_v33, %v10717_v26 }
 0x1ff   :  { %v10756_v36 = vpop.eup %7945  ;;  %v2259_v6 = vshrl.u32 %v17445_v19, %v10717_v26  ;;  %v2261_v58 = vshll.u32 %v17445_v19, %v2252_v62  ;;  %v2262_v8 = vshrl.u32 %v17405_v9, %v10717_v26  ;;  %vm1677_vm4 = vcmp.eq.s32.totalorder %v10664_v51, 2 }
 0x200   :  { %v1863_v40 = vadd.s32 127, %v1862_v43  ;;  %v7416_v13 = vadd.s32 4294967294, %v1994_v3  ;;  %v2179_v59 = vsel %vm2169_vm0, %v2165_v16, 1326507024  ;;  %v2266_v12 = vor.u32 %v2265_v25, %v2264_v44 }
 0x201   :  { %v17474_v52 = vand.u32 2147483647, %v10494_v32  ;;  %v2269_v7 = vor.u32 %v2268_v14, %v2267_v50  ;;  %vm2273_vm5 = vcmp.lt.s32.totalorder %v10742_v20, 4  ;;  %v7431_v46 = vadd.s32 4294967169, %v2382_v39 }
 0x202   :  { %v10771_v62 = vshrl.u32 %v2091_v0, 30  ;;  %v2177_v54 = vsel %vm2167_vm3, %v2174_v45, %v2176_v49  ;;  %v2178_v43 = vsel %vm2166_vm1, %v10725_v21, %v10727_v2  ;;  %v10779_v3 = vshll.u32 %v2142_v22, 8 }
 0x203   :  { %v2245_v10 = vand.u32 8388607, %v17474_v52  ;;  %v2180_v52 = vsel %vm2168_vm2, %v2162_v23, %v2179_v59  ;;  %v10783_v16 = vor.u32 %v2256_v31, %v2255_v15  ;;  %v10785_v44 = vor.u32 %v2259_v6, %v2258_v57  ;;  %v2371_v31 = vld [vmem:[#allocation8 + $0xa8] sm:$0xff]  ;;  %v17475_v15 = vld [vmem:[#allocation18_spill] sm:$0xff] }
 0x204   :  { %v2263_v25 = vor.u32 %v2262_v8, %v2261_v58  ;;  %vm1674_vm8 = vcmp.eq.s32.totalorder %v10664_v51, 0  ;;  %vm2270_vm9 = vcmp.lt.s32.totalorder %v10742_v20, 1  ;;  %vm2272_vm10 = vcmp.lt.s32.totalorder %v10742_v20, 3 }
 0x205   :  { %v2279_v0 = vsel %vm2273_vm5, %v2266_v12, 920167782  ;;  %v2366_v22 = vmul.f32 %v10666_v55, %v2362_v42  ;;  %v1864_v50 = vshll.u32 %v1863_v40, 23  ;;  %v2246_v14 = vor.u32 8388608, %v2245_v10 }
 0x206   :  { %v2283_v59 = vsel %vm2273_vm5, %v2269_v7, 1326507024  ;;  %v2388_v23 = vadd.s32 1, %v7431_v46  ;;  %v2093_v8 = vshll.u32 %v10771_v62, 30  ;;  %v2181_v58 = vsel %vm2167_vm3, %v2178_v43, %v2180_v52 }
 0x207   :  { %v10799_v39 = vmul.u32.u64.low %v10779_v3, %v2177_v54  ;;  %v10800_v45 = vmul.u32.u64.high %v10779_v3, %v2177_v54, %v10799_v39  ;;  %vm1673_vm11 = vcmp.lt.s32.totalorder %v10664_v51, 2  ;;  %vm7417_vm7 = vcmp.lt.s32.totalorder %v7416_v13, 0 }
 0x208   :  { %vm2271_vm12 = vcmp.lt.s32.totalorder %v10742_v20, 2  ;;  %v2278_v46 = vsel %vm2270_vm9, %v10783_v16, %v10785_v44  ;;  %v2280_v7 = vsel %vm2272_vm10, %v2263_v25, %v2279_v0  ;;  %v2150_v10 = vshrl.u32 %v17401_v1, %v10671_v28 }
 0x209   :  { %v2282_v54 = vsel %vm2270_vm9, %v10785_v44, %v2263_v25  ;;  %v2284_v42 = vsel %vm2272_vm10, %v2266_v12, %v2283_v59  ;;  %v10818_v49 = vadd.f32 %v2371_v31, %v2366_v22  ;;  %vm1788_vm6 = vcmp.lt.s32.totalorder %v17475_v15, 0 }
 0x20a   :  { %v10822_v57 = vmul.u32.u64.low %v10779_v3, %v2181_v58  ;;  %v10823_v6 = vmul.u32.u64.high %v10779_v3, %v2181_v58, %v10822_v57  ;;  %v10825_v40 = vshll.u32 %v2246_v14, 8  ;;  %vm2389_vm13 = vcmp.gt.s32.totalorder %v2388_v23, 0 }
 0x20b   :  { %v1675_v28 = vxor.u32 2147483648, %v10734_v11  ;;  %v10829_v43 = vsub.s32 %v10711_v63, %v2093_v8  ;;  %v2171_v12 = vsel %vm2169_vm0, %v10727_v2, 2102212464  ;;  %v2281_v52 = vsel %vm2271_vm12, %v2278_v46, %v2280_v7 }
 0x20c   :  { %v17476_v0 = vxor.u32 2147483648, %v10656_v24  ;;  %v1872_v14 = vsub.s32 4, %v10481_v18  ;;  %v10843_v59 = vsel %vm7417_vm7, 0, %v7416_v13  ;;  %v2285_v63 = vsel %vm2271_vm12, %v2282_v54, %v2284_v42 }
 0x20d   :  { %v17477_v2 = vshll.u32 %v10536_v17, %v10684_v5  ;;  %v1865_v8 = vor.u32 4788187, %v1864_v50  ;;  %v2390_v58 = vsel %vm2389_vm13, %v2388_v23, 0  ;;  %v2485_v46 = vand.u32 2139095040, %v10818_v49 }
 0x20e   :  { %v1679_v22 = vsel %vm1677_vm4, %v17476_v0, %v10734_v11  ;;  %v2170_v11 = vsel %vm2166_vm1, %v2150_v10, %v10723_v27  ;;  %v2172_v13 = vsel %vm2168_vm2, %v10725_v21, %v2171_v12  ;;  %v2002_v17 = vsub.s32 4294967266, %v10843_v59 }
 0x20f   :  { %v1861_v31 = vor.u32 %v10719_v37, %v17477_v2  ;;  %v10859_v7 = vmul.u32.u64.low %v10825_v40, %v2281_v52  ;;  %v10860_v54 = vmul.u32.u64.high %v10825_v40, %v2281_v52, %v10859_v7  ;;  %v2096_v5 = vsub.s32 0, %v10829_v43 }
 0x210   :  { %v10866_v37 = vmul.u32.u64.low %v10825_v40, %v2285_v63  ;;  %v10867_v50 = vmul.u32.u64.high %v10825_v40, %v2285_v63, %v10866_v37  ;;  %v1676_v27 = vsel %vm1674_vm8, %v10656_v24, %v1675_v28  ;;  %v1982_v21 = vadd.s32 %v10445_v41, %v10454_v53 }
 0x211   :  { %v2254_v23 = vshrl.u32 %v17401_v1, %v10717_v26  ;;  %v2392_v10 = vand.u32 31, %v2390_v58  ;;  %vm1781_vm14 = vcmp.eq.s32.totalorder %v10669_v4, 2  ;;  %v2173_v42 = vsel %vm2167_vm3, %v2170_v11, %v2172_v13 }
 0x212   :  { %v2192_v57 = vadd.s32 1, %v10800_v45  ;;  %v2275_v12 = vsel %vm2273_vm5, %v2263_v25, 2102212464  ;;  %v2486_v52 = vshrl.u32 %v2485_v46, 23  ;;  %v1866_v0 = vand.u32 2147483647, %v1865_v8 }
 0x213   :  { %v1868_v24 = vcvt.s32.f32 %v1861_v31  ;;  %v1998_v28 = vsub.s32 32, %v10843_v59  ;;  %vm2191_vm15 = vc.u32 %v10823_v6, %v10799_v39  ;;  %v10887_v41 = vsel %vm1673_vm11, %v1676_v27, %v1679_v22 }
 0x214   :  { %v10892_v53 = vsel %vm1788_vm6, %v1872_v14, %v10481_v18  ;;  %v2003_v30 = vadd.s32 127, %v2002_v17  ;;  %v7419_v26 = vmin.u32 %v2096_v5, %v10829_v43  ;;  %v2189_v25 = vmul.u32 %v10779_v3, %v2173_v42 }
 0x215   :  { %v2274_v63 = vsel %vm2270_vm9, %v2254_v23, %v10783_v16  ;;  %v2276_v51 = vsel %vm2272_vm10, %v10785_v44, %v2275_v12  ;;  %v10902_v22 = vsub.s32 32, %v2392_v10  ;;  %v1779_v2 = vxor.u32 2147483648, %v10756_v36 }
 0x216   :  { %v1782_v18 = vxor.u32 2147483648, %v10740_v60  ;;  %v2193_v14 = vsel %vm2191_vm15, %v2192_v57, %v10800_v45  ;;  %v7435_v31 = vadd.s32 4294967169, %v2486_v52  ;;  %vm1778_vm0 = vcmp.eq.s32.totalorder %v10669_v4, 0 }
 0x217   :  { %v1869_v3 = vmul.f32 %v1868_v24, %v1866_v0  ;;  %v1999_v8 = vshll.u32 %v10641_v34, %v10843_v59  ;;  %v2000_v16 = vshrl.u32 %v1982_v21, %v1998_v28  ;;  %v2296_v46 = vadd.s32 1, %v10860_v54 }
 0x218   :  { %v2004_v11 = vshll.u32 %v2003_v30, 23  ;;  %v2098_v44 = vclz %v7419_v26  ;;  %v2277_v13 = vsel %vm2271_vm12, %v2274_v63, %v2276_v51  ;;  %vm2295_vm1 = vc.u32 %v10867_v50, %v10859_v7  ;;  %v2363_v26 = vld [vmem:[#allocation7 + $0xb0] sm:$0xff] }
 0x219   :  { %v10915_v17 = vadd.s32 %v2193_v14, %v2189_v25  ;;  %v17230_v45 = vand.u32 2147483647, %v10699_v35  ;;  %v2404_v5 = vshll.u32 %v17405_v9, %v2392_v10  ;;  %v2405_v34 = vshrl.u32 %v17391_v38, %v10902_v22 }
 0x21a   :  { %v10921_v59 = vshrl.u32 %v2390_v58, 5  ;;  %v2407_v37 = vshll.u32 %v17391_v38, %v2392_v10  ;;  %v2408_v20 = vshrl.u32 %v17392_v56, %v10902_v22  ;;  %v2492_v27 = vadd.s32 1, %v7435_v31 }
 0x21b   :  { %vm1670_vm2 = vweird.f32 %v17453_v29  ;;  %v17478_v21 = vand.u32 2147483647, %v17475_v15  ;;  %v2293_v42 = vmul.u32 %v10825_v40, %v2277_v13  ;;  %v2297_v57 = vsel %vm2295_vm1, %v2296_v46, %v10860_v54 }
 0x21c   :  { %v2395_v58 = vshll.u32 %v17401_v1, %v2392_v10  ;;  %v2398_v12 = vshll.u32 %v17393_v33, %v2392_v10  ;;  %vm1777_vm4 = vcmp.lt.s32.totalorder %v10669_v4, 2  ;;  %v2396_v52 = vshrl.u32 %v17393_v33, %v10902_v22 }
 0x21d   :  { %vm10929_vm3 = vcmp.le.f32.partialorder %v17478_v21, 0.7853982  ;;  %v2399_v0 = vshrl.u32 %v17445_v19, %v10902_v22  ;;  %v2401_v24 = vshll.u32 %v17445_v19, %v2392_v10  ;;  %v2402_v28 = vshrl.u32 %v17405_v9, %v10902_v22 }
 0x21e   :  { %v1783_v40 = vsel %vm1781_vm14, %v1782_v18, %v10756_v36  ;;  %v1870_v54 = vxor.u32 2147483648, %v1869_v3  ;;  %v2001_v30 = vor.u32 %v2000_v16, %v1999_v8  ;;  %v2406_v25 = vor.u32 %v2405_v34, %v2404_v5  ;;  %v2372_v34 = vld [vmem:[#allocation8 + $0xb0] sm:$0xff] }
 0x21f   :  { %v2385_v63 = vand.u32 8388607, %v17230_v45  ;;  %v2409_v51 = vor.u32 %v2408_v20, %v2407_v37  ;;  %vm2413_vm5 = vcmp.lt.s32.totalorder %v10921_v59, 4  ;;  %vm2493_vm8 = vcmp.gt.s32.totalorder %v2492_v27, 0 }
 0x220   :  { %v2005_v14 = vor.u32 4788187, %v2004_v11  ;;  %v7420_v10 = vadd.s32 4294967294, %v2098_v44  ;;  %v2195_v31 = vadd.s32 536870912, %v10915_v17  ;;  %v10952_v46 = vadd.s32 %v2297_v57, %v2293_v42 }
 0x221   :  { %v2367_v13 = vmul.f32 %v10666_v55, %v2363_v26  ;;  %v2397_v36 = vor.u32 %v2396_v52, %v2395_v58  ;;  %v2400_v18 = vor.u32 %v2399_v0, %v2398_v12  ;;  %v2403_v8 = vor.u32 %v2402_v28, %v2401_v24 }
 0x222   :  { %vm2410_vm9 = vcmp.lt.s32.totalorder %v10921_v59, 1  ;;  %vm2412_vm10 = vcmp.lt.s32.totalorder %v10921_v59, 3  ;;  %v2419_v16 = vsel %vm2413_vm5, %v2406_v25, 920167782  ;;  %v2494_v5 = vsel %vm2493_vm8, %v2492_v27, 0 }
 0x223   :  { %v1780_v11 = vsel %vm1778_vm0, %v10740_v60, %v1779_v2  ;;  %v1871_v44 = vsel %vm1788_vm6, %v1870_v54, %v1869_v3  ;;  %v2386_v37 = vor.u32 8388608, %v2385_v63  ;;  %v2423_v20 = vsel %vm2413_vm5, %v2409_v51, 1326507024 }
 0x224   :  { %v2008_v21 = vcvt.s32.f32 %v2001_v30  ;;  %vm7421_vm11 = vcmp.lt.s32.totalorder %v7420_v10, 0  ;;  %v10966_v42 = vshrl.u32 %v2195_v31, 30  ;;  %v2299_v57 = vadd.s32 536870912, %v10952_v46 }
 0x225   :  { %vm2411_vm7 = vcmp.lt.s32.totalorder %v10921_v59, 2  ;;  %v2418_v27 = vsel %vm2410_vm9, %v2397_v36, %v2400_v18  ;;  %v2420_v60 = vsel %vm2412_vm10, %v2403_v8, %v2419_v16  ;;  %v2496_v2 = vand.u32 31, %v2494_v5 }
 0x226   :  { %v2006_v3 = vand.u32 2147483647, %v2005_v14  ;;  %v10974_v58 = vadd.f32 %v2372_v34, %v2367_v13  ;;  %v2422_v12 = vsel %vm2410_vm9, %v2400_v18, %v2403_v8  ;;  %v2424_v52 = vsel %vm2412_vm10, %v2406_v25, %v2423_v20 }
 0x227   :  { %v10983_v0 = vsel %vm1670_vm2, nan, %v10887_v41  ;;  %v10988_v24 = vsel %vm10929_vm3, %v17475_v15, %v1871_v44  ;;  %v10993_v54 = vshll.u32 %v2386_v37, 8  ;;  %v10997_v30 = vsel %vm1777_vm4, %v1780_v11, %v1783_v40  ;;  %v17483_v44 = vld [vmem:[#allocation27_spill] sm:$0xff] }
 0x228   :  { %17481 = vst [vmem:[#allocation18_spill] sm:$0xff] %v10974_v58  ;;  %v11000_v26 = vsel %vm7421_vm11, 0, %v7420_v10  ;;  %v2197_v29 = vshll.u32 %v10966_v42, 30  ;;  %v2421_v41 = vsel %vm2411_vm7, %v2418_v27, %v2420_v60  ;;  %v11006_v63 = vshrl.u32 %v2299_v57, 30 }
 0x229   :  { %v2425_v51 = vsel %vm2411_vm7, %v2422_v12, %v2424_v52  ;;  %v11010_v14 = vsub.s32 32, %v2496_v2  ;;  %7947 = vcosq.f32 %v10988_v24  ;;  %v11013_v4 = vmul.f32 %v2008_v21, %v2006_v3 }
 0x22a   :  { %17482 = vst [vmem:[#allocation29_spill] sm:$0xff] %v11006_v63  ;;  %v2086_v40 = vadd.s32 %v10610_v47, %v10620_v48  ;;  %v2589_v10 = vand.u32 2139095040, %v10974_v58  ;;  %v2106_v31 = vsub.s32 4294967266, %v11000_v26  ;;  %v2394_v13 = vshrl.u32 %v17401_v1, %v10902_v22 }
 0x22b   :  { %v11022_v16 = vmul.u32.u64.low %v10993_v54, %v2421_v41  ;;  %v11023_v11 = vmul.u32.u64.high %v10993_v54, %v2421_v41, %v11022_v16  ;;  %vm1774_vm12 = vweird.f32 %v17483_v44  ;;  %v11028_v34 = vsub.s32 %v10915_v17, %v2197_v29  ;;  %v17484_v41 = vld [vmem:[#allocation25_spill] sm:$0xff] }
 0x22c   :  { %v2415_v47 = vsel %vm2413_vm5, %v2403_v8, 2102212464  ;;  %v11033_v48 = vmul.u32.u64.low %v10993_v54, %v2425_v51  ;;  %v11034_v37 = vmul.u32.u64.high %v10993_v54, %v2425_v51, %v11033_v48  ;;  %v2301_v20 = vshll.u32 %v11006_v63, 30 }
 0x22d   :  { %v17237_v22 = vand.u32 2147483647, %v10818_v49  ;;  %v2508_v21 = vshll.u32 %v17405_v9, %v2496_v2  ;;  %v2509_v57 = vshrl.u32 %v17391_v38, %v11010_v14  ;;  %v11041_v27 = vshrl.u32 %v2494_v5, 5 }
 0x22e   :  { %v2511_v17 = vshll.u32 %v17391_v38, %v2496_v2  ;;  %v2512_v8 = vshrl.u32 %v17392_v56, %v11010_v14  ;;  %v2590_v60 = vshrl.u32 %v2589_v10, 23  ;;  %v2414_v3 = vsel %vm2410_vm9, %v2394_v13, %v2397_v36 }
 0x22f   :  { %v2416_v12 = vsel %vm2412_vm10, %v2400_v18, %v2415_v47  ;;  %v2499_v52 = vshll.u32 %v17401_v1, %v2496_v2  ;;  %v2500_v29 = vshrl.u32 %v17393_v33, %v11010_v14  ;;  %vm1928_vm6 = vcmp.lt.s32.totalorder %v17484_v41, 0 }
 0x230   :  { %v2502_v5 = vshll.u32 %v17393_v33, %v2496_v2  ;;  %v2503_v51 = vshrl.u32 %v17445_v19, %v11010_v14  ;;  %v2505_v10 = vshll.u32 %v17445_v19, %v2496_v2  ;;  %v2506_v36 = vshrl.u32 %v17405_v9, %v11010_v14 }
 0x231   :  { %v2102_v13 = vsub.s32 32, %v11000_v26  ;;  %v2103_v18 = vshll.u32 %v10829_v43, %v11000_v26  ;;  %v2107_v47 = vadd.s32 127, %v2106_v31  ;;  %v2510_v48 = vor.u32 %v2509_v57, %v2508_v21 }
 0x232   :  { %v2489_v45 = vand.u32 8388607, %v17237_v22  ;;  %v2513_v28 = vor.u32 %v2512_v8, %v2511_v17  ;;  %vm2517_vm13 = vcmp.lt.s32.totalorder %v11041_v27, 4  ;;  %v7439_v25 = vadd.s32 4294967169, %v2590_v60 }
 0x233   :  { %v2200_v35 = vsub.s32 0, %v11028_v34  ;;  %v11068_v2 = vsub.s32 %v10952_v46, %v2301_v20  ;;  %v2417_v63 = vsel %vm2411_vm7, %v2414_v3, %v2416_v12  ;;  %v2436_v32 = vadd.s32 1, %v11023_v11 }
 0x234   :  { %v17485_v43 = vand.u32 2147483647, %v17484_v41  ;;  %vm2435_vm15 = vc.u32 %v11034_v37, %v11022_v16  ;;  %v11081_v31 = vor.u32 %v2500_v29, %v2499_v52  ;;  %v11083_v21 = vor.u32 %v2503_v51, %v2502_v5  ;;  %v1454_v5 = vld [vmem:[#allocation5 + $0x70] sm:$0xff] }
 0x235   :  { %v2507_v46 = vor.u32 %v2506_v36, %v2505_v10  ;;  %v2104_v20 = vshrl.u32 %v2086_v40, %v2102_v13  ;;  %vm2514_vm0 = vcmp.lt.s32.totalorder %v11041_v27, 1  ;;  %vm2516_vm1 = vcmp.lt.s32.totalorder %v11041_v27, 3  ;;  %v17489_v13 = vld [vmem:[#allocation20_spill] sm:$0xff] }
 0x236   :  { %vm11075_vm14 = vcmp.le.f32.partialorder %v17485_v43, 0.7853982  ;;  %v2523_v59 = vsel %vm2517_vm13, %v2510_v48, 920167782  ;;  %v2433_v57 = vmul.u32 %v10993_v54, %v2417_v63  ;;  %v2490_v17 = vor.u32 8388608, %v2489_v45  ;;  %v11092_v3 = vpop.eup %7947  ;;  %v1452_v54 = vld [vmem:[#allocation5 + $0x60] sm:$0xff] }
 0x237   :  { %v2527_v8 = vsel %vm2517_vm13, %v2513_v28, 1326507024  ;;  %v2596_v60 = vadd.s32 1, %v7439_v25  ;;  %v1785_v40 = vsel %vm1774_vm12, nan, %v10997_v30  ;;  %v2108_v12 = vshll.u32 %v2107_v47, 23  ;;  %v1453_v45 = vld [vmem:[#allocation5 + $0x68] sm:$0xff] }
 0x238   :  { %v7423_v52 = vmin.u32 %v2200_v35, %v11028_v34  ;;  %v2437_v29 = vsel %vm2435_vm15, %v2436_v32, %v11023_v11  ;;  %v2304_v63 = vsub.s32 0, %v11068_v2  ;;  %vm2515_vm2 = vcmp.lt.s32.totalorder %v11041_v27, 2 }
 0x239   :  { %v2522_v28 = vsel %vm2514_vm0, %v11081_v31, %v11083_v21  ;;  %v2524_v30 = vsel %vm2516_vm1, %v2507_v46, %v2523_v59  ;;  %v2010_v35 = vxor.u32 2147483648, %v11013_v4  ;;  %v17488_v25 = vsub.s32 4, %v10589_v61 }
 0x23a   :  { %v2526_v11 = vsel %vm2514_vm0, %v11083_v21, %v2507_v46  ;;  %v2528_v44 = vsel %vm2516_vm1, %v2510_v48, %v2527_v8  ;;  %v2105_v51 = vor.u32 %v2104_v20, %v2103_v18  ;;  %v11121_v10 = vadd.s32 %v2437_v29, %v2433_v57 }
 0x23b   :  { %v2013_v32 = vsel %vm1928_vm6, %v17488_v25, %v10589_v61  ;;  %v11123_v36 = vshll.u32 %v2490_v17, 8  ;;  %vm2597_vm4 = vcmp.gt.s32.totalorder %v2596_v60, 0  ;;  %v1890_v47 = vmul.f32 %v17489_v13, %v1452_v54 }
 0x23c   :  { %v1891_v43 = vmul.f32 %v10983_v0, %v1453_v45  ;;  %v2109_v59 = vor.u32 4788187, %v2108_v12  ;;  %v2525_v61 = vsel %vm2515_vm2, %v2522_v28, %v2524_v30  ;;  %v17490_v25 = vsel %vm10929_vm3, 0, %v10892_v53 }
 0x23d   :  { %v1879_v48 = vadd.s32 3, %v17490_v25  ;;  %v2202_v8 = vclz %v7423_v52  ;;  %v7427_v18 = vmin.u32 %v2304_v63, %v11068_v2  ;;  %v2529_v20 = vsel %vm2515_vm2, %v2526_v11, %v2528_v44  ;;  %v17496_v25 = vld [vmem:[#allocation23_spill] sm:$0xff] }
 0x23e   :  { %v1892_v57 = vmul.f32 %v1785_v40, %v1454_v5  ;;  %v2011_v0 = vsel %vm1928_vm6, %v2010_v35, %v11013_v4  ;;  %v2015_v17 = vsel %vm11075_vm14, 0, %v2013_v32  ;;  %v2598_v12 = vsel %vm2597_vm4, %v2596_v60, 0  ;;  %v17491_v35 = vld [vmem:[#allocation26_spill] sm:$0xff]  ;;  %v17492_v32 = vld [vmem:[#allocation16_spill] sm:$0xff] }
 0x23f   :  { %v2112_v29 = vcvt.s32.f32 %v2105_v51  ;;  %v2439_v23 = vadd.s32 536870912, %v11121_v10  ;;  %v11143_v53 = vmul.u32.u64.low %v11123_v36, %v2525_v61  ;;  %v11144_v52 = vmul.u32.u64.high %v11123_v36, %v2525_v61, %v11143_v53  ;;  %v17493_v51 = vld [vmem:[#allocation24_spill] sm:$0xff] }
 0x240   :  { %v2110_v54 = vand.u32 2147483647, %v2109_v59  ;;  %v2498_v40 = vshrl.u32 %v17401_v1, %v11010_v14  ;;  %v11150_v45 = vmul.u32.u64.low %v11123_v36, %v2529_v20  ;;  %v11151_v63 = vmul.u32.u64.high %v11123_v36, %v2529_v20, %v11150_v45  ;;  %v17494_v14 = vld [vmem:[#allocation17_spill] sm:$0xff] }
 0x241   :  { %v7424_v4 = vadd.s32 4294967294, %v2202_v8  ;;  %v2306_v28 = vclz %v7427_v18  ;;  %v2519_v60 = vsel %vm2517_vm13, %v2507_v46, 2102212464  ;;  %v2600_v30 = vand.u32 31, %v2598_v12  ;;  %v17497_v18 = vld [vmem:[#allocation19_spill] sm:$0xff] }
 0x242   :  { %v11157_v11 = vadd.f32 %v17492_v32, %v17491_v35  ;;  %v2019_v44 = vadd.s32 3, %v2015_v17  ;;  %v11159_v5 = vand.u32 3, %v1879_v48  ;;  %v11162_v13 = vadd.f32 %v1890_v47, %v17493_v51  ;;  %v2364_v17 = vld [vmem:[#allocation7 + $0xb8] sm:$0xff] }
 0x243   :  { %v11165_v59 = vadd.f32 %v1891_v43, %v17494_v14  ;;  %v11167_v61 = vshrl.u32 %v2439_v23, 30  ;;  %v2014_v46 = vsel %vm11075_vm14, %v17484_v41, %v2011_v0  ;;  %vm2032_vm3 = vcmp.lt.s32.totalorder %v17496_v25, 0 }
 0x244   :  { %v2113_v8 = vmul.f32 %v2112_v29, %v2110_v54  ;;  %v2518_v48 = vsel %vm2514_vm0, %v2498_v40, %v11081_v31  ;;  %v2520_v47 = vsel %vm2516_vm1, %v11083_v21, %v2519_v60  ;;  %v11180_v43 = vadd.f32 %v1892_v57, %v17497_v18  ;;  %v2373_v18 = vld [vmem:[#allocation8 + $0xb8] sm:$0xff] }
 0x245   :  { %17495 = vst [vmem:[#allocation27_spill] sm:$0xff] %v11165_v59  ;;  %vm7425_vm5 = vcmp.lt.s32.totalorder %v7424_v4, 0  ;;  %v7428_v20 = vadd.s32 4294967294, %v2306_v28  ;;  %v11182_v23 = vsub.s32 32, %v2600_v30  ;;  %7949 = vsinq.f32 %v10988_v24 }
 0x246   :  { %17498 = vst [vmem:[#allocation25_spill] sm:$0xff] %v11180_v43  ;;  %v11186_v0 = vand.u32 3, %v2019_v44  ;;  %v2116_v31 = vsub.s32 4, %v10771_v62  ;;  %7951 = vcosq.f32 %v2014_v46  ;;  %v2441_v29 = vshll.u32 %v11167_v61, 30 }
 0x247   :  { %v2521_v21 = vsel %vm2515_vm2, %v2518_v48, %v2520_v47  ;;  %v2540_v57 = vadd.s32 1, %v11144_v52  ;;  %v17499_v54 = vand.u32 2147483647, %v17496_v25  ;;  %v2114_v24 = vxor.u32 2147483648, %v2113_v8 }
 0x248   :  { %v11199_v45 = vsel %vm7425_vm5, 0, %v7424_v4  ;;  %v2368_v28 = vmul.f32 %v10666_v55, %v2364_v17  ;;  %vm2539_vm9 = vc.u32 %v11151_v63, %v11143_v53  ;;  %vm7429_vm10 = vcmp.lt.s32.totalorder %v7428_v20, 0 }
 0x249   :  { %vm11195_vm8 = vcmp.le.f32.partialorder %v17499_v54, 0.7853982  ;;  %v17238_v27 = vand.u32 2147483647, %v10974_v58  ;;  %v2612_v60 = vshll.u32 %v17405_v9, %v2600_v30  ;;  %v2613_v35 = vshrl.u32 %v17391_v38, %v11182_v23 }
 0x24a   :  { %v2537_v32 = vmul.u32 %v11123_v36, %v2521_v21  ;;  %v11209_v44 = vshrl.u32 %v2598_v12, 5  ;;  %v2615_v4 = vshll.u32 %v17391_v38, %v2600_v30  ;;  %v2616_v55 = vshrl.u32 %v17392_v56, %v11182_v23 }
 0x24b   :  { %v11215_v51 = vsub.s32 %v11121_v10, %v2441_v29  ;;  %v2541_v14 = vsel %vm2539_vm9, %v2540_v57, %v11144_v52  ;;  %v2603_v48 = vshll.u32 %v17401_v1, %v2600_v30  ;;  %v2606_v47 = vshll.u32 %v17393_v33, %v2600_v30 }
 0x24c   :  { %v2604_v36 = vshrl.u32 %v17393_v33, %v11182_v23  ;;  %v2607_v12 = vshrl.u32 %v17445_v19, %v11182_v23  ;;  %v2609_v17 = vshll.u32 %v17445_v19, %v2600_v30  ;;  %v2610_v21 = vshrl.u32 %v17405_v9, %v11182_v23 }
 0x24d   :  { %7953 = vsinq.f32 %v2014_v46  ;;  %v2190_v10 = vadd.s32 %v10799_v39, %v10823_v6  ;;  %v2210_v52 = vsub.s32 4294967266, %v11199_v45  ;;  %v2614_v29 = vor.u32 %v2613_v35, %v2612_v60 }
 0x24e   :  { %v11230_v57 = vadd.s32 %v2541_v14, %v2537_v32  ;;  %v2593_v54 = vand.u32 8388607, %v17238_v27  ;;  %v2617_v22 = vor.u32 %v2616_v55, %v2615_v4  ;;  %vm2621_vm11 = vcmp.lt.s32.totalorder %v11209_v44, 4 }
 0x24f   :  { %v2115_v30 = vsel %vm2032_vm3, %v2114_v24, %v2113_v8  ;;  %v2206_v26 = vsub.s32 32, %v11199_v45  ;;  %v11239_v46 = vsel %vm7429_vm10, 0, %v7428_v20  ;;  %v11241_v39 = vadd.f32 %v2373_v18, %v2368_v28 }
 0x250   :  { %v2444_v6 = vsub.s32 0, %v11215_v51  ;;  %v11244_v60 = vor.u32 %v2604_v36, %v2603_v48  ;;  %v11246_v35 = vor.u32 %v2607_v12, %v2606_v47  ;;  %v2611_v32 = vor.u32 %v2610_v21, %v2609_v17 }
 0x251   :  { %v2211_v4 = vadd.s32 127, %v2210_v52  ;;  %vm2618_vm7 = vcmp.lt.s32.totalorder %v11209_v44, 1  ;;  %vm2620_vm12 = vcmp.lt.s32.totalorder %v11209_v44, 3  ;;  %v2627_v8 = vsel %vm2621_vm11, %v2614_v29, 920167782 }
 0x252   :  { %v11255_v20 = vsel %vm2032_vm3, %v2116_v31, %v10771_v62  ;;  %v2543_v24 = vadd.s32 536870912, %v11230_v57  ;;  %v2594_v28 = vor.u32 8388608, %v2593_v54  ;;  %v2631_v55 = vsel %vm2621_vm11, %v2617_v22, 1326507024  ;;  %v7950_v14 = vpop.eup %7949  ;;  %v11284_v52 = vld [vmem:[#allocation2 + $0x6] ss:$0 sm:$0xff] }
 0x253   :  { %vm1882_vm6 = vcmp.eq.s32.totalorder %v11159_v5, 0  ;;  %vm1885_vm13 = vcmp.eq.s32.totalorder %v11159_v5, 2  ;;  %v2118_v48 = vsel %vm11195_vm8, %v17496_v25, %v2115_v30  ;;  %v2207_v47 = vshll.u32 %v11028_v34, %v11199_v45  ;;  %v11269_v18 = vpop.eup %7951 }
 0x254   :  { %v2314_v62 = vsub.s32 4294967266, %v11239_v46  ;;  %v2693_v31 = vand.u32 2139095040, %v11241_v39  ;;  %v7432_v22 = vmin.u32 %v2444_v6, %v11215_v51  ;;  %vm2619_vm14 = vcmp.lt.s32.totalorder %v11209_v44, 2  ;;  %v2813_v6 = vld [vmem:[#allocation7 + $0xc0] sm:$0xff] }
 0x255   :  { %v2626_v36 = vsel %vm2618_vm7, %v11244_v60, %v11246_v35  ;;  %v2628_v12 = vsel %vm2620_vm12, %v2611_v32, %v2627_v8  ;;  %v2208_v17 = vshrl.u32 %v2190_v10, %v2206_v26  ;;  %v2212_v34 = vshll.u32 %v2211_v4, 23 }
 0x256   :  { %v2630_v45 = vsel %vm2618_vm7, %v11246_v35, %v2611_v32  ;;  %v2632_v21 = vsel %vm2620_vm12, %v2614_v29, %v2631_v55  ;;  %vm1881_vm15 = vcmp.lt.s32.totalorder %v11159_v5, 2  ;;  %v1883_v54 = vxor.u32 2147483648, %v7950_v14 }
 0x257   :  { %vm2025_vm0 = vcmp.eq.s32.totalorder %v11186_v0, 2  ;;  %v2119_v30 = vsel %vm11195_vm8, 0, %v11255_v20  ;;  %v11291_v26 = vshrl.u32 %v2543_v24, 30  ;;  %v11293_v10 = vshll.u32 %v2594_v28, 8 }
 0x258   :  { %vm2022_vm1 = vcmp.eq.s32.totalorder %v11186_v0, 0  ;;  %7955 = vcosq.f32 %v2118_v48  ;;  %v2294_v29 = vadd.s32 %v10859_v7, %v10867_v50  ;;  %v2629_v4 = vsel %vm2619_vm14, %v2626_v36, %v2628_v12  ;;  %v17502_v36 = vld [vmem:[#allocation21_spill] sm:$0xff] }
 0x259   :  { %v2694_v8 = vshrl.u32 %v2693_v31, 23  ;;  %v2310_v55 = vsub.s32 32, %v11239_v46  ;;  %v2315_v27 = vadd.s32 127, %v2314_v62  ;;  %v2446_v40 = vclz %v7432_v22  ;;  %v2822_v22 = vld [vmem:[#allocation8 + $0xc0] sm:$0xff] }
 0x25a   :  { %v2633_v20 = vsel %vm2619_vm14, %v2630_v45, %v2632_v21  ;;  %vm1878_vm2 = vweird.f32 %v17475_v15  ;;  %7957 = vsinq.f32 %v2118_v48  ;;  %v2209_v24 = vor.u32 %v2208_v17, %v2207_v47  ;;  %v7954_v58 = vpop.eup %7953 }
 0x25b   :  { %v2213_v28 = vor.u32 4788187, %v2212_v34  ;;  %v2817_v43 = vmul.f32 %v11284_v52, %v2813_v6  ;;  %vm2021_vm4 = vcmp.lt.s32.totalorder %v11186_v0, 2  ;;  %v2311_v7 = vshll.u32 %v11068_v2, %v11239_v46 }
 0x25c   :  { %v2545_v50 = vshll.u32 %v11291_v26, 30  ;;  %v11310_v62 = vmul.u32.u64.low %v11293_v10, %v2629_v4  ;;  %v11311_v31 = vmul.u32.u64.high %v11293_v10, %v2629_v4, %v11310_v62  ;;  %vm2136_vm3 = vcmp.lt.s32.totalorder %v17502_v36, 0 }
 0x25d   :  { %v2602_v48 = vshrl.u32 %v17401_v1, %v11182_v23  ;;  %v11318_v47 = vmul.u32.u64.low %v11293_v10, %v2633_v20  ;;  %v11319_v12 = vmul.u32.u64.high %v11293_v10, %v2633_v20, %v11318_v47  ;;  %v7443_v17 = vadd.s32 4294967169, %v2694_v8 }
 0x25e   :  { %v2312_v34 = vshrl.u32 %v2294_v29, %v2310_v55  ;;  %v2316_v2 = vshll.u32 %v2315_v27, 23  ;;  %v7433_v46 = vadd.s32 4294967294, %v2446_v40  ;;  %v2623_v45 = vsel %vm2621_vm11, %v2611_v32, 2102212464 }
 0x25f   :  { %vm2018_vm5 = vweird.f32 %v17484_v41  ;;  %v2026_v21 = vxor.u32 2147483648, %v11269_v18  ;;  %v2214_v6 = vand.u32 2147483647, %v2213_v28  ;;  %v2216_v4 = vcvt.s32.f32 %v2209_v24 }
 0x260   :  { %v11325_v59 = vadd.f32 %v2822_v22, %v2817_v43  ;;  %v1884_v23 = vsel %vm1882_vm6, %v11092_v3, %v1883_v54  ;;  %v17504_v8 = vxor.u32 2147483648, %v11092_v3  ;;  %v2023_v29 = vxor.u32 2147483648, %v7954_v58 }
 0x261   :  { %v17505_v32 = vand.u32 2147483647, %v17502_v36  ;;  %v11341_v40 = vsub.s32 %v11230_v57, %v2545_v50  ;;  %v2123_v43 = vadd.s32 3, %v2119_v30  ;;  %v2622_v54 = vsel %vm2618_vm7, %v2602_v48, %v11244_v60 }
 0x262   :  { %17503 = vst [vmem:[#allocation20_spill] sm:$0xff] %v11325_v59  ;;  %v1887_v27 = vsel %vm1885_vm13, %v17504_v8, %v7950_v14  ;;  %v2624_v3 = vsel %vm2620_vm12, %v11246_v35, %v2623_v45  ;;  %v2700_v14 = vadd.s32 1, %v7443_v17  ;;  %v2220_v20 = vsub.s32 4, %v10966_v42  ;;  %v17508_v35 = vld [vmem:[#allocation22_spill] sm:$0xff] }
 0x263   :  { %vm11336_vm8 = vcmp.le.f32.partialorder %v17505_v32, 0.7853982  ;;  %v2313_v24 = vor.u32 %v2312_v34, %v2311_v7  ;;  %v2317_v28 = vor.u32 4788187, %v2316_v2  ;;  %vm7434_vm9 = vcmp.lt.s32.totalorder %v7433_v46, 0  ;;  %v1455_v34 = vld [vmem:[#allocation5 + $0x78] sm:$0xff] }
 0x264   :  { %v1888_v22 = vsel %vm1881_vm15, %v1884_v23, %v1887_v27  ;;  %v2027_v57 = vsel %vm2025_vm0, %v2026_v21, %v7954_v58  ;;  %v2217_v30 = vmul.f32 %v2216_v4, %v2214_v6  ;;  %v2833_v50 = vand.u32 2139095040, %v11325_v59 }
 0x265   :  { %v2024_v60 = vsel %vm2022_vm1, %v11269_v18, %v2023_v29  ;;  %vm2240_vm10 = vcmp.lt.s32.totalorder %v17508_v35, 0  ;;  %v2548_v48 = vsub.s32 0, %v11341_v40  ;;  %v2625_v7 = vsel %vm2619_vm14, %v2622_v54, %v2624_v3  ;;  %v7956_v58 = vpop.eup %7955  ;;  %v1904_v3 = vld [vmem:[#allocation5 + $0x80] sm:$0xff] }
 0x266   :  { %v2644_v5 = vadd.s32 1, %v11311_v31  ;;  %v11363_v47 = vand.u32 3, %v2123_v43  ;;  %v2449_v17 = vsel %vm7434_vm9, 0, %v7433_v46  ;;  %vm2643_vm11 = vc.u32 %v11319_v12, %v11310_v62  ;;  %v17512_v43 = vld [vmem:[#allocation29_spill] sm:$0xff] }
 0x267   :  { %vm2701_vm7 = vcmp.gt.s32.totalorder %v2700_v14, 0  ;;  %v1889_v18 = vsel %vm1878_vm2, nan, %v1888_v22  ;;  %v2221_v2 = vsel %vm2136_vm3, %v2220_v20, %v10966_v42  ;;  %v2318_v44 = vand.u32 2147483647, %v2317_v28  ;;  %v7958_v23 = vpop.eup %7957 }
 0x268   :  { %v2320_v45 = vcvt.s32.f32 %v2313_v24  ;;  %v2028_v21 = vsel %vm2021_vm4, %v2024_v60, %v2027_v57  ;;  %v2218_v6 = vxor.u32 2147483648, %v2217_v30  ;;  %v2641_v46 = vmul.u32 %v11293_v10, %v2625_v7 }
 0x269   :  { %v2834_v4 = vshrl.u32 %v2833_v50, 23  ;;  %v17509_v8 = vand.u32 2147483647, %v17508_v35  ;;  %v2454_v15 = vsub.s32 4294967266, %v2449_v17  ;;  %v7436_v29 = vmin.u32 %v2548_v48, %v11341_v40 }
 0x26a   :  { %v2645_v42 = vsel %vm2643_vm11, %v2644_v5, %v11311_v31  ;;  %v2702_v0 = vsel %vm2701_vm7, %v2700_v14, 0  ;;  %v1893_v32 = vmul.f32 %v1889_v18, %v1455_v34  ;;  %vm2126_vm6 = vcmp.eq.s32.totalorder %v11363_v47, 0 }
 0x26b   :  { %vm11377_vm12 = vcmp.le.f32.partialorder %v17509_v8, 0.7853982  ;;  %v2223_v10 = vsel %vm11336_vm8, 0, %v2221_v2  ;;  %v2324_v54 = vsub.s32 4, %v17512_v43  ;;  %v2029_v20 = vsel %vm2018_vm5, nan, %v2028_v21 }
 0x26c   :  { %v2321_v24 = vmul.f32 %v2320_v45, %v2318_v44  ;;  %v2434_v28 = vadd.s32 %v11022_v16, %v11034_v37  ;;  %v2450_v22 = vsub.s32 32, %v2449_v17  ;;  %vm2129_vm13 = vcmp.eq.s32.totalorder %v11363_v47, 2 }
 0x26d   :  { %v11396_v31 = vadd.s32 %v2645_v42, %v2641_v46  ;;  %v2704_v14 = vand.u32 31, %v2702_v0  ;;  %v7448_v57 = vadd.s32 4294967169, %v2834_v4  ;;  %v2219_v50 = vsel %vm2136_vm3, %v2218_v6, %v2217_v30 }
 0x26e   :  { %v2227_v60 = vadd.s32 3, %v2223_v10  ;;  %v2455_v48 = vadd.s32 127, %v2454_v15  ;;  %v2550_v7 = vclz %v7436_v29  ;;  %v2127_v5 = vxor.u32 2147483648, %v7958_v23 }
 0x26f   :  { %v2130_v41 = vxor.u32 2147483648, %v7956_v58  ;;  %v11403_v34 = vsel %vm2240_vm10, %v2324_v54, %v17512_v43  ;;  %v2342_v16 = vmul.f32 %v2029_v20, %v1904_v3  ;;  %v2322_v37 = vxor.u32 2147483648, %v2321_v24 }
 0x270   :  { %v2451_v18 = vshll.u32 %v11215_v51, %v2449_v17  ;;  %v2452_v2 = vshrl.u32 %v2434_v28, %v2450_v22  ;;  %v17241_v44 = vand.u32 2147483647, %v11241_v39  ;;  %v2222_v30 = vsel %vm11336_vm8, %v17502_v36, %v2219_v50 }
 0x271   :  { %v2647_v45 = vadd.s32 536870912, %v11396_v31  ;;  %v11411_v21 = vsub.s32 32, %v2704_v14  ;;  %v2840_v6 = vadd.s32 1, %v7448_v57  ;;  %v11414_v46 = vadd.f32 %v1893_v32, %v11157_v11 }
 0x272   :  { %v11416_v4 = vand.u32 3, %v2227_v60  ;;  %v2456_v8 = vshll.u32 %v2455_v48, 23  ;;  %v7437_v15 = vadd.s32 4294967294, %v2550_v7  ;;  %vm2125_vm14 = vcmp.lt.s32.totalorder %v11363_v47, 2 }
 0x273   :  { %v2128_v51 = vsel %vm2126_vm6, %v7956_v58, %v2127_v5  ;;  %v2131_v55 = vsel %vm2129_vm13, %v2130_v41, %v7958_v23  ;;  %v2327_v17 = vsel %vm11377_vm12, 0, %v11403_v34  ;;  %v11427_v29 = vadd.f32 %v2342_v16, %v11162_v13 }
 0x274   :  { %7959 = vcosq.f32 %v2222_v30  ;;  %v2323_v11 = vsel %vm2240_vm10, %v2322_v37, %v2321_v24  ;;  %v2453_v42 = vor.u32 %v2452_v2, %v2451_v18  ;;  %v2697_v32 = vand.u32 8388607, %v17241_v44 }
 0x275   :  { %v11433_v10 = vshrl.u32 %v2647_v45, 30  ;;  %v2716_v58 = vshll.u32 %v17405_v9, %v2704_v14  ;;  %v2717_v23 = vshrl.u32 %v17391_v38, %v11411_v21  ;;  %vm2841_vm15 = vcmp.gt.s32.totalorder %v2840_v6, 0 }
 0x276   :  { %v2457_v43 = vor.u32 4788187, %v2456_v8  ;;  %vm7438_vm0 = vcmp.lt.s32.totalorder %v7437_v15, 0  ;;  %v11438_v13 = vshrl.u32 %v2702_v0, 5  ;;  %v2707_v54 = vshll.u32 %v17401_v1, %v2704_v14  ;;  %v2814_v8 = vld [vmem:[#allocation7 + $0xc8] sm:$0xff] }
 0x277   :  { %v2710_v3 = vshll.u32 %v17393_v33, %v2704_v14  ;;  %v2713_v20 = vshll.u32 %v17445_v19, %v2704_v14  ;;  %v2719_v24 = vshll.u32 %v17391_v38, %v2704_v14  ;;  %v2720_v28 = vshrl.u32 %v17392_v56, %v11411_v21 }
 0x278   :  { %v2708_v22 = vshrl.u32 %v17393_v33, %v11411_v21  ;;  %v2711_v57 = vshrl.u32 %v17445_v19, %v11411_v21  ;;  %v2714_v0 = vshrl.u32 %v17405_v9, %v11411_v21  ;;  %v2842_v50 = vsel %vm2841_vm15, %v2840_v6, 0 }
 0x279   :  { %7961 = vsinq.f32 %v2222_v30  ;;  %v2553_v60 = vsel %vm7438_vm0, 0, %v7437_v15  ;;  %v2649_v48 = vshll.u32 %v11433_v10, 30  ;;  %v2718_v7 = vor.u32 %v2717_v23, %v2716_v58 }
 0x27a   :  { %v2326_v14 = vsel %vm11377_vm12, %v17508_v35, %v2323_v11  ;;  %v2538_v5 = vadd.s32 %v11143_v53, %v11151_v63  ;;  %v2554_v41 = vsub.s32 32, %v2553_v60  ;;  %vm2725_vm1 = vcmp.lt.s32.totalorder %v11438_v13, 4 }
 0x27b   :  { %v2460_v34 = vcvt.s32.f32 %v2453_v42  ;;  %v2698_v16 = vor.u32 8388608, %v2697_v32  ;;  %v2721_v37 = vor.u32 %v2720_v28, %v2719_v24  ;;  %v2844_v18 = vand.u32 31, %v2842_v50 }
 0x27c   :  { %v2458_v2 = vand.u32 2147483647, %v2457_v43  ;;  %v11459_v30 = vor.u32 %v2708_v22, %v2707_v54  ;;  %v11461_v45 = vor.u32 %v2711_v57, %v2710_v3  ;;  %v2715_v6 = vor.u32 %v2714_v0, %v2713_v20 }
 0x27d   :  { %v11464_v27 = vsub.s32 %v11396_v31, %v2649_v48  ;;  %vm2722_vm2 = vcmp.lt.s32.totalorder %v11438_v13, 1  ;;  %vm2724_vm4 = vcmp.lt.s32.totalorder %v11438_v13, 3  ;;  %v2731_v53 = vsel %vm2725_vm1, %v2718_v7, 920167782 }
 0x27e   :  { %v11472_v63 = vsel %vm2125_vm14, %v2128_v51, %v2131_v55  ;;  %v2555_v15 = vshll.u32 %v11341_v40, %v2553_v60  ;;  %v2556_v11 = vshrl.u32 %v2538_v5, %v2554_v41  ;;  %v2558_v42 = vsub.s32 4294967266, %v2553_v60  ;;  %v2823_v51 = vld [vmem:[#allocation8 + $0xc8] sm:$0xff] }
 0x27f   :  { %v11475_v32 = vadd.s32 3, %v2327_v17  ;;  %v2735_v31 = vsel %vm2725_vm1, %v2721_v37, 1326507024  ;;  %v2818_v58 = vmul.f32 %v11284_v52, %v2814_v8  ;;  %v11480_v23 = vsub.s32 32, %v2844_v18 }
 0x280   :  { %7963 = vcosq.f32 %v2326_v14  ;;  %vm2723_vm3 = vcmp.lt.s32.totalorder %v11438_v13, 2  ;;  %v2730_v47 = vsel %vm2722_vm2, %v11459_v30, %v11461_v45  ;;  %v2732_v40 = vsel %vm2724_vm4, %v2715_v6, %v2731_v53 }
 0x281   :  { %v11489_v55 = vpop.eup %7959  ;;  %7965 = vsinq.f32 %v2326_v14  ;;  %v11491_v17 = vmul.f32 %v2460_v34, %v2458_v2  ;;  %v2652_v43 = vsub.s32 0, %v11464_v27  ;;  %v11494_v54 = vshll.u32 %v2698_v16, 8 }
 0x282   :  { %v11496_v3 = vor.u32 %v2556_v11, %v2555_v15  ;;  %v2559_v20 = vadd.s32 127, %v2558_v42  ;;  %v2734_v24 = vsel %vm2722_vm2, %v11461_v45, %v2715_v6  ;;  %v2736_v28 = vsel %vm2724_vm4, %v2718_v7, %v2735_v31 }
 0x283   :  { %v2733_v22 = vsel %vm2723_vm3, %v2730_v47, %v2732_v40  ;;  %v11505_v57 = vadd.f32 %v2823_v51, %v2818_v58  ;;  %v2856_v0 = vshll.u32 %v17405_v9, %v2844_v18  ;;  %v2857_v60 = vshrl.u32 %v17391_v38, %v11480_v23  ;;  %v17514_v47 = vld [vmem:[#allocation28_spill] sm:$0xff] }
 0x284   :  { %v17242_v48 = vand.u32 2147483647, %v11325_v59  ;;  %v11511_v14 = vshrl.u32 %v2842_v50, 5  ;;  %v2859_v5 = vshll.u32 %v17391_v38, %v2844_v18  ;;  %v2860_v41 = vshrl.u32 %v17392_v56, %v11480_v23 }
 0x285   :  { %17513 = vst [vmem:[#allocation26_spill] sm:$0xff] %v11505_v57  ;;  %v7440_v7 = vmin.u32 %v2652_v43, %v11464_v27  ;;  %v2737_v34 = vsel %vm2723_vm3, %v2734_v24, %v2736_v28  ;;  %v2847_v16 = vshll.u32 %v17401_v1, %v2844_v18  ;;  %v2850_v37 = vshll.u32 %v17393_v33, %v2844_v18 }
 0x286   :  { %v7962_v2 = vpop.eup %7961  ;;  %vm2122_vm5 = vweird.f32 %v17496_v25  ;;  %v2848_v50 = vshrl.u32 %v17393_v33, %v11480_v23  ;;  %v2851_v8 = vshrl.u32 %v17445_v19, %v11480_v23  ;;  %v2853_v53 = vshll.u32 %v17445_v19, %v2844_v18  ;;  %v2815_v25 = vld [vmem:[#allocation7 + $0xd0] sm:$0xff] }
 0x287   :  { %v2854_v15 = vshrl.u32 %v17405_v9, %v11480_v23  ;;  %vm2230_vm8 = vcmp.eq.s32.totalorder %v11416_v4, 0  ;;  %vm2233_vm9 = vcmp.eq.s32.totalorder %v11416_v4, 2  ;;  %v2858_v31 = vor.u32 %v2857_v60, %v2856_v0 }
 0x288   :  { %v11532_v11 = vmul.u32.u64.low %v11494_v54, %v2733_v22  ;;  %v11533_v42 = vmul.u32.u64.high %v11494_v54, %v2733_v22, %v11532_v11  ;;  %v2937_v58 = vand.u32 2139095040, %v11505_v57  ;;  %vm2380_vm10 = vcmp.lt.s32.totalorder %v17514_v47, 0 }
 0x289   :  { %v2560_v40 = vshll.u32 %v2559_v20, 23  ;;  %v2837_v18 = vand.u32 8388607, %v17242_v48  ;;  %v2861_v51 = vor.u32 %v2860_v41, %v2859_v5  ;;  %vm2865_vm11 = vcmp.lt.s32.totalorder %v11511_v14, 4 }
 0x28a   :  { %v2706_v43 = vshrl.u32 %v17401_v1, %v11411_v21  ;;  %v2727_v24 = vsel %vm2725_vm1, %v2715_v6, 2102212464  ;;  %v11546_v28 = vmul.u32.u64.low %v11494_v54, %v2737_v34  ;;  %v11547_v22 = vmul.u32.u64.high %v11494_v54, %v2737_v34, %v11546_v28 }
 0x28b   :  { %v2654_v0 = vclz %v7440_v7  ;;  %v11549_v60 = vor.u32 %v2848_v50, %v2847_v16  ;;  %v11551_v20 = vor.u32 %v2851_v8, %v2850_v37  ;;  %v2855_v44 = vor.u32 %v2854_v15, %v2853_v53 }
 0x28c   :  { %vm2862_vm7 = vcmp.lt.s32.totalorder %v11511_v14, 1  ;;  %vm2864_vm12 = vcmp.lt.s32.totalorder %v11511_v14, 3  ;;  %v2871_v21 = vsel %vm2865_vm11, %v2858_v31, 920167782  ;;  %v2938_v5 = vshrl.u32 %v2937_v58, 23 }
 0x28d   :  { %v2234_v6 = vxor.u32 2147483648, %v11489_v55  ;;  %v2561_v41 = vor.u32 4788187, %v2560_v40  ;;  %v2838_v48 = vor.u32 8388608, %v2837_v18  ;;  %v2875_v7 = vsel %vm2865_vm11, %v2861_v51, 1326507024  ;;  %v11560_v34 = vpop.eup %7963 }
 0x28e   :  { %vm2229_vm6 = vcmp.lt.s32.totalorder %v11416_v4, 2  ;;  %v2231_v16 = vxor.u32 2147483648, %v7962_v2  ;;  %v17515_v37 = vand.u32 2147483647, %v17514_v47  ;;  %v2462_v8 = vxor.u32 2147483648, %v11491_v17  ;;  %v11576_v58 = vpop.eup %7965 }
 0x28f   :  { %v2726_v53 = vsel %vm2722_vm2, %v2706_v43, %v11459_v30  ;;  %v2728_v15 = vsel %vm2724_vm4, %v11461_v45, %v2727_v24  ;;  %v2564_v40 = vcvt.s32.f32 %v11496_v3  ;;  %vm2863_vm14 = vcmp.lt.s32.totalorder %v11511_v14, 2  ;;  %v1906_v14 = vld [vmem:[#allocation5 + $0x90] sm:$0xff] }
 0x290   :  { %vm11565_vm13 = vcmp.le.f32.partialorder %v17515_v37, 0.7853982  ;;  %v2870_v18 = vsel %vm2862_vm7, %v11549_v60, %v11551_v20  ;;  %v2872_v51 = vsel %vm2864_vm12, %v2855_v44, %v2871_v21  ;;  %v7441_v28 = vadd.s32 4294967294, %v2654_v0 }
 0x291   :  { %v2874_v30 = vsel %vm2862_vm7, %v11551_v20, %v2855_v44  ;;  %v2876_v45 = vsel %vm2864_vm12, %v2858_v31, %v2875_v7  ;;  %v7452_v43 = vadd.s32 4294967169, %v2938_v5  ;;  %v2562_v3 = vand.u32 2147483647, %v2561_v41 }
 0x292   :  { %v2729_v24 = vsel %vm2723_vm3, %v2726_v53, %v2728_v15  ;;  %v2748_v37 = vadd.s32 1, %v11533_v42  ;;  %v11594_v59 = vshll.u32 %v2838_v48, 8  ;;  %v2133_v0 = vsel %vm2122_vm5, nan, %v11472_v63 }
 0x293   :  { %v11600_v21 = vand.u32 3, %v11475_v32  ;;  %vm2747_vm15 = vc.u32 %v11547_v22, %v11532_v11  ;;  %v2873_v31 = vsel %vm2863_vm14, %v2870_v18, %v2872_v51  ;;  %v2232_v13 = vsel %vm2230_vm8, %v11489_v55, %v2231_v16  ;;  %v1905_v32 = vld [vmem:[#allocation5 + $0x88] sm:$0xff] }
 0x294   :  { %v2235_v48 = vsel %vm2233_vm9, %v2234_v6, %v7962_v2  ;;  %v2464_v5 = vsub.s32 4, %v11167_v61  ;;  %v2877_v63 = vsel %vm2863_vm14, %v2874_v30, %v2876_v45  ;;  %vm2226_vm0 = vweird.f32 %v17502_v36  ;;  %v2824_v30 = vld [vmem:[#allocation8 + $0xd0] sm:$0xff] }
 0x295   :  { %v2463_v41 = vsel %vm2380_vm10, %v2462_v8, %v11491_v17  ;;  %vm7442_vm1 = vcmp.lt.s32.totalorder %v7441_v28, 0  ;;  %v2745_v7 = vmul.u32 %v11494_v54, %v2729_v24  ;;  %v2944_v55 = vadd.s32 1, %v7452_v43 }
 0x296   :  { %v2565_v16 = vmul.f32 %v2564_v40, %v2562_v3  ;;  %v2749_v2 = vsel %vm2747_vm15, %v2748_v37, %v11533_v42  ;;  %v11621_v6 = vmul.u32.u64.low %v11594_v59, %v2873_v31  ;;  %v11622_v53 = vmul.u32.u64.high %v11594_v59, %v2873_v31, %v11621_v6 }
 0x297   :  { %v17518_v15 = vand.u32 2147483647, %v10818_v49  ;;  %v2819_v17 = vmul.f32 %v11284_v52, %v2815_v25  ;;  %v2846_v54 = vshrl.u32 %v17401_v1, %v11480_v23  ;;  %v2343_v42 = vmul.f32 %v2133_v0, %v1905_v32 }
 0x298   :  { %v11635_v8 = vmul.u32.u64.low %v11594_v59, %v2877_v63  ;;  %v11636_v40 = vmul.u32.u64.high %v11594_v59, %v2877_v63, %v11635_v8  ;;  %vm2484_vm4 = vcmp.lt.s32.totalorder %v10818_v49, 0  ;;  %v11639_v51 = vsel %vm7442_vm1, 0, %v7441_v28  ;;  %v2816_v63 = vld [vmem:[#allocation7 + $0xd8] sm:$0xff] }
 0x299   :  { %vm11627_vm2 = vcmp.le.f32.partialorder %v17518_v15, 0.7853982  ;;  %v2867_v45 = vsel %vm2865_vm11, %v2855_v44, 2102212464  ;;  %vm2334_vm3 = vcmp.eq.s32.totalorder %v11600_v21, 0  ;;  %v2465_v43 = vsel %vm2380_vm10, %v2464_v5, %v11167_v61  ;;  %v2825_v8 = vld [vmem:[#allocation8 + $0xd8] sm:$0xff] }
 0x29a   :  { %v11647_v23 = vadd.s32 %v2749_v2, %v2745_v7  ;;  %vm2945_vm5 = vcmp.gt.s32.totalorder %v2944_v55, 0  ;;  %v2236_v3 = vsel %vm2229_vm6, %v2232_v13, %v2235_v48  ;;  %vm2333_vm8 = vcmp.lt.s32.totalorder %v11600_v21, 2 }
 0x29b   :  { %vm2337_vm9 = vcmp.eq.s32.totalorder %v11600_v21, 2  ;;  %v2466_v44 = vsel %vm11565_vm13, %v17514_v47, %v2463_v41  ;;  %v2566_v28 = vxor.u32 2147483648, %v2565_v16  ;;  %v2662_v24 = vsub.s32 4294967266, %v11639_v51 }
 0x29c   :  { %v11657_v37 = vadd.f32 %v2824_v30, %v2819_v17  ;;  %v2866_v61 = vsel %vm2862_vm7, %v2846_v54, %v11549_v60  ;;  %v2868_v4 = vsel %vm2864_vm12, %v11551_v20, %v2867_v45  ;;  %v2335_v0 = vxor.u32 2147483648, %v11576_v58 }
 0x29d   :  { %v2338_v31 = vxor.u32 2147483648, %v11560_v34  ;;  %v2467_v13 = vsel %vm11565_vm13, 0, %v2465_v43  ;;  %v2946_v48 = vsel %vm2945_vm5, %v2944_v55, 0  ;;  %7967 = vcosq.f32 %v2466_v44 }
 0x29e   :  { %17521 = vst [vmem:[#allocation16_spill] sm:$0xff] %v11657_v37  ;;  %v2568_v5 = vsub.s32 4, %v11291_v26  ;;  %v2642_v25 = vadd.s32 %v11310_v62, %v11319_v12  ;;  %v2751_v60 = vadd.s32 536870912, %v11647_v23  ;;  %v2567_v20 = vsel %vm2484_vm4, %v2566_v28, %v2565_v16  ;;  %v17522_v28 = vld [vmem:[#allocation27_spill] sm:$0xff] }
 0x29f   :  { %v2658_v32 = vsub.s32 32, %v11639_v51  ;;  %v2869_v41 = vsel %vm2863_vm14, %v2866_v61, %v2868_v4  ;;  %v2888_v50 = vadd.s32 1, %v11622_v53  ;;  %v2663_v7 = vadd.s32 127, %v2662_v24 }
 0x2a0   :  { %vm2887_vm10 = vc.u32 %v11636_v40, %v11621_v6  ;;  %v2948_v55 = vand.u32 31, %v2946_v48  ;;  %v3041_v62 = vand.u32 2139095040, %v11657_v37  ;;  %v2237_v12 = vsel %vm2226_vm0, nan, %v2236_v3 }
 0x2a1   :  { %vm2330_vm11 = vweird.f32 %v17508_v35  ;;  %7969 = vsinq.f32 %v2466_v44  ;;  %v2471_v16 = vadd.s32 3, %v2467_v13  ;;  %v2820_v2 = vmul.f32 %v11284_v52, %v2816_v63  ;;  %v17525_v35 = vld [vmem:[#allocation18_spill] sm:$0xff] }
 0x2a2   :  { %v2336_v15 = vsel %vm2334_vm3, %v11560_v34, %v2335_v0  ;;  %v2339_v17 = vsel %vm2337_vm9, %v2338_v31, %v11576_v58  ;;  %v11692_v54 = vshrl.u32 %v2751_v60, 30  ;;  %v2885_v36 = vmul.u32 %v11594_v59, %v2869_v41 }
 0x2a3   :  { %v2570_v30 = vsel %vm11627_vm2, %v10818_v49, %v2567_v20  ;;  %v2659_v52 = vshll.u32 %v11464_v27, %v11639_v51  ;;  %v2660_v45 = vshrl.u32 %v2642_v25, %v2658_v32  ;;  %v2889_v34 = vsel %vm2887_vm10, %v2888_v50, %v11622_v53 }
 0x2a4   :  { %v2569_v58 = vsel %vm2484_vm4, %v2568_v5, %v11291_v26  ;;  %v2664_v43 = vshll.u32 %v2663_v7, 23  ;;  %v11707_v3 = vsub.s32 32, %v2948_v55  ;;  %v3042_v59 = vshrl.u32 %v3041_v62, 23 }
 0x2a5   :  { %v11709_v44 = vmul.f32 %v2237_v12, %v1906_v14  ;;  %v11712_v24 = vadd.f32 %v2343_v42, %v17522_v28  ;;  %v11714_v27 = vand.u32 3, %v2471_v16  ;;  %v11716_v51 = vadd.f32 %v2825_v8, %v2820_v2 }
 0x2a6   :  { %v2340_v53 = vsel %vm2333_vm8, %v2336_v15, %v2339_v17  ;;  %7971 = vcosq.f32 %v2570_v30  ;;  %v2753_v61 = vshll.u32 %v11692_v54, 30  ;;  %v11721_v26 = vadd.s32 %v2889_v34, %v2885_v36 }
 0x2a7   :  { %17523 = vst [vmem:[#allocation24_spill] sm:$0xff] %v11712_v24  ;;  %v2571_v4 = vsel %vm11627_vm2, 0, %v2569_v58  ;;  %7973 = vsinq.f32 %v2570_v30  ;;  %v2661_v0 = vor.u32 %v2660_v45, %v2659_v52  ;;  %v17245_v42 = vand.u32 2147483647, %v11505_v57 }
 0x2a8   :  { %v2665_v31 = vor.u32 4788187, %v2664_v43  ;;  %v2960_v13 = vshll.u32 %v17405_v9, %v2948_v55  ;;  %v2961_v5 = vshrl.u32 %v17391_v38, %v11707_v3  ;;  %v7456_v21 = vadd.s32 4294967169, %v3042_v59 }
 0x2a9   :  { %v11729_v25 = vshrl.u32 %v2946_v48, 5  ;;  %v2963_v60 = vshll.u32 %v17391_v38, %v2948_v55  ;;  %v2964_v63 = vshrl.u32 %v17392_v56, %v11707_v3  ;;  %v3145_v18 = vand.u32 2139095040, %v11716_v51 }
 0x2aa   :  { %vm2474_vm7 = vcmp.eq.s32.totalorder %v11714_v27, 0  ;;  %vm2477_vm12 = vcmp.eq.s32.totalorder %v11714_v27, 2  ;;  %v11738_v20 = vsub.s32 %v11647_v23, %v2753_v61  ;;  %v2891_v32 = vadd.s32 536870912, %v11721_v26  ;;  %v7968_v50 = vpop.eup %7967 }
 0x2ab   :  { %v2951_v41 = vshll.u32 %v17401_v1, %v2948_v55  ;;  %v2954_v48 = vshll.u32 %v17393_v33, %v2948_v55  ;;  %v2952_v7 = vshrl.u32 %v17393_v33, %v11707_v3  ;;  %v2955_v62 = vshrl.u32 %v17445_v19, %v11707_v3 }
 0x2ac   :  { %v2957_v12 = vshll.u32 %v17445_v19, %v2948_v55  ;;  %v2958_v16 = vshrl.u32 %v17405_v9, %v11707_v3  ;;  %v2341_v23 = vsel %vm2330_vm11, nan, %v2340_v53  ;;  %v2575_v2 = vadd.s32 3, %v2571_v4 }
 0x2ad   :  { %v2962_v14 = vor.u32 %v2961_v5, %v2960_v13  ;;  %v3048_v15 = vadd.s32 1, %v7456_v21  ;;  %v2941_v17 = vand.u32 8388607, %v17245_v42  ;;  %v2965_v8 = vor.u32 %v2964_v63, %v2963_v60 }
 0x2ae   :  { %vm2969_vm6 = vcmp.lt.s32.totalorder %v11729_v25, 4  ;;  %v3146_v36 = vshrl.u32 %v3145_v18, 23  ;;  %v7970_v30 = vpop.eup %7969  ;;  %v2666_v52 = vand.u32 2147483647, %v2665_v31  ;;  %v2668_v45 = vcvt.s32.f32 %v2661_v0  ;;  %v1907_v18 = vld [vmem:[#allocation5 + $0x98] sm:$0xff] }
 0x2af   :  { %v2756_v55 = vsub.s32 0, %v11738_v20  ;;  %v11756_v34 = vshrl.u32 %v2891_v32, 30  ;;  %v2478_v58 = vxor.u32 2147483648, %v7968_v50  ;;  %vm2588_vm13 = vcmp.lt.s32.totalorder %v17525_v35, 0 }
 0x2b0   :  { %v2953_v43 = vor.u32 %v2952_v7, %v2951_v41  ;;  %v2956_v59 = vor.u32 %v2955_v62, %v2954_v48  ;;  %v2959_v28 = vor.u32 %v2958_v16, %v2957_v12  ;;  %vm2966_vm14 = vcmp.lt.s32.totalorder %v11729_v25, 1 }
 0x2b1   :  { %17524 = vst [vmem:[#allocation17_spill] sm:$0xff] %v11756_v34  ;;  %vm2968_vm15 = vcmp.lt.s32.totalorder %v11729_v25, 3  ;;  %v2975_v53 = vsel %vm2969_vm6, %v2962_v14, 920167782  ;;  %vm3049_vm0 = vcmp.gt.s32.totalorder %v3048_v15, 0  ;;  %vm2470_vm1 = vweird.f32 %v17514_v47 }
 0x2b2   :  { %v2475_v61 = vxor.u32 2147483648, %v7970_v30  ;;  %v2942_v4 = vor.u32 8388608, %v2941_v17  ;;  %v2979_v0 = vsel %vm2969_vm6, %v2965_v8, 1326507024  ;;  %v7460_v31 = vadd.s32 4294967169, %v3146_v36 }
 0x2b3   :  { %v11766_v13 = vand.u32 3, %v2575_v2  ;;  %v2669_v5 = vmul.f32 %v2668_v45, %v2666_v52  ;;  %v7444_v21 = vmin.u32 %v2756_v55, %v11738_v20  ;;  %v2893_v60 = vshll.u32 %v11756_v34, 30  ;;  %v7972_v63 = vpop.eup %7971 }
 0x2b4   :  { %v17526_v32 = vand.u32 2147483647, %v17525_v35  ;;  %vm2967_vm4 = vcmp.lt.s32.totalorder %v11729_v25, 2  ;;  %v2974_v48 = vsel %vm2966_vm14, %v2953_v43, %v2956_v59  ;;  %v2976_v7 = vsel %vm2968_vm15, %v2959_v28, %v2975_v53  ;;  %v7974_v12 = vpop.eup %7973 }
 0x2b5   :  { %v3050_v62 = vsel %vm3049_vm0, %v3048_v15, 0  ;;  %vm2473_vm3 = vcmp.lt.s32.totalorder %v11714_v27, 2  ;;  %v2672_v16 = vsub.s32 4, %v11433_v10  ;;  %v2978_v2 = vsel %vm2966_vm14, %v2956_v59, %v2959_v28 }
 0x2b6   :  { %vm11772_vm2 = vcmp.le.f32.partialorder %v17526_v32, 0.7853982  ;;  %v2980_v17 = vsel %vm2968_vm15, %v2962_v14, %v2979_v0  ;;  %v2476_v8 = vsel %vm2474_vm7, %v7968_v50, %v2475_v61  ;;  %v2479_v36 = vsel %vm2477_vm12, %v2478_v58, %v7970_v30 }
 0x2b7   :  { %v11792_v52 = vshll.u32 %v2942_v4, 8  ;;  %v3152_v15 = vadd.s32 1, %v7460_v31  ;;  %v11794_v45 = vmul.f32 %v2341_v23, %v1907_v18  ;;  %vm2581_vm5 = vcmp.eq.s32.totalorder %v11766_v13, 2 }
 0x2b8   :  { %v2977_v55 = vsel %vm2967_vm4, %v2974_v48, %v2976_v7  ;;  %v3052_v53 = vand.u32 31, %v3050_v62  ;;  %v2670_v32 = vxor.u32 2147483648, %v2669_v5  ;;  %v2758_v42 = vclz %v7444_v21 }
 0x2b9   :  { %v11800_v14 = vsub.s32 %v11721_v26, %v2893_v60  ;;  %v2981_v50 = vsel %vm2967_vm4, %v2978_v2, %v2980_v17  ;;  %v2480_v30 = vsel %vm2473_vm3, %v2476_v8, %v2479_v36  ;;  %v2579_v58 = vxor.u32 2147483648, %v7974_v12 }
 0x2ba   :  { %v2582_v23 = vxor.u32 2147483648, %v7972_v63  ;;  %v11809_v61 = vsel %vm2588_vm13, %v2672_v16, %v11433_v10  ;;  %v2950_v4 = vshrl.u32 %v17401_v1, %v11707_v3  ;;  %vm3153_vm8 = vcmp.gt.s32.totalorder %v3152_v15, 0 }
 0x2bb   :  { %v11814_v0 = vmul.u32.u64.low %v11792_v52, %v2977_v55  ;;  %v11815_v26 = vmul.u32.u64.high %v11792_v52, %v2977_v55, %v11814_v0  ;;  %v2971_v27 = vsel %vm2969_vm6, %v2959_v28, 2102212464  ;;  %v11824_v60 = vsub.s32 32, %v3052_v53 }
 0x2bc   :  { %v11821_v31 = vmul.u32.u64.low %v11792_v52, %v2981_v50  ;;  %v11822_v21 = vmul.u32.u64.high %v11792_v52, %v2981_v50, %v11821_v31  ;;  %vm2578_vm9 = vcmp.eq.s32.totalorder %v11766_v13, 0  ;;  %v2671_v10 = vsel %vm2588_vm13, %v2670_v32, %v2669_v5  ;;  %v11869_v32 = vld [vmem:[#allocation2 + $0x7] ss:$0 sm:$0xff]  ;;  %v3265_v50 = vld [vmem:[#allocation7 + $0xe0] sm:$0xff] }
 0x2bd   :  { %17529 = vst [vmem:[#allocation23_spill] sm:$0xff] %v11814_v0  ;;  %v7445_v3 = vadd.s32 4294967294, %v2758_v42  ;;  %v2896_v18 = vsub.s32 0, %v11800_v14  ;;  %v11832_v48 = vsel %vm2470_vm1, nan, %v2480_v30  ;;  %v17246_v7 = vand.u32 2147483647, %v11657_v37 }
 0x2be   :  { %17530 = vst [vmem:[#allocation19_spill] sm:$0xff] %v11822_v21  ;;  %v3154_v16 = vsel %vm3153_vm8, %v3152_v15, 0  ;;  %v11840_v2 = vsel %vm2581_vm5, %v2582_v23, %v7974_v12  ;;  %v11844_v42 = vadd.s32 %v11532_v11, %v11547_v22  ;;  %v2970_v47 = vsel %vm2966_vm14, %v2950_v4, %v2953_v43  ;;  %v3274_v37 = vld [vmem:[#allocation8 + $0xe0] sm:$0xff] }
 0x2bf   :  { %v2972_v5 = vsel %vm2968_vm15, %v2956_v59, %v2971_v27  ;;  %v11850_v17 = vsel %vm2578_vm9, %v7972_v63, %v2579_v58  ;;  %v11855_v8 = vsel %vm11772_vm2, %v17525_v35, %v2671_v10  ;;  %v3064_v12 = vshll.u32 %v17405_v9, %v3052_v53 }
 0x2c0   :  { %v3065_v36 = vshrl.u32 %v17391_v38, %v11824_v60  ;;  %vm7446_vm10 = vcmp.lt.s32.totalorder %v7445_v3, 0  ;;  %v7449_v11 = vmin.u32 %v2896_v18, %v11800_v14  ;;  %v11861_v22 = vshrl.u32 %v3050_v62, 5 }
 0x2c1   :  { %v3156_v43 = vand.u32 31, %v3154_v16  ;;  %v2973_v59 = vsel %vm2967_vm4, %v2970_v47, %v2972_v5  ;;  %v3045_v63 = vand.u32 8388607, %v17246_v7  ;;  %v3055_v15 = vshll.u32 %v17401_v1, %v3052_v53 }
 0x2c2   :  { %v3058_v55 = vshll.u32 %v17393_v33, %v3052_v53  ;;  %v3056_v30 = vshrl.u32 %v17393_v33, %v11824_v60  ;;  %v3059_v62 = vshrl.u32 %v17445_v19, %v11824_v60  ;;  %v3061_v58 = vshll.u32 %v17445_v19, %v3052_v53 }
 0x2c3   :  { %v3062_v25 = vshrl.u32 %v17405_v9, %v11824_v60  ;;  %vm2991_vm11 = vc.u32 %v11822_v21, %v11814_v0  ;;  %v2992_v23 = vadd.s32 1, %v11815_v26  ;;  %v3066_v4 = vor.u32 %v3065_v36, %v3064_v12 }
 0x2c4   :  { %v3067_v27 = vshll.u32 %v17391_v38, %v3052_v53  ;;  %v3068_v31 = vshrl.u32 %v17392_v56, %v11824_v60  ;;  %vm3073_vm7 = vcmp.lt.s32.totalorder %v11861_v22, 4  ;;  %v11885_v10 = vsub.s32 32, %v3156_v43 }
 0x2c5   :  { %v3269_v18 = vmul.f32 %v11869_v32, %v3265_v50  ;;  %v11889_v47 = vsel %vm7446_vm10, 0, %v7445_v3  ;;  %v2898_v5 = vclz %v7449_v11  ;;  %v2989_v7 = vmul.u32 %v11792_v52, %v2973_v59 }
 0x2c6   :  { %v3046_v28 = vor.u32 8388608, %v3045_v63  ;;  %v11892_v12 = vor.u32 %v3056_v30, %v3055_v15  ;;  %v11894_v53 = vor.u32 %v3059_v62, %v3058_v55  ;;  %v11896_v36 = vor.u32 %v3062_v25, %v3061_v58 }
 0x2c7   :  { %v2993_v50 = vsel %vm2991_vm11, %v2992_v23, %v11815_v26  ;;  %vm3070_vm12 = vcmp.lt.s32.totalorder %v11861_v22, 1  ;;  %vm3072_vm6 = vcmp.lt.s32.totalorder %v11861_v22, 3  ;;  %v3079_v52 = vsel %vm3073_vm7, %v3066_v4, 920167782 }
 0x2c8   :  { %v3069_v3 = vor.u32 %v3068_v31, %v3067_v27  ;;  %v3168_v11 = vshll.u32 %v17405_v9, %v3156_v43  ;;  %v3169_v59 = vshrl.u32 %v17391_v38, %v11885_v10  ;;  %v11910_v63 = vadd.f32 %v3274_v37, %v3269_v18 }
 0x2c9   :  { %vm3071_vm13 = vcmp.lt.s32.totalorder %v11861_v22, 2  ;;  %v11913_v15 = vshrl.u32 %v3154_v16, 5  ;;  %v3171_v26 = vshll.u32 %v17391_v38, %v3156_v43  ;;  %v3172_v55 = vshrl.u32 %v17392_v56, %v11885_v10 }
 0x2ca   :  { %17531 = vst [vmem:[#allocation21_spill] sm:$0xff] %v11910_v63  ;;  %v3078_v30 = vsel %vm3070_vm12, %v11892_v12, %v11894_v53  ;;  %v3080_v62 = vsel %vm3072_vm6, %v11896_v36, %v3079_v52  ;;  %v3159_v37 = vshll.u32 %v17401_v1, %v3156_v43  ;;  %v3162_v58 = vshll.u32 %v17393_v33, %v3156_v43 }
 0x2cb   :  { %v3160_v16 = vshrl.u32 %v17393_v33, %v11885_v10  ;;  %v3163_v25 = vshrl.u32 %v17445_v19, %v11885_v10  ;;  %v3165_v23 = vshll.u32 %v17445_v19, %v3156_v43  ;;  %v3166_v27 = vshrl.u32 %v17405_v9, %v11885_v10 }
 0x2cc   :  { %v2766_v31 = vsub.s32 4294967266, %v11889_v47  ;;  %v3083_v18 = vsel %vm3073_vm7, %v3069_v3, 1326507024  ;;  %v3170_v52 = vor.u32 %v3169_v59, %v3168_v11  ;;  %v3285_v57 = vand.u32 2139095040, %v11910_v63 }
 0x2cd   :  { %v7450_v0 = vadd.s32 4294967294, %v2898_v5  ;;  %v17532_v21 = vand.u32 2147483647, %v11716_v51  ;;  %v3173_v24 = vor.u32 %v3172_v55, %v3171_v26  ;;  %vm3177_vm14 = vcmp.lt.s32.totalorder %v11913_v15, 4 }
 0x2ce   :  { %v11941_v56 = vadd.s32 %v2993_v50, %v2989_v7  ;;  %v3081_v43 = vsel %vm3071_vm13, %v3078_v30, %v3080_v62  ;;  %v3082_v3 = vsel %vm3070_vm12, %v11894_v53, %v11896_v36  ;;  %v11949_v11 = vshll.u32 %v3046_v28, 8 }
 0x2cf   :  { %v3149_v34 = vand.u32 8388607, %v17532_v21  ;;  %v3084_v5 = vsel %vm3072_vm6, %v3066_v4, %v3083_v18  ;;  %v11953_v59 = vor.u32 %v3160_v16, %v3159_v37  ;;  %v11955_v21 = vor.u32 %v3163_v25, %v3162_v58  ;;  %v3266_v16 = vld [vmem:[#allocation7 + $0xe8] sm:$0xff] }
 0x2d0   :  { %v3167_v26 = vor.u32 %v3166_v27, %v3165_v23  ;;  %vm3174_vm15 = vcmp.lt.s32.totalorder %v11913_v15, 1  ;;  %vm3176_vm0 = vcmp.lt.s32.totalorder %v11913_v15, 3  ;;  %v3183_v7 = vsel %vm3177_vm14, %v3170_v52, 920167782 }
 0x2d1   :  { %v3286_v50 = vshrl.u32 %v3285_v57, 23  ;;  %v2762_v55 = vsub.s32 32, %v11889_v47  ;;  %v2767_v28 = vadd.s32 127, %v2766_v31  ;;  %v3150_v30 = vor.u32 8388608, %v3149_v34 }
 0x2d2   :  { %v3187_v4 = vsel %vm3177_vm14, %v3173_v24, 1326507024  ;;  %vm7451_vm1 = vcmp.lt.s32.totalorder %v7450_v0, 0  ;;  %v3085_v62 = vsel %vm3071_vm13, %v3082_v3, %v3084_v5  ;;  %v2995_v25 = vadd.s32 536870912, %v11941_v56 }
 0x2d3   :  { %v11967_v37 = vmul.u32.u64.low %v11949_v11, %v3081_v43  ;;  %v11968_v58 = vmul.u32.u64.high %v11949_v11, %v3081_v43, %v11967_v37  ;;  %vm3175_vm4 = vcmp.lt.s32.totalorder %v11913_v15, 2  ;;  %v3182_v57 = vsel %vm3174_vm15, %v11953_v59, %v11955_v21 }
 0x2d4   :  { %v3184_v24 = vsel %vm3176_vm0, %v3167_v26, %v3183_v7  ;;  %vm2577_vm3 = vcmp.lt.s32.totalorder %v11766_v13, 2  ;;  %v3054_v34 = vshrl.u32 %v17401_v1, %v11824_v60  ;;  %v3186_v23 = vsel %vm3174_vm15, %v11955_v21, %v3167_v26 }
 0x2d5   :  { %v3188_v27 = vsel %vm3176_vm0, %v3170_v52, %v3187_v4  ;;  %v7465_v31 = vadd.s32 4294967169, %v3286_v50  ;;  %v11988_v18 = vmul.u32.u64.low %v11949_v11, %v3085_v62  ;;  %v11989_v43 = vmul.u32.u64.high %v11949_v11, %v3085_v62, %v11988_v18  ;;  %v3275_v50 = vld [vmem:[#allocation8 + $0xe8] sm:$0xff] }
 0x2d6   :  { %v11991_v3 = vshll.u32 %v3150_v30, 8  ;;  %v3270_v5 = vmul.f32 %v11869_v32, %v3266_v16  ;;  %7975 = vcosq.f32 %v11855_v8  ;;  %v2763_v60 = vshll.u32 %v11738_v20, %v11889_v47 }
 0x2d7   :  { %v3075_v7 = vsel %vm3073_vm7, %v11896_v36, 2102212464  ;;  %v3185_v52 = vsel %vm3175_vm4, %v3182_v57, %v3184_v24  ;;  %vm2692_vm5 = vcmp.lt.s32.totalorder %v11241_v39, 0  ;;  %v2764_v30 = vshrl.u32 %v11844_v42, %v2762_v55 }
 0x2d8   :  { %v12005_v4 = vsel %vm7451_vm1, 0, %v7450_v0  ;;  %v12007_v62 = vshrl.u32 %v2995_v25, 30  ;;  %v3189_v20 = vsel %vm3175_vm4, %v3186_v23, %v3188_v27  ;;  %7977 = vsinq.f32 %v11855_v8 }
 0x2d9   :  { %v2768_v47 = vshll.u32 %v2767_v28, 23  ;;  %v3074_v36 = vsel %vm3070_vm12, %v3054_v34, %v11892_v12  ;;  %v3292_v16 = vadd.s32 1, %v7465_v31  ;;  %vm2574_vm8 = vweird.f32 %v10818_v49 }
 0x2da   :  { %v3076_v0 = vsel %vm3072_vm6, %v11894_v53, %v3075_v7  ;;  %v12020_v42 = vmul.u32.u64.low %v11991_v3, %v3185_v52  ;;  %v12021_v55 = vmul.u32.u64.high %v11991_v3, %v3185_v52, %v12020_v42  ;;  %v12024_v25 = vadd.f32 %v3275_v50, %v3270_v5 }
 0x2db   :  { %v2906_v8 = vsub.s32 4294967266, %v12005_v4  ;;  %v3158_v28 = vshrl.u32 %v17401_v1, %v11885_v10  ;;  %v12030_v12 = vmul.u32.u64.low %v11991_v3, %v3189_v20  ;;  %v12031_v57 = vmul.u32.u64.high %v11991_v3, %v3189_v20, %v12030_v12 }
 0x2dc   :  { %v2765_v24 = vor.u32 %v2764_v30, %v2763_v60  ;;  %v2776_v34 = vsub.s32 4, %v11692_v54  ;;  %v2997_v53 = vshll.u32 %v12007_v62, 30  ;;  %v3179_v23 = vsel %vm3177_vm14, %v3167_v26, 2102212464 }
 0x2dd   :  { %v2769_v27 = vor.u32 4788187, %v2768_v47  ;;  %v3077_v31 = vsel %vm3071_vm13, %v3074_v36, %v3076_v0  ;;  %v3096_v18 = vadd.s32 1, %v11968_v58  ;;  %vm3293_vm9 = vcmp.gt.s32.totalorder %v3292_v16, 0 }
 0x2de   :  { %v17533_v10 = vsel %vm11772_vm2, 0, %v11809_v61  ;;  %v2886_v60 = vadd.s32 %v11621_v6, %v11636_v40  ;;  %vm3095_vm10 = vc.u32 %v11989_v43, %v11967_v37  ;;  %v3389_v26 = vand.u32 2139095040, %v12024_v25 }
 0x2df   :  { %v2679_v5 = vadd.s32 3, %v17533_v10  ;;  %v2902_v7 = vsub.s32 32, %v12005_v4  ;;  %v2907_v22 = vadd.s32 127, %v2906_v8  ;;  %v3178_v52 = vsel %vm3174_vm15, %v3158_v28, %v11953_v59 }
 0x2e0   :  { %v3180_v41 = vsel %vm3176_vm0, %v11955_v21, %v3179_v23  ;;  %v2584_v6 = vsel %vm2577_vm3, %v11850_v17, %v11840_v2  ;;  %v12061_v40 = vsub.s32 %v11941_v56, %v2997_v53  ;;  %v3093_v61 = vmul.u32 %v11949_v11, %v3077_v31  ;;  %v2356_v21 = vld [vmem:[#allocation5 + $0xa0] sm:$0xff]  ;;  %v2357_v53 = vld [vmem:[#allocation5 + $0xa8] sm:$0xff] }
 0x2e1   :  { %v3294_v50 = vsel %vm3293_vm9, %v3292_v16, 0  ;;  %v2770_v30 = vand.u32 2147483647, %v2769_v27  ;;  %v2772_v20 = vcvt.s32.f32 %v2765_v24  ;;  %v2777_v59 = vsel %vm2692_vm5, %v2776_v34, %v11692_v54  ;;  %v17534_v54 = vld [vmem:[#allocation25_spill] sm:$0xff] }
 0x2e2   :  { %v3097_v47 = vsel %vm3095_vm10, %v3096_v18, %v11968_v58  ;;  %v2903_v36 = vshll.u32 %v11800_v14, %v12005_v4  ;;  %v3181_v13 = vsel %vm3175_vm4, %v3178_v52, %v3180_v41  ;;  %v3200_v56 = vadd.s32 1, %v12021_v55 }
 0x2e3   :  { %v3390_v2 = vshrl.u32 %v3389_v26, 23  ;;  %v2904_v17 = vshrl.u32 %v2886_v60, %v2902_v7  ;;  %v2908_v11 = vshll.u32 %v2907_v22, 23  ;;  %vm3199_vm2 = vc.u32 %v12031_v57, %v12020_v42  ;;  %v7976_v0 = vpop.eup %7975 }
 0x2e4   :  { %v3296_v16 = vand.u32 31, %v3294_v50  ;;  %v12077_v58 = vadd.f32 %v11709_v44, %v17534_v54  ;;  %v12079_v8 = vand.u32 3, %v2679_v5  ;;  %v3000_v14 = vsub.s32 0, %v12061_v40 }
 0x2e5   :  { %v12082_v15 = vadd.s32 %v3097_v47, %v3093_v61  ;;  %v2585_v4 = vsel %vm2574_vm8, nan, %v2584_v6  ;;  %v17535_v28 = vand.u32 2147483647, %v11241_v39  ;;  %v2794_v24 = vmul.f32 %v11832_v48, %v2356_v21  ;;  %v7978_v34 = vpop.eup %7977 }
 0x2e6   :  { %v3197_v44 = vmul.u32 %v11991_v3, %v3181_v13  ;;  %v2773_v23 = vmul.f32 %v2772_v20, %v2770_v30  ;;  %v3201_v31 = vsel %vm3199_vm2, %v3200_v56, %v12021_v55  ;;  %v7469_v49 = vadd.s32 4294967169, %v3390_v2 }
 0x2e7   :  { %vm12088_vm11 = vcmp.le.f32.partialorder %v17535_v28, 0.7853982  ;;  %v12099_v18 = vadd.f32 %v11794_v45, %v11414_v46  ;;  %v2905_v10 = vor.u32 %v2904_v17, %v2903_v36  ;;  %v2909_v5 = vor.u32 4788187, %v2908_v11 }
 0x2e8   :  { %v2779_v27 = vsel %vm12088_vm11, 0, %v2777_v59  ;;  %v12101_v60 = vsub.s32 32, %v3296_v16  ;;  %vm2682_vm7 = vcmp.eq.s32.totalorder %v12079_v8, 0  ;;  %vm2685_vm12 = vcmp.eq.s32.totalorder %v12079_v8, 2 }
 0x2e9   :  { %v7453_v48 = vmin.u32 %v3000_v14, %v12061_v40  ;;  %v3099_v3 = vadd.s32 536870912, %v12082_v15  ;;  %v2783_v26 = vadd.s32 3, %v2779_v27  ;;  %v2795_v7 = vmul.f32 %v2585_v4, %v2357_v53 }
 0x2ea   :  { %v12108_v55 = vadd.f32 %v2794_v24, %v11427_v29  ;;  %v12110_v22 = vadd.s32 %v3201_v31, %v3197_v44  ;;  %vm2681_vm6 = vcmp.lt.s32.totalorder %v12079_v8, 2  ;;  %v2683_v46 = vxor.u32 2147483648, %v7978_v34 }
 0x2eb   :  { %v2686_v45 = vxor.u32 2147483648, %v7976_v0  ;;  %v2774_v52 = vxor.u32 2147483648, %v2773_v23  ;;  %v3396_v41 = vadd.s32 1, %v7469_v49  ;;  %v2910_v6 = vand.u32 2147483647, %v2909_v5 }
 0x2ec   :  { %17538 = vst [vmem:[#allocation22_spill] sm:$0xff] %v12108_v55  ;;  %v2912_v61 = vcvt.s32.f32 %v2905_v10  ;;  %v3308_v30 = vshll.u32 %v17405_v9, %v3296_v16  ;;  %v3309_v20 = vshrl.u32 %v17391_v38, %v12101_v60  ;;  %v3002_v59 = vclz %v7453_v48  ;;  %v17550_v55 = vld [vmem:[#allocation23_spill] sm:$0xff] }
 0x2ed   :  { %v12116_v47 = vshrl.u32 %v3099_v3, 30  ;;  %v17256_v29 = vand.u32 2147483647, %v11910_v63  ;;  %v12119_v21 = vshrl.u32 %v3294_v50, 5  ;;  %vm2678_vm13 = vweird.f32 %v17525_v35  ;;  %v3267_v3 = vld [vmem:[#allocation7 + $0xf0] sm:$0xff] }
 0x2ee   :  { %v3203_v36 = vadd.s32 536870912, %v12110_v22  ;;  %v3299_v13 = vshll.u32 %v17401_v1, %v3296_v16  ;;  %v3300_v56 = vshrl.u32 %v17393_v33, %v12101_v60  ;;  %v3302_v2 = vshll.u32 %v17393_v33, %v3296_v16 }
 0x2ef   :  { %v3303_v17 = vshrl.u32 %v17445_v19, %v12101_v60  ;;  %v3305_v11 = vshll.u32 %v17445_v19, %v3296_v16  ;;  %v3306_v50 = vshrl.u32 %v17405_v9, %v12101_v60  ;;  %vm3397_vm14 = vcmp.gt.s32.totalorder %v3396_v41, 0 }
 0x2f0   :  { %v2687_v54 = vsel %vm2685_vm12, %v2686_v45, %v7978_v34  ;;  %v3310_v14 = vor.u32 %v3309_v20, %v3308_v30  ;;  %v3311_v4 = vshll.u32 %v17391_v38, %v3296_v16  ;;  %v17539_v28 = vmov 1326507024   ;;  %v17541_v45 = vld [vmem:[#allocation24_spill] sm:$0xff] }
 0x2f1   :  { %v3312_v24 = vshrl.u32 %v17539_v28, %v12101_v60  ;;  %v2684_v44 = vsel %vm2682_vm7, %v7976_v0, %v2683_v46  ;;  %v2775_v53 = vsel %vm2692_vm5, %v2774_v52, %v2773_v23  ;;  %v3289_v27 = vand.u32 8388607, %v17256_v29 }
 0x2f2   :  { %vm3317_vm15 = vcmp.lt.s32.totalorder %v12119_v21, 4  ;;  %v2913_v31 = vmul.f32 %v2912_v61, %v2910_v6  ;;  %v7454_v49 = vadd.s32 4294967294, %v3002_v59  ;;  %v3101_v34 = vshll.u32 %v12116_v47, 30 }
 0x2f3   :  { %v3398_v10 = vsel %vm3397_vm14, %v3396_v41, 0  ;;  %v12145_v16 = vshrl.u32 %v3203_v36, 30  ;;  %v12147_v5 = vor.u32 %v3300_v56, %v3299_v13  ;;  %v12149_v48 = vor.u32 %v3303_v17, %v3302_v2  ;;  %v17543_v41 = vld [vmem:[#allocation20_spill] sm:$0xff] }
 0x2f4   :  { %v3307_v0 = vor.u32 %v3306_v50, %v3305_v11  ;;  %v3313_v46 = vor.u32 %v3312_v24, %v3311_v4  ;;  %vm3314_vm0 = vcmp.lt.s32.totalorder %v12119_v21, 1  ;;  %vm3316_vm1 = vcmp.lt.s32.totalorder %v12119_v21, 3  ;;  %v17547_v24 = vld [vmem:[#allocation17_spill] sm:$0xff] }
 0x2f5   :  { %17540 = vst [vmem:[#allocation29_spill] sm:$0xff] %v12145_v16  ;;  %v3323_v23 = vsel %vm3317_vm15, %v3310_v14, 920167782  ;;  %v12156_v52 = vadd.f32 %v2795_v7, %v17541_v45  ;;  %vm2832_vm4 = vcmp.lt.s32.totalorder %v17543_v41, 0  ;;  %v3290_v6 = vor.u32 8388608, %v3289_v27 }
 0x2f6   :  { %v3400_v61 = vand.u32 31, %v3398_v10  ;;  %v2688_v30 = vsel %vm2681_vm6, %v2684_v44, %v2687_v54  ;;  %v2778_v20 = vsel %vm12088_vm11, %v11241_v39, %v2775_v53  ;;  %v12164_v59 = vand.u32 3, %v2783_v26  ;;  %v3276_v26 = vld [vmem:[#allocation8 + $0xf0] sm:$0xff] }
 0x2f7   :  { %17542 = vst [vmem:[#allocation28_spill] sm:$0xff] %v12156_v52  ;;  %v2914_v36 = vxor.u32 2147483648, %v2913_v31  ;;  %v3271_v13 = vmul.f32 %v11869_v32, %v3267_v3  ;;  %vm3315_vm3 = vcmp.lt.s32.totalorder %v12119_v21, 2  ;;  %v3322_v7 = vsel %vm3314_vm0, %v12147_v5, %v12149_v48 }
 0x2f8   :  { %v3324_v8 = vsel %vm3316_vm1, %v3307_v0, %v3323_v23  ;;  %vm7455_vm5 = vcmp.lt.s32.totalorder %v7454_v49, 0  ;;  %v12175_v56 = vsub.s32 %v12082_v15, %v3101_v34  ;;  %v3205_v12 = vshll.u32 %v12145_v16, 30 }
 0x2f9   :  { %v3327_v2 = vsel %vm3317_vm15, %v3313_v46, 1326507024  ;;  %v12182_v17 = vsel %vm2678_vm13, nan, %v2688_v30  ;;  %7979 = vcosq.f32 %v2778_v20  ;;  %v12184_v11 = vshll.u32 %v3290_v6, 8 }
 0x2fa   :  { %v12186_v50 = vsub.s32 32, %v3400_v61  ;;  %7981 = vsinq.f32 %v2778_v20  ;;  %v17544_v54 = vand.u32 2147483647, %v17543_v41  ;;  %v2915_v4 = vsel %vm2832_vm4, %v2914_v36, %v2913_v31 }
 0x2fb   :  { %v3325_v35 = vsel %vm3315_vm3, %v3322_v7, %v3324_v8  ;;  %v12199_v53 = vsel %vm7455_vm5, 0, %v7454_v49  ;;  %v12201_v27 = vadd.f32 %v3276_v26, %v3271_v13  ;;  %v3326_v34 = vsel %vm3314_vm0, %v12149_v48, %v3307_v0 }
 0x2fc   :  { %vm12190_vm8 = vcmp.le.f32.partialorder %v17544_v54, 0.7853982  ;;  %v3328_v3 = vsel %vm3316_vm1, %v3310_v14, %v3327_v2  ;;  %v3104_v46 = vsub.s32 0, %v12175_v56  ;;  %v12210_v31 = vsub.s32 %v12110_v22, %v3205_v12 }
 0x2fd   :  { %17548 = vst [vmem:[#allocation27_spill] sm:$0xff] %v12201_v27  ;;  %v3298_v23 = vshrl.u32 %v17401_v1, %v12101_v60  ;;  %v17261_v49 = vand.u32 2147483647, %v12024_v25  ;;  %v12216_v45 = vmul.u32.u64.low %v12184_v11, %v3325_v35  ;;  %v12217_v6 = vmul.u32.u64.high %v12184_v11, %v3325_v35, %v12216_v45 }
 0x2fe   :  { %v3412_v30 = vshll.u32 %v17405_v9, %v3400_v61  ;;  %v3413_v14 = vshrl.u32 %v17391_v38, %v12186_v50  ;;  %v3329_v20 = vsel %vm3315_vm3, %v3326_v34, %v3328_v3  ;;  %v12225_v22 = vshrl.u32 %v3398_v10, 5 }
 0x2ff   :  { %v3415_v36 = vshll.u32 %v17391_v38, %v3400_v61  ;;  %v3416_v60 = vshrl.u32 %v17539_v28, %v12186_v50  ;;  %v3319_v13 = vsel %vm3317_vm15, %v3307_v0, 2102212464  ;;  %v3403_v7 = vshll.u32 %v17401_v1, %v3400_v61 }
 0x300   :  { %v3404_v8 = vshrl.u32 %v17393_v33, %v12186_v50  ;;  %v3406_v12 = vshll.u32 %v17393_v33, %v3400_v61  ;;  %v3407_v26 = vshrl.u32 %v17445_v19, %v12186_v50  ;;  %v3409_v10 = vshll.u32 %v17445_v19, %v3400_v61  ;;  %v17549_v61 = vld [vmem:[#allocation19_spill] sm:$0xff] }
 0x301   :  { %v3410_v2 = vshrl.u32 %v17405_v9, %v12186_v50  ;;  %v3493_v54 = vand.u32 2139095040, %v12201_v27  ;;  %v7457_v35 = vmin.u32 %v3104_v46, %v12175_v56  ;;  %v3414_v3 = vor.u32 %v3413_v14, %v3412_v30 }
 0x302   :  { %v12244_v0 = vmul.u32.u64.low %v12184_v11, %v3329_v20  ;;  %v12245_v34 = vmul.u32.u64.high %v12184_v11, %v3329_v20, %v12244_v0  ;;  %v3208_v29 = vsub.s32 0, %v12210_v31  ;;  %v3393_v44 = vand.u32 8388607, %v17261_v49 }
 0x303   :  { %v3417_v52 = vor.u32 %v3416_v60, %v3415_v36  ;;  %vm3421_vm9 = vcmp.lt.s32.totalorder %v12225_v22, 4  ;;  %v2990_v63 = vadd.s32 %v17550_v55, %v17549_v61  ;;  %v3010_v16 = vsub.s32 4294967266, %v12199_v53  ;;  %v3268_v0 = vld [vmem:[#allocation7 + $0xf8] sm:$0xff] }
 0x304   :  { %v3318_v46 = vsel %vm3314_vm0, %v3298_v23, %v12147_v5  ;;  %v3320_v30 = vsel %vm3316_vm1, %v12149_v48, %v3319_v13  ;;  %v12260_v14 = vor.u32 %v3404_v8, %v3403_v7  ;;  %v12262_v20 = vor.u32 %v3407_v26, %v3406_v12 }
 0x305   :  { %v3411_v36 = vor.u32 %v3410_v2, %v3409_v10  ;;  %v3494_v60 = vshrl.u32 %v3493_v54, 23  ;;  %v2918_v55 = vsel %vm12190_vm8, %v17543_v41, %v2915_v4  ;;  %vm3418_vm10 = vcmp.lt.s32.totalorder %v12225_v22, 1 }
 0x306   :  { %vm3420_vm2 = vcmp.lt.s32.totalorder %v12225_v22, 3  ;;  %v3427_v5 = vsel %vm3421_vm9, %v3414_v3, 920167782  ;;  %v7980_v23 = vpop.eup %7979  ;;  %vm2786_vm11 = vcmp.eq.s32.totalorder %v12164_v59, 0  ;;  %vm2789_vm7 = vcmp.eq.s32.totalorder %v12164_v59, 2 }
 0x307   :  { %v3106_v48 = vclz %v7457_v35  ;;  %v7461_v13 = vmin.u32 %v3208_v29, %v12210_v31  ;;  %v3394_v7 = vor.u32 8388608, %v3393_v44  ;;  %v3431_v8 = vsel %vm3421_vm9, %v3417_v52, 1326507024  ;;  %v7982_v4 = vpop.eup %7981 }
 0x308   :  { %v3006_v12 = vsub.s32 32, %v12199_v53  ;;  %v3011_v26 = vadd.s32 127, %v3010_v16  ;;  %v3321_v10 = vsel %vm3315_vm3, %v3318_v46, %v3320_v30  ;;  %v3340_v2 = vadd.s32 1, %v12217_v6 }
 0x309   :  { %vm3419_vm12 = vcmp.lt.s32.totalorder %v12225_v22, 2  ;;  %v3426_v29 = vsel %vm3418_vm10, %v12260_v14, %v12262_v20  ;;  %v3428_v44 = vsel %vm3420_vm2, %v3411_v36, %v3427_v5  ;;  %v7473_v52 = vadd.s32 4294967169, %v3494_v60 }
 0x30a   :  { %7983 = vcosq.f32 %v2918_v55  ;;  %vm3339_vm6 = vc.u32 %v12245_v34, %v12216_v45  ;;  %v3430_v21 = vsel %vm3418_vm10, %v12262_v20, %v3411_v36  ;;  %v3432_v16 = vsel %vm3420_vm2, %v3414_v3, %v3431_v8 }
 0x30b   :  { %vm2785_vm13 = vcmp.lt.s32.totalorder %v12164_v59, 2  ;;  %7985 = vsinq.f32 %v2918_v55  ;;  %v7458_v54 = vadd.s32 4294967294, %v3106_v48  ;;  %v3210_v35 = vclz %v7461_v13 }
 0x30c   :  { %v12295_v61 = vshll.u32 %v3394_v7, 8  ;;  %v3007_v46 = vshll.u32 %v12061_v40, %v12199_v53  ;;  %v3008_v30 = vshrl.u32 %v2990_v63, %v3006_v12  ;;  %v3337_v60 = vmul.u32 %v12184_v11, %v3321_v10  ;;  %v2358_v11 = vld [vmem:[#allocation5 + $0xb0] sm:$0xff]  ;;  %v3277_v10 = vld [vmem:[#allocation8 + $0xf8] sm:$0xff] }
 0x30d   :  { %v3429_v5 = vsel %vm3419_vm12, %v3426_v29, %v3428_v44  ;;  %v3012_v49 = vshll.u32 %v3011_v26, 23  ;;  %v3341_v3 = vsel %vm3339_vm6, %v3340_v2, %v12217_v6  ;;  %v3433_v55 = vsel %vm3419_vm12, %v3430_v21, %v3432_v16  ;;  %v17552_v53 = vld [vmem:[#allocation26_spill] sm:$0xff] }
 0x30e   :  { %v3500_v48 = vadd.s32 1, %v7473_v52  ;;  %v2787_v13 = vxor.u32 2147483648, %v7982_v4  ;;  %v2790_v8 = vxor.u32 2147483648, %v7980_v23  ;;  %v17551_v7 = vsub.s32 4, %v17547_v24 }
 0x30f   :  { %v3272_v40 = vmul.f32 %v11869_v32, %v3268_v0  ;;  %vm2936_vm14 = vcmp.lt.s32.totalorder %v17552_v53, 0  ;;  %vm7459_vm15 = vcmp.lt.s32.totalorder %v7458_v54, 0  ;;  %v7462_v12 = vadd.s32 4294967294, %v3210_v35 }
 0x310   :  { %v2917_v63 = vsel %vm2832_vm4, %v17551_v7, %v17547_v24  ;;  %v12313_v6 = vmul.u32.u64.low %v12295_v61, %v3429_v5  ;;  %v12314_v26 = vmul.u32.u64.high %v12295_v61, %v3429_v5, %v12313_v6  ;;  %vm2782_vm0 = vweird.f32 %v11241_v39 }
 0x311   :  { %v12318_v2 = vadd.s32 %v3341_v3, %v3337_v60  ;;  %v3402_v24 = vshrl.u32 %v17401_v1, %v12186_v50  ;;  %v12323_v32 = vmul.u32.u64.low %v12295_v61, %v3433_v55  ;;  %v12324_v29 = vmul.u32.u64.high %v12295_v61, %v3433_v55, %v12323_v32 }
 0x312   :  { %v3009_v44 = vor.u32 %v3008_v30, %v3007_v46  ;;  %v3013_v52 = vor.u32 4788187, %v3012_v49  ;;  %v3423_v21 = vsel %vm3421_vm9, %v3411_v36, 2102212464  ;;  %vm3501_vm1 = vcmp.gt.s32.totalorder %v3500_v48, 0  ;;  %v17557_v30 = vld [vmem:[#allocation16_spill] sm:$0xff] }
 0x313   :  { %v2788_v16 = vsel %vm2786_vm11, %v7980_v23, %v2787_v13  ;;  %v2791_v35 = vsel %vm2789_vm7, %v2790_v8, %v7982_v4  ;;  %v2796_v0 = vmul.f32 %v12182_v17, %v2358_v11  ;;  %v2919_v50 = vsel %vm12190_vm8, 0, %v2917_v63 }
 0x314   :  { %v17553_v60 = vand.u32 2147483647, %v17552_v53  ;;  %v3020_v49 = vsub.s32 4, %v12007_v62  ;;  %v3109_v36 = vsel %vm7459_vm15, 0, %v7458_v54  ;;  %vm7463_vm3 = vcmp.lt.s32.totalorder %v7462_v12, 0 }
 0x315   :  { %v12343_v23 = vadd.f32 %v3277_v10, %v3272_v40  ;;  %vm3040_vm5 = vcmp.lt.s32.totalorder %v17557_v30, 0  ;;  %v3343_v17 = vadd.s32 536870912, %v12318_v2  ;;  %v3422_v15 = vsel %vm3418_vm10, %v3402_v24, %v12260_v14 }
 0x316   :  { %vm12337_vm4 = vcmp.le.f32.partialorder %v17553_v60, 0.7853982  ;;  %v3424_v4 = vsel %vm3420_vm2, %v12262_v20, %v3423_v21  ;;  %v3502_v5 = vsel %vm3501_vm1, %v3500_v48, 0  ;;  %v3014_v3 = vand.u32 2147483647, %v3013_v52 }
 0x317   :  { %17556 = vst [vmem:[#allocation18_spill] sm:$0xff] %v12343_v23  ;;  %v3016_v55 = vcvt.s32.f32 %v3009_v44  ;;  %v3094_v54 = vadd.s32 %v11967_v37, %v11989_v43  ;;  %v3110_v13 = vsub.s32 32, %v3109_v36  ;;  %v2792_v8 = vsel %vm2785_vm13, %v2788_v16, %v2791_v35  ;;  %v12361_v40 = vpop.eup %7983 }
 0x318   :  { %v12359_v7 = vadd.f32 %v2796_v0, %v12077_v58  ;;  %v2923_v63 = vadd.s32 3, %v2919_v50  ;;  %v3114_v14 = vsub.s32 4294967266, %v3109_v36  ;;  %v12364_v20 = vsel %vm7463_vm3, 0, %v7462_v12  ;;  %v12369_v43 = vpop.eup %7985 }
 0x319   :  { %v3425_v48 = vsel %vm3419_vm12, %v3422_v15, %v3424_v4  ;;  %v3444_v11 = vadd.s32 1, %v12314_v26  ;;  %v3504_v37 = vand.u32 31, %v3502_v5  ;;  %v12374_v58 = vsel %vm2936_vm14, %v3020_v49, %v12007_v62 }
 0x31a   :  { %v12376_v59 = vshrl.u32 %v3343_v17, 30  ;;  %vm3443_vm8 = vc.u32 %v12324_v29, %v12313_v6  ;;  %v3597_v12 = vand.u32 2139095040, %v12343_v23  ;;  %v12381_v10 = vmul.f32 %v3016_v55, %v3014_v3 }
 0x31b   :  { %v3111_v22 = vshll.u32 %v12175_v56, %v3109_v36  ;;  %v3112_v24 = vshrl.u32 %v3094_v54, %v3110_v13  ;;  %v3124_v32 = vsub.s32 4, %v12116_v47  ;;  %v12385_v44 = vand.u32 3, %v2923_v63  ;;  %v12421_v63 = vld [vmem:[#allocation2 + $0x8] ss:$0 sm:$0xff] }
 0x31c   :  { %v3115_v52 = vadd.s32 127, %v3114_v14  ;;  %v3218_v62 = vsub.s32 4294967266, %v12364_v20  ;;  %v3441_v21 = vmul.u32 %v12295_v61, %v3425_v48  ;;  %v12391_v16 = vsel %vm2782_vm0, nan, %v2792_v8  ;;  %v3717_v14 = vld [vmem:[#allocation7 + $0x100] sm:$0xff] }
 0x31d   :  { %v3445_v56 = vsel %vm3443_vm8, %v3444_v11, %v12314_v26  ;;  %v12397_v0 = vsub.s32 32, %v3504_v37  ;;  %v3345_v49 = vshll.u32 %v12376_v59, 30  ;;  %v3598_v36 = vshrl.u32 %v3597_v12, 23  ;;  %v3726_v61 = vld [vmem:[#allocation8 + $0x100] sm:$0xff] }
 0x31e   :  { %v12403_v39 = vor.u32 %v3112_v24, %v3111_v22  ;;  %v12408_v17 = vsel %vm3040_vm5, %v3124_v32, %v12116_v47  ;;  %v3198_v26 = vadd.s32 %v12020_v42, %v12031_v57  ;;  %v3116_v15 = vshll.u32 %v3115_v52, 23 }
 0x31f   :  { %v3214_v4 = vsub.s32 32, %v12364_v20  ;;  %v3219_v3 = vadd.s32 127, %v3218_v62  ;;  %v12413_v55 = vadd.s32 %v3445_v56, %v3441_v21  ;;  %v3516_v54 = vshll.u32 %v17405_v9, %v3504_v37 }
 0x320   :  { %v3517_v13 = vshrl.u32 %v17391_v38, %v12397_v0  ;;  %v3519_v8 = vshll.u32 %v17391_v38, %v3504_v37  ;;  %v3520_v47 = vshrl.u32 %v17539_v28, %v12397_v0  ;;  %vm2929_vm9 = vcmp.eq.s32.totalorder %v12385_v44, 2 }
 0x321   :  { %v12425_v42 = vsub.s32 %v12318_v2, %v3345_v49  ;;  %v17262_v57 = vand.u32 2147483647, %v12201_v27  ;;  %v12428_v48 = vshrl.u32 %v3502_v5, 5  ;;  %v7477_v11 = vadd.s32 4294967169, %v3598_v36 }
 0x322   :  { %vm2926_vm10 = vcmp.eq.s32.totalorder %v12385_v44, 0  ;;  %v3507_v12 = vshll.u32 %v17401_v1, %v3504_v37  ;;  %v3508_v22 = vshrl.u32 %v17393_v33, %v12397_v0  ;;  %v3510_v24 = vshll.u32 %v17393_v33, %v3504_v37 }
 0x323   :  { %v3511_v32 = vshrl.u32 %v17445_v19, %v12397_v0  ;;  %v3117_v52 = vor.u32 4788187, %v3116_v15  ;;  %v3513_v2 = vshll.u32 %v17445_v19, %v3504_v37  ;;  %v3514_v5 = vshrl.u32 %v17405_v9, %v12397_v0 }
 0x324   :  { %v3721_v62 = vmul.f32 %v12421_v63, %v3717_v14  ;;  %v3215_v21 = vshll.u32 %v12210_v31, %v12364_v20  ;;  %v3447_v56 = vadd.s32 536870912, %v12413_v55  ;;  %v3518_v49 = vor.u32 %v3517_v13, %v3516_v54  ;;  %v2359_v14 = vld [vmem:[#allocation5 + $0xb8] sm:$0xff] }
 0x325   :  { %v3521_v36 = vor.u32 %v3520_v47, %v3519_v8  ;;  %v17558_v50 = vand.u32 2147483647, %v17557_v30  ;;  %v3216_v37 = vshrl.u32 %v3198_v26, %v3214_v4  ;;  %v3220_v15 = vshll.u32 %v3219_v3, 23 }
 0x326   :  { %v3497_v60 = vand.u32 8388607, %v17262_v57  ;;  %vm3525_vm11 = vcmp.lt.s32.totalorder %v12428_v48, 4  ;;  %v3348_v31 = vsub.s32 0, %v12425_v42  ;;  %v12454_v20 = vor.u32 %v3508_v22, %v3507_v12 }
 0x327   :  { %vm12446_vm2 = vcmp.le.f32.partialorder %v17558_v50, 0.7853982  ;;  %v12456_v54 = vor.u32 %v3511_v32, %v3510_v24  ;;  %v3604_v13 = vadd.s32 1, %v7477_v11  ;;  %vm2925_vm7 = vcmp.lt.s32.totalorder %v12385_v44, 2 }
 0x328   :  { %v3120_v50 = vcvt.s32.f32 %v12403_v39  ;;  %v3515_v8 = vor.u32 %v3514_v5, %v3513_v2  ;;  %vm3522_vm12 = vcmp.lt.s32.totalorder %v12428_v48, 1  ;;  %v12461_v26 = vadd.f32 %v3726_v61, %v3721_v62 }
 0x329   :  { %v12463_v4 = vshrl.u32 %v3447_v56, 30  ;;  %vm3524_vm6 = vcmp.lt.s32.totalorder %v12428_v48, 3  ;;  %v3531_v3 = vsel %vm3525_vm11, %v3518_v49, 920167782  ;;  %v3535_v47 = vsel %vm3525_vm11, %v3521_v36, 1326507024 }
 0x32a   :  { %v3118_v11 = vand.u32 2147483647, %v3117_v52  ;;  %v3217_v12 = vor.u32 %v3216_v37, %v3215_v21  ;;  %v3221_v22 = vor.u32 4788187, %v3220_v15  ;;  %v3498_v39 = vor.u32 8388608, %v3497_v60 }
 0x32b   :  { %v7466_v24 = vmin.u32 %v3348_v31, %v12425_v42  ;;  %vm3523_vm13 = vcmp.lt.s32.totalorder %v12428_v48, 2  ;;  %v3530_v61 = vsel %vm3522_vm12, %v12454_v20, %v12456_v54  ;;  %vm3605_vm15 = vcmp.gt.s32.totalorder %v3604_v13, 0 }
 0x32c   :  { %vm2922_vm0 = vweird.f32 %v17543_v41  ;;  %v3532_v32 = vsel %vm3524_vm6, %v3515_v8, %v3531_v3  ;;  %v3534_v52 = vsel %vm3522_vm12, %v12456_v54, %v3515_v8  ;;  %v3536_v60 = vsel %vm3524_vm6, %v3518_v49, %v3535_v47 }
 0x32d   :  { %v3737_v2 = vand.u32 2139095040, %v12461_v26  ;;  %v2797_v5 = vmul.f32 %v12391_v16, %v2359_v14  ;;  %v17561_v62 = vxor.u32 2147483648, %v12361_v40  ;;  %v17562_v56 = vsel %vm12337_vm4, 0, %v12374_v58 }
 0x32e   :  { %v3027_v36 = vadd.s32 3, %v17562_v56  ;;  %v3449_v37 = vshll.u32 %v12463_v4, 30  ;;  %v17563_v15 = vxor.u32 2147483648, %v12369_v43  ;;  %v17564_v16 = vxor.u32 2147483648, %v12381_v10 }
 0x32f   :  { %v2931_v21 = vsel %vm2929_vm9, %v17561_v62, %v12369_v43  ;;  %v12506_v3 = vshll.u32 %v3498_v39, 8  ;;  %v3606_v47 = vsel %vm3605_vm15, %v3604_v13, 0  ;;  %v3121_v14 = vmul.f32 %v3120_v50, %v3118_v11 }
 0x330   :  { %v2928_v49 = vsel %vm2926_vm10, %v12361_v40, %v17563_v15  ;;  %v3019_v31 = vsel %vm2936_vm14, %v17564_v16, %v12381_v10  ;;  %v3127_v58 = vsel %vm12446_vm2, 0, %v12408_v17  ;;  %v3533_v43 = vsel %vm3523_vm13, %v3530_v61, %v3532_v32 }
 0x331   :  { %v3537_v40 = vsel %vm3523_vm13, %v3534_v52, %v3536_v60  ;;  %v3222_v62 = vand.u32 2147483647, %v3221_v22  ;;  %v3224_v56 = vcvt.s32.f32 %v3217_v12  ;;  %v3350_v15 = vclz %v7466_v24 }
 0x332   :  { %v3738_v57 = vshrl.u32 %v3737_v2, 23  ;;  %v3022_v10 = vsel %vm12337_vm4, %v17552_v53, %v3019_v31  ;;  %v12519_v13 = vsub.s32 %v12413_v55, %v3449_v37  ;;  %v3506_v17 = vshrl.u32 %v17401_v1, %v12397_v0 }
 0x333   :  { %v3608_v50 = vand.u32 31, %v3606_v47  ;;  %v12524_v11 = vmul.u32.u64.low %v12506_v3, %v3537_v40  ;;  %v12525_v39 = vmul.u32.u64.high %v12506_v3, %v3537_v40, %v12524_v11  ;;  %v2932_v46 = vsel %vm2925_vm7, %v2928_v49, %v2931_v21 }
 0x334   :  { %v12528_v22 = vmul.u32.u64.low %v12506_v3, %v3533_v43  ;;  %v12529_v12 = vmul.u32.u64.high %v12506_v3, %v3533_v43, %v12528_v22  ;;  %v3122_v24 = vxor.u32 2147483648, %v3121_v14  ;;  %v3131_v61 = vadd.s32 3, %v3127_v58 }
 0x335   :  { %v3527_v55 = vsel %vm3525_vm11, %v3515_v8, 2102212464  ;;  %7987 = vcosq.f32 %v3022_v10  ;;  %v3225_v0 = vmul.f32 %v3224_v56, %v3222_v62  ;;  %v7467_v32 = vadd.s32 4294967294, %v3350_v15  ;;  %v2808_v62 = vld [vmem:[#allocation5 + $0xc0] sm:$0xff] }
 0x336   :  { %v7482_v52 = vadd.s32 4294967169, %v3738_v57  ;;  %7989 = vsinq.f32 %v3022_v10  ;;  %vm3144_vm14 = vcmp.lt.s32.totalorder %v11716_v51, 0  ;;  %v3452_v60 = vsub.s32 0, %v12519_v13 }
 0x337   :  { %v12538_v2 = vsub.s32 32, %v3608_v50  ;;  %v12541_v37 = vadd.f32 %v2797_v5, %v12099_v18  ;;  %v12543_v44 = vand.u32 3, %v3027_v36  ;;  %v3526_v8 = vsel %vm3522_vm12, %v3506_v17, %v12454_v20  ;;  %v17568_v36 = vld [vmem:[#allocation29_spill] sm:$0xff] }
 0x338   :  { %v3528_v57 = vsel %vm3524_vm6, %v12456_v54, %v3527_v55  ;;  %v2933_v21 = vsel %vm2922_vm0, nan, %v2932_v46  ;;  %v3123_v49 = vsel %vm3040_vm5, %v3122_v24, %v3121_v14  ;;  %v12555_v16 = vand.u32 3, %v3131_v61 }
 0x339   :  { %v17565_v18 = vand.u32 2147483647, %v11716_v51  ;;  %v3228_v20 = vsub.s32 4, %v17568_v36  ;;  %v3226_v31 = vxor.u32 2147483648, %v3225_v0  ;;  %vm7468_vm4 = vcmp.lt.s32.totalorder %v7467_v32, 0 }
 0x33a   :  { %v17263_v54 = vand.u32 2147483647, %v12343_v23  ;;  %v3744_v58 = vadd.s32 1, %v7482_v52  ;;  %v7470_v41 = vmin.u32 %v3452_v60, %v12519_v13  ;;  %v3529_v14 = vsel %vm3523_vm13, %v3526_v8, %v3528_v57 }
 0x33b   :  { %vm12559_vm1 = vcmp.le.f32.partialorder %v17565_v18, 0.7853982  ;;  %v3620_v43 = vshll.u32 %v17405_v9, %v3608_v50  ;;  %v3621_v40 = vshrl.u32 %v17391_v38, %v12538_v2  ;;  %vm3547_vm3 = vc.u32 %v12525_v39, %v12528_v22 }
 0x33c   :  { %v3548_v56 = vadd.s32 1, %v12529_v12  ;;  %v12574_v15 = vshrl.u32 %v3606_v47, 5  ;;  %v3611_v10 = vshll.u32 %v17401_v1, %v3608_v50  ;;  %v3614_v17 = vshll.u32 %v17393_v33, %v3608_v50 }
 0x33d   :  { %v3617_v48 = vshll.u32 %v17445_v19, %v3608_v50  ;;  %v3623_v11 = vshll.u32 %v17391_v38, %v3608_v50  ;;  %v3624_v46 = vshrl.u32 %v17539_v28, %v12538_v2  ;;  %v3612_v24 = vshrl.u32 %v17393_v33, %v12538_v2 }
 0x33e   :  { %v3615_v61 = vshrl.u32 %v17445_v19, %v12538_v2  ;;  %v3618_v47 = vshrl.u32 %v17405_v9, %v12538_v2  ;;  %vm3745_vm5 = vcmp.gt.s32.totalorder %v3744_v58, 0  ;;  %v3229_v55 = vsel %vm3144_vm14, %v3228_v20, %v17568_v36 }
 0x33f   :  { %v12591_v52 = vmul.f32 %v2933_v21, %v2808_v62  ;;  %v3545_v50 = vmul.u32 %v12506_v3, %v3529_v14  ;;  %v3622_v60 = vor.u32 %v3621_v40, %v3620_v43  ;;  %v3126_v8 = vsel %vm12446_vm2, %v17557_v30, %v3123_v49 }
 0x340   :  { %v3549_v57 = vsel %vm3547_vm3, %v3548_v56, %v12529_v12  ;;  %v3601_v18 = vand.u32 8388607, %v17263_v54  ;;  %vm3629_vm8 = vcmp.lt.s32.totalorder %v12574_v15, 4  ;;  %v3227_v21 = vsel %vm3144_vm14, %v3226_v31, %v3225_v0 }
 0x341   :  { %v12607_v3 = vsel %vm7468_vm4, 0, %v7467_v32  ;;  %v3625_v36 = vor.u32 %v3624_v46, %v3623_v11  ;;  %v3746_v20 = vsel %vm3745_vm5, %v3744_v58, 0  ;;  %v3454_v35 = vclz %v7470_v41 }
 0x342   :  { %v12609_v49 = vor.u32 %v3612_v24, %v3611_v10  ;;  %v12611_v14 = vor.u32 %v3615_v61, %v3614_v17  ;;  %v3619_v43 = vor.u32 %v3618_v47, %v3617_v48  ;;  %v12613_v12 = vpop.eup %7987  ;;  %v12615_v40 = vadd.s32 %v3549_v57, %v3545_v50  ;;  %v3718_v50 = vld [vmem:[#allocation7 + $0x108] sm:$0xff] }
 0x343   :  { %vm3626_vm9 = vcmp.lt.s32.totalorder %v12574_v15, 1  ;;  %vm3628_vm10 = vcmp.lt.s32.totalorder %v12574_v15, 3  ;;  %v3635_v0 = vsel %vm3629_vm8, %v3622_v60, 920167782  ;;  %v12621_v32 = vpop.eup %7989  ;;  %7991 = vcosq.f32 %v3126_v8 }
 0x344   :  { %v3230_v31 = vsel %vm12559_vm1, %v11716_v51, %v3227_v21  ;;  %v3602_v58 = vor.u32 8388608, %v3601_v18  ;;  %v3748_v41 = vand.u32 31, %v3746_v20  ;;  %7993 = vsinq.f32 %v3126_v8 }
 0x345   :  { %v3231_v62 = vsel %vm12559_vm1, 0, %v3229_v55  ;;  %v3358_v56 = vsub.s32 4294967266, %v12607_v3  ;;  %v3639_v10 = vsel %vm3629_vm8, %v3625_v36, 1326507024  ;;  %v7471_v17 = vadd.s32 4294967294, %v3454_v35 }
 0x346   :  { %vm3627_vm2 = vcmp.lt.s32.totalorder %v12574_v15, 2  ;;  %v3634_v48 = vsel %vm3626_vm9, %v12609_v49, %v12611_v14  ;;  %v3636_v11 = vsel %vm3628_vm10, %v3619_v43, %v3635_v0  ;;  %7995 = vcosq.f32 %v3230_v31 }
 0x347   :  { %v3551_v24 = vadd.s32 536870912, %v12615_v40  ;;  %v3638_v61 = vsel %vm3626_vm9, %v12611_v14, %v3619_v43  ;;  %v3640_v47 = vsel %vm3628_vm10, %v3622_v60, %v3639_v10  ;;  %v12646_v55 = vshll.u32 %v3602_v58, 8 }
 0x348   :  { %v12648_v8 = vsub.s32 32, %v3748_v41  ;;  %7997 = vsinq.f32 %v3230_v31  ;;  %v12650_v57 = vadd.s32 3, %v3231_v62  ;;  %v3338_v18 = vadd.s32 %v12216_v45, %v12245_v34 }
 0x349   :  { %v3637_v21 = vsel %vm3627_vm2, %v3634_v48, %v3636_v11  ;;  %v3354_v36 = vsub.s32 32, %v12607_v3  ;;  %v3355_v35 = vshll.u32 %v12425_v42, %v12607_v3  ;;  %v3359_v60 = vadd.s32 127, %v3358_v56 }
 0x34a   :  { %vm7472_vm11 = vcmp.lt.s32.totalorder %v7471_v17, 0  ;;  %v12659_v0 = vshrl.u32 %v3551_v24, 30  ;;  %v3610_v31 = vshrl.u32 %v17401_v1, %v12538_v2  ;;  %v3641_v58 = vsel %vm3627_vm2, %v3638_v61, %v3640_v47 }
 0x34b   :  { %v3722_v45 = vmul.f32 %v12421_v63, %v3718_v50  ;;  %v12667_v34 = vmul.u32.u64.low %v12646_v55, %v3637_v21  ;;  %v12668_v62 = vmul.u32.u64.high %v12646_v55, %v3637_v21, %v12667_v34  ;;  %v3760_v10 = vshll.u32 %v17405_v9, %v3748_v41  ;;  %v3727_v50 = vld [vmem:[#allocation8 + $0x108] sm:$0xff] }
 0x34c   :  { %v3761_v42 = vshrl.u32 %v17391_v38, %v12648_v8  ;;  %v12675_v56 = vshrl.u32 %v3746_v20, 5  ;;  %v3763_v2 = vshll.u32 %v17391_v38, %v3748_v41  ;;  %v3764_v48 = vshrl.u32 %v17539_v28, %v12648_v8 }
 0x34d   :  { %vm3030_vm7 = vcmp.eq.s32.totalorder %v12543_v44, 0  ;;  %vm3033_vm12 = vcmp.eq.s32.totalorder %v12543_v44, 2  ;;  %v12683_v11 = vmul.u32.u64.low %v12646_v55, %v3641_v58  ;;  %v12684_v24 = vmul.u32.u64.high %v12646_v55, %v3641_v58, %v12683_v11 }
 0x34e   :  { %v3751_v61 = vshll.u32 %v17401_v1, %v3748_v41  ;;  %v3754_v47 = vshll.u32 %v17393_v33, %v3748_v41  ;;  %v3752_v20 = vshrl.u32 %v17393_v33, %v12648_v8  ;;  %v3755_v21 = vshrl.u32 %v17445_v19, %v12648_v8 }
 0x34f   :  { %v3757_v54 = vshll.u32 %v17445_v19, %v3748_v41  ;;  %v3758_v5 = vshrl.u32 %v17405_v9, %v12648_v8  ;;  %v3356_v46 = vshrl.u32 %v3338_v18, %v3354_v36  ;;  %v3360_v3 = vshll.u32 %v3359_v60, 23 }
 0x350   :  { %v3631_v58 = vsel %vm3629_vm8, %v3619_v43, 2102212464  ;;  %v3762_v11 = vor.u32 %v3761_v42, %v3760_v10  ;;  %v12697_v23 = vpop.eup %7991  ;;  %v12700_v27 = vsel %vm7472_vm11, 0, %v7471_v17  ;;  %v17569_v33 = vand.u32 2147483647, %v12461_v26 }
 0x351   :  { %v3765_v38 = vor.u32 %v3764_v48, %v3763_v2  ;;  %vm3769_vm6 = vcmp.lt.s32.totalorder %v12675_v56, 4  ;;  %v12705_v41 = vpop.eup %7993  ;;  %v3442_v18 = vadd.s32 %v12313_v6, %v12324_v29  ;;  %v3553_v36 = vshll.u32 %v12659_v0, 30 }
 0x352   :  { %v3741_v28 = vand.u32 8388607, %v17569_v33  ;;  %v3630_v43 = vsel %vm3626_vm9, %v3610_v31, %v12609_v49  ;;  %v12713_v60 = vadd.f32 %v3727_v50, %v3722_v45  ;;  %v3632_v33 = vsel %vm3628_vm10, %v12611_v14, %v3631_v58 }
 0x353   :  { %v12718_v17 = vor.u32 %v3752_v20, %v3751_v61  ;;  %v12720_v10 = vor.u32 %v3755_v21, %v3754_v47  ;;  %v3759_v42 = vor.u32 %v3758_v5, %v3757_v54  ;;  %v12722_v2 = vpop.eup %7995  ;;  %v3462_v6 = vsub.s32 4294967266, %v12700_v27 }
 0x354   :  { %17570 = vst [vmem:[#allocation25_spill] sm:$0xff] %v12713_v60  ;;  %vm3766_vm13 = vcmp.lt.s32.totalorder %v12675_v56, 1  ;;  %vm3768_vm15 = vcmp.lt.s32.totalorder %v12675_v56, 3  ;;  %v3775_v29 = vsel %vm3769_vm6, %v3762_v11, 920167782  ;;  %v3357_v49 = vor.u32 %v3356_v46, %v3355_v35 }
 0x355   :  { %v3361_v31 = vor.u32 4788187, %v3360_v3  ;;  %v3742_v45 = vor.u32 8388608, %v3741_v28  ;;  %v3779_v14 = vsel %vm3769_vm6, %v3765_v38, 1326507024  ;;  %v12731_v48 = vpop.eup %7997  ;;  %vm3134_vm0 = vcmp.eq.s32.totalorder %v12555_v16, 0 }
 0x356   :  { %vm3137_vm14 = vcmp.eq.s32.totalorder %v12555_v16, 2  ;;  %v12736_v54 = vsub.s32 %v12615_v40, %v3553_v36  ;;  %v3633_v5 = vsel %vm3627_vm2, %v3630_v43, %v3632_v33  ;;  %v3652_v61 = vadd.s32 1, %v12668_v62 }
 0x357   :  { %v3841_v46 = vand.u32 2139095040, %v12713_v60  ;;  %vm3651_vm1 = vc.u32 %v12684_v24, %v12667_v34  ;;  %vm3767_vm4 = vcmp.lt.s32.totalorder %v12675_v56, 2  ;;  %v3774_v38 = vsel %vm3766_vm13, %v12718_v17, %v12720_v10 }
 0x358   :  { %v3776_v28 = vsel %vm3768_vm15, %v3759_v42, %v3775_v29  ;;  %v3458_v15 = vsub.s32 32, %v12700_v27  ;;  %v3463_v40 = vadd.s32 127, %v3462_v6  ;;  %v3778_v35 = vsel %vm3766_vm13, %v12720_v10, %v3759_v42 }
 0x359   :  { %v3780_v3 = vsel %vm3768_vm15, %v3762_v11, %v3779_v14  ;;  %vm3029_vm3 = vcmp.lt.s32.totalorder %v12543_v44, 2  ;;  %v17571_v47 = vxor.u32 2147483648, %v12621_v32  ;;  %v17572_v20 = vxor.u32 2147483648, %v12613_v12 }
 0x35a   :  { %v3649_v58 = vmul.u32 %v12646_v55, %v3633_v5  ;;  %v12769_v36 = vshll.u32 %v3742_v45, 8  ;;  %v12772_v11 = vand.u32 3, %v12650_v57  ;;  %v3653_v43 = vsel %vm3651_vm1, %v3652_v61, %v12668_v62  ;;  %v17573_v45 = vld [vmem:[#allocation21_spill] sm:$0xff]  ;;  %v3719_v61 = vld [vmem:[#allocation7 + $0x110] sm:$0xff] }
 0x35b   :  { %v3032_v50 = vsel %vm3030_vm7, %v12613_v12, %v17571_v47  ;;  %v3035_v21 = vsel %vm3033_vm12, %v17572_v20, %v12621_v32  ;;  %v3777_v33 = vsel %vm3767_vm4, %v3774_v38, %v3776_v28  ;;  %v3842_v6 = vshrl.u32 %v3841_v46, 23 }
 0x35c   :  { %vm3133_vm5 = vcmp.lt.s32.totalorder %v12555_v16, 2  ;;  %v3362_v29 = vand.u32 2147483647, %v3361_v31  ;;  %v3364_v12 = vcvt.s32.f32 %v3357_v49  ;;  %v3556_v14 = vsub.s32 0, %v12736_v54 }
 0x35d   :  { %v3781_v32 = vsel %vm3767_vm4, %v3778_v35, %v3780_v3  ;;  %v3138_v55 = vxor.u32 2147483648, %v12697_v23  ;;  %vm3284_vm8 = vcmp.lt.s32.totalorder %v17573_v45, 0  ;;  %v3459_v57 = vshll.u32 %v12519_v13, %v12700_v27 }
 0x35e   :  { %v3460_v62 = vshrl.u32 %v3442_v18, %v3458_v15  ;;  %v3464_v5 = vshll.u32 %v3463_v40, 23  ;;  %v3135_v46 = vxor.u32 2147483648, %v12705_v41  ;;  %v12786_v38 = vadd.s32 %v3653_v43, %v3649_v58  ;;  %v3728_v43 = vld [vmem:[#allocation8 + $0x110] sm:$0xff] }
 0x35f   :  { %v12789_v49 = vmul.u32.u64.low %v12769_v36, %v3777_v33  ;;  %v12790_v31 = vmul.u32.u64.high %v12769_v36, %v3777_v33, %v12789_v49  ;;  %vm3026_vm9 = vweird.f32 %v17552_v53  ;;  %v3750_v28 = vshrl.u32 %v17401_v1, %v12648_v8 }
 0x360   :  { %v12797_v35 = vmul.u32.u64.low %v12769_v36, %v3781_v32  ;;  %v12798_v27 = vmul.u32.u64.high %v12769_v36, %v3781_v32, %v12797_v35  ;;  %v7486_v13 = vadd.s32 4294967169, %v3842_v6  ;;  %vm3130_vm10 = vweird.f32 %v17557_v30 }
 0x361   :  { %v17574_v18 = vand.u32 2147483647, %v17573_v45  ;;  %v3365_v40 = vmul.f32 %v3364_v12, %v3362_v29  ;;  %v7474_v3 = vmin.u32 %v3556_v14, %v12736_v54  ;;  %v3723_v47 = vmul.f32 %v12421_v63, %v3719_v61 }
 0x362   :  { %v3771_v8 = vsel %vm3769_vm6, %v3759_v42, 2102212464  ;;  %vm3234_vm11 = vweird.f32 %v11716_v51  ;;  %vm3238_vm7 = vcmp.eq.s32.totalorder %v12772_v11, 0  ;;  %vm3241_vm12 = vcmp.eq.s32.totalorder %v12772_v11, 2 }
 0x363   :  { %vm12803_vm2 = vcmp.le.f32.partialorder %v17574_v18, 0.7853982  ;;  %v3461_v20 = vor.u32 %v3460_v62, %v3459_v57  ;;  %v3465_v58 = vor.u32 4788187, %v3464_v5  ;;  %v3136_v33 = vsel %vm3134_vm0, %v12697_v23, %v3135_v46 }
 0x364   :  { %v3139_v6 = vsel %vm3137_vm14, %v3138_v55, %v12705_v41  ;;  %v3239_v29 = vxor.u32 2147483648, %v12731_v48  ;;  %v3242_v42 = vxor.u32 2147483648, %v12722_v2  ;;  %v3655_v12 = vadd.s32 536870912, %v12786_v38 }
 0x365   :  { %v3770_v14 = vsel %vm3766_vm13, %v3750_v28, %v12718_v17  ;;  %v3772_v32 = vsel %vm3768_vm15, %v12720_v10, %v3771_v8  ;;  %v3848_v57 = vadd.s32 1, %v7486_v13  ;;  %v3366_v23 = vxor.u32 2147483648, %v3365_v40  ;;  %v2809_v8 = vld [vmem:[#allocation5 + $0xc8] sm:$0xff] }
 0x366   :  { %v3368_v62 = vsub.s32 4, %v12376_v59  ;;  %v3558_v5 = vclz %v7474_v3  ;;  %v12830_v41 = vadd.f32 %v3728_v43, %v3723_v47  ;;  %v3036_v55 = vsel %vm3029_vm3, %v3032_v50, %v3035_v21  ;;  %v2811_v43 = vld [vmem:[#allocation5 + $0xd8] sm:$0xff] }
 0x367   :  { %vm3237_vm6 = vcmp.lt.s32.totalorder %v12772_v11, 2  ;;  %v3466_v61 = vand.u32 2147483647, %v3465_v58  ;;  %v3468_v46 = vcvt.s32.f32 %v3461_v20  ;;  %v3240_v17 = vsel %vm3238_vm7, %v12722_v2, %v3239_v29  ;;  %v2810_v20 = vld [vmem:[#allocation5 + $0xd0] sm:$0xff] }
 0x368   :  { %17577 = vst [vmem:[#allocation24_spill] sm:$0xff] %v12830_v41  ;;  %v3243_v10 = vsel %vm3241_vm12, %v3242_v42, %v12731_v48  ;;  %v3773_v28 = vsel %vm3767_vm4, %v3770_v14, %v3772_v32  ;;  %v3792_v35 = vadd.s32 1, %v12790_v31  ;;  %v3140_v44 = vsel %vm3133_vm5, %v3136_v33, %v3139_v6 }
 0x369   :  { %v12846_v50 = vshrl.u32 %v3655_v12, 30  ;;  %vm3791_vm13 = vc.u32 %v12798_v27, %v12789_v49  ;;  %vm3849_vm15 = vcmp.gt.s32.totalorder %v3848_v57, 0  ;;  %v3367_v2 = vsel %vm3284_vm8, %v3366_v23, %v3365_v40 }
 0x36a   :  { %v3369_v48 = vsel %vm3284_vm8, %v3368_v62, %v12376_v59  ;;  %v7475_v56 = vadd.s32 4294967294, %v3558_v5  ;;  %v3945_v21 = vand.u32 2139095040, %v12830_v41  ;;  %v3244_v11 = vsel %vm3237_vm6, %v3240_v17, %v3243_v10 }
 0x36b   :  { %v3469_v13 = vmul.f32 %v3468_v46, %v3466_v61  ;;  %v3472_v16 = vsub.s32 4, %v12463_v4  ;;  %v3789_v18 = vmul.u32 %v12769_v36, %v3773_v28  ;;  %v3037_v3 = vsel %vm3026_vm9, nan, %v3036_v55  ;;  %v3720_v55 = vld [vmem:[#allocation7 + $0x118] sm:$0xff] }
 0x36c   :  { %vm3388_vm0 = vcmp.lt.s32.totalorder %v12024_v25, 0  ;;  %v3793_v40 = vsel %vm3791_vm13, %v3792_v35, %v12790_v31  ;;  %v3850_v47 = vsel %vm3849_vm15, %v3848_v57, 0  ;;  %v3141_v59 = vsel %vm3130_vm10, nan, %v3140_v44  ;;  %v17582_v35 = vld [vmem:[#allocation28_spill] sm:$0xff] }
 0x36d   :  { %v3370_v58 = vsel %vm12803_vm2, %v17573_v45, %v3367_v2  ;;  %v3371_v36 = vsel %vm12803_vm2, 0, %v3369_v48  ;;  %v3657_v53 = vshll.u32 %v12846_v50, 30  ;;  %v3245_v33 = vsel %vm3234_vm11, nan, %v3244_v11 }
 0x36e   :  { %v17578_v31 = vand.u32 2147483647, %v12024_v25  ;;  %vm7476_vm1 = vcmp.lt.s32.totalorder %v7475_v56, 0  ;;  %v3946_v30 = vshrl.u32 %v3945_v21, 23  ;;  %v3470_v29 = vxor.u32 2147483648, %v3469_v13 }
 0x36f   :  { %v3473_v15 = vsel %vm3388_vm0, %v3472_v16, %v12463_v4  ;;  %v12881_v42 = vadd.s32 %v3793_v40, %v3789_v18  ;;  %v3852_v12 = vand.u32 31, %v3850_v47  ;;  %v3247_v14 = vmul.f32 %v3037_v3, %v2809_v8  ;;  %v17581_v4 = vld [vmem:[#allocation22_spill] sm:$0xff] }
 0x370   :  { %vm12874_vm14 = vcmp.le.f32.partialorder %v17578_v31, 0.7853982  ;;  %v3248_v32 = vmul.f32 %v3141_v59, %v2810_v20  ;;  %7999 = vcosq.f32 %v3370_v58  ;;  %v3375_v51 = vadd.s32 3, %v3371_v36 }
 0x371   :  { %v3249_v57 = vmul.f32 %v3245_v33, %v2811_v43  ;;  %8001 = vsinq.f32 %v3370_v58  ;;  %v12883_v23 = vsel %vm7476_vm1, 0, %v7475_v56  ;;  %v12886_v62 = vsub.s32 %v12786_v38, %v3657_v53  ;;  %v3729_v53 = vld [vmem:[#allocation8 + $0x118] sm:$0xff] }
 0x372   :  { %v3475_v5 = vsel %vm12874_vm14, 0, %v3473_v15  ;;  %v7490_v61 = vadd.s32 4294967169, %v3946_v30  ;;  %v12892_v46 = vadd.f32 %v12591_v52, %v17581_v4  ;;  %v3471_v17 = vsel %vm3388_vm0, %v3470_v29, %v3469_v13 }
 0x373   :  { %v3795_v10 = vadd.s32 536870912, %v12881_v42  ;;  %v12897_v28 = vsub.s32 32, %v3852_v12  ;;  %v12900_v44 = vadd.f32 %v3247_v14, %v17582_v35  ;;  %v12903_v38 = vadd.f32 %v3248_v32, %v12359_v7 }
 0x374   :  { %v12905_v2 = vand.u32 3, %v3375_v51  ;;  %v3566_v48 = vsub.s32 4294967266, %v12883_v23  ;;  %v12909_v52 = vadd.f32 %v3249_v57, %v12541_v37  ;;  %v3479_v56 = vadd.s32 3, %v3475_v5 }
 0x375   :  { %17583 = vst [vmem:[#allocation20_spill] sm:$0xff] %v12903_v38  ;;  %v3660_v21 = vsub.s32 0, %v12886_v62  ;;  %v3724_v11 = vmul.f32 %v12421_v63, %v3720_v55  ;;  %v12916_v13 = vsel %vm12874_vm14, %v12024_v25, %v3471_v17  ;;  %v3546_v7 = vadd.s32 %v12528_v22, %v12525_v39 }
 0x376   :  { %17584 = vst [vmem:[#allocation17_spill] sm:$0xff] %v12909_v52  ;;  %v3562_v16 = vsub.s32 32, %v12883_v23  ;;  %v3952_v18 = vadd.s32 1, %v7490_v61  ;;  %v12921_v3 = vshrl.u32 %v3795_v10, 30  ;;  %v17271_v37 = vand.u32 2147483647, %v12713_v60 }
 0x377   :  { %v3864_v40 = vshll.u32 %v17405_v9, %v3852_v12  ;;  %v17585_v8 = vmov 920167782   ;;  %v3567_v20 = vadd.s32 127, %v3566_v48  ;;  %v12927_v59 = vshrl.u32 %v3850_v47, 5 }
 0x378   :  { %v3865_v63 = vshrl.u32 %v17585_v8, %v12897_v28  ;;  %v3867_v58 = vshll.u32 %v17585_v8, %v3852_v12  ;;  %v17586_v36 = vmov 1326507024   ;;  %vm3381_vm4 = vcmp.eq.s32.totalorder %v12905_v2, 2 }
 0x379   :  { %v3868_v39 = vshrl.u32 %v17586_v36, %v12897_v28  ;;  %v7478_v22 = vmin.u32 %v3660_v21, %v12886_v62  ;;  %v3855_v43 = vshll.u32 %v17401_v1, %v3852_v12  ;;  %v17587_v33 = vmov 2475754826  }
 0x37a   :  { %v3858_v31 = vshll.u32 %v17587_v33, %v3852_v12  ;;  %v3861_v6 = vshll.u32 %v17445_v19, %v3852_v12  ;;  %vm3378_vm3 = vcmp.eq.s32.totalorder %v12905_v2, 0  ;;  %v3856_v47 = vshrl.u32 %v17587_v33, %v12897_v28  ;;  %v17588_v12 = vld [vmem:[#allocation27_spill] sm:$0xff] }
 0x37b   :  { %v3859_v30 = vshrl.u32 %v17445_v19, %v12897_v28  ;;  %v3862_v29 = vshrl.u32 %v17405_v9, %v12897_v28  ;;  %vm3953_vm5 = vcmp.gt.s32.totalorder %v3952_v18, 0  ;;  %8003 = vcosq.f32 %v12916_v13 }
 0x37c   :  { %v12945_v15 = vand.u32 3, %v3479_v56  ;;  %v3797_v14 = vshll.u32 %v12921_v3, 30  ;;  %v3866_v32 = vor.u32 %v3865_v63, %v3864_v40  ;;  %vm3492_vm8 = vcmp.lt.s32.totalorder %v17588_v12, 0 }
 0x37d   :  { %v12949_v51 = vadd.f32 %v3729_v53, %v3724_v11  ;;  %v3845_v57 = vand.u32 8388607, %v17271_v37  ;;  %v3869_v5 = vor.u32 %v3868_v39, %v3867_v58  ;;  %vm3873_vm9 = vcmp.lt.s32.totalorder %v12927_v59, 4  ;;  %v8000_v55 = vpop.eup %7999 }
 0x37e   :  { %v3563_v61 = vshll.u32 %v12736_v54, %v12883_v23  ;;  %v3564_v4 = vshrl.u32 %v3546_v7, %v3562_v16  ;;  %v3568_v17 = vshll.u32 %v3567_v20, 23  ;;  %v3954_v10 = vsel %vm3953_vm5, %v3952_v18, 0  ;;  %v8002_v35 = vpop.eup %8001 }
 0x37f   :  { %17589 = vst [vmem:[#allocation19_spill] sm:$0xff] %v12949_v51  ;;  %v3662_v48 = vclz %v7478_v22  ;;  %v12956_v56 = vor.u32 %v3856_v47, %v3855_v43  ;;  %v12958_v21 = vor.u32 %v3859_v30, %v3858_v31  ;;  %v3863_v11 = vor.u32 %v3862_v29, %v3861_v6 }
 0x380   :  { %v12961_v40 = vsub.s32 %v12881_v42, %v3797_v14  ;;  %vm3870_vm10 = vcmp.lt.s32.totalorder %v12927_v59, 1  ;;  %vm3872_vm2 = vcmp.lt.s32.totalorder %v12927_v59, 3  ;;  %v3879_v54 = vsel %vm3873_vm9, %v3866_v32, 920167782 }
 0x381   :  { %v3382_v23 = vxor.u32 2147483648, %v8000_v55  ;;  %v3846_v7 = vor.u32 8388608, %v3845_v57  ;;  %v3883_v16 = vsel %vm3873_vm9, %v3869_v5, 1326507024  ;;  %v3956_v18 = vand.u32 31, %v3954_v10 }
 0x382   :  { %v3379_v63 = vxor.u32 2147483648, %v8002_v35  ;;  %v3565_v20 = vor.u32 %v3564_v4, %v3563_v61  ;;  %v3569_v58 = vor.u32 4788187, %v3568_v17  ;;  %v3576_v39 = vsub.s32 4, %v12659_v0 }
 0x383   :  { %v7479_v42 = vadd.s32 4294967294, %v3662_v48  ;;  %vm3871_vm11 = vcmp.lt.s32.totalorder %v12927_v59, 2  ;;  %v3878_v22 = vsel %vm3870_vm10, %v12956_v56, %v12958_v21  ;;  %v3880_v53 = vsel %vm3872_vm2, %v3863_v11, %v3879_v54 }
 0x384   :  { %v17590_v43 = vand.u32 2147483647, %v17588_v12  ;;  %v3800_v6 = vsub.s32 0, %v12961_v40  ;;  %v3882_v47 = vsel %vm3870_vm10, %v12958_v21, %v3863_v11  ;;  %v3884_v30 = vsel %vm3872_vm2, %v3866_v32, %v3883_v16 }
 0x385   :  { %v4049_v29 = vand.u32 2139095040, %v12949_v51  ;;  %v12992_v14 = vsel %vm3381_vm4, %v3382_v23, %v8002_v35  ;;  %8005 = vsinq.f32 %v12916_v13  ;;  %v12995_v57 = vshll.u32 %v3846_v7, 8 }
 0x386   :  { %vm12979_vm7 = vcmp.le.f32.partialorder %v17590_v43, 0.7853982  ;;  %v12997_v5 = vsub.s32 32, %v3956_v18  ;;  %v13001_v61 = vsel %vm3378_vm3, %v8000_v55, %v3379_v63  ;;  %v3572_v4 = vcvt.s32.f32 %v3565_v20 }
 0x387   :  { %v13006_v32 = vsel %vm3492_vm8, %v3576_v39, %v12659_v0  ;;  %v3881_v17 = vsel %vm3871_vm11, %v3878_v22, %v3880_v53  ;;  %v3570_v35 = vand.u32 2147483647, %v3569_v58  ;;  %vm7480_vm12 = vcmp.lt.s32.totalorder %v7479_v42, 0 }
 0x388   :  { %v3885_v13 = vsel %vm3871_vm11, %v3882_v47, %v3884_v30  ;;  %v7483_v54 = vmin.u32 %v3800_v6, %v12961_v40  ;;  %v3854_v55 = vshrl.u32 %v17401_v1, %v12897_v28  ;;  %v3875_v23 = vsel %vm3873_vm9, %v3863_v11, 2102212464  ;;  %v13018_v7 = vpop.eup %8003 }
 0x389   :  { %v4050_v0 = vshrl.u32 %v4049_v29, 23  ;;  %v13021_v16 = vmul.u32.u64.low %v12995_v57, %v3881_v17  ;;  %v13022_v63 = vmul.u32.u64.high %v12995_v57, %v3881_v17, %v13021_v16  ;;  %v3968_v20 = vshll.u32 %v17405_v9, %v3956_v18 }
 0x38a   :  { %v3969_v58 = vshrl.u32 %v17585_v8, %v12997_v5  ;;  %v13029_v39 = vmul.u32.u64.low %v12995_v57, %v3885_v13  ;;  %v13030_v22 = vmul.u32.u64.high %v12995_v57, %v3885_v13, %v13029_v39  ;;  %v13032_v28 = vshrl.u32 %v3954_v10, 5 }
 0x38b   :  { %v3959_v11 = vshll.u32 %v17401_v1, %v3956_v18  ;;  %v3962_v53 = vshll.u32 %v17587_v33, %v3956_v18  ;;  %v3965_v43 = vshll.u32 %v17445_v19, %v3956_v18  ;;  %v3971_v6 = vshll.u32 %v17585_v8, %v3956_v18 }
 0x38c   :  { %v3972_v47 = vshrl.u32 %v17586_v36, %v12997_v5  ;;  %v3960_v30 = vshrl.u32 %v17587_v33, %v12997_v5  ;;  %v3963_v29 = vshrl.u32 %v17445_v19, %v12997_v5  ;;  %v3966_v10 = vshrl.u32 %v17405_v9, %v12997_v5 }
 0x38d   :  { %v7494_v17 = vadd.s32 4294967169, %v4050_v0  ;;  %vm3377_vm6 = vcmp.lt.s32.totalorder %v12905_v2, 2  ;;  %v3573_v13 = vmul.f32 %v3572_v4, %v3570_v35  ;;  %v3579_v18 = vsel %vm12979_vm7, 0, %v13006_v32 }
 0x38e   :  { %v3650_v39 = vadd.s32 %v12667_v34, %v12684_v24  ;;  %v3970_v37 = vor.u32 %v3969_v58, %v3968_v20  ;;  %vm3485_vm13 = vcmp.eq.s32.totalorder %v12945_v15, 2  ;;  %v3486_v48 = vxor.u32 2147483648, %v13018_v7 }
 0x38f   :  { %v3665_v52 = vsel %vm7480_vm12, 0, %v7479_v42  ;;  %v17593_v38 = vand.u32 2147483647, %v12830_v41  ;;  %vm3977_vm15 = vcmp.lt.s32.totalorder %v13032_v28, 4  ;;  %v3802_v4 = vclz %v7483_v54 }
 0x390   :  { %v3874_v32 = vsel %vm3870_vm10, %v3854_v55, %v12956_v56  ;;  %v3876_v34 = vsel %vm3872_vm2, %v12958_v21, %v3875_v23  ;;  %v3973_v24 = vor.u32 %v3972_v47, %v3971_v6  ;;  %vm3482_vm0 = vcmp.eq.s32.totalorder %v12945_v15, 0 }
 0x391   :  { %v3949_v0 = vand.u32 8388607, %v17593_v38  ;;  %v13065_v35 = vor.u32 %v3960_v30, %v3959_v11  ;;  %v13067_v42 = vor.u32 %v3963_v29, %v3962_v53  ;;  %v3967_v20 = vor.u32 %v3966_v10, %v3965_v43  ;;  %v13077_v53 = vld [vmem:[#allocation2 + $0x9] ss:$0 sm:$0xff]  ;;  %v4169_v43 = vld [vmem:[#allocation7 + $0x120] sm:$0xff] }
 0x392   :  { %v4056_v38 = vadd.s32 1, %v7494_v17  ;;  %v3574_v58 = vxor.u32 2147483648, %v3573_v13  ;;  %vm3974_vm14 = vcmp.lt.s32.totalorder %v13032_v28, 1  ;;  %vm3976_vm1 = vcmp.lt.s32.totalorder %v13032_v28, 3  ;;  %v8006_v54 = vpop.eup %8005 }
 0x393   :  { %v3983_v56 = vsel %vm3977_vm15, %v3970_v37, 920167782  ;;  %vm3374_vm4 = vweird.f32 %v17573_v45  ;;  %v3666_v21 = vsub.s32 32, %v3665_v52  ;;  %v3877_v55 = vsel %vm3871_vm11, %v3874_v32, %v3876_v34 }
 0x394   :  { %v3896_v23 = vadd.s32 1, %v13022_v63  ;;  %v3950_v11 = vor.u32 8388608, %v3949_v0  ;;  %vm3481_vm3 = vcmp.lt.s32.totalorder %v12945_v15, 2  ;;  %v3670_v6 = vsub.s32 4294967266, %v3665_v52 }
 0x395   :  { %v7484_v47 = vadd.s32 4294967294, %v3802_v4  ;;  %vm3895_vm5 = vc.u32 %v13030_v22, %v13021_v16  ;;  %v3987_v30 = vsel %vm3977_vm15, %v3973_v24, 1326507024  ;;  %vm3975_vm9 = vcmp.lt.s32.totalorder %v13032_v28, 2 }
 0x396   :  { %v3982_v59 = vsel %vm3974_vm14, %v13065_v35, %v13067_v42  ;;  %v3984_v29 = vsel %vm3976_vm1, %v3967_v20, %v3983_v56  ;;  %vm4057_vm10 = vcmp.gt.s32.totalorder %v4056_v38, 0  ;;  %v3483_v10 = vxor.u32 2147483648, %v8006_v54  ;;  %v4178_v56 = vld [vmem:[#allocation8 + $0x120] sm:$0xff] }
 0x397   :  { %v3667_v17 = vshll.u32 %v12886_v62, %v3665_v52  ;;  %v3893_v0 = vmul.u32 %v12995_v57, %v3877_v55  ;;  %v4173_v4 = vmul.f32 %v13077_v53, %v4169_v43  ;;  %v3897_v32 = vsel %vm3895_vm5, %v3896_v23, %v13022_v63 }
 0x398   :  { %v3986_v34 = vsel %vm3974_vm14, %v13067_v42, %v3967_v20  ;;  %v3988_v24 = vsel %vm3976_vm1, %v3970_v37, %v3987_v30  ;;  %v13100_v41 = vshll.u32 %v3950_v11, 8  ;;  %v3668_v60 = vshrl.u32 %v3650_v39, %v3666_v21 }
 0x399   :  { %vm7485_vm2 = vcmp.lt.s32.totalorder %v7484_v47, 0  ;;  %v3985_v62 = vsel %vm3975_vm9, %v3982_v59, %v3984_v29  ;;  %v4058_v52 = vsel %vm4057_vm10, %v4056_v38, 0  ;;  %v3384_v57 = vsel %vm3377_vm6, %v13001_v61, %v12992_v14 }
 0x39a   :  { %v3575_v63 = vsel %vm3492_vm8, %v3574_v58, %v3573_v13  ;;  %v3583_v55 = vadd.s32 3, %v3579_v18  ;;  %v3671_v23 = vadd.s32 127, %v3670_v6  ;;  %v3487_v37 = vsel %vm3485_vm13, %v3486_v48, %v8006_v54 }
 0x39b   :  { %v13112_v11 = vadd.s32 %v3897_v32, %v3893_v0  ;;  %v3989_v39 = vsel %vm3975_vm9, %v3986_v34, %v3988_v24  ;;  %v13116_v21 = vadd.f32 %v4178_v56, %v4173_v4  ;;  %v13118_v38 = vsel %vm7485_vm2, 0, %v7484_v47  ;;  %v4170_v32 = vld [vmem:[#allocation7 + $0x128] sm:$0xff] }
 0x39c   :  { %v13121_v2 = vmul.u32.u64.low %v13100_v41, %v3985_v62  ;;  %v13122_v14 = vmul.u32.u64.high %v13100_v41, %v3985_v62, %v13121_v2  ;;  %v4060_v61 = vand.u32 31, %v4058_v52  ;;  %v3484_v13 = vsel %vm3482_vm0, %v13018_v7, %v3483_v10  ;;  %v17595_v62 = vld [vmem:[#allocation18_spill] sm:$0xff] }
 0x39d   :  { %17594 = vst [vmem:[#allocation23_spill] sm:$0xff] %v13116_v21  ;;  %v3578_v48 = vsel %vm12979_vm7, %v17588_v12, %v3575_v63  ;;  %v13131_v18 = vor.u32 %v3668_v60, %v3667_v17  ;;  %v3958_v58 = vshrl.u32 %v17401_v1, %v12997_v5  ;;  %v3672_v54 = vshll.u32 %v3671_v23, 23 }
 0x39e   :  { %v3979_v43 = vsel %vm3977_vm15, %v3967_v20, 2102212464  ;;  %v13138_v6 = vmul.u32.u64.low %v13100_v41, %v3989_v39  ;;  %v13139_v47 = vmul.u32.u64.high %v13100_v41, %v3989_v39, %v13138_v6  ;;  %v13143_v7 = vsel %vm3374_vm4, nan, %v3384_v57 }
 0x39f   :  { %v3810_v31 = vsub.s32 4294967266, %v13118_v38  ;;  %v3899_v60 = vadd.s32 536870912, %v13112_v11  ;;  %v4189_v30 = vand.u32 2139095040, %v13116_v21  ;;  %v3488_v5 = vsel %vm3481_vm3, %v3484_v13, %v3487_v37 }
 0x3a0   :  { %8007 = vcosq.f32 %v3578_v48  ;;  %v13150_v59 = vand.u32 3, %v3583_v55  ;;  %v13152_v20 = vsub.s32 32, %v4060_v61  ;;  %v3680_v29 = vsub.s32 4, %v12846_v50 }
 0x3a1   :  { %8009 = vsinq.f32 %v3578_v48  ;;  %v3978_v45 = vsel %vm3974_vm14, %v3958_v58, %v13065_v35  ;;  %v3980_v10 = vsel %vm3976_vm1, %v13067_v42, %v3979_v43  ;;  %vm3478_vm8 = vweird.f32 %v12024_v25  ;;  %v4179_v58 = vld [vmem:[#allocation8 + $0x128] sm:$0xff] }
 0x3a2   :  { %v3673_v15 = vor.u32 4788187, %v3672_v54  ;;  %v3676_v17 = vcvt.s32.f32 %v13131_v18  ;;  %v3790_v0 = vadd.s32 %v12789_v49, %v12798_v27  ;;  %v17276_v4 = vand.u32 2147483647, %v12949_v51 }
 0x3a3   :  { %v3806_v34 = vsub.s32 32, %v13118_v38  ;;  %v3811_v24 = vadd.s32 127, %v3810_v31  ;;  %v13167_v56 = vshrl.u32 %v3899_v60, 30  ;;  %v4190_v35 = vshrl.u32 %v4189_v30, 23 }
 0x3a4   :  { %vm3596_vm11 = vcmp.lt.s32.totalorder %v17595_v62, 0  ;;  %v3981_v42 = vsel %vm3975_vm9, %v3978_v45, %v3980_v10  ;;  %v4000_v57 = vadd.s32 1, %v13122_v14  ;;  %v4072_v63 = vshll.u32 %v17405_v9, %v4060_v61 }
 0x3a5   :  { %v4073_v49 = vshrl.u32 %v17585_v8, %v13152_v20  ;;  %v13176_v27 = vshrl.u32 %v4058_v52, 5  ;;  %v4075_v55 = vshll.u32 %v17585_v8, %v4060_v61  ;;  %v4076_v23 = vshrl.u32 %v17586_v36, %v13152_v20 }
 0x3a6   :  { %v4174_v37 = vmul.f32 %v13077_v53, %v4170_v32  ;;  %vm3999_vm7 = vc.u32 %v13139_v47, %v13121_v2  ;;  %v4063_v28 = vshll.u32 %v17401_v1, %v4060_v61  ;;  %v4066_v39 = vshll.u32 %v17587_v33, %v4060_v61 }
 0x3a7   :  { %v4069_v13 = vshll.u32 %v17445_v19, %v4060_v61  ;;  %v4064_v52 = vshrl.u32 %v17587_v33, %v13152_v20  ;;  %v4067_v48 = vshrl.u32 %v17445_v19, %v13152_v20  ;;  %v4070_v18 = vshrl.u32 %v17405_v9, %v13152_v20 }
 0x3a8   :  { %v7499_v54 = vadd.s32 4294967169, %v4190_v35  ;;  %v3674_v43 = vand.u32 2147483647, %v3673_v15  ;;  %v3807_v6 = vshll.u32 %v12961_v40, %v13118_v38  ;;  %v3997_v31 = vmul.u32 %v13100_v41, %v3981_v42 }
 0x3a9   :  { %v4074_v60 = vor.u32 %v4073_v49, %v4072_v63  ;;  %v17596_v61 = vand.u32 2147483647, %v17595_v62  ;;  %v4001_v45 = vsel %vm3999_vm7, %v4000_v57, %v13122_v14  ;;  %v4053_v10 = vand.u32 8388607, %v17276_v4 }
 0x3aa   :  { %v4077_v32 = vor.u32 %v4076_v23, %v4075_v55  ;;  %vm4081_vm6 = vcmp.lt.s32.totalorder %v13176_v27, 4  ;;  %v3808_v15 = vshrl.u32 %v3790_v0, %v3806_v34  ;;  %v3812_v35 = vshll.u32 %v3811_v24, 23 }
 0x3ab   :  { %vm13198_vm12 = vcmp.le.f32.partialorder %v17596_v61, 0.7853982  ;;  %v3901_v40 = vshll.u32 %v13167_v56, 30  ;;  %v13207_v41 = vadd.f32 %v4179_v58, %v4174_v37  ;;  %v4065_v38 = vor.u32 %v4064_v52, %v4063_v28  ;;  %v3260_v37 = vld [vmem:[#allocation5 + $0xe0] sm:$0xff]  ;;  %v3261_v28 = vld [vmem:[#allocation5 + $0xe8] sm:$0xff] }
 0x3ac   :  { %v4068_v42 = vor.u32 %v4067_v48, %v4066_v39  ;;  %v4071_v63 = vor.u32 %v4070_v18, %v4069_v13  ;;  %v4196_v49 = vadd.s32 1, %v7499_v54  ;;  %v13209_v61 = vadd.s32 %v4001_v45, %v3997_v31 }
 0x3ad   :  { %17599 = vst [vmem:[#allocation26_spill] sm:$0xff] %v13207_v41  ;;  %vm4078_vm13 = vcmp.lt.s32.totalorder %v13176_v27, 1  ;;  %vm4080_vm15 = vcmp.lt.s32.totalorder %v13176_v27, 3  ;;  %v4087_v14 = vsel %vm4081_vm6, %v4074_v60, 920167782  ;;  %v13215_v57 = vpop.eup %8007  ;;  %v3489_v0 = vsel %vm3478_vm8, nan, %v3488_v5 }
 0x3ae   :  { %v3681_v34 = vsel %vm3596_vm11, %v3680_v29, %v12846_v50  ;;  %v4054_v24 = vor.u32 8388608, %v4053_v10  ;;  %v4091_v55 = vsel %vm4081_vm6, %v4077_v32, 1326507024  ;;  %v8010_v23 = vpop.eup %8009  ;;  %v3677_v39 = vmul.f32 %v3676_v17, %v3674_v43 }
 0x3af   :  { %v3809_v13 = vor.u32 %v3808_v15, %v3807_v6  ;;  %v3813_v52 = vor.u32 4788187, %v3812_v35  ;;  %vm4079_vm0 = vcmp.lt.s32.totalorder %v13176_v27, 2  ;;  %v4086_v25 = vsel %vm4078_vm13, %v4065_v38, %v4068_v42 }
 0x3b0   :  { %v4088_v5 = vsel %vm4080_vm15, %v4071_v63, %v4087_v14  ;;  %vm4197_vm14 = vcmp.gt.s32.totalorder %v4196_v49, 0  ;;  %v4293_v50 = vand.u32 2139095040, %v13207_v41  ;;  %vm3586_vm1 = vcmp.eq.s32.totalorder %v13150_v59, 0 }
 0x3b1   :  { %v13232_v29 = vsub.s32 %v13112_v11, %v3901_v40  ;;  %v4003_v17 = vadd.s32 536870912, %v13209_v61  ;;  %v4090_v48 = vsel %vm4078_vm13, %v4068_v42, %v4071_v63  ;;  %v4092_v18 = vsel %vm4080_vm15, %v4074_v60, %v4091_v55 }
 0x3b2   :  { %vm3589_vm4 = vcmp.eq.s32.totalorder %v13150_v59, 2  ;;  %v3698_v58 = vmul.f32 %v13143_v7, %v3260_v37  ;;  %v3699_v54 = vmul.f32 %v3489_v0, %v3261_v28  ;;  %v13241_v43 = vshll.u32 %v4054_v24, 8 }
 0x3b3   :  { %v3678_v6 = vxor.u32 2147483648, %v3677_v39  ;;  %v3683_v11 = vsel %vm13198_vm12, 0, %v3681_v34  ;;  %v4089_v31 = vsel %vm4079_vm0, %v4086_v25, %v4088_v5  ;;  %v4198_v45 = vsel %vm4197_vm14, %v4196_v49, 0 }
 0x3b4   :  { %v3816_v10 = vcvt.s32.f32 %v3809_v13  ;;  %v4062_v32 = vshrl.u32 %v17401_v1, %v13152_v20  ;;  %v4093_v60 = vsel %vm4079_vm0, %v4090_v48, %v4092_v18  ;;  %v4294_v15 = vshrl.u32 %v4293_v50, 23 }
 0x3b5   :  { %v3814_v7 = vand.u32 2147483647, %v3813_v52  ;;  %v3904_v35 = vsub.s32 0, %v13232_v29  ;;  %v13252_v40 = vshrl.u32 %v4003_v17, 30  ;;  %v4083_v14 = vsel %vm4081_vm6, %v4071_v63, 2102212464 }
 0x3b6   :  { %v3687_v0 = vadd.s32 3, %v3683_v11  ;;  %v13257_v34 = vmul.u32.u64.low %v13241_v43, %v4089_v31  ;;  %v13258_v49 = vmul.u32.u64.high %v13241_v43, %v4089_v31, %v13257_v34  ;;  %v4200_v24 = vand.u32 31, %v4198_v45 }
 0x3b7   :  { %v3587_v20 = vxor.u32 2147483648, %v8010_v23  ;;  %v3590_v55 = vxor.u32 2147483648, %v13215_v57  ;;  %v13263_v37 = vmul.u32.u64.low %v13241_v43, %v4093_v60  ;;  %v13264_v28 = vmul.u32.u64.high %v13241_v43, %v4093_v60, %v13263_v37 }
 0x3b8   :  { %v3820_v13 = vsub.s32 4, %v12921_v3  ;;  %v4082_v52 = vsel %vm4078_vm13, %v4062_v32, %v4065_v38  ;;  %v4084_v63 = vsel %vm4080_vm15, %v4068_v42, %v4083_v14  ;;  %v7503_v25 = vadd.s32 4294967169, %v4294_v15  ;;  %v4171_v38 = vld [vmem:[#allocation7 + $0x130] sm:$0xff] }
 0x3b9   :  { %v3679_v5 = vsel %vm3596_vm11, %v3678_v6, %v3677_v39  ;;  %v3817_v50 = vmul.f32 %v3816_v10, %v3814_v7  ;;  %v7487_v17 = vmin.u32 %v3904_v35, %v13232_v29  ;;  %v4005_v48 = vshll.u32 %v13252_v40, 30 }
 0x3ba   :  { %v13276_v18 = vadd.f32 %v3698_v58, %v12892_v46  ;;  %v17601_v11 = vand.u32 2147483647, %v12461_v26  ;;  %vm3736_vm5 = vcmp.lt.s32.totalorder %v12461_v26, 0  ;;  %v13285_v42 = vsub.s32 32, %v4200_v24 }
 0x3bb   :  { %v3591_v39 = vsel %vm3589_vm4, %v3590_v55, %v8010_v23  ;;  %v13289_v6 = vand.u32 3, %v3687_v0  ;;  %v13292_v10 = vadd.f32 %v3699_v54, %v12900_v44  ;;  %v4085_v46 = vsel %vm4079_vm0, %v4082_v52, %v4084_v63  ;;  %v4180_v55 = vld [vmem:[#allocation8 + $0x130] sm:$0xff] }
 0x3bc   :  { %17600 = vst [vmem:[#allocation16_spill] sm:$0xff] %v13276_v18  ;;  %vm13280_vm3 = vcmp.le.f32.partialorder %v17601_v11, 0.7853982  ;;  %vm3585_vm9 = vcmp.lt.s32.totalorder %v13150_v59, 2  ;;  %v3588_v58 = vsel %vm3586_vm1, %v13215_v57, %v3587_v20  ;;  %v3682_v32 = vsel %vm13198_vm12, %v17595_v62, %v3679_v5 }
 0x3bd   :  { %17604 = vst [vmem:[#allocation29_spill] sm:$0xff] %v13292_v10  ;;  %v3821_v23 = vsel %vm3736_vm5, %v3820_v13, %v12921_v3  ;;  %v4300_v60 = vadd.s32 1, %v7503_v25  ;;  %v3818_v44 = vxor.u32 2147483648, %v3817_v50  ;;  %v3906_v54 = vclz %v7487_v17 }
 0x3be   :  { %v13307_v27 = vsub.s32 %v13209_v61, %v4005_v48  ;;  %v4175_v15 = vmul.f32 %v13077_v53, %v4171_v38  ;;  %v4101_v7 = vmul.u32 %v13241_v43, %v4085_v46  ;;  %v4104_v57 = vadd.s32 1, %v13258_v49 }
 0x3bf   :  { %v4212_v35 = vshll.u32 %v17405_v9, %v4200_v24  ;;  %v4213_v30 = vshrl.u32 %v17585_v8, %v13285_v42  ;;  %vm4103_vm10 = vc.u32 %v13264_v28, %v13257_v34  ;;  %v17277_v3 = vand.u32 2147483647, %v13116_v21 }
 0x3c0   :  { %v13318_v14 = vshrl.u32 %v4198_v45, 5  ;;  %v4203_v61 = vshll.u32 %v17401_v1, %v4200_v24  ;;  %v4204_v0 = vshrl.u32 %v17587_v33, %v13285_v42  ;;  %v4215_v43 = vshll.u32 %v17585_v8, %v4200_v24 }
 0x3c1   :  { %v4216_v20 = vshrl.u32 %v17586_v36, %v13285_v42  ;;  %vm4301_vm2 = vcmp.gt.s32.totalorder %v4300_v60, 0  ;;  %v4206_v37 = vshll.u32 %v17587_v33, %v4200_v24  ;;  %v4207_v13 = vshrl.u32 %v17445_v19, %v13285_v42 }
 0x3c2   :  { %v4209_v45 = vshll.u32 %v17445_v19, %v4200_v24  ;;  %v4210_v52 = vshrl.u32 %v17405_v9, %v13285_v42  ;;  %8011 = vcosq.f32 %v3682_v32  ;;  %v3823_v63 = vsel %vm13280_vm3, 0, %v3821_v23 }
 0x3c3   :  { %v4105_v25 = vsel %vm4103_vm10, %v4104_v57, %v13258_v49  ;;  %v4214_v5 = vor.u32 %v4213_v30, %v4212_v35  ;;  %v3819_v17 = vsel %vm3736_vm5, %v3818_v44, %v3817_v50  ;;  %v4193_v48 = vand.u32 8388607, %v17277_v3 }
 0x3c4   :  { %vm4221_vm8 = vcmp.lt.s32.totalorder %v13318_v14, 4  ;;  %v4302_v11 = vsel %vm4301_vm2, %v4300_v60, 0  ;;  %v7488_v24 = vadd.s32 4294967294, %v3906_v54  ;;  %v4008_v38 = vsub.s32 0, %v13307_v27 }
 0x3c5   :  { %v13341_v46 = vadd.f32 %v4180_v55, %v4175_v15  ;;  %v4217_v4 = vor.u32 %v4216_v20, %v4215_v43  ;;  %v13343_v10 = vadd.s32 %v4105_v25, %v4101_v7  ;;  %v4205_v23 = vor.u32 %v4204_v0, %v4203_v61 }
 0x3c6   :  { %v13345_v49 = vor.u32 %v4207_v13, %v4206_v37  ;;  %v4211_v57 = vor.u32 %v4210_v52, %v4209_v45  ;;  %vm4218_vm11 = vcmp.lt.s32.totalorder %v13318_v14, 1  ;;  %vm4220_vm7 = vcmp.lt.s32.totalorder %v13318_v14, 3 }
 0x3c7   :  { %v4227_v50 = vsel %vm4221_vm8, %v4214_v5, 920167782  ;;  %v4304_v60 = vand.u32 31, %v4302_v11  ;;  %v13353_v44 = vsel %vm3585_vm9, %v3588_v58, %v3591_v39  ;;  %8013 = vsinq.f32 %v3682_v32 }
 0x3c8   :  { %v13358_v54 = vsel %vm13280_vm3, %v12461_v26, %v3819_v17  ;;  %v4194_v15 = vor.u32 8388608, %v4193_v48  ;;  %v13360_v7 = vadd.s32 3, %v3823_v63  ;;  %vm7489_vm12 = vcmp.lt.s32.totalorder %v7488_v24, 0 }
 0x3c9   :  { %v7491_v35 = vmin.u32 %v4008_v38, %v13307_v27  ;;  %v4231_v30 = vsel %vm4221_vm8, %v4217_v4, 1326507024  ;;  %v4107_v61 = vadd.s32 536870912, %v13343_v10  ;;  %vm4219_vm6 = vcmp.lt.s32.totalorder %v13318_v14, 2 }
 0x3ca   :  { %v4226_v59 = vsel %vm4218_vm11, %v4205_v23, %v13345_v49  ;;  %v4228_v31 = vsel %vm4220_vm7, %v4211_v57, %v4227_v50  ;;  %8015 = vcosq.f32 %v13358_v54  ;;  %v13375_v39 = vadd.s32 %v13021_v16, %v13030_v22 }
 0x3cb   :  { %v13377_v58 = vsub.s32 32, %v4304_v60  ;;  %v4397_v4 = vand.u32 2139095040, %v13341_v46  ;;  %v13380_v32 = vsel %vm7489_vm12, 0, %v7488_v24  ;;  %v4230_v0 = vsel %vm4218_vm11, %v13345_v49, %v4211_v57 }
 0x3cc   :  { %v4232_v43 = vsel %vm4220_vm7, %v4214_v5, %v4231_v30  ;;  %v13387_v20 = vshll.u32 %v4194_v15, 8  ;;  %v3910_v55 = vsub.s32 32, %v13380_v32  ;;  %v4010_v37 = vclz %v7491_v35 }
 0x3cd   :  { %v4229_v16 = vsel %vm4219_vm6, %v4226_v59, %v4228_v31  ;;  %v4398_v22 = vshrl.u32 %v4397_v4, 23  ;;  %v13392_v13 = vshrl.u32 %v4107_v61, 30  ;;  %v4202_v45 = vshrl.u32 %v17401_v1, %v13285_v42 }
 0x3ce   :  { %v4223_v52 = vsel %vm4221_vm8, %v4211_v57, 2102212464  ;;  %v17282_v63 = vand.u32 2147483647, %v13207_v41  ;;  %v4233_v25 = vsel %vm4219_vm6, %v4230_v0, %v4232_v43  ;;  %v4316_v5 = vshll.u32 %v17405_v9, %v4304_v60 }
 0x3cf   :  { %17605 = vst [vmem:[#allocation21_spill] sm:$0xff] %v13392_v13  ;;  %v4317_v17 = vshrl.u32 %v17585_v8, %v13377_v58  ;;  %v7507_v48 = vadd.s32 4294967169, %v4398_v22  ;;  %v13404_v24 = vpop.eup %8011  ;;  %v13407_v38 = vmul.u32.u64.low %v13387_v20, %v4229_v16  ;;  %v13408_v50 = vmul.u32.u64.high %v13387_v20, %v4229_v16, %v13407_v38 }
 0x3d0   :  { %v13411_v42 = vshrl.u32 %v4302_v11, 5  ;;  %v4307_v57 = vshll.u32 %v17401_v1, %v4304_v60  ;;  %v4310_v15 = vshll.u32 %v17587_v33, %v4304_v60  ;;  %v4319_v35 = vshll.u32 %v17585_v8, %v4304_v60 }
 0x3d1   :  { %17606 = vst [vmem:[#allocation22_spill] sm:$0xff] %v13407_v38  ;;  %v4320_v30 = vshrl.u32 %v17586_v36, %v13377_v58  ;;  %v4404_v61 = vadd.s32 1, %v7507_v48  ;;  %v4308_v59 = vshrl.u32 %v17587_v33, %v13377_v58  ;;  %v4311_v31 = vshrl.u32 %v17445_v19, %v13377_v58 }
 0x3d2   :  { %v4313_v4 = vshll.u32 %v17445_v19, %v4304_v60  ;;  %v4314_v11 = vshrl.u32 %v17405_v9, %v13377_v58  ;;  %v13426_v0 = vmul.u32.u64.low %v13387_v20, %v4233_v25  ;;  %v13427_v43 = vmul.u32.u64.high %v13387_v20, %v4233_v25, %v13426_v0 }
 0x3d3   :  { %v4318_v16 = vor.u32 %v4317_v17, %v4316_v5  ;;  %vm4405_vm13 = vcmp.gt.s32.totalorder %v4404_v61, 0  ;;  %v3914_v22 = vsub.s32 4294967266, %v13380_v32  ;;  %v7492_v48 = vadd.s32 4294967294, %v4010_v37 }
 0x3d4   :  { %17607 = vst [vmem:[#allocation28_spill] sm:$0xff] %v13427_v43  ;;  %v4297_v3 = vand.u32 8388607, %v17282_v63  ;;  %vm4325_vm15 = vcmp.lt.s32.totalorder %v13411_v42, 4  ;;  %v13433_v21 = vpop.eup %8013  ;;  %v4109_v60 = vshll.u32 %v13392_v13, 30  ;;  %v4222_v18 = vsel %vm4218_vm11, %v4202_v45, %v4205_v23 }
 0x3d5   :  { %v4321_v51 = vor.u32 %v4320_v30, %v4319_v35  ;;  %v4406_v25 = vsel %vm4405_vm13, %v4404_v61, 0  ;;  %v4224_v5 = vsel %vm4220_vm7, %v13345_v49, %v4223_v52  ;;  %v13441_v17 = vor.u32 %v4308_v59, %v4307_v57  ;;  %v4172_v57 = vld [vmem:[#allocation7 + $0x138] sm:$0xff] }
 0x3d6   :  { %v13443_v37 = vor.u32 %v4311_v31, %v4310_v15  ;;  %v4315_v0 = vor.u32 %v4314_v11, %v4313_v4  ;;  %vm4322_vm0 = vcmp.lt.s32.totalorder %v13411_v42, 1  ;;  %vm4324_vm14 = vcmp.lt.s32.totalorder %v13411_v42, 3 }
 0x3d7   :  { %v4331_v63 = vsel %vm4325_vm15, %v4318_v16, 920167782  ;;  %v4408_v41 = vand.u32 31, %v4406_v25  ;;  %v13449_v23 = vpop.eup %8015  ;;  %8017 = vsinq.f32 %v13358_v54  ;;  %vm7493_vm1 = vcmp.lt.s32.totalorder %v7492_v48, 0 }
 0x3d8   :  { %v4298_v45 = vor.u32 8388608, %v4297_v3  ;;  %v13455_v52 = vsub.s32 %v13343_v10, %v4109_v60  ;;  %v4225_v15 = vsel %vm4219_vm6, %v4222_v18, %v4224_v5  ;;  %v4244_v35 = vadd.s32 1, %v13408_v50  ;;  %v4181_v5 = vld [vmem:[#allocation8 + $0x138] sm:$0xff] }
 0x3d9   :  { %v4335_v30 = vsel %vm4325_vm15, %v4321_v51, 1326507024  ;;  %vm4323_vm4 = vcmp.lt.s32.totalorder %v13411_v42, 2  ;;  %v4330_v54 = vsel %vm4322_vm0, %v13441_v17, %v13443_v37  ;;  %v4332_v10 = vsel %vm4324_vm14, %v4315_v0, %v4331_v63 }
 0x3da   :  { %v13469_v3 = vsub.s32 32, %v4408_v41  ;;  %v3912_v14 = vshrl.u32 %v13375_v39, %v3910_v55  ;;  %v3915_v18 = vadd.s32 127, %v3914_v22  ;;  %v13474_v61 = vadd.s32 %v13121_v2, %v13139_v47 }
 0x3db   :  { %vm4243_vm3 = vc.u32 %v13427_v43, %v13407_v38  ;;  %v4176_v51 = vmul.f32 %v13077_v53, %v4172_v57  ;;  %v4334_v59 = vsel %vm4322_vm0, %v13443_v37, %v4315_v0  ;;  %v4336_v63 = vsel %vm4324_vm14, %v4318_v16, %v4335_v30 }
 0x3dc   :  { %v13484_v31 = vshll.u32 %v4298_v45, 8  ;;  %v13487_v39 = vsel %vm7493_vm1, 0, %v7492_v48  ;;  %v4112_v2 = vsub.s32 0, %v13455_v52  ;;  %v4241_v47 = vmul.u32 %v13387_v20, %v4225_v15 }
 0x3dd   :  { %v4333_v55 = vsel %vm4323_vm4, %v4330_v54, %v4332_v10  ;;  %v4245_v53 = vsel %vm4243_vm3, %v4244_v35, %v13408_v50  ;;  %v17292_v4 = vand.u32 2147483647, %v13341_v46  ;;  %v4420_v11 = vshll.u32 %v17405_v9, %v4408_v41 }
 0x3de   :  { %v4421_v16 = vshrl.u32 %v17585_v8, %v13469_v3  ;;  %v4337_v22 = vsel %vm4323_vm4, %v4334_v59, %v4336_v63  ;;  %v13500_v48 = vshrl.u32 %v4406_v25, 5  ;;  %v4423_v60 = vshll.u32 %v17585_v8, %v4408_v41 }
 0x3df   :  { %v4424_v20 = vshrl.u32 %v17586_v36, %v13469_v3  ;;  %v13506_v50 = vmul.u32.u64.low %v13484_v31, %v4333_v55  ;;  %v13507_v45 = vmul.u32.u64.high %v13484_v31, %v4333_v55, %v13506_v50  ;;  %v4411_v57 = vshll.u32 %v17401_v1, %v4408_v41 }
 0x3e0   :  { %v4414_v15 = vshll.u32 %v17587_v33, %v4408_v41  ;;  %v4412_v35 = vshrl.u32 %v17587_v33, %v13469_v3  ;;  %v4415_v25 = vshrl.u32 %v17445_v19, %v13469_v3  ;;  %v4417_v30 = vshll.u32 %v17445_v19, %v4408_v41 }
 0x3e1   :  { %v4418_v54 = vshrl.u32 %v17405_v9, %v13469_v3  ;;  %v4306_v10 = vshrl.u32 %v17401_v1, %v13377_v58  ;;  %v13522_v59 = vmul.u32.u64.low %v13484_v31, %v4337_v22  ;;  %v13523_v63 = vmul.u32.u64.high %v13484_v31, %v4337_v22, %v13522_v59 }
 0x3e2   :  { %v4422_v55 = vor.u32 %v4421_v16, %v4420_v11  ;;  %v13525_v49 = vadd.f32 %v4181_v5, %v4176_v51  ;;  %v4401_v13 = vand.u32 8388607, %v17292_v4  ;;  %v4425_v38 = vor.u32 %v4424_v20, %v4423_v60  ;;  %v17610_v59 = vld [vmem:[#allocation25_spill] sm:$0xff] }
 0x3e3   :  { %vm4429_vm5 = vcmp.lt.s32.totalorder %v13500_v48, 4  ;;  %v3916_v41 = vshll.u32 %v3915_v18, 23  ;;  %v4018_v43 = vsub.s32 4294967266, %v13487_v39  ;;  %v7495_v19 = vmin.u32 %v4112_v2, %v13455_v52 }
 0x3e4   :  { %17608 = vst [vmem:[#allocation27_spill] sm:$0xff] %v13525_v49  ;;  %v4327_v58 = vsel %vm4325_vm15, %v4315_v0, 2102212464  ;;  %v13534_v33 = vpop.eup %8017  ;;  %v13536_v22 = vadd.s32 %v4245_v53, %v4241_v47  ;;  %v13538_v51 = vor.u32 %v4412_v35, %v4411_v57  ;;  %v13540_v11 = vor.u32 %v4415_v25, %v4414_v15 }
 0x3e5   :  { %v4419_v16 = vor.u32 %v4418_v54, %v4417_v30  ;;  %v4326_v18 = vsel %vm4322_vm0, %v4306_v10, %v13441_v17  ;;  %vm4426_vm9 = vcmp.lt.s32.totalorder %v13500_v48, 1  ;;  %vm4428_vm10 = vcmp.lt.s32.totalorder %v13500_v48, 3 }
 0x3e6   :  { %v4435_v0 = vsel %vm4429_vm5, %v4422_v55, 920167782  ;;  %vm3582_vm2 = vweird.f32 %v17588_v12  ;;  %v4328_v2 = vsel %vm4324_vm14, %v13443_v37, %v4327_v58  ;;  %v4402_v47 = vor.u32 8388608, %v4401_v13 }
 0x3e7   :  { %v4439_v53 = vsel %vm4429_vm5, %v4425_v38, 1326507024  ;;  %v4501_v60 = vand.u32 2139095040, %v13525_v49  ;;  %vm3690_vm8 = vcmp.eq.s32.totalorder %v13289_v6, 0  ;;  %vm3693_vm11 = vcmp.eq.s32.totalorder %v13289_v6, 2 }
 0x3e8   :  { %v17609_v17 = vshll.u32 %v13232_v29, %v13380_v32  ;;  %v3917_v5 = vor.u32 4788187, %v3916_v41  ;;  %v4014_v57 = vsub.s32 32, %v13487_v39  ;;  %v4019_v15 = vadd.s32 127, %v4018_v43 }
 0x3e9   :  { %v4114_v35 = vclz %v7495_v19  ;;  %vm4427_vm7 = vcmp.lt.s32.totalorder %v13500_v48, 2  ;;  %v4434_v13 = vsel %vm4426_vm9, %v13538_v51, %v13540_v11  ;;  %v4436_v38 = vsel %vm4428_vm10, %v4419_v16, %v4435_v0 }
 0x3ea   :  { %v3913_v20 = vor.u32 %v3912_v14, %v17609_v17  ;;  %v4329_v37 = vsel %vm4323_vm4, %v4326_v18, %v4328_v2  ;;  %v4348_v29 = vadd.s32 1, %v13507_v45  ;;  %v4438_v32 = vsel %vm4426_vm9, %v13540_v11, %v4419_v16 }
 0x3eb   :  { %v4440_v19 = vsel %vm4428_vm10, %v4422_v55, %v4439_v53  ;;  %v4247_v43 = vadd.s32 536870912, %v13536_v22  ;;  %vm4347_vm12 = vc.u32 %v13523_v63, %v13506_v50  ;;  %v13580_v14 = vshll.u32 %v4402_v47, 8 }
 0x3ec   :  { %v4502_v25 = vshrl.u32 %v4501_v60, 23  ;;  %v3918_v30 = vand.u32 2147483647, %v3917_v5  ;;  %v3920_v42 = vcvt.s32.f32 %v3913_v20  ;;  %v4015_v54 = vshll.u32 %v13307_v27, %v13487_v39 }
 0x3ed   :  { %v4437_v10 = vsel %vm4427_vm7, %v4434_v13, %v4436_v38  ;;  %vm3840_vm6 = vcmp.lt.s32.totalorder %v17610_v59, 0  ;;  %v4016_v55 = vshrl.u32 %v13474_v61, %v4014_v57  ;;  %v4020_v41 = vshll.u32 %v4019_v15, 23 }
 0x3ee   :  { %v4345_v58 = vmul.u32 %v13484_v31, %v4329_v37  ;;  %v4441_v18 = vsel %vm4427_vm7, %v4438_v32, %v4440_v19  ;;  %v3691_v0 = vxor.u32 2147483648, %v13433_v21  ;;  %v3694_v2 = vxor.u32 2147483648, %v13404_v24 }
 0x3ef   :  { %v7496_v47 = vadd.s32 4294967294, %v4114_v35  ;;  %v4349_v27 = vsel %vm4347_vm12, %v4348_v29, %v13507_v45  ;;  %vm3686_vm13 = vweird.f32 %v17595_v62  ;;  %v13595_v39 = vshrl.u32 %v4247_v43, 30  ;;  %v3262_v29 = vld [vmem:[#allocation5 + $0xf0] sm:$0xff] }
 0x3f0   :  { %v13598_v53 = vmul.u32.u64.low %v13580_v14, %v4437_v10  ;;  %v13599_v61 = vmul.u32.u64.high %v13580_v14, %v4437_v10, %v13598_v53  ;;  %v7511_v31 = vadd.s32 4294967169, %v4502_v25  ;;  %v3921_v60 = vmul.f32 %v3920_v42, %v3918_v30 }
 0x3f1   :  { %v4410_v17 = vshrl.u32 %v17401_v1, %v13469_v3  ;;  %v13605_v20 = vmul.u32.u64.low %v13580_v14, %v4441_v18  ;;  %v13606_v5 = vmul.u32.u64.high %v13580_v14, %v4441_v18, %v13605_v20  ;;  %v17611_v45 = vand.u32 2147483647, %v17610_v59 }
 0x3f2   :  { %v4017_v15 = vor.u32 %v4016_v55, %v4015_v54  ;;  %v4021_v35 = vor.u32 4788187, %v4020_v41  ;;  %v13614_v13 = vadd.s32 %v4349_v27, %v4345_v58  ;;  %v4431_v38 = vsel %vm4429_vm5, %v4419_v16, 2102212464  ;;  %v17614_v41 = vld [vmem:[#allocation24_spill] sm:$0xff] }
 0x3f3   :  { %vm13610_vm15 = vcmp.le.f32.partialorder %v17611_v45, 0.7853982  ;;  %v3593_v3 = vsel %vm3582_vm2, nan, %v13353_v44  ;;  %vm3689_vm0 = vcmp.lt.s32.totalorder %v13289_v6, 2  ;;  %v3924_v37 = vsub.s32 4, %v13167_v56 }
 0x3f4   :  { %vm7497_vm14 = vcmp.lt.s32.totalorder %v7496_v47, 0  ;;  %v3692_v32 = vsel %vm3690_vm8, %v13404_v24, %v3691_v0  ;;  %v3695_v19 = vsel %vm3693_vm11, %v3694_v2, %v13433_v21  ;;  %v4249_v16 = vshll.u32 %v13595_v39, 30 }
 0x3f5   :  { %v4508_v43 = vadd.s32 1, %v7511_v31  ;;  %v13631_v12 = vand.u32 3, %v13360_v7  ;;  %v3922_v44 = vxor.u32 2147483648, %v3921_v60  ;;  %v4430_v25 = vsel %vm4426_vm9, %v4410_v17, %v13538_v51 }
 0x3f6   :  { %v4432_v30 = vsel %vm4428_vm10, %v13540_v11, %v4431_v38  ;;  %v4022_v24 = vand.u32 2147483647, %v4021_v35  ;;  %v4024_v42 = vcvt.s32.f32 %v4017_v15  ;;  %v13639_v54 = vsel %vm7497_vm14, 0, %v7496_v47  ;;  %v3263_v47 = vld [vmem:[#allocation5 + $0xf8] sm:$0xff] }
 0x3f7   :  { %v4351_v21 = vadd.s32 536870912, %v13614_v13  ;;  %v3696_v10 = vsel %vm3689_vm0, %v3692_v32, %v3695_v19  ;;  %v3700_v7 = vmul.f32 %v3593_v3, %v3262_v29  ;;  %v3925_v55 = vsel %vm3840_vm6, %v3924_v37, %v13167_v56  ;;  %v13680_v38 = vld [vmem:[#allocation2 + $0xa] ss:$0 sm:$0xff]  ;;  %v4621_v3 = vld [vmem:[#allocation7 + $0x140] sm:$0xff] }
 0x3f8   :  { %vm3944_vm1 = vcmp.lt.s32.totalorder %v17614_v41, 0  ;;  %v17615_v51 = vand.u32 2147483647, %v17614_v41  ;;  %v13655_v58 = vsub.s32 %v13536_v22, %v4249_v16  ;;  %v4433_v6 = vsel %vm4427_vm7, %v4430_v25, %v4432_v30  ;;  %v4630_v30 = vld [vmem:[#allocation8 + $0x140] sm:$0xff] }
 0x3f9   :  { %v4452_v18 = vadd.s32 1, %v13599_v61  ;;  %vm4509_vm3 = vcmp.gt.s32.totalorder %v4508_v43, 0  ;;  %vm3829_vm5 = vcmp.lt.s32.totalorder %v13631_v12, 2  ;;  %vm3830_vm9 = vcmp.eq.s32.totalorder %v13631_v12, 0 }
 0x3fa   :  { %vm13650_vm4 = vcmp.le.f32.partialorder %v17615_v51, 0.7853982  ;;  %vm3833_vm10 = vcmp.eq.s32.totalorder %v13631_v12, 2  ;;  %v4122_v56 = vsub.s32 4294967266, %v13639_v54  ;;  %vm4451_vm2 = vc.u32 %v13606_v5, %v13598_v53 }
 0x3fb   :  { %v3923_v22 = vsel %vm3840_vm6, %v3922_v44, %v3921_v60  ;;  %v4025_v0 = vmul.f32 %v4024_v42, %v4022_v24  ;;  %v4028_v48 = vsub.s32 4, %v13252_v40  ;;  %v13669_v2 = vshrl.u32 %v4351_v21, 30 }
 0x3fc   :  { %v3697_v27 = vsel %vm3686_vm13, nan, %v3696_v10  ;;  %v3927_v31 = vsel %vm13610_vm15, 0, %v3925_v55  ;;  %v4449_v17 = vmul.u32 %v13580_v14, %v4433_v6  ;;  %v4510_v20 = vsel %vm4509_vm3, %v4508_v43, 0  ;;  %v17618_v55 = vld [vmem:[#allocation20_spill] sm:$0xff] }
 0x3fd   :  { %v3831_v45 = vxor.u32 2147483648, %v13534_v33  ;;  %v3834_v15 = vxor.u32 2147483648, %v13449_v23  ;;  %v4252_v60 = vsub.s32 0, %v13655_v58  ;;  %v4453_v35 = vsel %vm4451_vm2, %v4452_v18, %v13599_v61  ;;  %v17619_v18 = vld [vmem:[#allocation17_spill] sm:$0xff] }
 0x3fe   :  { %v3926_v62 = vsel %vm13610_vm15, %v17610_v59, %v3923_v22  ;;  %v4102_v37 = vadd.s32 %v13257_v34, %v13264_v28  ;;  %v4118_v14 = vsub.s32 32, %v13639_v54  ;;  %v4123_v29 = vadd.s32 127, %v4122_v56 }
 0x3ff   :  { %v4026_v32 = vxor.u32 2147483648, %v4025_v0  ;;  %v4029_v19 = vsel %vm3944_vm1, %v4028_v48, %v13252_v40  ;;  %v4353_v61 = vshll.u32 %v13669_v2, 30  ;;  %v4512_v16 = vand.u32 31, %v4510_v20 }
 0x400   :  { %v3701_v43 = vmul.f32 %v3697_v27, %v3263_v47  ;;  %v3931_v44 = vadd.s32 3, %v3927_v31  ;;  %v13692_v25 = vadd.s32 %v4453_v35, %v4449_v17  ;;  %v4625_v57 = vmul.f32 %v13680_v38, %v4621_v3  ;;  %v4622_v17 = vld [vmem:[#allocation7 + $0x148] sm:$0xff] }
 0x401   :  { %v3832_v34 = vsel %vm3830_vm9, %v13449_v23, %v3831_v45  ;;  %v3835_v28 = vsel %vm3833_vm10, %v3834_v15, %v13534_v33  ;;  %8019 = vcosq.f32 %v3926_v62  ;;  %v7500_v40 = vmin.u32 %v4252_v60, %v13655_v58 }
 0x402   :  { %v4031_v24 = vsel %vm13650_vm4, 0, %v4029_v19  ;;  %v4119_v42 = vshll.u32 %v13455_v52, %v13639_v54  ;;  %v4120_v21 = vshrl.u32 %v4102_v37, %v4118_v14  ;;  %v4124_v10 = vshll.u32 %v4123_v29, 23 }
 0x403   :  { %v13707_v51 = vadd.f32 %v3700_v7, %v17618_v55  ;;  %v4027_v23 = vsel %vm3944_vm1, %v4026_v32, %v4025_v0  ;;  %v13712_v33 = vsub.s32 %v13614_v13, %v4353_v61  ;;  %v13714_v6 = vsub.s32 32, %v4512_v16 }
 0x404   :  { %v13717_v56 = vadd.f32 %v3701_v43, %v17619_v18  ;;  %v13719_v22 = vand.u32 3, %v3931_v44  ;;  %v4455_v52 = vadd.s32 536870912, %v13692_v25  ;;  %v13722_v54 = vadd.f32 %v4630_v30, %v4625_v57  ;;  %v4631_v30 = vld [vmem:[#allocation8 + $0x148] sm:$0xff] }
 0x405   :  { %v3836_v7 = vsel %vm3829_vm5, %v3832_v34, %v3835_v28  ;;  %8021 = vsinq.f32 %v3926_v62  ;;  %v13726_v48 = vadd.s32 3, %v4031_v24  ;;  %v4254_v0 = vclz %v7500_v40 }
 0x406   :  { %17620 = vst [vmem:[#allocation18_spill] sm:$0xff] %v13717_v56  ;;  %17621 = vst [vmem:[#allocation25_spill] sm:$0xff] %v13722_v54  ;;  %vm3826_vm8 = vweird.f32 %v12461_v26  ;;  %v4030_v13 = vsel %vm13650_vm4, %v17614_v41, %v4027_v23  ;;  %v4121_v47 = vor.u32 %v4120_v21, %v4119_v42  ;;  %v4125_v27 = vor.u32 4788187, %v4124_v10 }
 0x407   :  { %v17291_v31 = vand.u32 2147483647, %v13525_v49  ;;  %v4356_v45 = vsub.s32 0, %v13712_v33  ;;  %v13734_v15 = vshrl.u32 %v4510_v20, 5  ;;  %v4524_v12 = vshll.u32 %v17405_v9, %v4512_v16 }
 0x408   :  { %v4525_v60 = vshrl.u32 %v17585_v8, %v13714_v6  ;;  %v13739_v35 = vshrl.u32 %v4455_v52, 30  ;;  %v4527_v3 = vshll.u32 %v17585_v8, %v4512_v16  ;;  %v4528_v11 = vshrl.u32 %v17586_v36, %v13714_v6 }
 0x409   :  { %v4641_v62 = vand.u32 2139095040, %v13722_v54  ;;  %v7501_v37 = vadd.s32 4294967294, %v4254_v0  ;;  %v4515_v14 = vshll.u32 %v17401_v1, %v4512_v16  ;;  %v17623_v29 = vmov 2475754826  }
 0x40a   :  { %17622 = vst [vmem:[#allocation24_spill] sm:$0xff] %v13739_v35  ;;  %v4518_v20 = vshll.u32 %v17623_v29, %v4512_v16  ;;  %v4626_v32 = vmul.f32 %v13680_v38, %v4622_v17  ;;  %v4516_v19 = vshrl.u32 %v17623_v29, %v13714_v6  ;;  %v17624_v61 = vmov 2131351028  }
 0x40b   :  { %v4519_v43 = vshrl.u32 %v17624_v61, %v13714_v6  ;;  %v4521_v44 = vshll.u32 %v17624_v61, %v4512_v16  ;;  %v4522_v57 = vshrl.u32 %v17405_v9, %v13714_v6  ;;  %8023 = vcosq.f32 %v4030_v13 }
 0x40c   :  { %v7504_v34 = vmin.u32 %v4356_v45, %v13712_v33  ;;  %v4505_v28 = vand.u32 8388607, %v17291_v31  ;;  %v4526_v40 = vor.u32 %v4525_v60, %v4524_v12  ;;  %v4457_v24 = vshll.u32 %v13739_v35, 30 }
 0x40d   :  { %v4529_v42 = vor.u32 %v4528_v11, %v4527_v3  ;;  %vm4533_vm11 = vcmp.lt.s32.totalorder %v13734_v15, 4  ;;  %v4642_v21 = vshrl.u32 %v4641_v62, 23  ;;  %8025 = vsinq.f32 %v4030_v13  ;;  %v17625_v11 = vld [vmem:[#allocation19_spill] sm:$0xff] }
 0x40e   :  { %v4126_v10 = vand.u32 2147483647, %v4125_v27  ;;  %v4128_v16 = vcvt.s32.f32 %v4121_v47  ;;  %vm7502_vm7 = vcmp.lt.s32.totalorder %v7501_v37, 0  ;;  %v8020_v55 = vpop.eup %8019  ;;  %v13760_v23 = vor.u32 %v4516_v19, %v4515_v14 }
 0x40f   :  { %v13762_v18 = vor.u32 %v4519_v43, %v4518_v20  ;;  %v4523_v52 = vor.u32 %v4522_v57, %v4521_v44  ;;  %v13764_v0 = vadd.f32 %v4631_v30, %v4626_v32  ;;  %v4358_v17 = vclz %v7504_v34  ;;  %v3712_v20 = vld [vmem:[#allocation5 + $0x100] sm:$0xff] }
 0x410   :  { %vm4530_vm12 = vcmp.lt.s32.totalorder %v13734_v15, 1  ;;  %vm4532_vm6 = vcmp.lt.s32.totalorder %v13734_v15, 3  ;;  %v4539_v45 = vsel %vm4533_vm11, %v4526_v40, 920167782  ;;  %v13771_v13 = vsub.s32 %v13692_v25, %v4457_v24 }
 0x411   :  { %v4506_v47 = vor.u32 8388608, %v4505_v28  ;;  %v4543_v27 = vsel %vm4533_vm11, %v4529_v42, 1326507024  ;;  %v7516_v12 = vadd.s32 4294967169, %v4642_v21  ;;  %v3837_v60 = vsel %vm3826_vm8, nan, %v3836_v7 }
 0x412   :  { %vm3937_vm13 = vcmp.eq.s32.totalorder %v13719_v22, 2  ;;  %v3938_v3 = vxor.u32 2147483648, %v8020_v55  ;;  %vm4048_vm15 = vcmp.lt.s32.totalorder %v17625_v11, 0  ;;  %v13780_v62 = vsel %vm7502_vm7, 0, %v7501_v37  ;;  %v8022_v14 = vpop.eup %8021 }
 0x413   :  { %vm3933_vm0 = vcmp.lt.s32.totalorder %v13719_v22, 2  ;;  %vm4531_vm14 = vcmp.lt.s32.totalorder %v13734_v15, 2  ;;  %v4538_v26 = vsel %vm4530_vm12, %v13760_v23, %v13762_v18  ;;  %v4540_v25 = vsel %vm4532_vm6, %v4523_v52, %v4539_v45 }
 0x414   :  { %v4745_v7 = vand.u32 2139095040, %v13764_v0  ;;  %v4129_v32 = vmul.f32 %v4128_v16, %v4126_v10  ;;  %v7505_v19 = vadd.s32 4294967294, %v4358_v17  ;;  %v4542_v37 = vsel %vm4530_vm12, %v13762_v18, %v4523_v52 }
 0x415   :  { %v4544_v43 = vsel %vm4532_vm6, %v4526_v40, %v4543_v27  ;;  %v13797_v44 = vand.u32 3, %v13726_v48  ;;  %v17626_v57 = vand.u32 2147483647, %v17625_v11  ;;  %v4460_v28 = vsub.s32 0, %v13771_v13  ;;  %v17630_v27 = vld [vmem:[#allocation22_spill] sm:$0xff] }
 0x416   :  { %v13806_v30 = vshll.u32 %v4506_v47, 8  ;;  %v4648_v24 = vadd.s32 1, %v7516_v12  ;;  %vm3934_vm4 = vcmp.eq.s32.totalorder %v13719_v22, 0  ;;  %v4150_v42 = vmul.f32 %v3837_v60, %v3712_v20  ;;  %v17629_v47 = vld [vmem:[#allocation28_spill] sm:$0xff] }
 0x417   :  { %vm13801_vm1 = vcmp.le.f32.partialorder %v17626_v57, 0.7853982  ;;  %v4262_v21 = vsub.s32 4294967266, %v13780_v62  ;;  %v4541_v48 = vsel %vm4531_vm14, %v4538_v26, %v4540_v25  ;;  %v3935_v40 = vxor.u32 2147483648, %v8022_v14 }
 0x418   :  { %v3939_v10 = vsel %vm3937_vm13, %v3938_v3, %v8022_v14  ;;  %v4545_v16 = vsel %vm4531_vm14, %v4542_v37, %v4544_v43  ;;  %v4746_v17 = vshrl.u32 %v4745_v7, 23  ;;  %v4130_v45 = vxor.u32 2147483648, %v4129_v32  ;;  %v8024_v60 = vpop.eup %8023 }
 0x419   :  { %v4242_v12 = vadd.s32 %v17630_v27, %v17629_v47  ;;  %v4258_v57 = vsub.s32 32, %v13780_v62  ;;  %vm7506_vm3 = vcmp.lt.s32.totalorder %v7505_v19, 0  ;;  %vm4038_vm5 = vcmp.eq.s32.totalorder %v13797_v44, 0  ;;  %v17632_v27 = vld [vmem:[#allocation21_spill] sm:$0xff] }
 0x41a   :  { %v7508_v20 = vmin.u32 %v4460_v28, %v13771_v13  ;;  %v13822_v26 = vmul.u32.u64.low %v13806_v30, %v4541_v48  ;;  %v13823_v25 = vmul.u32.u64.high %v13806_v30, %v4541_v48, %v13822_v26  ;;  %vm4649_vm9 = vcmp.gt.s32.totalorder %v4648_v24, 0  ;;  %v8026_v43 = vpop.eup %8025 }
 0x41b   :  { %v4263_v3 = vadd.s32 127, %v4262_v21  ;;  %v4514_v14 = vshrl.u32 %v17401_v1, %v13714_v6  ;;  %v13829_v7 = vmul.u32.u64.low %v13806_v30, %v4545_v16  ;;  %v13830_v37 = vmul.u32.u64.high %v13806_v30, %v4545_v16, %v13829_v7  ;;  %v17633_v21 = vld [vmem:[#allocation16_spill] sm:$0xff] }
 0x41c   :  { %17631 = vst [vmem:[#allocation20_spill] sm:$0xff] %v13822_v26  ;;  %v3936_v47 = vsel %vm3934_vm4, %v8020_v55, %v3935_v40  ;;  %v4132_v28 = vsub.s32 4, %v17632_v27  ;;  %v4535_v48 = vsel %vm4533_vm11, %v4523_v52, 2102212464  ;;  %v7520_v31 = vadd.s32 4294967169, %v4746_v17 }
 0x41d   :  { %vm4041_vm10 = vcmp.eq.s32.totalorder %v13797_v44, 2  ;;  %v13839_v4 = vadd.f32 %v4150_v42, %v17633_v21  ;;  %v13842_v6 = vsel %vm7506_vm3, 0, %v7505_v19  ;;  %v4650_v16 = vsel %vm4649_vm9, %v4648_v24, 0 }
 0x41e   :  { %v4131_v7 = vsel %vm4048_vm15, %v4130_v45, %v4129_v32  ;;  %v4259_v55 = vshll.u32 %v13655_v58, %v13780_v62  ;;  %v4260_v40 = vshrl.u32 %v4242_v12, %v4258_v57  ;;  %v4462_v56 = vclz %v7508_v20 }
 0x41f   :  { %17634 = vst [vmem:[#allocation17_spill] sm:$0xff] %v13839_v4  ;;  %v13850_v52 = vsel %vm3933_vm0, %v3936_v47, %v3939_v10  ;;  %v4264_v17 = vshll.u32 %v4263_v3, 23  ;;  %v4534_v42 = vsel %vm4530_vm12, %v4514_v14, %v13760_v23  ;;  %v4536_v19 = vsel %vm4532_vm6, %v13762_v18, %v4535_v48  ;;  %v4623_v47 = vld [vmem:[#allocation7 + $0x150] sm:$0xff] }
 0x420   :  { %v13861_v32 = vsel %vm4048_vm15, %v4132_v28, %v17632_v27  ;;  %v4366_v58 = vsub.s32 4294967266, %v13842_v6  ;;  %v4652_v62 = vand.u32 31, %v4650_v16  ;;  %v4752_v22 = vadd.s32 1, %v7520_v31 }
 0x421   :  { %v4039_v24 = vxor.u32 2147483648, %v8026_v43  ;;  %v4042_v10 = vxor.u32 2147483648, %v8024_v60  ;;  %v4134_v45 = vsel %vm13801_vm1, %v17625_v11, %v4131_v7  ;;  %v4346_v23 = vadd.s32 %v13506_v50, %v13523_v63 }
 0x422   :  { %v13869_v12 = vor.u32 %v4260_v40, %v4259_v55  ;;  %v7509_v18 = vadd.s32 4294967294, %v4462_v56  ;;  %v4537_v57 = vsel %vm4531_vm14, %v4534_v42, %v4536_v19  ;;  %v4556_v20 = vadd.s32 1, %v13823_v25 }
 0x423   :  { %v13874_v3 = vor.u32 4788187, %v4264_v17  ;;  %v4362_v31 = vsub.s32 32, %v13842_v6  ;;  %vm4555_vm2 = vc.u32 %v13830_v37, %v13822_v26  ;;  %vm4753_vm8 = vcmp.gt.s32.totalorder %v4752_v22, 0 }
 0x424   :  { %8027 = vcosq.f32 %v4134_v45  ;;  %v4367_v14 = vadd.s32 127, %v4366_v58  ;;  %v17293_v50 = vand.u32 2147483647, %v13722_v54  ;;  %v13880_v63 = vsub.s32 32, %v4652_v62 }
 0x425   :  { %v13884_v56 = vsel %vm4038_vm5, %v8024_v60, %v4039_v24  ;;  %v13888_v15 = vsel %vm4041_vm10, %v4042_v10, %v8026_v43  ;;  %8029 = vsinq.f32 %v4134_v45  ;;  %v4553_v27 = vmul.u32 %v13806_v30, %v4537_v57 }
 0x426   :  { %vm7510_vm11 = vcmp.lt.s32.totalorder %v7509_v18, 0  ;;  %v4557_v48 = vsel %vm4555_vm2, %v4556_v20, %v13823_v25  ;;  %v4754_v21 = vsel %vm4753_vm8, %v4752_v22, 0  ;;  %v4363_v55 = vshll.u32 %v13712_v33, %v13842_v6  ;;  %v4632_v6 = vld [vmem:[#allocation8 + $0x150] sm:$0xff] }
 0x427   :  { %v4364_v60 = vshrl.u32 %v4346_v23, %v4362_v31  ;;  %v4627_v40 = vmul.f32 %v13680_v38, %v4623_v47  ;;  %v4368_v17 = vshll.u32 %v4367_v14, 23  ;;  %v13899_v43 = vand.u32 8388607, %v17293_v50 }
 0x428   :  { %v4664_v30 = vshll.u32 %v17405_v9, %v4652_v62  ;;  %v4665_v42 = vshrl.u32 %v17585_v8, %v13880_v63  ;;  %v13904_v25 = vsel %vm7510_vm11, 0, %v7509_v18  ;;  %v13906_v19 = vadd.s32 %v4557_v48, %v4553_v27 }
 0x429   :  { %v13908_v58 = vshrl.u32 %v4650_v16, 5  ;;  %v4756_v33 = vand.u32 31, %v4754_v21  ;;  %v4655_v22 = vshll.u32 %v17401_v1, %v4652_v62  ;;  %v4658_v24 = vshll.u32 %v17623_v29, %v4652_v62 }
 0x42a   :  { %v4667_v10 = vshll.u32 %v17585_v8, %v4652_v62  ;;  %v4668_v45 = vshrl.u32 %v17586_v36, %v13880_v63  ;;  %v4656_v23 = vshrl.u32 %v17623_v29, %v13880_v63  ;;  %v4659_v18 = vshrl.u32 %v17624_v61, %v13880_v63 }
 0x42b   :  { %v4661_v16 = vshll.u32 %v17624_v61, %v4652_v62  ;;  %v4662_v57 = vshrl.u32 %v17405_v9, %v13880_v63  ;;  %v13922_v20 = vor.u32 %v4364_v60, %v4363_v55  ;;  %v13924_v31 = vor.u32 4788187, %v4368_v17 }
 0x42c   :  { %v4450_v14 = vadd.s32 %v13598_v53, %v13606_v5  ;;  %v4666_v47 = vor.u32 %v4665_v42, %v4664_v30  ;;  %v4559_v27 = vadd.s32 536870912, %v13906_v19  ;;  %v13929_v48 = vadd.f32 %v4632_v6, %v4627_v40 }
 0x42d   :  { %vm4673_vm7 = vcmp.lt.s32.totalorder %v13908_v58, 4  ;;  %v13932_v50 = vsub.s32 32, %v4756_v33  ;;  %v4466_v62 = vsub.s32 32, %v13904_v25  ;;  %v4470_v60 = vsub.s32 4294967266, %v13904_v25 }
 0x42e   :  { %17635 = vst [vmem:[#allocation28_spill] sm:$0xff] %v13929_v48  ;;  %v4669_v17 = vor.u32 %v4668_v45, %v4667_v10  ;;  %v4646_v28 = vor.u32 8388608, %v13899_v43  ;;  %v13939_v53 = vor.u32 %v4656_v23, %v4655_v22  ;;  %v13941_v5 = vor.u32 %v4659_v18, %v4658_v24 }
 0x42f   :  { %v4663_v40 = vor.u32 %v4662_v57, %v4661_v16  ;;  %vm4670_vm12 = vcmp.lt.s32.totalorder %v13908_v58, 1  ;;  %vm4672_vm6 = vcmp.lt.s32.totalorder %v13908_v58, 3  ;;  %v4679_v30 = vsel %vm4673_vm7, %v4666_v47, 920167782 }
 0x430   :  { %v13950_v55 = vshrl.u32 %v4559_v27, 30  ;;  %vm4671_vm13 = vcmp.lt.s32.totalorder %v13908_v58, 2  ;;  %v4768_v43 = vshll.u32 %v17405_v9, %v4756_v33  ;;  %v4769_v22 = vshrl.u32 %v17585_v8, %v13932_v50 }
 0x431   :  { %v13948_v6 = vpop.eup %8027  ;;  %v4683_v10 = vsel %vm4673_vm7, %v4669_v17, 1326507024  ;;  %v13960_v45 = vshrl.u32 %v4754_v21, 5  ;;  %v4771_v23 = vshll.u32 %v17585_v8, %v4756_v33  ;;  %v4772_v18 = vshrl.u32 %v17586_v36, %v13932_v50 }
 0x432   :  { %17636 = vst [vmem:[#allocation22_spill] sm:$0xff] %v13950_v55  ;;  %v13956_v24 = vpop.eup %8029  ;;  %vm3930_vm15 = vweird.f32 %v17610_v59  ;;  %v4678_v16 = vsel %vm4670_vm12, %v13939_v53, %v13941_v5  ;;  %v4680_v57 = vsel %vm4672_vm6, %v4663_v40, %v4679_v30  ;;  %v4759_v27 = vshll.u32 %v17401_v1, %v4756_v33 }
 0x433   :  { %v4762_v21 = vshll.u32 %v17623_v29, %v4756_v33  ;;  %vm4037_vm0 = vcmp.lt.s32.totalorder %v13797_v44, 2  ;;  %v4760_v17 = vshrl.u32 %v17623_v29, %v13932_v50  ;;  %v4763_v7 = vshrl.u32 %v17624_v61, %v13932_v50 }
 0x434   :  { %v4765_v42 = vshll.u32 %v17624_v61, %v4756_v33  ;;  %v4766_v4 = vshrl.u32 %v17405_v9, %v13932_v50  ;;  %v4561_v54 = vshll.u32 %v13950_v55, 30  ;;  %v4682_v30 = vsel %vm4670_vm12, %v13941_v5, %v4663_v40 }
 0x435   :  { %v4684_v49 = vsel %vm4672_vm6, %v4666_v47, %v4683_v10  ;;  %v4770_v35 = vor.u32 %v4769_v22, %v4768_v43  ;;  %v17637_v11 = vand.u32 2147483647, %v13764_v0  ;;  %v4773_v36 = vor.u32 %v4772_v18, %v4771_v23 }
 0x436   :  { %vm4777_vm14 = vcmp.lt.s32.totalorder %v13960_v45, 4  ;;  %v4849_v33 = vand.u32 2139095040, %v13929_v48  ;;  %v4468_v61 = vshrl.u32 %v4450_v14, %v4466_v62  ;;  %v4471_v8 = vadd.s32 127, %v4470_v60 }
 0x437   :  { %v4749_v29 = vand.u32 8388607, %v17637_v11  ;;  %v4681_v55 = vsel %vm4671_vm13, %v4678_v16, %v4680_v57  ;;  %v13994_v9 = vshll.u32 %v4646_v28, 8  ;;  %v4685_v26 = vsel %vm4671_vm13, %v4682_v30, %v4684_v49 }
 0x438   :  { %v13998_v47 = vor.u32 %v4760_v17, %v4759_v27  ;;  %v14000_v43 = vor.u32 %v4763_v7, %v4762_v21  ;;  %v4767_v11 = vor.u32 %v4766_v4, %v4765_v42  ;;  %v14003_v22 = vsub.s32 %v13906_v19, %v4561_v54  ;;  %v17638_v42 = vld [vmem:[#allocation23_spill] sm:$0xff]  ;;  %v3713_v21 = vld [vmem:[#allocation5 + $0x108] sm:$0xff] }
 0x439   :  { %vm4774_vm4 = vcmp.lt.s32.totalorder %v13960_v45, 1  ;;  %vm4776_vm3 = vcmp.lt.s32.totalorder %v13960_v45, 3  ;;  %v4783_v14 = vsel %vm4777_vm14, %v4770_v35, 920167782  ;;  %vm4034_vm5 = vweird.f32 %v17614_v41 }
 0x43a   :  { %v4654_v49 = vshrl.u32 %v17401_v1, %v13880_v63  ;;  %v4750_v28 = vor.u32 8388608, %v4749_v29  ;;  %v4787_v7 = vsel %vm4777_vm14, %v4773_v36, 1326507024  ;;  %v4850_v4 = vshrl.u32 %v4849_v33, 23 }
 0x43b   :  { %v14015_v54 = vmul.u32.u64.low %v13994_v9, %v4685_v26  ;;  %v14016_v19 = vmul.u32.u64.high %v13994_v9, %v4685_v26, %v14015_v54  ;;  %v14019_v62 = vmul.u32.u64.low %v13994_v9, %v4681_v55  ;;  %v14020_v60 = vmul.u32.u64.high %v13994_v9, %v4681_v55, %v14019_v62 }
 0x43c   :  { %vm4188_vm9 = vcmp.lt.s32.totalorder %v17638_v42, 0  ;;  %v4675_v10 = vsel %vm4673_vm7, %v4663_v40, 2102212464  ;;  %vm4775_vm10 = vcmp.lt.s32.totalorder %v13960_v45, 2  ;;  %v4782_v36 = vsel %vm4774_vm4, %v13998_v47, %v14000_v43 }
 0x43d   :  { %v4784_v29 = vsel %vm4776_vm3, %v4767_v11, %v4783_v14  ;;  %v4472_v26 = vshll.u32 %v4471_v8, 23  ;;  %v4564_v63 = vsub.s32 0, %v14003_v22  ;;  %v4786_v55 = vsel %vm4774_vm4, %v14000_v43, %v4767_v11 }
 0x43e   :  { %v4788_v40 = vsel %vm4776_vm3, %v4770_v35, %v4787_v7  ;;  %v3941_v23 = vsel %vm3930_vm15, nan, %v13850_v52  ;;  %v4135_v18 = vsel %vm13801_vm1, 0, %v13861_v32  ;;  %v14045_v16 = vshll.u32 %v4750_v28, 8 }
 0x43f   :  { %v7524_v8 = vadd.s32 4294967169, %v4850_v4  ;;  %v4044_v57 = vsel %vm4037_vm0, %v13884_v56, %v13888_v15  ;;  %v4674_v35 = vsel %vm4670_vm12, %v4654_v49, %v13939_v53  ;;  %v4676_v59 = vsel %vm4672_vm6, %v13941_v5, %v4675_v10 }
 0x440   :  { %v4785_v34 = vsel %vm4775_vm10, %v4782_v36, %v4784_v29  ;;  %v17639_v52 = vand.u32 2147483647, %v17638_v42  ;;  %v17642_v44 = vand.u32 2147483647, %v13874_v3  ;;  %v17643_v56 = vcvt.s32.f32 %v13869_v12  ;;  %v3714_v29 = vld [vmem:[#allocation5 + $0x110] sm:$0xff] }
 0x441   :  { %v4272_v53 = vsub.s32 4, %v13595_v39  ;;  %v4372_v27 = vcvt.s32.f32 %v13922_v20  ;;  %v4789_v5 = vsel %vm4775_vm10, %v4786_v55, %v4788_v40  ;;  %v4370_v17 = vand.u32 2147483647, %v13924_v31 }
 0x442   :  { %vm14061_vm1 = vcmp.le.f32.partialorder %v17639_v52, 0.7853982  ;;  %v4269_v15 = vmul.f32 %v17643_v56, %v17642_v44  ;;  %v17644_v30 = vshll.u32 %v13771_v13, %v13904_v25  ;;  %v4473_v14 = vor.u32 4788187, %v4472_v26 }
 0x443   :  { %v7512_v3 = vmin.u32 %v4564_v63, %v14003_v22  ;;  %v4677_v12 = vsel %vm4671_vm13, %v4674_v35, %v4676_v59  ;;  %v14081_v49 = vmul.u32.u64.low %v14045_v16, %v4785_v34  ;;  %v14082_v28 = vmul.u32.u64.high %v14045_v16, %v4785_v34, %v14081_v49 }
 0x444   :  { %v4469_v33 = vor.u32 %v4468_v61, %v17644_v30  ;;  %v4856_v20 = vadd.s32 1, %v7524_v8  ;;  %v4696_v7 = vadd.s32 1, %v14020_v60  ;;  %v4758_v31 = vshrl.u32 %v17401_v1, %v13932_v50 }
 0x445   :  { %v14089_v13 = vmul.u32.u64.low %v14045_v16, %v4789_v5  ;;  %v14090_v61 = vmul.u32.u64.high %v14045_v16, %v4789_v5, %v14089_v13  ;;  %v4139_v25 = vadd.s32 3, %v4135_v18  ;;  %v4151_v4 = vmul.f32 %v3941_v23, %v3713_v21 }
 0x446   :  { %vm4695_vm2 = vc.u32 %v14016_v19, %v14019_v62  ;;  %v4779_v58 = vsel %vm4777_vm14, %v4767_v11, 2102212464  ;;  %v4045_v54 = vsel %vm4034_vm5, nan, %v4044_v57  ;;  %v4270_v10 = vxor.u32 2147483648, %v4269_v15  ;;  %v17646_v57 = vld [vmem:[#allocation26_spill] sm:$0xff] }
 0x447   :  { %v4273_v50 = vsel %vm4188_vm9, %v4272_v53, %v13595_v39  ;;  %v4373_v36 = vmul.f32 %v4372_v27, %v4370_v17  ;;  %v4476_v26 = vcvt.s32.f32 %v4469_v33  ;;  %v4566_v63 = vclz %v7512_v3  ;;  %v17645_v39 = vld [vmem:[#allocation29_spill] sm:$0xff]  ;;  %v4624_v17 = vld [vmem:[#allocation7 + $0x158] sm:$0xff] }
 0x448   :  { %v4693_v55 = vmul.u32 %v13994_v9, %v4677_v12  ;;  %vm4857_vm8 = vcmp.gt.s32.totalorder %v4856_v20, 0  ;;  %v4474_v40 = vand.u32 2147483647, %v4473_v14  ;;  %v4697_v23 = vsel %vm4695_vm2, %v4696_v7, %v14020_v60 }
 0x449   :  { %v4778_v41 = vsel %vm4774_vm4, %v4758_v31, %v13998_v47  ;;  %v4780_v11 = vsel %vm4776_vm3, %v14000_v43, %v4779_v58  ;;  %v14109_v18 = vand.u32 3, %v4139_v25  ;;  %v14112_v8 = vadd.f32 %v4151_v4, %v17645_v39 }
 0x44a   :  { %v17647_v35 = vand.u32 2147483647, %v17646_v57  ;;  %vm4292_vm7 = vcmp.lt.s32.totalorder %v17646_v57, 0  ;;  %v4152_v60 = vmul.f32 %v4045_v54, %v3714_v29  ;;  %v4275_v47 = vsel %vm14061_vm1, 0, %v4273_v50  ;;  %v17654_v29 = vld [vmem:[#allocation20_spill] sm:$0xff] }
 0x44b   :  { %v4374_v59 = vxor.u32 2147483648, %v4373_v36  ;;  %v4858_v34 = vsel %vm4857_vm8, %v4856_v20, 0  ;;  %v7513_v43 = vadd.s32 4294967294, %v4566_v63  ;;  %v14123_v52 = vadd.s32 %v4697_v23, %v4693_v55 }
 0x44c   :  { %vm14116_vm11 = vcmp.le.f32.partialorder %v17647_v35, 0.7853982  ;;  %v4781_v44 = vsel %vm4775_vm10, %v4778_v41, %v4780_v11  ;;  %v4800_v56 = vadd.s32 1, %v14082_v28  ;;  %v4271_v53 = vsel %vm4188_vm9, %v4270_v10, %v4269_v15 }
 0x44d   :  { %v4376_v27 = vsub.s32 4, %v13669_v2  ;;  %v4477_v5 = vmul.f32 %v4476_v26, %v4474_v40  ;;  %vm4799_vm12 = vc.u32 %v14090_v61, %v14081_v49  ;;  %vm4142_vm6 = vcmp.eq.s32.totalorder %v14109_v18, 0 }
 0x44e   :  { %vm4145_vm13 = vcmp.eq.s32.totalorder %v14109_v18, 2  ;;  %v4279_v21 = vadd.s32 3, %v4275_v47  ;;  %v4860_v30 = vand.u32 31, %v4858_v34  ;;  %v4143_v45 = vxor.u32 2147483648, %v13956_v24 }
 0x44f   :  { %v4146_v33 = vxor.u32 2147483648, %v13948_v6  ;;  %v4375_v15 = vsel %vm4292_vm7, %v4374_v59, %v4373_v36  ;;  %v4797_v14 = vmul.u32 %v14045_v16, %v4781_v44  ;;  %v4274_v3 = vsel %vm14061_vm1, %v17638_v42, %v4271_v53  ;;  %v17660_v53 = vld [vmem:[#allocation19_spill] sm:$0xff] }
 0x450   :  { %vm7514_vm15 = vcmp.lt.s32.totalorder %v7513_v43, 0  ;;  %v4699_v12 = vadd.s32 536870912, %v14123_v52  ;;  %v4801_v20 = vsel %vm4799_vm12, %v4800_v56, %v14082_v28  ;;  %v14146_v7 = vadd.f32 %v4152_v60, %v13707_v51  ;;  %v4633_v28 = vld [vmem:[#allocation8 + $0x158] sm:$0xff] }
 0x451   :  { %v14151_v31 = vsel %vm4292_vm7, %v4376_v27, %v13669_v2  ;;  %v17651_v13 = vand.u32 2147483647, %v13341_v46  ;;  %v4478_v32 = vxor.u32 2147483648, %v4477_v5  ;;  %v4628_v25 = vmul.f32 %v13680_v38, %v4624_v17  ;;  %v3715_v16 = vld [vmem:[#allocation5 + $0x118] sm:$0xff] }
 0x452   :  { %17650 = vst [vmem:[#allocation21_spill] sm:$0xff] %v14146_v7  ;;  %v14160_v4 = vand.u32 3, %v4279_v21  ;;  %v4378_v51 = vsel %vm14116_vm11, %v17646_v57, %v4375_v15  ;;  %vm4396_vm14 = vcmp.lt.s32.totalorder %v13341_v46, 0  ;;  %v14166_v2 = vsub.s32 32, %v4860_v30 }
 0x453   :  { %vm14155_vm0 = vcmp.le.f32.partialorder %v17651_v13, 0.7853982  ;;  %v4147_v58 = vsel %vm4145_vm13, %v4146_v33, %v13956_v24  ;;  %8031 = vcosq.f32 %v4274_v3  ;;  %v4569_v54 = vsel %vm7514_vm15, 0, %v7513_v43 }
 0x454   :  { %v14171_v10 = vadd.s32 %v4801_v20, %v4797_v14  ;;  %v4144_v38 = vsel %vm4142_vm6, %v13948_v6, %v4143_v45  ;;  %8033 = vsinq.f32 %v4274_v3  ;;  %v4379_v50 = vsel %vm14116_vm11, 0, %v14151_v31  ;;  %v17662_v20 = vld [vmem:[#allocation24_spill] sm:$0xff] }
 0x455   :  { %v14179_v36 = vshrl.u32 %v4699_v12, 30  ;;  %vm4141_vm4 = vcmp.lt.s32.totalorder %v14109_v18, 2  ;;  %8035 = vcosq.f32 %v4378_v51  ;;  %v4479_v24 = vsel %vm4396_vm14, %v4478_v32, %v4477_v5  ;;  %v14247_v18 = vld [vmem:[#allocation2 + $0xb] ss:$0 sm:$0xff] }
 0x456   :  { %v4554_v26 = vadd.s32 %v17654_v29, %v13830_v37  ;;  %v14186_v63 = vadd.f32 %v4633_v28, %v4628_v25  ;;  %v4574_v55 = vsub.s32 4294967266, %v4569_v54  ;;  %v17309_v6 = vand.u32 2147483647, %v13929_v48 }
 0x457   :  { %v17656_v40 = vmov 2102212464   ;;  %v17657_v41 = vmov 920167782   ;;  %v4803_v39 = vadd.s32 536870912, %v14171_v10  ;;  %v14193_v35 = vshrl.u32 %v4858_v34, 5 }
 0x458   :  { %17655 = vst [vmem:[#allocation16_spill] sm:$0xff] %v14186_v63  ;;  %v4872_v23 = vshll.u32 %v17656_v40, %v4860_v30  ;;  %v4873_v11 = vshrl.u32 %v17657_v41, %v14166_v2  ;;  %v4875_v9 = vshll.u32 %v17657_v41, %v4860_v30  ;;  %v17658_v60 = vmov 1326507024  }
 0x459   :  { %v4876_v47 = vshrl.u32 %v17658_v60, %v14166_v2  ;;  %v4570_v37 = vsub.s32 32, %v4569_v54  ;;  %v4701_v59 = vshll.u32 %v14179_v36, 30  ;;  %v4863_v43 = vshll.u32 %v17401_v1, %v4860_v30 }
 0x45a   :  { %v17659_v44 = vmov 2475754826   ;;  %vm4138_vm3 = vweird.f32 %v17660_v53  ;;  %v17661_v34 = vmov 2131351028   ;;  %v4870_v17 = vshrl.u32 %v17656_v40, %v14166_v2 }
 0x45b   :  { %v4866_v56 = vshll.u32 %v17659_v44, %v4860_v30  ;;  %v4864_v27 = vshrl.u32 %v17659_v44, %v14166_v2  ;;  %v4867_v5 = vshrl.u32 %v17661_v34, %v14166_v2  ;;  %v4869_v21 = vshll.u32 %v17661_v34, %v4860_v30 }
 0x45c   :  { %8037 = vsinq.f32 %v4378_v51  ;;  %v4575_v45 = vadd.s32 127, %v4574_v55  ;;  %v4874_v33 = vor.u32 %v4873_v11, %v4872_v23  ;;  %v4953_v15 = vand.u32 2139095040, %v14186_v63 }
 0x45d   :  { %v14210_v14 = vshrl.u32 %v4803_v39, 30  ;;  %v4853_v3 = vand.u32 8388607, %v17309_v6  ;;  %v4877_v12 = vor.u32 %v4876_v47, %v4875_v9  ;;  %vm4881_vm5 = vcmp.lt.s32.totalorder %v14193_v35, 4  ;;  %v5083_v6 = vld [vmem:[#allocation8 + $0x168] sm:$0xff] }
 0x45e   :  { %v4480_v31 = vsub.s32 4, %v17662_v20  ;;  %v4482_v30 = vsel %vm14155_vm0, %v13341_v46, %v4479_v24  ;;  %v4571_v13 = vshll.u32 %v14003_v22, %v4569_v54  ;;  %v4572_v32 = vshrl.u32 %v4554_v26, %v4570_v37 }
 0x45f   :  { %v14221_v25 = vsub.s32 %v14123_v52, %v4701_v59  ;;  %v14223_v51 = vor.u32 %v4864_v27, %v4863_v43  ;;  %v14225_v28 = vor.u32 %v4867_v5, %v4866_v56  ;;  %v4871_v29 = vor.u32 %v4870_v17, %v4869_v21 }
 0x460   :  { %vm4878_vm9 = vcmp.lt.s32.totalorder %v14193_v35, 1  ;;  %vm4880_vm10 = vcmp.lt.s32.totalorder %v14193_v35, 3  ;;  %v4887_v55 = vsel %vm4881_vm5, %v4874_v33, 920167782  ;;  %v4954_v23 = vshrl.u32 %v4953_v15, 23  ;;  %v8032_v26 = vpop.eup %8031 }
 0x461   :  { %vm4282_vm1 = vcmp.eq.s32.totalorder %v14160_v4, 0  ;;  %v4576_v22 = vshll.u32 %v4575_v45, 23  ;;  %v4805_v54 = vshll.u32 %v14210_v14, 30  ;;  %v4854_v52 = vor.u32 8388608, %v4853_v3  ;;  %v8034_v47 = vpop.eup %8033 }
 0x462   :  { %v4891_v24 = vsel %vm4881_vm5, %v4877_v12, 1326507024  ;;  %v4148_v11 = vsel %vm4141_vm4, %v4144_v38, %v4147_v58  ;;  %v4383_v39 = vadd.s32 3, %v4379_v50  ;;  %v4481_v9 = vsel %vm4396_vm14, %v4480_v31, %v17662_v20  ;;  %v5073_v58 = vld [vmem:[#allocation7 + $0x160] sm:$0xff]  ;;  %v8036_v38 = vpop.eup %8035 }
 0x463   :  { %8039 = vcosq.f32 %v4482_v30  ;;  %v4573_v37 = vor.u32 %v4572_v32, %v4571_v13  ;;  %vm4879_vm2 = vcmp.lt.s32.totalorder %v14193_v35, 2  ;;  %v4886_v59 = vsel %vm4878_vm9, %v14223_v51, %v14225_v28  ;;  %v5082_v32 = vld [vmem:[#allocation8 + $0x160] sm:$0xff] }
 0x464   :  { %v4888_v43 = vsel %vm4880_vm10, %v4871_v29, %v4887_v55  ;;  %vm4281_vm8 = vcmp.lt.s32.totalorder %v14160_v4, 2  ;;  %v4704_v50 = vsub.s32 0, %v14221_v25  ;;  %v4890_v56 = vsel %vm4878_vm9, %v14225_v28, %v4871_v29 }
 0x465   :  { %v4892_v27 = vsel %vm4880_vm10, %v4874_v33, %v4891_v24  ;;  %v7528_v5 = vadd.s32 4294967169, %v4954_v23  ;;  %vm4285_vm11 = vcmp.eq.s32.totalorder %v14160_v4, 2  ;;  %v4577_v21 = vor.u32 4788187, %v4576_v22 }
 0x466   :  { %v14258_v17 = vsub.s32 %v14171_v10, %v4805_v54  ;;  %v14260_v45 = vshll.u32 %v4854_v52, 8  ;;  %v4149_v15 = vsel %vm4138_vm3, nan, %v4148_v11  ;;  %v4384_v3 = vand.u32 3, %v4383_v39 }
 0x467   :  { %v4889_v12 = vsel %vm4879_vm2, %v4886_v59, %v4888_v43  ;;  %v5077_v20 = vmul.f32 %v14247_v18, %v5073_v58  ;;  %v4283_v31 = vxor.u32 2147483648, %v8034_v47  ;;  %v4286_v33 = vxor.u32 2147483648, %v8032_v26 }
 0x468   :  { %v4483_v13 = vsel %vm14155_vm0, 0, %v4481_v9  ;;  %v4893_v10 = vsel %vm4879_vm2, %v4890_v56, %v4892_v27  ;;  %vm4278_vm7 = vweird.f32 %v17638_v42  ;;  %8041 = vsinq.f32 %v4482_v30 }
 0x469   :  { %v4580_v53 = vcvt.s32.f32 %v4573_v37  ;;  %v7517_v55 = vmin.u32 %v4704_v50, %v14221_v25  ;;  %v4960_v23 = vadd.s32 1, %v7528_v5  ;;  %v8038_v22 = vpop.eup %8037  ;;  %v4578_v54 = vand.u32 2147483647, %v4577_v21 }
 0x46a   :  { %v4808_v52 = vsub.s32 0, %v14258_v17  ;;  %v14275_v24 = vmul.u32.u64.low %v14260_v45, %v4889_v12  ;;  %v14276_v11 = vmul.u32.u64.high %v14260_v45, %v4889_v12, %v14275_v24  ;;  %v4862_v39 = vshrl.u32 %v17401_v1, %v14166_v2 }
 0x46b   :  { %v14282_v9 = vmul.u32.u64.low %v14260_v45, %v4893_v10  ;;  %v14283_v30 = vmul.u32.u64.high %v14260_v45, %v4893_v10, %v14282_v9  ;;  %v14285_v37 = vadd.f32 %v5082_v32, %v5077_v20  ;;  %v4287_v59 = vsel %vm4285_vm11, %v4286_v33, %v8034_v47  ;;  %v17665_v10 = vld [vmem:[#allocation22_spill] sm:$0xff] }
 0x46c   :  { %17663 = vst [vmem:[#allocation23_spill] sm:$0xff] %v14275_v24  ;;  %vm4389_vm12 = vcmp.eq.s32.totalorder %v4384_v3, 2  ;;  %v4390_v43 = vxor.u32 2147483648, %v8036_v38  ;;  %v4883_v58 = vsel %vm4881_vm5, %v4871_v29, 2102212464  ;;  %v4284_v50 = vsel %vm4282_vm1, %v8032_v26, %v4283_v31 }
 0x46d   :  { %17664 = vst [vmem:[#allocation29_spill] sm:$0xff] %v14283_v30  ;;  %vm4382_vm6 = vweird.f32 %v17646_v57  ;;  %v4387_v2 = vxor.u32 2147483648, %v8038_v22  ;;  %v4706_v56 = vclz %v7517_v55  ;;  %vm4961_vm13 = vcmp.gt.s32.totalorder %v4960_v23, 0 }
 0x46e   :  { %v4153_v27 = vmul.f32 %v4149_v15, %v3715_v16  ;;  %vm4386_vm15 = vcmp.eq.s32.totalorder %v4384_v3, 0  ;;  %v4487_v5 = vadd.s32 3, %v4483_v13  ;;  %v7521_v21 = vmin.u32 %v4808_v52, %v14258_v17  ;;  %v17666_v16 = vld [vmem:[#allocation27_spill] sm:$0xff] }
 0x46f   :  { %v4581_v12 = vmul.f32 %v4580_v53, %v4578_v54  ;;  %v4882_v47 = vsel %vm4878_vm9, %v4862_v39, %v14223_v51  ;;  %v4884_v29 = vsel %vm4880_vm10, %v14225_v28, %v4883_v58  ;;  %v5093_v26 = vand.u32 2139095040, %v14285_v37 }
 0x470   :  { %v14302_v20 = vpop.eup %8039  ;;  %v4288_v15 = vsel %vm4281_vm8, %v4284_v50, %v4287_v59  ;;  %vm4385_vm0 = vcmp.lt.s32.totalorder %v4384_v3, 2  ;;  %v4391_v31 = vsel %vm4389_vm12, %v4390_v43, %v8038_v22  ;;  %v4962_v33 = vsel %vm4961_vm13, %v4960_v23, 0  ;;  %v17670_v3 = vld [vmem:[#allocation18_spill] sm:$0xff] }
 0x471   :  { %v4388_v13 = vsel %vm4386_vm15, %v8036_v38, %v4387_v2  ;;  %v4584_v32 = vsub.s32 4, %v17665_v10  ;;  %v7518_v53 = vadd.s32 4294967294, %v4706_v56  ;;  %v5094_v51 = vshrl.u32 %v5093_v26, 23  ;;  %v4164_v38 = vld [vmem:[#allocation5 + $0x120] sm:$0xff] }
 0x472   :  { %v14308_v55 = vand.u32 3, %v4487_v5  ;;  %v4810_v54 = vclz %v7521_v21  ;;  %v4885_v28 = vsel %vm4879_vm2, %v4882_v47, %v4884_v29  ;;  %v4904_v52 = vadd.s32 1, %v14276_v11 }
 0x473   :  { %vm4500_vm14 = vcmp.lt.s32.totalorder %v17666_v16, 0  ;;  %v4582_v4 = vxor.u32 2147483648, %v4581_v12  ;;  %vm4903_vm4 = vc.u32 %v14283_v30, %v14275_v24  ;;  %v4964_v23 = vand.u32 31, %v4962_v33 }
 0x474   :  { %v4289_v22 = vsel %vm4278_vm7, nan, %v4288_v15  ;;  %v4392_v39 = vsel %vm4385_vm0, %v4388_v13, %v4391_v31  ;;  %v17667_v9 = vand.u32 2147483647, %v17666_v16  ;;  %v7533_v59 = vadd.s32 4294967169, %v5094_v51 }
 0x475   :  { %v4494_v43 = vxor.u32 2147483648, %v14302_v20  ;;  %v14329_v58 = vsel %vm4500_vm14, %v4584_v32, %v17665_v10  ;;  %vm7519_vm5 = vcmp.lt.s32.totalorder %v7518_v53, 0  ;;  %v4901_v42 = vmul.u32 %v14260_v45, %v4885_v28  ;;  %v8042_v50 = vpop.eup %8041 }
 0x476   :  { %vm14321_vm3 = vcmp.le.f32.partialorder %v17667_v9, 0.7853982  ;;  %v14333_v2 = vadd.f32 %v4153_v27, %v17670_v3  ;;  %vm4493_vm9 = vcmp.eq.s32.totalorder %v14308_v55, 2  ;;  %v7522_v56 = vadd.s32 4294967294, %v4810_v54 }
 0x477   :  { %v4905_v5 = vsel %vm4903_vm4, %v4904_v52, %v14276_v11  ;;  %vm4490_vm10 = vcmp.eq.s32.totalorder %v14308_v55, 0  ;;  %v4583_v21 = vsel %vm4500_vm14, %v4582_v4, %v4581_v12  ;;  %v14340_v47 = vmul.f32 %v4289_v22, %v4164_v38  ;;  %v5074_v4 = vld [vmem:[#allocation7 + $0x168] sm:$0xff] }
 0x478   :  { %17671 = vst [vmem:[#allocation26_spill] sm:$0xff] %v14333_v2  ;;  %v14342_v29 = vsub.s32 32, %v4964_v23  ;;  %v14346_v45 = vsel %vm4382_vm6, nan, %v4392_v39  ;;  %v4709_v26 = vsel %vm7519_vm5, 0, %v7518_v53  ;;  %v5100_v15 = vadd.s32 1, %v7533_v59 }
 0x479   :  { %v4491_v11 = vxor.u32 2147483648, %v8042_v50  ;;  %v14351_v31 = vsel %vm4493_vm9, %v4494_v43, %v8042_v50  ;;  %v4694_v12 = vadd.s32 %v14019_v62, %v14016_v19  ;;  %v14355_v13 = vadd.s32 %v4905_v5, %v4901_v42 }
 0x47a   :  { %v14360_v57 = vsel %vm14321_vm3, %v17666_v16, %v4583_v21  ;;  %v4710_v10 = vsub.s32 32, %v4709_v26  ;;  %vm7523_vm1 = vcmp.lt.s32.totalorder %v7522_v56, 0  ;;  %v17310_v32 = vand.u32 2147483647, %v14186_v63 }
 0x47b   :  { %v4711_v53 = vshll.u32 %v14221_v25, %v4709_v26  ;;  %v4714_v51 = vsub.s32 4294967266, %v4709_v26  ;;  %v4976_v54 = vshll.u32 %v17656_v40, %v4964_v23  ;;  %v4977_v28 = vshrl.u32 %v17657_v41, %v14342_v29 }
 0x47c   :  { %v14367_v19 = vshrl.u32 %v4962_v33, 5  ;;  %v4979_v62 = vshll.u32 %v17657_v41, %v4964_v23  ;;  %v4980_v52 = vshrl.u32 %v17658_v60, %v14342_v29  ;;  %vm5101_vm2 = vcmp.gt.s32.totalorder %v5100_v15, 0 }
 0x47d   :  { %v14372_v38 = vsel %vm7523_vm1, 0, %v7522_v56  ;;  %v4907_v22 = vadd.s32 536870912, %v14355_v13  ;;  %v4967_v25 = vshll.u32 %v17401_v1, %v4964_v23  ;;  %v4970_v39 = vshll.u32 %v17659_v44, %v4964_v23 }
 0x47e   :  { %v4968_v9 = vshrl.u32 %v17659_v44, %v14342_v29  ;;  %v4971_v33 = vshrl.u32 %v17661_v34, %v14342_v29  ;;  %v4973_v59 = vshll.u32 %v17661_v34, %v4964_v23  ;;  %v4974_v43 = vshrl.u32 %v17656_v40, %v14342_v29 }
 0x47f   :  { %v4712_v42 = vshrl.u32 %v4694_v12, %v4710_v10  ;;  %v4978_v50 = vor.u32 %v4977_v28, %v4976_v54  ;;  %v5078_v3 = vmul.f32 %v14247_v18, %v5074_v4  ;;  %v5102_v56 = vsel %vm5101_vm2, %v5100_v15, 0 }
 0x480   :  { %v4715_v5 = vadd.s32 127, %v4714_v51  ;;  %v4957_v21 = vand.u32 8388607, %v17310_v32  ;;  %v4981_v26 = vor.u32 %v4980_v52, %v4979_v62  ;;  %vm4985_vm8 = vcmp.lt.s32.totalorder %v14367_v19, 4 }
 0x481   :  { %v14391_v23 = vsel %vm4490_vm10, %v14302_v20, %v4491_v11  ;;  %8043 = vcosq.f32 %v14360_v57  ;;  %v4818_v12 = vsub.s32 4294967266, %v14372_v38  ;;  %v14395_v10 = vshrl.u32 %v4907_v22, 30 }
 0x482   :  { %v14397_v15 = vor.u32 %v4968_v9, %v4967_v25  ;;  %v14399_v51 = vor.u32 %v4971_v33, %v4970_v39  ;;  %v4975_v54 = vor.u32 %v4974_v43, %v4973_v59  ;;  %v5104_v28 = vand.u32 31, %v5102_v56 }
 0x483   :  { %17672 = vst [vmem:[#allocation20_spill] sm:$0xff] %v14395_v10  ;;  %vm4982_vm11 = vcmp.lt.s32.totalorder %v14367_v19, 1  ;;  %vm4984_vm7 = vcmp.lt.s32.totalorder %v14367_v19, 3  ;;  %v4991_v20 = vsel %vm4985_vm8, %v4978_v50, 920167782  ;;  %v14405_v11 = vadd.f32 %v5083_v6, %v5078_v3 }
 0x484   :  { %v14407_v62 = vor.u32 %v4712_v42, %v4711_v53  ;;  %v4716_v52 = vshll.u32 %v4715_v5, 23  ;;  %v4958_v4 = vor.u32 8388608, %v4957_v21  ;;  %v4995_v22 = vsel %vm4985_vm8, %v4981_v26, 1326507024 }
 0x485   :  { %v4798_v25 = vadd.s32 %v14081_v49, %v14090_v61  ;;  %v4814_v39 = vsub.s32 32, %v14372_v38  ;;  %v4819_v9 = vadd.s32 127, %v4818_v12  ;;  %v4909_v33 = vshll.u32 %v14395_v10, 30 }
 0x486   :  { %vm4983_vm12 = vcmp.lt.s32.totalorder %v14367_v19, 2  ;;  %v4990_v6 = vsel %vm4982_vm11, %v14397_v15, %v14399_v51  ;;  %v4992_v53 = vsel %vm4984_vm7, %v4975_v54, %v4991_v20  ;;  %v14422_v59 = vsub.s32 32, %v5104_v28 }
 0x487   :  { %v4724_v43 = vsub.s32 4, %v14179_v36  ;;  %v4994_v49 = vsel %vm4982_vm11, %v14399_v51, %v4975_v54  ;;  %v4996_v61 = vsel %vm4984_vm7, %v4978_v50, %v4995_v22  ;;  %v5197_v42 = vand.u32 2139095040, %v14405_v11 }
 0x488   :  { %v4717_v3 = vor.u32 4788187, %v4716_v52  ;;  %v4720_v5 = vcvt.s32.f32 %v14407_v62  ;;  %v4815_v21 = vshll.u32 %v14258_v17, %v14372_v38  ;;  %v14434_v26 = vshll.u32 %v4958_v4, 8  ;;  %v17673_v38 = vld [vmem:[#allocation25_spill] sm:$0xff] }
 0x489   :  { %vm4489_vm6 = vcmp.lt.s32.totalorder %v14308_v55, 2  ;;  %v4816_v12 = vshrl.u32 %v4798_v25, %v4814_v39  ;;  %v4820_v20 = vshll.u32 %v4819_v9, 23  ;;  %v14438_v32 = vsub.s32 %v14355_v13, %v4909_v33 }
 0x48a   :  { %v4993_v50 = vsel %vm4983_vm12, %v4990_v6, %v4992_v53  ;;  %v4997_v52 = vsel %vm4983_vm12, %v4994_v49, %v4996_v61  ;;  %v5116_v22 = vshll.u32 %v17656_v40, %v5104_v28  ;;  %v5117_v17 = vshrl.u32 %v17657_v41, %v14422_v59 }
 0x48b   :  { %vm4640_vm13 = vcmp.lt.s32.totalorder %v17673_v38, 0  ;;  %v14449_v4 = vshrl.u32 %v5102_v56, 5  ;;  %v5119_v13 = vshll.u32 %v17657_v41, %v5104_v28  ;;  %v5120_v25 = vshrl.u32 %v17658_v60, %v14422_v59 }
 0x48c   :  { %v5198_v39 = vshrl.u32 %v5197_v42, 23  ;;  %v14455_v9 = vmul.u32.u64.low %v14434_v26, %v4993_v50  ;;  %v14456_v33 = vmul.u32.u64.high %v14434_v26, %v4993_v50, %v14455_v9  ;;  %v5107_v6 = vshll.u32 %v17401_v1, %v5104_v28 }
 0x48d   :  { %v5108_v53 = vshrl.u32 %v17659_v44, %v14422_v59  ;;  %v5110_v49 = vshll.u32 %v17659_v44, %v5104_v28  ;;  %v5111_v56 = vshrl.u32 %v17661_v34, %v14422_v59  ;;  %v5113_v61 = vshll.u32 %v17661_v34, %v5104_v28 }
 0x48e   :  { %v5114_v42 = vshrl.u32 %v17656_v40, %v14422_v59  ;;  %v14468_v27 = vpop.eup %8043  ;;  %v4966_v50 = vshrl.u32 %v17401_v1, %v14342_v29  ;;  %v14473_v62 = vmul.u32.u64.low %v14434_v26, %v4997_v52  ;;  %v14474_v2 = vmul.u32.u64.high %v14434_v26, %v4997_v52, %v14473_v62 }
 0x48f   :  { %v5118_v63 = vor.u32 %v5117_v17, %v5116_v22  ;;  %vm4486_vm15 = vweird.f32 %v13341_v46  ;;  %v17674_v7 = vand.u32 2147483647, %v14285_v37  ;;  %v5121_v10 = vor.u32 %v5120_v25, %v5119_v13 }
 0x490   :  { %vm5125_vm0 = vcmp.lt.s32.totalorder %v14449_v4, 4  ;;  %v7537_v28 = vadd.s32 4294967169, %v5198_v39  ;;  %v4718_v48 = vand.u32 2147483647, %v4717_v3  ;;  %v4817_v24 = vor.u32 %v4816_v12, %v4815_v21 }
 0x491   :  { %v5097_v16 = vand.u32 8388607, %v17674_v7  ;;  %v4821_v30 = vor.u32 4788187, %v4820_v20  ;;  %v4987_v29 = vsel %vm4985_vm8, %v4975_v54, 2102212464  ;;  %v5109_v22 = vor.u32 %v5108_v53, %v5107_v6 }
 0x492   :  { %v17675_v34 = vand.u32 2147483647, %v17673_v38  ;;  %v4912_v62 = vsub.s32 0, %v14438_v32  ;;  %v5112_v7 = vor.u32 %v5111_v56, %v5110_v49  ;;  %v5115_v17 = vor.u32 %v5114_v42, %v5113_v61  ;;  %v4165_v6 = vld [vmem:[#allocation5 + $0x128] sm:$0xff]  ;;  %v5084_v42 = vld [vmem:[#allocation8 + $0x170] sm:$0xff] }
 0x493   :  { %v4986_v3 = vsel %vm4982_vm11, %v4966_v50, %v14397_v15  ;;  %vm5122_vm4 = vcmp.lt.s32.totalorder %v14449_v4, 1  ;;  %vm5124_vm5 = vcmp.lt.s32.totalorder %v14449_v4, 3  ;;  %v5131_v54 = vsel %vm5125_vm0, %v5118_v63, 920167782 }
 0x494   :  { %vm14484_vm14 = vcmp.le.f32.partialorder %v17675_v34, 0.7853982  ;;  %v4988_v34 = vsel %vm4984_vm7, %v14399_v51, %v4987_v29  ;;  %v5098_v21 = vor.u32 8388608, %v5097_v16  ;;  %v5135_v12 = vsel %vm5125_vm0, %v5121_v10, 1326507024  ;;  %v5075_v51 = vld [vmem:[#allocation7 + $0x170] sm:$0xff] }
 0x495   :  { %v5204_v20 = vadd.s32 1, %v7537_v28  ;;  %v4496_v15 = vsel %vm4489_vm6, %v14391_v23, %v14351_v31  ;;  %v4721_v13 = vmul.f32 %v4720_v5, %v4718_v48  ;;  %v4725_v25 = vsel %vm4640_vm13, %v4724_v43, %v14179_v36 }
 0x496   :  { %v4824_v39 = vcvt.s32.f32 %v4817_v24  ;;  %v7525_v53 = vmin.u32 %v4912_v62, %v14438_v32  ;;  %vm5123_vm9 = vcmp.lt.s32.totalorder %v14449_v4, 2  ;;  %v5130_v16 = vsel %vm5122_vm4, %v5109_v22, %v5112_v7 }
 0x497   :  { %v5132_v10 = vsel %vm5124_vm5, %v5115_v17, %v5131_v54  ;;  %v4989_v48 = vsel %vm4983_vm12, %v4986_v3, %v4988_v34  ;;  %v5008_v55 = vadd.s32 1, %v14456_v33  ;;  %v5134_v36 = vsel %vm5122_vm4, %v5112_v7, %v5115_v17 }
 0x498   :  { %v5136_v24 = vsel %vm5124_vm5, %v5118_v63, %v5135_v12  ;;  %v4822_v31 = vand.u32 2147483647, %v4821_v30  ;;  %vm5007_vm10 = vc.u32 %v14474_v2, %v14455_v9  ;;  %v14523_v23 = vshll.u32 %v5098_v21, 8 }
 0x499   :  { %vm5205_vm1 = vcmp.gt.s32.totalorder %v5204_v20, 0  ;;  %v17678_v19 = vsel %vm14321_vm3, 0, %v14329_v58  ;;  %v4603_v5 = vmul.f32 %v14346_v45, %v4165_v6  ;;  %v5079_v49 = vmul.f32 %v14247_v18, %v5075_v51 }
 0x49a   :  { %v4591_v43 = vadd.s32 3, %v17678_v19  ;;  %v5133_v56 = vsel %vm5123_vm9, %v5130_v16, %v5132_v10  ;;  %v4722_v63 = vxor.u32 2147483648, %v4721_v13  ;;  %v4914_v30 = vclz %v7525_v53 }
 0x49b   :  { %v5005_v61 = vmul.u32 %v14434_v26, %v4989_v48  ;;  %v5137_v50 = vsel %vm5123_vm9, %v5134_v36, %v5136_v24  ;;  %v4497_v35 = vsel %vm4486_vm15, nan, %v4496_v15  ;;  %v4727_v58 = vsel %vm14484_vm14, 0, %v4725_v25  ;;  %v17680_v25 = vld [vmem:[#allocation17_spill] sm:$0xff] }
 0x49c   :  { %v5009_v45 = vsel %vm5007_vm10, %v5008_v55, %v14456_v33  ;;  %v5206_v28 = vsel %vm5205_vm1, %v5204_v20, 0  ;;  %v4825_v29 = vmul.f32 %v4824_v39, %v4822_v31  ;;  %v5106_v62 = vshrl.u32 %v17401_v1, %v14422_v59  ;;  %v4166_v33 = vld [vmem:[#allocation5 + $0x130] sm:$0xff] }
 0x49d   :  { %v14544_v3 = vmul.u32.u64.low %v14523_v23, %v5133_v56  ;;  %v14545_v26 = vmul.u32.u64.high %v14523_v23, %v5133_v56, %v14544_v3  ;;  %v14548_v54 = vadd.f32 %v5084_v42, %v5079_v49  ;;  %v5127_v46 = vsel %vm5125_vm0, %v5115_v17, 2102212464  ;;  %v5076_v42 = vld [vmem:[#allocation7 + $0x178] sm:$0xff] }
 0x49e   :  { %v14553_v34 = vmul.u32.u64.low %v14523_v23, %v5137_v50  ;;  %v14554_v21 = vmul.u32.u64.high %v14523_v23, %v5137_v50, %v14553_v34  ;;  %v4723_v12 = vsel %vm4640_vm13, %v4722_v63, %v4721_v13  ;;  %v7526_v20 = vadd.s32 4294967294, %v4914_v30 }
 0x49f   :  { %17679 = vst [vmem:[#allocation19_spill] sm:$0xff] %v14548_v54  ;;  %v14558_v59 = vadd.s32 %v5009_v45, %v5005_v61  ;;  %v5208_v15 = vand.u32 31, %v5206_v28  ;;  %v14562_v39 = vadd.f32 %v14340_v47, %v17680_v25  ;;  %v14565_v6 = vadd.f32 %v4603_v5, %v14112_v8  ;;  %v17688_v25 = vld [vmem:[#allocation23_spill] sm:$0xff] }
 0x4a0   :  { %v4731_v17 = vadd.s32 3, %v4727_v58  ;;  %vm4744_vm3 = vcmp.lt.s32.totalorder %v13764_v0, 0  ;;  %v4826_v53 = vxor.u32 2147483648, %v4825_v29  ;;  %v4828_v51 = vsub.s32 4, %v14210_v14 }
 0x4a1   :  { %17681 = vst [vmem:[#allocation24_spill] sm:$0xff] %v14562_v39  ;;  %17682 = vst [vmem:[#allocation22_spill] sm:$0xff] %v14565_v6  ;;  %v5126_v13 = vsel %vm5122_vm4, %v5106_v62, %v5109_v22  ;;  %v5128_v16 = vsel %vm5124_vm5, %v5112_v7, %v5127_v46  ;;  %v14573_v10 = vand.u32 3, %v4591_v43  ;;  %v14575_v48 = vmul.f32 %v4497_v35, %v4166_v33 }
 0x4a2   :  { %v4726_v8 = vsel %vm14484_vm14, %v17673_v38, %v4723_v12  ;;  %v17683_v47 = vand.u32 2147483647, %v13764_v0  ;;  %v5301_v36 = vand.u32 2139095040, %v14548_v54  ;;  %8045 = vsinq.f32 %v14360_v57 }
 0x4a3   :  { %vm7527_vm8 = vcmp.lt.s32.totalorder %v7526_v20, 0  ;;  %v5011_v22 = vadd.s32 536870912, %v14558_v59  ;;  %v14589_v7 = vsub.s32 32, %v5208_v15  ;;  %v14592_v31 = vand.u32 3, %v4731_v17 }
 0x4a4   :  { %vm14582_vm2 = vcmp.le.f32.partialorder %v17683_v47, 0.7853982  ;;  %v5129_v52 = vsel %vm5123_vm9, %v5126_v13, %v5128_v16  ;;  %v5302_v19 = vshrl.u32 %v5301_v36, 23  ;;  %8047 = vcosq.f32 %v4726_v8 }
 0x4a5   :  { %v4827_v43 = vsel %vm4744_vm3, %v4826_v53, %v4825_v29  ;;  %v14601_v57 = vsel %vm4744_vm3, %v4828_v51, %v14210_v14  ;;  %v5148_v5 = vadd.s32 1, %v14545_v26  ;;  %v14604_v49 = vsel %vm7527_vm8, 0, %v7526_v20  ;;  %v17687_v20 = vld [vmem:[#allocation29_spill] sm:$0xff] }
 0x4a6   :  { %vm5147_vm11 = vc.u32 %v14554_v21, %v14544_v3  ;;  %v17321_v4 = vand.u32 2147483647, %v14405_v11  ;;  %v7541_v56 = vadd.s32 4294967169, %v5302_v19  ;;  %v14609_v63 = vshrl.u32 %v5011_v22, 30 }
 0x4a7   :  { %v5145_v30 = vmul.u32 %v14523_v23, %v5129_v52  ;;  %v5220_v61 = vshll.u32 %v17656_v40, %v5208_v15  ;;  %v5221_v14 = vshrl.u32 %v17657_v41, %v14589_v7  ;;  %v14615_v50 = vshrl.u32 %v5206_v28, 5 }
 0x4a8   :  { %v5223_v35 = vshll.u32 %v17657_v41, %v5208_v15  ;;  %v5224_v58 = vshrl.u32 %v17658_v60, %v14589_v7  ;;  %v5308_v45 = vadd.s32 1, %v7541_v56  ;;  %v5149_v29 = vsel %vm5147_vm11, %v5148_v5, %v14545_v26 }
 0x4a9   :  { %v5211_v62 = vshll.u32 %v17401_v1, %v5208_v15  ;;  %v5212_v23 = vshrl.u32 %v17659_v44, %v14589_v7  ;;  %v5214_v46 = vshll.u32 %v17659_v44, %v5208_v15  ;;  %v17686_v34 = vmov 2131351028  }
 0x4aa   :  { %v5215_v33 = vshrl.u32 %v17686_v34, %v14589_v7  ;;  %v5217_v28 = vshll.u32 %v17686_v34, %v5208_v15  ;;  %v5218_v12 = vshrl.u32 %v17656_v40, %v14589_v7  ;;  %vm5309_vm7 = vcmp.gt.s32.totalorder %v5308_v45, 0 }
 0x4ab   :  { %v4902_v17 = vadd.s32 %v17688_v25, %v17687_v20  ;;  %v5013_v26 = vshll.u32 %v14609_v63, 30  ;;  %v5080_v53 = vmul.f32 %v14247_v18, %v5076_v42  ;;  %v5222_v51 = vor.u32 %v5221_v14, %v5220_v61  ;;  %v5085_v18 = vld [vmem:[#allocation8 + $0x178] sm:$0xff] }
 0x4ac   :  { %v5201_v13 = vand.u32 8388607, %v17321_v4  ;;  %v5225_v16 = vor.u32 %v5224_v58, %v5223_v35  ;;  %vm5229_vm12 = vcmp.lt.s32.totalorder %v14615_v50, 4  ;;  %v5310_v47 = vsel %vm5309_vm7, %v5308_v45, 0 }
 0x4ad   :  { %v14640_v15 = vsel %vm14582_vm2, %v13764_v0, %v4827_v43  ;;  %v4918_v36 = vsub.s32 32, %v14604_v49  ;;  %v4922_v22 = vsub.s32 4294967266, %v14604_v49  ;;  %v14644_v52 = vadd.s32 %v5149_v29, %v5145_v30 }
 0x4ae   :  { %v14646_v19 = vor.u32 %v5212_v23, %v5211_v62  ;;  %v14648_v5 = vor.u32 %v5215_v33, %v5214_v46  ;;  %v5219_v56 = vor.u32 %v5218_v12, %v5217_v28  ;;  %v5312_v61 = vand.u32 31, %v5310_v47 }
 0x4af   :  { %v14651_v14 = vsub.s32 %v14558_v59, %v5013_v26  ;;  %vm5226_vm6 = vcmp.lt.s32.totalorder %v14615_v50, 1  ;;  %vm5228_vm13 = vcmp.lt.s32.totalorder %v14615_v50, 3  ;;  %v5235_v43 = vsel %vm5229_vm12, %v5222_v51, 920167782  ;;  %v14657_v42 = vpop.eup %8045 }
 0x4b0   :  { %8049 = vsinq.f32 %v4726_v8  ;;  %v5202_v30 = vor.u32 8388608, %v5201_v13  ;;  %v5239_v35 = vsel %vm5229_vm12, %v5225_v16, 1326507024  ;;  %v14661_v58 = vsub.s32 32, %v5312_v61 }
 0x4b1   :  { %8051 = vcosq.f32 %v14640_v15  ;;  %v4919_v59 = vshll.u32 %v14438_v32, %v14604_v49  ;;  %v14666_v45 = vadd.f32 %v5085_v18, %v5080_v53  ;;  %v5151_v29 = vadd.s32 536870912, %v14644_v52  ;;  %v14669_v62 = vpop.eup %8047 }
 0x4b2   :  { %v4920_v23 = vshrl.u32 %v4902_v17, %v4918_v36  ;;  %vm5227_vm15 = vcmp.lt.s32.totalorder %v14615_v50, 2  ;;  %v5234_v8 = vsel %vm5226_vm6, %v14646_v19, %v14648_v5  ;;  %v5236_v46 = vsel %vm5228_vm13, %v5219_v56, %v5235_v43 }
 0x4b3   :  { %17689 = vst [vmem:[#allocation18_spill] sm:$0xff] %v14666_v45  ;;  %v4923_v33 = vadd.s32 127, %v4922_v22  ;;  %v5016_v32 = vsub.s32 0, %v14651_v14  ;;  %v5238_v49 = vsel %vm5226_vm6, %v14648_v5, %v5219_v56  ;;  %v5240_v28 = vsel %vm5228_vm13, %v5222_v51, %v5239_v35 }
 0x4b4   :  { %v14684_v12 = vshll.u32 %v5202_v30, 8  ;;  %v17322_v20 = vand.u32 2147483647, %v14548_v54  ;;  %v5324_v25 = vshll.u32 %v17656_v40, %v5312_v61  ;;  %v5325_v17 = vshrl.u32 %v17657_v41, %v14661_v58 }
 0x4b5   :  { %v14690_v26 = vshrl.u32 %v5151_v29, 30  ;;  %v5237_v53 = vsel %vm5227_vm15, %v5234_v8, %v5236_v46  ;;  %v14694_v13 = vshrl.u32 %v5310_v47, 5  ;;  %v5327_v16 = vshll.u32 %v17657_v41, %v5312_v61 }
 0x4b6   :  { %v5241_v51 = vsel %vm5227_vm15, %v5238_v49, %v5240_v28  ;;  %v5315_v36 = vshll.u32 %v17401_v1, %v5312_v61  ;;  %v5318_v22 = vshll.u32 %v17659_v44, %v5312_v61  ;;  %v5328_v18 = vshrl.u32 %v17658_v60, %v14661_v58 }
 0x4b7   :  { %v5316_v43 = vshrl.u32 %v17659_v44, %v14661_v58  ;;  %v5319_v30 = vshrl.u32 %v17686_v34, %v14661_v58  ;;  %v5321_v47 = vshll.u32 %v17686_v34, %v5312_v61  ;;  %v5322_v35 = vshrl.u32 %v17656_v40, %v14661_v58 }
 0x4b8   :  { %v4924_v29 = vshll.u32 %v4923_v33, 23  ;;  %v7529_v8 = vmin.u32 %v5016_v32, %v14651_v14  ;;  %v5210_v46 = vshrl.u32 %v17401_v1, %v14589_v7  ;;  %v5326_v49 = vor.u32 %v5325_v17, %v5324_v25 }
 0x4b9   :  { %v5305_v28 = vand.u32 8388607, %v17322_v20  ;;  %v5329_v4 = vor.u32 %v5328_v18, %v5327_v16  ;;  %vm5333_vm0 = vcmp.lt.s32.totalorder %v14694_v13, 4  ;;  %v5405_v24 = vand.u32 2139095040, %v14666_v45 }
 0x4ba   :  { %v14718_v61 = vmul.u32.u64.low %v14684_v12, %v5241_v51  ;;  %v14719_v6 = vmul.u32.u64.high %v14684_v12, %v5241_v51, %v14718_v61  ;;  %v14722_v33 = vmul.u32.u64.low %v14684_v12, %v5237_v53  ;;  %v14723_v39 = vmul.u32.u64.high %v14684_v12, %v5237_v53, %v14722_v33 }
 0x4bb   :  { %v5153_v7 = vshll.u32 %v14690_v26, 30  ;;  %v14727_v32 = vor.u32 %v5316_v43, %v5315_v36  ;;  %v14729_v25 = vor.u32 %v5319_v30, %v5318_v22  ;;  %v5323_v17 = vor.u32 %v5322_v35, %v5321_v47 }
 0x4bc   :  { %vm4594_vm14 = vcmp.eq.s32.totalorder %v14573_v10, 0  ;;  %vm4597_vm4 = vcmp.eq.s32.totalorder %v14573_v10, 2  ;;  %v5231_v16 = vsel %vm5229_vm12, %v5219_v56, 2102212464  ;;  %vm5330_vm5 = vcmp.lt.s32.totalorder %v14694_v13, 1 }
 0x4bd   :  { %vm5332_vm9 = vcmp.lt.s32.totalorder %v14694_v13, 3  ;;  %v5339_v53 = vsel %vm5333_vm0, %v5326_v49, 920167782  ;;  %v8050_v51 = vpop.eup %8049  ;;  %vm4734_vm10 = vcmp.eq.s32.totalorder %v14592_v31, 0  ;;  %vm4737_vm1 = vcmp.eq.s32.totalorder %v14592_v31, 2 }
 0x4be   :  { %8053 = vsinq.f32 %v14640_v15  ;;  %v5306_v36 = vor.u32 8388608, %v5305_v28  ;;  %v5343_v22 = vsel %vm5333_vm0, %v5329_v4, 1326507024  ;;  %v5406_v18 = vshrl.u32 %v5405_v24, 23  ;;  %v14744_v56 = vpop.eup %8051 }
 0x4bf   :  { %v4831_v43 = vsel %vm14582_vm2, 0, %v14601_v57  ;;  %v4921_v30 = vor.u32 %v4920_v23, %v4919_v59  ;;  %v4925_v47 = vor.u32 4788187, %v4924_v29  ;;  %v5230_v35 = vsel %vm5226_vm6, %v5210_v46, %v14646_v19  ;;  %v17690_v57 = vld [vmem:[#allocation28_spill] sm:$0xff] }
 0x4c0   :  { %vm4593_vm3 = vcmp.lt.s32.totalorder %v14573_v10, 2  ;;  %v5232_v15 = vsel %vm5228_vm13, %v14648_v5, %v5231_v16  ;;  %vm5331_vm8 = vcmp.lt.s32.totalorder %v14694_v13, 2  ;;  %v5338_v55 = vsel %vm5330_vm5, %v14727_v32, %v14729_v25  ;;  %v5525_v10 = vld [vmem:[#allocation7 + $0x180] sm:$0xff] }
 0x4c1   :  { %v5340_v24 = vsel %vm5332_vm9, %v5323_v17, %v5339_v53  ;;  %vm4733_vm2 = vcmp.lt.s32.totalorder %v14592_v31, 2  ;;  %vm4848_vm11 = vcmp.lt.s32.totalorder %v17690_v57, 0  ;;  %v5018_v4 = vclz %v7529_v8 }
 0x4c2   :  { %v14766_v19 = vsub.s32 %v14644_v52, %v5153_v7  ;;  %v5342_v5 = vsel %vm5330_vm5, %v14729_v25, %v5323_v17  ;;  %v5344_v59 = vsel %vm5332_vm9, %v5326_v49, %v5343_v22  ;;  %v4595_v23 = vxor.u32 2147483648, %v14657_v42 }
 0x4c3   :  { %v4835_v29 = vadd.s32 3, %v4831_v43  ;;  %v14774_v46 = vshll.u32 %v5306_v36, 8  ;;  %v7545_v28 = vadd.s32 4294967169, %v5406_v18  ;;  %v4738_v61 = vxor.u32 2147483648, %v14669_v62  ;;  %v17694_v36 = vld [vmem:[#allocation20_spill] sm:$0xff] }
 0x4c4   :  { %v5233_v8 = vsel %vm5227_vm15, %v5230_v35, %v5232_v15  ;;  %v5252_v52 = vadd.s32 1, %v14723_v39  ;;  %v5341_v7 = vsel %vm5331_vm8, %v5338_v55, %v5340_v24  ;;  %v4735_v16 = vxor.u32 2147483648, %v8050_v51 }
 0x4c5   :  { %v17691_v53 = vand.u32 2147483647, %v17690_v57  ;;  %v4932_v22 = vsub.s32 4, %v17694_v36  ;;  %vm5251_vm12 = vc.u32 %v14719_v6, %v14722_v33  ;;  %v5345_v50 = vsel %vm5331_vm8, %v5342_v5, %v5344_v59 }
 0x4c6   :  { %vm4730_vm6 = vweird.f32 %v17673_v38  ;;  %v4926_v18 = vand.u32 2147483647, %v4925_v47  ;;  %v4928_v43 = vcvt.s32.f32 %v4921_v30  ;;  %v7530_v35 = vadd.s32 4294967294, %v5018_v4 }
 0x4c7   :  { %vm14784_vm7 = vcmp.le.f32.partialorder %v17691_v53, 0.7853982  ;;  %v5156_v15 = vsub.s32 0, %v14766_v19  ;;  %v5249_v55 = vmul.u32 %v14684_v12, %v5233_v8  ;;  %v5412_v20 = vadd.s32 1, %v7545_v28  ;;  %v17696_v8 = vld [vmem:[#allocation27_spill] sm:$0xff] }
 0x4c8   :  { %v14797_v24 = vmul.u32.u64.low %v14774_v46, %v5341_v7  ;;  %v14798_v53 = vmul.u32.u64.high %v14774_v46, %v5341_v7, %v14797_v24  ;;  %v5253_v54 = vsel %vm5251_vm12, %v5252_v52, %v14723_v39  ;;  %v5314_v5 = vshrl.u32 %v17401_v1, %v14661_v58 }
 0x4c9   :  { %v14805_v59 = vmul.u32.u64.low %v14774_v46, %v5345_v50  ;;  %v14806_v47 = vmul.u32.u64.high %v14774_v46, %v5345_v50, %v14805_v59  ;;  %v4596_v30 = vsel %vm4594_vm14, %v14468_v27, %v4595_v23  ;;  %v17695_v12 = vxor.u32 2147483648, %v14468_v27  ;;  %v17697_v27 = vld [vmem:[#allocation21_spill] sm:$0xff] }
 0x4ca   :  { %v4836_v28 = vand.u32 3, %v4835_v29  ;;  %v5335_v39 = vsel %vm5333_vm0, %v5323_v17, 2102212464  ;;  %vm4590_vm13 = vweird.f32 %v17696_v8  ;;  %v4736_v58 = vsel %vm4734_vm10, %v14669_v62, %v4735_v16 }
 0x4cb   :  { %v4599_v4 = vsel %vm4597_vm4, %v17695_v12, %v14657_v42  ;;  %v4739_v52 = vsel %vm4737_vm1, %v4738_v61, %v8050_v51  ;;  %vm7531_vm15 = vcmp.lt.s32.totalorder %v7530_v35, 0  ;;  %v7534_v23 = vmin.u32 %v5156_v15, %v14766_v19  ;;  %v8054_v29 = vpop.eup %8053  ;;  %v5534_v12 = vld [vmem:[#allocation8 + $0x180] sm:$0xff] }
 0x4cc   :  { %v14827_v7 = vadd.f32 %v14575_v48, %v17697_v27  ;;  %v4933_v42 = vsel %vm4848_vm11, %v4932_v22, %v17694_v36  ;;  %v14832_v17 = vadd.s32 %v5253_v54, %v5249_v55  ;;  %vm5413_vm0 = vcmp.gt.s32.totalorder %v5412_v20, 0  ;;  %v14847_v36 = vld [vmem:[#allocation2 + $0xc] ss:$0 sm:$0xff] }
 0x4cd   :  { %v4600_v62 = vsel %vm4593_vm3, %v4596_v30, %v4599_v4  ;;  %v4929_v16 = vmul.f32 %v4928_v43, %v4926_v18  ;;  %v5334_v51 = vsel %vm5330_vm5, %v5314_v5, %v14727_v32  ;;  %v5336_v48 = vsel %vm5332_vm9, %v14729_v25, %v5335_v39 }
 0x4ce   :  { %17698 = vst [vmem:[#allocation25_spill] sm:$0xff] %v14827_v7  ;;  %v4740_v61 = vsel %vm4733_vm2, %v4736_v58, %v4739_v52  ;;  %vm4838_vm14 = vcmp.eq.s32.totalorder %v4836_v28, 0  ;;  %vm4841_vm4 = vcmp.eq.s32.totalorder %v4836_v28, 2  ;;  %v14845_v54 = vsel %vm7531_vm15, 0, %v7530_v35  ;;  %v4616_v52 = vld [vmem:[#allocation5 + $0x140] sm:$0xff] }
 0x4cf   :  { %v4842_v22 = vxor.u32 2147483648, %v14744_v56  ;;  %v4935_v32 = vsel %vm14784_vm7, 0, %v4933_v42  ;;  %v5158_v50 = vclz %v7534_v23  ;;  %v5414_v18 = vsel %vm5413_vm0, %v5412_v20, 0 }
 0x4d0   :  { %v4839_v25 = vxor.u32 2147483648, %v8054_v29  ;;  %v5255_v31 = vadd.s32 536870912, %v14832_v17  ;;  %v5337_v43 = vsel %vm5331_vm8, %v5334_v51, %v5336_v48  ;;  %v5356_v35 = vadd.s32 1, %v14798_v53 }
 0x4d1   :  { %v4930_v15 = vxor.u32 2147483648, %v4929_v16  ;;  %v5026_v55 = vsub.s32 4294967266, %v14845_v54  ;;  %vm5355_vm5 = vc.u32 %v14806_v47, %v14797_v24  ;;  %v5529_v5 = vmul.f32 %v14847_v36, %v5525_v10 }
 0x4d2   :  { %v4741_v59 = vsel %vm4730_vm6, nan, %v4740_v61  ;;  %vm4837_vm9 = vcmp.lt.s32.totalorder %v4836_v28, 2  ;;  %v4939_v20 = vadd.s32 3, %v4935_v32  ;;  %v5416_v30 = vand.u32 31, %v5414_v18 }
 0x4d3   :  { %v4843_v13 = vsel %vm4841_vm4, %v4842_v22, %v8054_v29  ;;  %v5006_v4 = vadd.s32 %v14455_v9, %v14474_v2  ;;  %v7535_v39 = vadd.s32 4294967294, %v5158_v50  ;;  %v5353_v58 = vmul.u32 %v14774_v46, %v5337_v43 }
 0x4d4   :  { %v4840_v23 = vsel %vm4838_vm14, %v14744_v56, %v4839_v25  ;;  %v5036_v27 = vsub.s32 4, %v14609_v63  ;;  %v14870_v38 = vshrl.u32 %v5255_v31, 30  ;;  %v5357_v42 = vsel %vm5355_vm5, %v5356_v35, %v14798_v53  ;;  %v17700_v56 = vld [vmem:[#allocation16_spill] sm:$0xff] }
 0x4d5   :  { %v4931_v51 = vsel %vm4848_vm11, %v4930_v15, %v4929_v16  ;;  %v5022_v29 = vsub.s32 32, %v14845_v54  ;;  %v5027_v48 = vadd.s32 127, %v5026_v55  ;;  %v14876_v2 = vadd.f32 %v5534_v12, %v5529_v5 }
 0x4d6   :  { %v14880_v9 = vsel %vm4590_vm13, nan, %v4600_v62  ;;  %v14882_v46 = vand.u32 3, %v4939_v20  ;;  %vm4952_vm10 = vcmp.lt.s32.totalorder %v17700_v56, 0  ;;  %v14885_v61 = vsub.s32 32, %v5416_v30 }
 0x4d7   :  { %17699 = vst [vmem:[#allocation17_spill] sm:$0xff] %v14876_v2  ;;  %v14888_v53 = vsel %vm4837_vm9, %v4840_v23, %v4843_v13  ;;  %v14890_v10 = vmul.f32 %v4741_v59, %v4616_v52  ;;  %vm7536_vm1 = vcmp.lt.s32.totalorder %v7535_v39, 0  ;;  %v14892_v16 = vadd.s32 %v5357_v42, %v5353_v58  ;;  %v5526_v58 = vld [vmem:[#allocation7 + $0x188] sm:$0xff] }
 0x4d8   :  { %v14897_v8 = vsel %vm14784_vm7, %v17690_v57, %v4931_v51  ;;  %v5023_v62 = vshll.u32 %v14651_v14, %v14845_v54  ;;  %v14904_v22 = vsel %vm4952_vm10, %v5036_v27, %v14609_v63  ;;  %v5257_v28 = vshll.u32 %v14870_v38, 30 }
 0x4d9   :  { %17701 = vst [vmem:[#allocation29_spill] sm:$0xff] %v14890_v10  ;;  %v5024_v32 = vshrl.u32 %v5006_v4, %v5022_v29  ;;  %v5028_v50 = vshll.u32 %v5027_v48, 23  ;;  %v17325_v25 = vand.u32 2147483647, %v14666_v45  ;;  %v5545_v31 = vand.u32 2139095040, %v14876_v2 }
 0x4da   :  { %v14909_v43 = vsel %vm7536_vm1, 0, %v7535_v39  ;;  %v14911_v49 = vshrl.u32 %v5414_v18, 5  ;;  %v5428_v35 = vshll.u32 %v17656_v40, %v5416_v30  ;;  %v5429_v14 = vshrl.u32 %v17657_v41, %v14885_v61 }
 0x4db   :  { %v5359_v63 = vadd.s32 536870912, %v14892_v16  ;;  %v5431_v54 = vshll.u32 %v17657_v41, %v5416_v30  ;;  %v5432_v15 = vshrl.u32 %v17658_v60, %v14885_v61  ;;  %v5546_v55 = vshrl.u32 %v5545_v31, 23 }
 0x4dc   :  { %v14921_v5 = vsub.s32 %v14832_v17, %v5257_v28  ;;  %v5419_v59 = vshll.u32 %v17401_v1, %v5416_v30  ;;  %v5422_v18 = vshll.u32 %v17659_v44, %v5416_v30  ;;  %v5425_v20 = vshll.u32 %v17686_v34, %v5416_v30 }
 0x4dd   :  { %v17702_v12 = vand.u32 2147483647, %v17700_v56  ;;  %v5420_v4 = vshrl.u32 %v17659_v44, %v14885_v61  ;;  %v5423_v39 = vshrl.u32 %v17686_v34, %v14885_v61  ;;  %v5426_v17 = vshrl.u32 %v17656_v40, %v14885_v61 }
 0x4de   :  { %v7550_v52 = vadd.s32 4294967169, %v5546_v55  ;;  %v5025_v23 = vor.u32 %v5024_v32, %v5023_v62  ;;  %v5029_v27 = vor.u32 4788187, %v5028_v50  ;;  %v5409_v30 = vand.u32 8388607, %v17325_v25 }
 0x4df   :  { %vm14928_vm3 = vcmp.le.f32.partialorder %v17702_v12, 0.7853982  ;;  %v5430_v42 = vor.u32 %v5429_v14, %v5428_v35  ;;  %v14940_v51 = vshrl.u32 %v5359_v63, 30  ;;  %v5433_v29 = vor.u32 %v5432_v15, %v5431_v54 }
 0x4e0   :  { %vm5437_vm8 = vcmp.lt.s32.totalorder %v14911_v49, 4  ;;  %v5552_v48 = vadd.s32 1, %v7550_v52  ;;  %v5146_v28 = vadd.s32 %v14544_v3, %v14554_v21  ;;  %v5166_v31 = vsub.s32 4294967266, %v14909_v43  ;;  %v5535_v3 = vld [vmem:[#allocation8 + $0x188] sm:$0xff] }
 0x4e1   :  { %v5260_v12 = vsub.s32 0, %v14921_v5  ;;  %v5530_v62 = vmul.f32 %v14847_v36, %v5526_v58  ;;  %v5421_v32 = vor.u32 %v5420_v4, %v5419_v59  ;;  %v5424_v50 = vor.u32 %v5423_v39, %v5422_v18 }
 0x4e2   :  { %v5427_v55 = vor.u32 %v5426_v17, %v5425_v20  ;;  %vm5553_vm2 = vcmp.gt.s32.totalorder %v5552_v48, 0  ;;  %v5162_v35 = vsub.s32 32, %v14909_v43  ;;  %vm5434_vm11 = vcmp.lt.s32.totalorder %v14911_v49, 1 }
 0x4e3   :  { %vm5436_vm7 = vcmp.lt.s32.totalorder %v14911_v49, 3  ;;  %v5443_v14 = vsel %vm5437_vm8, %v5430_v42, 920167782  ;;  %v5361_v21 = vshll.u32 %v14940_v51, 30  ;;  %v5410_v63 = vor.u32 8388608, %v5409_v30 }
 0x4e4   :  { %v5447_v54 = vsel %vm5437_vm8, %v5433_v29, 1326507024  ;;  %v5554_v15 = vsel %vm5553_vm2, %v5552_v48, 0  ;;  %v5030_v59 = vand.u32 2147483647, %v5029_v27  ;;  %v5032_v18 = vcvt.s32.f32 %v5025_v23 }
 0x4e5   :  { %v5167_v20 = vadd.s32 127, %v5166_v31  ;;  %v7538_v4 = vmin.u32 %v5260_v12, %v14921_v5  ;;  %vm5435_vm12 = vcmp.lt.s32.totalorder %v14911_v49, 2  ;;  %v5442_v39 = vsel %vm5434_vm11, %v5421_v32, %v5424_v50 }
 0x4e6   :  { %v5444_v17 = vsel %vm5436_vm7, %v5427_v55, %v5443_v14  ;;  %v14962_v58 = vadd.f32 %v5535_v3, %v5530_v62  ;;  %v5039_v52 = vsel %vm14928_vm3, 0, %v14904_v22  ;;  %v5446_v23 = vsel %vm5434_vm11, %v5424_v50, %v5427_v55 }
 0x4e7   :  { %v5448_v27 = vsel %vm5436_vm7, %v5430_v42, %v5447_v54  ;;  %v5556_v30 = vand.u32 31, %v5554_v15  ;;  %v5163_v29 = vshll.u32 %v14766_v19, %v14909_v43  ;;  %v5164_v48 = vshrl.u32 %v5146_v28, %v5162_v35 }
 0x4e8   :  { %17705 = vst [vmem:[#allocation23_spill] sm:$0xff] %v14962_v58  ;;  %v14974_v31 = vsub.s32 %v14892_v16, %v5361_v21  ;;  %v14976_v12 = vshll.u32 %v5410_v63, 8  ;;  %8055 = vcosq.f32 %v14897_v8  ;;  %v14979_v62 = vmul.f32 %v5032_v18, %v5030_v59 }
 0x4e9   :  { %v5262_v22 = vclz %v7538_v4  ;;  %v5445_v14 = vsel %vm5435_vm12, %v5442_v39, %v5444_v17  ;;  %v5168_v3 = vshll.u32 %v5167_v20, 23  ;;  %v5418_v42 = vshrl.u32 %v17401_v1, %v14885_v61 }
 0x4ea   :  { %v5449_v19 = vsel %vm5435_vm12, %v5446_v23, %v5448_v27  ;;  %v5649_v16 = vand.u32 2139095040, %v14962_v58  ;;  %8057 = vsinq.f32 %v14897_v8  ;;  %v14989_v43 = vadd.s32 3, %v5039_v52 }
 0x4eb   :  { %v5439_v28 = vsel %vm5437_vm8, %v5427_v55, 2102212464  ;;  %v14993_v35 = vsub.s32 32, %v5556_v30  ;;  %v5165_v21 = vor.u32 %v5164_v48, %v5163_v29  ;;  %v5364_v63 = vsub.s32 0, %v14974_v31 }
 0x4ec   :  { %v14997_v54 = vmul.u32.u64.low %v14976_v12, %v5445_v14  ;;  %v14998_v61 = vmul.u32.u64.high %v14976_v12, %v5445_v14, %v14997_v54  ;;  %v7539_v18 = vadd.s32 4294967294, %v5262_v22  ;;  %v5169_v4 = vor.u32 4788187, %v5168_v3 }
 0x4ed   :  { %v15003_v8 = vmul.u32.u64.low %v14976_v12, %v5449_v19  ;;  %v15004_v20 = vmul.u32.u64.high %v14976_v12, %v5449_v19, %v15003_v8  ;;  %v5438_v55 = vsel %vm5434_vm11, %v5418_v42, %v5421_v32  ;;  %v5440_v39 = vsel %vm5436_vm7, %v5424_v50, %v5439_v28 }
 0x4ee   :  { %v5650_v17 = vshrl.u32 %v5649_v16, 23  ;;  %v5568_v52 = vshll.u32 %v17656_v40, %v5556_v30  ;;  %v5569_v23 = vshrl.u32 %v17657_v41, %v14993_v35  ;;  %v5571_v27 = vshll.u32 %v17657_v41, %v5556_v30 }
 0x4ef   :  { %v5572_v29 = vshrl.u32 %v17658_v60, %v14993_v35  ;;  %vm4834_vm6 = vweird.f32 %v13764_v0  ;;  %v5172_v48 = vcvt.s32.f32 %v5165_v21  ;;  %v7542_v22 = vmin.u32 %v5364_v63, %v14974_v31  ;;  %v5536_v0 = vld [vmem:[#allocation8 + $0x190] sm:$0xff] }
 0x4f0   :  { %v17326_v32 = vand.u32 2147483647, %v14876_v2  ;;  %v15019_v14 = vshrl.u32 %v5554_v15, 5  ;;  %vm7540_vm13 = vcmp.lt.s32.totalorder %v7539_v18, 0  ;;  %v5441_v50 = vsel %vm5435_vm12, %v5438_v55, %v5440_v39 }
 0x4f1   :  { %v5559_v3 = vshll.u32 %v17401_v1, %v5556_v30  ;;  %v5562_v42 = vshll.u32 %v17659_v44, %v5556_v30  ;;  %v5560_v19 = vshrl.u32 %v17659_v44, %v14993_v35  ;;  %v5563_v16 = vshrl.u32 %v17686_v34, %v14993_v35 }
 0x4f2   :  { %v5565_v28 = vshll.u32 %v17686_v34, %v5556_v30  ;;  %v5566_v15 = vshrl.u32 %v17656_v40, %v14993_v35  ;;  %v5170_v21 = vand.u32 2147483647, %v5169_v4  ;;  %v5570_v63 = vor.u32 %v5569_v23, %v5568_v52  ;;  %v5527_v52 = vld [vmem:[#allocation7 + $0x190] sm:$0xff] }
 0x4f3   :  { %v5573_v8 = vor.u32 %v5572_v29, %v5571_v27  ;;  %v7554_v49 = vadd.s32 4294967169, %v5650_v17  ;;  %v5366_v55 = vclz %v7542_v22  ;;  %v5460_v39 = vadd.s32 1, %v14998_v61 }
 0x4f4   :  { %v5549_v25 = vand.u32 8388607, %v17326_v32  ;;  %vm5577_vm15 = vcmp.lt.s32.totalorder %v15019_v14, 4  ;;  %vm5092_vm0 = vcmp.lt.s32.totalorder %v14285_v37, 0  ;;  %v5176_v59 = vsub.s32 4, %v14690_v26 }
 0x4f5   :  { %v15039_v30 = vsel %vm7540_vm13, 0, %v7539_v18  ;;  %v5457_v4 = vmul.u32 %v14976_v12, %v5441_v50  ;;  %vm5459_vm14 = vc.u32 %v15004_v20, %v14997_v54  ;;  %v15044_v17 = vpop.eup %8055  ;;  %v5561_v23 = vor.u32 %v5560_v19, %v5559_v3 }
 0x4f6   :  { %v5564_v27 = vor.u32 %v5563_v16, %v5562_v42  ;;  %v5567_v29 = vor.u32 %v5566_v15, %v5565_v28  ;;  %vm5574_vm4 = vcmp.lt.s32.totalorder %v15019_v14, 1  ;;  %vm5576_vm5 = vcmp.lt.s32.totalorder %v15019_v14, 3 }
 0x4f7   :  { %v5583_v22 = vsel %vm5577_vm15, %v5570_v63, 920167782  ;;  %v5587_v18 = vsel %vm5577_vm15, %v5573_v8, 1326507024  ;;  %v5656_v12 = vadd.s32 1, %v7554_v49  ;;  %v15052_v50 = vpop.eup %8057  ;;  %v5173_v32 = vmul.f32 %v5172_v48, %v5170_v21 }
 0x4f8   :  { %v7543_v7 = vadd.s32 4294967294, %v5366_v55  ;;  %v5461_v2 = vsel %vm5459_vm14, %v5460_v39, %v14998_v61  ;;  %v5550_v3 = vor.u32 8388608, %v5549_v25  ;;  %v5270_v42 = vsub.s32 4294967266, %v15039_v30 }
 0x4f9   :  { %v5531_v19 = vmul.f32 %v14847_v36, %v5527_v52  ;;  %vm5575_vm9 = vcmp.lt.s32.totalorder %v15019_v14, 2  ;;  %vm5657_vm1 = vcmp.gt.s32.totalorder %v5656_v12, 0  ;;  %v5582_v16 = vsel %vm5574_vm4, %v5561_v23, %v5564_v27 }
 0x4fa   :  { %v5584_v28 = vsel %vm5576_vm5, %v5567_v29, %v5583_v22  ;;  %v5586_v48 = vsel %vm5574_vm4, %v5564_v27, %v5567_v29  ;;  %v5588_v61 = vsel %vm5576_vm5, %v5570_v63, %v5587_v18  ;;  %v15069_v25 = vsel %vm4834_vm6, nan, %v14888_v53 }
 0x4fb   :  { %v17706_v15 = vxor.u32 2147483648, %v14979_v62  ;;  %v15077_v8 = vand.u32 3, %v14989_v43  ;;  %v17707_v49 = vand.u32 2147483647, %v14285_v37  ;;  %v15085_v63 = vadd.s32 %v5461_v2, %v5457_v4 }
 0x4fc   :  { %v5250_v53 = vadd.s32 %v14722_v33, %v14719_v6  ;;  %vm7544_vm2 = vcmp.lt.s32.totalorder %v7543_v7, 0  ;;  %v15089_v39 = vshll.u32 %v5550_v3, 8  ;;  %v5658_v52 = vsel %vm5657_vm1, %v5656_v12, 0 }
 0x4fd   :  { %v5035_v21 = vsel %vm4952_vm10, %v17706_v15, %v14979_v62  ;;  %vm15081_vm8 = vcmp.le.f32.partialorder %v17707_v49, 0.7853982  ;;  %v5266_v62 = vsub.s32 32, %v15039_v30  ;;  %v5271_v43 = vadd.s32 127, %v5270_v42 }
 0x4fe   :  { %v5585_v22 = vsel %vm5575_vm9, %v5582_v16, %v5584_v28  ;;  %v5589_v18 = vsel %vm5575_vm9, %v5586_v48, %v5588_v61  ;;  %v5038_v2 = vsel %vm14928_vm3, %v17700_v56, %v5035_v21  ;;  %v5174_v4 = vxor.u32 2147483648, %v5173_v32 }
 0x4ff   :  { %v15102_v6 = vsel %vm5092_vm0, %v5176_v59, %v14690_v26  ;;  %v15104_v33 = vadd.f32 %v5536_v0, %v5531_v19  ;;  %v15106_v12 = vsel %vm7544_vm2, 0, %v7543_v7  ;;  %v5463_v3 = vadd.s32 536870912, %v15085_v63 }
 0x500   :  { %v5558_v42 = vshrl.u32 %v17401_v1, %v14993_v35  ;;  %v5660_v16 = vand.u32 31, %v5658_v52  ;;  %v15112_v28 = vmul.u32.u64.low %v15089_v39, %v5589_v18  ;;  %v15113_v13 = vmul.u32.u64.high %v15089_v39, %v5589_v18, %v15112_v28 }
 0x501   :  { %17710 = vst [vmem:[#allocation28_spill] sm:$0xff] %v15104_v33  ;;  %v15116_v48 = vmul.u32.u64.low %v15089_v39, %v5585_v22  ;;  %v15117_v61 = vmul.u32.u64.high %v15089_v39, %v5585_v22, %v15116_v48  ;;  %v5267_v26 = vshll.u32 %v14921_v5, %v15039_v30  ;;  %v5268_v7 = vshrl.u32 %v5250_v53, %v5266_v62 }
 0x502   :  { %v5272_v59 = vshll.u32 %v5271_v43, 23  ;;  %v5579_v19 = vsel %vm5577_vm15, %v5567_v29, 2102212464  ;;  %8059 = vcosq.f32 %v5038_v2  ;;  %v5374_v15 = vsub.s32 4294967266, %v15106_v12 }
 0x503   :  { %v5753_v21 = vand.u32 2139095040, %v15104_v33  ;;  %8061 = vsinq.f32 %v5038_v2  ;;  %v15128_v0 = vshrl.u32 %v5463_v3, 30  ;;  %v15130_v22 = vsub.s32 32, %v5660_v16 }
 0x504   :  { %v5179_v5 = vsel %vm15081_vm8, 0, %v15102_v6  ;;  %v5578_v29 = vsel %vm5574_vm4, %v5558_v42, %v5561_v23  ;;  %v5580_v53 = vsel %vm5576_vm5, %v5564_v27, %v5579_v19  ;;  %v5175_v62 = vsel %vm5092_vm0, %v5174_v4, %v5173_v32 }
 0x505   :  { %17711 = vst [vmem:[#allocation20_spill] sm:$0xff] %v15128_v0  ;;  %v5269_v43 = vor.u32 %v5268_v7, %v5267_v26  ;;  %v5273_v18 = vor.u32 4788187, %v5272_v59  ;;  %v5354_v2 = vadd.s32 %v14797_v24, %v14806_v47  ;;  %v5370_v3 = vsub.s32 32, %v15106_v12 }
 0x506   :  { %v5375_v28 = vadd.s32 127, %v5374_v15  ;;  %v5754_v49 = vshrl.u32 %v5753_v21, 23  ;;  %v5465_v35 = vshll.u32 %v15128_v0, 30  ;;  %v5581_v23 = vsel %vm5575_vm9, %v5578_v29, %v5580_v53 }
 0x507   :  { %v5672_v27 = vshll.u32 %v17656_v40, %v5660_v16  ;;  %v5673_v32 = vshrl.u32 %v17657_v41, %v15130_v22  ;;  %vm5599_vm10 = vc.u32 %v15113_v13, %v15116_v48  ;;  %v5600_v24 = vadd.s32 1, %v15117_v61 }
 0x508   :  { %v15155_v47 = vshrl.u32 %v5658_v52, 5  ;;  %v5663_v4 = vshll.u32 %v17401_v1, %v5660_v16  ;;  %v5666_v42 = vshll.u32 %v17659_v44, %v5660_v16  ;;  %v5669_v26 = vshll.u32 %v17686_v34, %v5660_v16 }
 0x509   :  { %v5675_v14 = vshll.u32 %v17657_v41, %v5660_v16  ;;  %v5676_v7 = vshrl.u32 %v17658_v60, %v15130_v22  ;;  %vm5196_vm3 = vcmp.lt.s32.totalorder %v14405_v11, 0  ;;  %v5664_v59 = vshrl.u32 %v17659_v44, %v15130_v22 }
 0x50a   :  { %v5667_v52 = vshrl.u32 %v17686_v34, %v15130_v22  ;;  %v5670_v19 = vshrl.u32 %v17656_v40, %v15130_v22  ;;  %v7558_v15 = vadd.s32 4294967169, %v5754_v49  ;;  %v5274_v21 = vand.u32 2147483647, %v5273_v18 }
 0x50b   :  { %v5276_v29 = vcvt.s32.f32 %v5269_v43  ;;  %v5597_v53 = vmul.u32 %v15089_v39, %v5581_v23  ;;  %v5674_v16 = vor.u32 %v5673_v32, %v5672_v27  ;;  %v5371_v30 = vshll.u32 %v14974_v31, %v15106_v12 }
 0x50c   :  { %v5601_v6 = vsel %vm5599_vm10, %v5600_v24, %v15117_v61  ;;  %v17712_v45 = vand.u32 2147483647, %v14962_v58  ;;  %vm5681_vm11 = vcmp.lt.s32.totalorder %v15155_v47, 4  ;;  %v5372_v10 = vshrl.u32 %v5354_v2, %v5370_v3 }
 0x50d   :  { %v5376_v49 = vshll.u32 %v5375_v28, 23  ;;  %v15181_v43 = vsub.s32 %v15085_v63, %v5465_v35  ;;  %v5677_v39 = vor.u32 %v5676_v7, %v5675_v14  ;;  %v15183_v18 = vor.u32 %v5664_v59, %v5663_v4 }
 0x50e   :  { %v5653_v0 = vand.u32 8388607, %v17712_v45  ;;  %v15185_v23 = vor.u32 %v5667_v52, %v5666_v42  ;;  %v5671_v31 = vor.u32 %v5670_v19, %v5669_v26  ;;  %v5760_v12 = vadd.s32 1, %v7558_v15  ;;  %v5528_v42 = vld [vmem:[#allocation7 + $0x198] sm:$0xff] }
 0x50f   :  { %v15187_v27 = vpop.eup %8059  ;;  %v15189_v61 = vadd.s32 %v5601_v6, %v5597_v53  ;;  %vm5678_vm7 = vcmp.lt.s32.totalorder %v15155_v47, 1  ;;  %vm5680_vm12 = vcmp.lt.s32.totalorder %v15155_v47, 3  ;;  %v5687_v45 = vsel %vm5681_vm11, %v5674_v16, 920167782 }
 0x510   :  { %v15195_v63 = vpop.eup %8061  ;;  %v5178_v35 = vsel %vm15081_vm8, %v14285_v37, %v5175_v62  ;;  %v15200_v2 = vadd.s32 3, %v5179_v5  ;;  %v5277_v3 = vmul.f32 %v5276_v29, %v5274_v21  ;;  %v5654_v28 = vor.u32 8388608, %v5653_v0 }
 0x511   :  { %v5373_v32 = vor.u32 %v5372_v10, %v5371_v30  ;;  %v5377_v6 = vor.u32 4788187, %v5376_v49  ;;  %v5468_v24 = vsub.s32 0, %v15181_v43  ;;  %v5691_v4 = vsel %vm5681_vm11, %v5677_v39, 1326507024 }
 0x512   :  { %vm5679_vm6 = vcmp.lt.s32.totalorder %v15155_v47, 2  ;;  %v5686_v55 = vsel %vm5678_vm7, %v15183_v18, %v15185_v23  ;;  %v5688_v5 = vsel %vm5680_vm12, %v5671_v31, %v5687_v45  ;;  %vm5761_vm13 = vcmp.gt.s32.totalorder %v5760_v12, 0 }
 0x513   :  { %8063 = vcosq.f32 %v5178_v35  ;;  %v17713_v10 = vsub.s32 4, %v14870_v38  ;;  %v5603_v30 = vadd.s32 536870912, %v15189_v61  ;;  %v5762_v62 = vsel %vm5761_vm13, %v5760_v12, 0 }
 0x514   :  { %8065 = vsinq.f32 %v5178_v35  ;;  %v5690_v26 = vsel %vm5678_vm7, %v15185_v23, %v5671_v31  ;;  %v5692_v14 = vsel %vm5680_vm12, %v5674_v16, %v5691_v4  ;;  %v15225_v7 = vshll.u32 %v5654_v28, 8 }
 0x515   :  { %v15217_v0 = vsel %vm5196_vm3, %v17713_v10, %v14870_v38  ;;  %v17714_v59 = vand.u32 2147483647, %v14405_v11  ;;  %v5278_v38 = vxor.u32 2147483648, %v5277_v3  ;;  %v5532_v19 = vmul.f32 %v14847_v36, %v5528_v42 }
 0x516   :  { %v5689_v15 = vsel %vm5679_vm6, %v5686_v55, %v5688_v5  ;;  %v5764_v21 = vand.u32 31, %v5762_v62  ;;  %v5378_v29 = vand.u32 2147483647, %v5377_v6  ;;  %v5380_v53 = vcvt.s32.f32 %v5373_v32 }
 0x517   :  { %vm15229_vm15 = vcmp.le.f32.partialorder %v17714_v59, 0.7853982  ;;  %v7546_v49 = vmin.u32 %v5468_v24, %v15181_v43  ;;  %v17335_v16 = vand.u32 2147483647, %v15104_v33  ;;  %v15238_v39 = vshrl.u32 %v5603_v30, 30  ;;  %v5537_v30 = vld [vmem:[#allocation8 + $0x198] sm:$0xff] }
 0x518   :  { %v5662_v12 = vshrl.u32 %v17401_v1, %v15130_v22  ;;  %v5693_v45 = vsel %vm5679_vm6, %v5690_v26, %v5692_v14  ;;  %v15244_v35 = vsub.s32 32, %v5764_v21  ;;  %v5683_v36 = vsel %vm5681_vm11, %v5671_v31, 2102212464 }
 0x519   :  { %v15249_v28 = vmul.u32.u64.low %v15225_v7, %v5689_v15  ;;  %v15250_v32 = vmul.u32.u64.high %v15225_v7, %v5689_v15, %v15249_v28  ;;  %v5767_v6 = vshll.u32 %v17401_v1, %v5764_v21  ;;  %v5770_v22 = vshll.u32 %v17659_v44, %v5764_v21 }
 0x51a   :  { %v5768_v24 = vshrl.u32 %v17659_v44, %v15244_v35  ;;  %v5771_v4 = vshrl.u32 %v17686_v34, %v15244_v35  ;;  %v5776_v42 = vshll.u32 %v17656_v40, %v5764_v21  ;;  %v15264_v5 = vshrl.u32 %v5762_v62, 5 }
 0x51b   :  { %v15261_v55 = vmul.u32.u64.low %v15225_v7, %v5693_v45  ;;  %v15262_v31 = vmul.u32.u64.high %v15225_v7, %v5693_v45, %v15261_v55  ;;  %v5777_v10 = vshrl.u32 %v17657_v41, %v15244_v35  ;;  %v5757_v26 = vand.u32 8388607, %v17335_v16 }
 0x51c   :  { %v5773_v14 = vshll.u32 %v17686_v34, %v5764_v21  ;;  %v5774_v59 = vshrl.u32 %v17656_v40, %v15244_v35  ;;  %v5779_v15 = vshll.u32 %v17657_v41, %v5764_v21  ;;  %v5279_v45 = vsel %vm5196_vm3, %v5278_v38, %v5277_v3  ;;  %v17717_v55 = vld [vmem:[#allocation19_spill] sm:$0xff] }
 0x51d   :  { %vm5300_vm0 = vcmp.lt.s32.totalorder %v17717_v55, 0  ;;  %v5381_v62 = vmul.f32 %v5380_v53, %v5378_v29  ;;  %v5682_v58 = vsel %vm5678_vm7, %v5662_v12, %v15183_v18  ;;  %v5684_v16 = vsel %vm5680_vm12, %v15185_v23, %v5683_v36 }
 0x51e   :  { %v15283_v33 = vor.u32 %v5768_v24, %v5767_v6  ;;  %v15285_v34 = vor.u32 %v5771_v4, %v5770_v22  ;;  %v5778_v44 = vor.u32 %v5777_v10, %v5776_v42  ;;  %v5780_v21 = vshrl.u32 %v17658_v60, %v15244_v35 }
 0x51f   :  { %vm4945_vm14 = vcmp.eq.s32.totalorder %v14882_v46, 2  ;;  %v5470_v3 = vclz %v7546_v49  ;;  %v15290_v38 = vadd.f32 %v5537_v30, %v5532_v19  ;;  %v5605_v29 = vshll.u32 %v15238_v39, 30 }
 0x520   :  { %vm5782_vm4 = vcmp.lt.s32.totalorder %v15264_v5, 1  ;;  %vm4942_vm5 = vcmp.eq.s32.totalorder %v14882_v46, 0  ;;  %v5758_v18 = vor.u32 8388608, %v5757_v26  ;;  %v5775_v23 = vor.u32 %v5774_v59, %v5773_v14  ;;  %v15296_v12 = vpop.eup %8063 }
 0x521   :  { %17718 = vst [vmem:[#allocation27_spill] sm:$0xff] %v15290_v38  ;;  %v5781_v53 = vor.u32 %v5780_v21, %v5779_v15  ;;  %vm5785_vm9 = vcmp.lt.s32.totalorder %v15264_v5, 4  ;;  %v5282_v36 = vsel %vm15229_vm15, %v14405_v11, %v5279_v45  ;;  %v5382_v49 = vxor.u32 2147483648, %v5381_v62  ;;  %v15304_v6 = vpop.eup %8065 }
 0x522   :  { %v5685_v19 = vsel %vm5679_vm6, %v5682_v58, %v5684_v16  ;;  %vm5784_vm1 = vcmp.lt.s32.totalorder %v15264_v5, 3  ;;  %v5704_v24 = vadd.s32 1, %v15250_v32  ;;  %vm5783_vm8 = vcmp.lt.s32.totalorder %v15264_v5, 2 }
 0x523   :  { %v5790_v22 = vsel %vm5782_vm4, %v15283_v33, %v15285_v34  ;;  %v5791_v4 = vsel %vm5785_vm9, %v5778_v44, 920167782  ;;  %v7547_v42 = vadd.s32 4294967294, %v5470_v3  ;;  %v15315_v47 = vsub.s32 %v15189_v61, %v5605_v29 }
 0x524   :  { %vm5703_vm2 = vc.u32 %v15262_v31, %v15249_v28  ;;  %v5857_v58 = vand.u32 2139095040, %v15290_v38  ;;  %v5792_v16 = vsel %vm5784_vm1, %v5775_v23, %v5791_v4  ;;  %v5794_v10 = vsel %vm5782_vm4, %v15285_v34, %v5775_v23 }
 0x525   :  { %v5795_v30 = vsel %vm5785_vm9, %v5781_v53, 1326507024  ;;  %v15327_v26 = vshll.u32 %v5758_v18, 8  ;;  %8067 = vcosq.f32 %v5282_v36  ;;  %v5701_v61 = vmul.u32 %v15225_v7, %v5685_v19 }
 0x526   :  { %v5793_v14 = vsel %vm5783_vm8, %v5790_v22, %v5792_v16  ;;  %v5796_v59 = vsel %vm5784_vm1, %v5778_v44, %v5795_v30  ;;  %8069 = vsinq.f32 %v5282_v36  ;;  %v17719_v15 = vand.u32 2147483647, %v17717_v55 }
 0x527   :  { %v5705_v21 = vsel %vm5703_vm2, %v5704_v24, %v15250_v32  ;;  %v5797_v3 = vsel %vm5783_vm8, %v5794_v10, %v5796_v59  ;;  %v15344_v7 = vand.u32 3, %v15200_v2  ;;  %v5283_v29 = vsel %vm15229_vm15, 0, %v15217_v0 }
 0x528   :  { %vm15336_vm10 = vcmp.le.f32.partialorder %v17719_v15, 0.7853982  ;;  %v5608_v44 = vsub.s32 0, %v15315_v47  ;;  %v5858_v18 = vshrl.u32 %v5857_v58, 23  ;;  %v5383_v53 = vsel %vm5300_vm0, %v5382_v49, %v5381_v62 }
 0x529   :  { %vm7548_vm3 = vcmp.lt.s32.totalorder %v7547_v42, 0  ;;  %v15353_v36 = vmul.u32.u64.low %v15327_v26, %v5793_v14  ;;  %v15354_v32 = vmul.u32.u64.high %v15327_v26, %v5793_v14, %v15353_v36  ;;  %vm4941_vm11 = vcmp.lt.s32.totalorder %v14882_v46, 2 }
 0x52a   :  { %v15358_v2 = vadd.s32 %v5705_v21, %v5701_v61  ;;  %v5766_v52 = vshrl.u32 %v17401_v1, %v15244_v35  ;;  %v15363_v0 = vmul.u32.u64.low %v15327_v26, %v5797_v3  ;;  %v15364_v19 = vmul.u32.u64.high %v15327_v26, %v5797_v3, %v15363_v0 }
 0x52b   :  { %v17722_v62 = vxor.u32 2147483648, %v15044_v17  ;;  %vm5046_vm7 = vcmp.eq.s32.totalorder %v15077_v8, 0  ;;  %vm5049_vm12 = vcmp.eq.s32.totalorder %v15077_v8, 2  ;;  %v5787_v24 = vsel %vm5785_vm9, %v5775_v23, 2102212464 }
 0x52c   :  { %v17723_v22 = vxor.u32 2147483648, %v15052_v50  ;;  %vm5185_vm6 = vcmp.lt.s32.totalorder %v15344_v7, 2  ;;  %v7551_v4 = vmin.u32 %v5608_v44, %v15315_v47  ;;  %v7562_v58 = vadd.s32 4294967169, %v5858_v18 }
 0x52d   :  { %v4947_v49 = vsel %vm4945_vm14, %v17722_v62, %v15052_v50  ;;  %vm5186_vm13 = vcmp.eq.s32.totalorder %v15344_v7, 0  ;;  %v5287_v16 = vadd.s32 3, %v5283_v29  ;;  %v5386_v10 = vsel %vm15336_vm10, %v17717_v55, %v5383_v53 }
 0x52e   :  { %v4944_v35 = vsel %vm4942_vm5, %v15044_v17, %v17723_v22  ;;  %v15387_v23 = vsel %vm7548_vm3, 0, %v7547_v42  ;;  %vm4938_vm15 = vweird.f32 %v17690_v57  ;;  %vm5045_vm14 = vcmp.lt.s32.totalorder %v15077_v8, 2 }
 0x52f   :  { %v5190_v17 = vxor.u32 2147483648, %v15296_v12  ;;  %v5707_v50 = vadd.s32 536870912, %v15358_v2  ;;  %v5786_v30 = vsel %vm5782_vm4, %v5766_v52, %v15283_v33  ;;  %v5788_v61 = vsel %vm5784_vm1, %v15285_v34, %v5787_v24 }
 0x530   :  { %v5050_v14 = vxor.u32 2147483648, %v15187_v27  ;;  %vm5182_vm5 = vweird.f32 %v14285_v37  ;;  %v5187_v42 = vxor.u32 2147483648, %v15304_v6  ;;  %vm5189_vm9 = vcmp.eq.s32.totalorder %v15344_v7, 2  ;;  %v15446_v7 = vld [vmem:[#allocation2 + $0xd] ss:$0 sm:$0xff] }
 0x531   :  { %v5384_v59 = vsub.s32 4, %v14940_v51  ;;  %8071 = vcosq.f32 %v5386_v10  ;;  %v5478_v15 = vsub.s32 4294967266, %v15387_v23  ;;  %v5610_v21 = vclz %v7551_v4 }
 0x532   :  { %v5864_v3 = vadd.s32 1, %v7562_v58  ;;  %v5047_v33 = vxor.u32 2147483648, %v15195_v63  ;;  %8073 = vsinq.f32 %v5386_v10  ;;  %v5789_v34 = vsel %vm5783_vm8, %v5786_v30, %v5788_v61  ;;  %v8068_v52 = vpop.eup %8067  ;;  %v5977_v30 = vld [vmem:[#allocation7 + $0x1a0] sm:$0xff] }
 0x533   :  { %v5808_v29 = vadd.s32 1, %v15354_v32  ;;  %v5191_v44 = vsel %vm5189_vm9, %v5190_v17, %v15304_v6  ;;  %v15410_v18 = vand.u32 3, %v5287_v16  ;;  %v15412_v53 = vshrl.u32 %v5707_v50, 30  ;;  %v8070_v24 = vpop.eup %8069 }
 0x534   :  { %vm5807_vm4 = vc.u32 %v15364_v19, %v15353_v36  ;;  %vm5042_vm1 = vweird.f32 %v17700_v56  ;;  %v5188_v0 = vsel %vm5186_vm13, %v15296_v12, %v5187_v42  ;;  %v5385_v5 = vsel %vm5300_vm0, %v5384_v59, %v14940_v51 }
 0x535   :  { %v5458_v6 = vadd.s32 %v14997_v54, %v15004_v20  ;;  %v5474_v62 = vsub.s32 32, %v15387_v23  ;;  %v5479_v22 = vadd.s32 127, %v5478_v15  ;;  %v7552_v4 = vadd.s32 4294967294, %v5610_v21  ;;  %v4617_v20 = vld [vmem:[#allocation5 + $0x148] sm:$0xff] }
 0x536   :  { %v5805_v58 = vmul.u32 %v15327_v26, %v5789_v34  ;;  %vm5865_vm8 = vcmp.gt.s32.totalorder %v5864_v3, 0  ;;  %v4948_v16 = vsel %vm4941_vm11, %v4944_v35, %v4947_v49  ;;  %v5048_v12 = vsel %vm5046_vm7, %v15187_v27, %v5047_v33 }
 0x537   :  { %v5051_v51 = vsel %vm5049_vm12, %v5050_v14, %v15195_v63  ;;  %v5809_v54 = vsel %vm5807_vm4, %v5808_v29, %v15354_v32  ;;  %v5192_v10 = vsel %vm5185_vm6, %v5188_v0, %v5191_v44  ;;  %vm5293_vm0 = vcmp.eq.s32.totalorder %v15410_v18, 2  ;;  %v5986_v44 = vld [vmem:[#allocation8 + $0x1a0] sm:$0xff] }
 0x538   :  { %v5387_v46 = vsel %vm15336_vm10, 0, %v5385_v5  ;;  %v5709_v26 = vshll.u32 %v15412_v53, 30  ;;  %v5291_v49 = vxor.u32 2147483648, %v8070_v24  ;;  %v5294_v35 = vxor.u32 2147483648, %v8068_v52 }
 0x539   :  { %v5475_v27 = vshll.u32 %v15181_v43, %v15387_v23  ;;  %v5866_v17 = vsel %vm5865_vm8, %v5864_v3, 0  ;;  %v5476_v63 = vshrl.u32 %v5458_v6, %v5474_v62  ;;  %v5480_v50 = vshll.u32 %v5479_v22, 23  ;;  %v4167_v43 = vld [vmem:[#allocation5 + $0x138] sm:$0xff]  ;;  %v4618_v23 = vld [vmem:[#allocation5 + $0x150] sm:$0xff]  ;;  %v5068_v3 = vld [vmem:[#allocation5 + $0x160] sm:$0xff] }
 0x53a   :  { %vm7553_vm2 = vcmp.lt.s32.totalorder %v7552_v4, 0  ;;  %v15444_v32 = vadd.s32 %v5809_v54, %v5805_v58  ;;  %v4949_v45 = vsel %vm4938_vm15, nan, %v4948_v16  ;;  %v5052_v61 = vsel %vm5045_vm14, %v5048_v12, %v5051_v51  ;;  %v17724_v6 = vld [vmem:[#allocation24_spill] sm:$0xff]  ;;  %v17725_v62 = vld [vmem:[#allocation29_spill] sm:$0xff]  ;;  %v17727_v22 = vld [vmem:[#allocation22_spill] sm:$0xff] }
 0x53b   :  { %v5055_v14 = vmul.f32 %v15069_v25, %v4617_v20  ;;  %vm5290_vm10 = vcmp.eq.s32.totalorder %v15410_v18, 0  ;;  %v5193_v42 = vsel %vm5182_vm5, nan, %v5192_v10  ;;  %vm5289_vm3 = vcmp.lt.s32.totalorder %v15410_v18, 2 }
 0x53c   :  { %v15458_v59 = vsub.s32 %v15358_v2, %v5709_v26  ;;  %v5868_v15 = vand.u32 31, %v5866_v17  ;;  %v5295_v57 = vsel %vm5293_vm0, %v5294_v35, %v8070_v24  ;;  %v5391_v8 = vadd.s32 3, %v5387_v46  ;;  %v17731_v26 = vld [vmem:[#allocation20_spill] sm:$0xff] }
 0x53d   :  { %v15463_v21 = vsel %vm7553_vm2, 0, %v7552_v4  ;;  %v5981_v25 = vmul.f32 %v15446_v7, %v5977_v30  ;;  %v5292_v33 = vsel %vm5290_vm10, %v8068_v52, %v5291_v49  ;;  %v5477_v34 = vor.u32 %v5476_v63, %v5475_v27 }
 0x53e   :  { %v5481_v37 = vor.u32 4788187, %v5480_v50  ;;  %v5811_v29 = vadd.s32 536870912, %v15444_v32  ;;  %v15467_v0 = vpop.eup %8071  ;;  %v15470_v2 = vmul.f32 %v14880_v9, %v4167_v43  ;;  %v15472_v5 = vmul.f32 %v4949_v45, %v4618_v23 }
 0x53f   :  { %v15476_v24 = vadd.f32 %v17725_v62, %v17724_v6  ;;  %v15479_v4 = vadd.f32 %v5055_v14, %v17727_v22  ;;  %v15481_v52 = vpop.eup %8073  ;;  %v15485_v58 = vsel %vm5042_vm1, nan, %v5052_v61  ;;  %v5618_v16 = vsub.s32 4294967266, %v15463_v21 }
 0x540   :  { %v5712_v9 = vsub.s32 0, %v15458_v59  ;;  %v15489_v12 = vsub.s32 32, %v5868_v15  ;;  %v15493_v51 = vsel %vm5289_vm3, %v5292_v33, %v5295_v57  ;;  %v15495_v54 = vand.u32 3, %v5391_v8 }
 0x541   :  { %17726 = vst [vmem:[#allocation21_spill] sm:$0xff] %v15476_v24  ;;  %17728 = vst [vmem:[#allocation16_spill] sm:$0xff] %v15479_v4  ;;  %v15497_v20 = vmul.f32 %v5193_v42, %v5068_v3  ;;  %v15499_v10 = vadd.f32 %v5986_v44, %v5981_v25  ;;  %v5482_v46 = vand.u32 2147483647, %v5481_v37  ;;  %v5484_v56 = vcvt.s32.f32 %v5477_v34  ;;  %v17736_v24 = vld [vmem:[#allocation18_spill] sm:$0xff] }
 0x542   :  { %v15502_v35 = vshrl.u32 %v5811_v29, 30  ;;  %v5398_v63 = vxor.u32 2147483648, %v15467_v0  ;;  %v5598_v18 = vadd.s32 %v15116_v48, %v15113_v13  ;;  %v17343_v50 = vand.u32 2147483647, %v15290_v38  ;;  %v5978_v29 = vld [vmem:[#allocation7 + $0x1a8] sm:$0xff] }
 0x543   :  { %17729 = vst [vmem:[#allocation19_spill] sm:$0xff] %v15497_v20  ;;  %17730 = vst [vmem:[#allocation24_spill] sm:$0xff] %v15499_v10  ;;  %v5619_v30 = vadd.s32 127, %v5618_v16  ;;  %v7555_v45 = vmin.u32 %v5712_v9, %v15458_v59  ;;  %v5880_v61 = vshll.u32 %v17656_v40, %v5868_v15  ;;  %v5881_v14 = vshrl.u32 %v17657_v41, %v15489_v12 }
 0x544   :  { %17732 = vst [vmem:[#allocation29_spill] sm:$0xff] %v15502_v35  ;;  %vm5397_vm11 = vcmp.eq.s32.totalorder %v15495_v54, 2  ;;  %v15514_v43 = vshrl.u32 %v5866_v17, 5  ;;  %v5871_v23 = vshll.u32 %v17401_v1, %v5868_v15  ;;  %v17733_v42 = vmov 2475754826  }
 0x545   :  { %v5874_v57 = vshll.u32 %v17733_v42, %v5868_v15  ;;  %v5997_v13 = vand.u32 2139095040, %v15499_v10  ;;  %v5813_v48 = vshll.u32 %v15502_v35, 30  ;;  %v17734_v8 = vmov 2131351028  }
 0x546   :  { %v5877_v25 = vshll.u32 %v17734_v8, %v5868_v15  ;;  %v5883_v3 = vshll.u32 %v17657_v41, %v5868_v15  ;;  %v5884_v33 = vshrl.u32 %v17658_v60, %v15489_v12  ;;  %v5872_v34 = vshrl.u32 %v17733_v42, %v15489_v12 }
 0x547   :  { %v5875_v17 = vshrl.u32 %v17734_v8, %v15489_v12  ;;  %v5878_v37 = vshrl.u32 %v17656_v40, %v15489_v12  ;;  %v5998_v44 = vshrl.u32 %v5997_v13, 23  ;;  %v15530_v6 = vmul.f32 %v5484_v56, %v5482_v46 }
 0x548   :  { %v5614_v62 = vsub.s32 32, %v15463_v21  ;;  %v5620_v22 = vshll.u32 %v5619_v30, 23  ;;  %v5882_v15 = vor.u32 %v5881_v14, %v5880_v61  ;;  %v5714_v16 = vclz %v7555_v45  ;;  %v5987_v61 = vld [vmem:[#allocation8 + $0x1a8] sm:$0xff] }
 0x549   :  { %v5861_v9 = vand.u32 8388607, %v17343_v50  ;;  %vm5889_vm7 = vcmp.lt.s32.totalorder %v15514_v43, 4  ;;  %v7567_v49 = vadd.s32 4294967169, %v5998_v44  ;;  %v5615_v27 = vshll.u32 %v15315_v47, %v15463_v21 }
 0x54a   :  { %v15539_v35 = vsub.s32 %v15444_v32, %v5813_v48  ;;  %v5885_v13 = vor.u32 %v5884_v33, %v5883_v3  ;;  %v5982_v46 = vmul.f32 %v15446_v7, %v5978_v29  ;;  %v5873_v56 = vor.u32 %v5872_v34, %v5871_v23 }
 0x54b   :  { %v5876_v4 = vor.u32 %v5875_v17, %v5874_v57  ;;  %v5879_v30 = vor.u32 %v5878_v37, %v5877_v25  ;;  %v6004_v45 = vadd.s32 1, %v7567_v49  ;;  %v5616_v14 = vshrl.u32 %v5598_v18, %v5614_v62 }
 0x54c   :  { %vm5886_vm12 = vcmp.lt.s32.totalorder %v15514_v43, 1  ;;  %vm5888_vm6 = vcmp.lt.s32.totalorder %v15514_v43, 3  ;;  %v5895_v44 = vsel %vm5889_vm7, %v5882_v15, 920167782  ;;  %v15546_v47 = vor.u32 4788187, %v5620_v22 }
 0x54d   :  { %v15548_v32 = vadd.s32 4294967294, %v5714_v16  ;;  %v5862_v21 = vor.u32 8388608, %v5861_v9  ;;  %vm6005_vm13 = vcmp.gt.s32.totalorder %v6004_v45, 0  ;;  %v5816_v23 = vsub.s32 0, %v15539_v35 }
 0x54e   :  { %v5899_v57 = vsel %vm5889_vm7, %v5885_v13, 1326507024  ;;  %v15553_v49 = vadd.f32 %v5987_v61, %v5982_v46  ;;  %v6006_v18 = vsel %vm6005_vm13, %v6004_v45, 0  ;;  %vm5887_vm15 = vcmp.lt.s32.totalorder %v15514_v43, 2 }
 0x54f   :  { %v5894_v48 = vsel %vm5886_vm12, %v5873_v56, %v5876_v4  ;;  %v5896_v25 = vsel %vm5888_vm6, %v5879_v30, %v5895_v44  ;;  %v17342_v3 = vand.u32 2147483647, %v15499_v10  ;;  %v15564_v33 = vsel %vm5397_vm11, %v5398_v63, %v15481_v52 }
 0x550   :  { %17735 = vst [vmem:[#allocation22_spill] sm:$0xff] %v15553_v49  ;;  %v15567_v17 = vor.u32 %v5616_v14, %v5615_v27  ;;  %v6008_v37 = vand.u32 31, %v6006_v18  ;;  %v5898_v62 = vsel %vm5886_vm12, %v5876_v4, %v5879_v30  ;;  %v5900_v22 = vsel %vm5888_vm6, %v5882_v15, %v5899_v57 }
 0x551   :  { %v15574_v16 = vshll.u32 %v5862_v21, 8  ;;  %vm7557_vm14 = vcmp.lt.s32.totalorder %v15548_v32, 0  ;;  %v5897_v63 = vsel %vm5887_vm15, %v5894_v48, %v5896_v25  ;;  %v6101_v27 = vand.u32 2139095040, %v15553_v49 }
 0x552   :  { %v6009_v9 = vsub.s32 32, %v6008_v37  ;;  %v15581_v13 = vmin.u32 %v5816_v23, %v15539_v35  ;;  %v5870_v46 = vshrl.u32 %v17401_v1, %v15489_v12  ;;  %v6001_v61 = vand.u32 8388607, %v17342_v3 }
 0x553   :  { %v6011_v15 = vshll.u32 %v17401_v1, %v6008_v37  ;;  %v5901_v45 = vsel %vm5887_vm15, %v5898_v62, %v5900_v22  ;;  %v6007_v14 = vshrl.u32 %v6006_v18, 5  ;;  %v6014_v21 = vshll.u32 %v17733_v42, %v6008_v37 }
 0x554   :  { %v6012_v44 = vshrl.u32 %v17733_v42, %v6009_v9  ;;  %v5891_v23 = vsel %vm5889_vm7, %v5879_v30, 2102212464  ;;  %v15595_v57 = vmul.u32.u64.low %v15574_v16, %v5897_v63  ;;  %v15596_v48 = vmul.u32.u64.high %v15574_v16, %v5897_v63, %v15595_v57 }
 0x555   :  { %v6015_v12 = vshrl.u32 %v17734_v8, %v6009_v9  ;;  %v6017_v25 = vshll.u32 %v17734_v8, %v6008_v37  ;;  %v6018_v3 = vshrl.u32 %v17656_v40, %v6009_v9  ;;  %v6020_v18 = vshll.u32 %v17656_v40, %v6008_v37 }
 0x556   :  { %v6102_v62 = vshrl.u32 %v6101_v27, 23  ;;  %v15604_v22 = vmul.u32.u64.low %v15574_v16, %v5901_v45  ;;  %v15605_v50 = vmul.u32.u64.high %v15574_v16, %v5901_v45, %v15604_v22  ;;  %v6002_v34 = vor.u32 8388608, %v6001_v61 }
 0x557   :  { %v6013_v30 = vor.u32 %v6012_v44, %v6011_v15  ;;  %v6016_v29 = vor.u32 %v6015_v12, %v6014_v21  ;;  %v6021_v63 = vshrl.u32 %v17657_v41, %v6009_v9  ;;  %v6023_v10 = vshll.u32 %v17657_v41, %v6008_v37 }
 0x558   :  { %vm6026_vm5 = vcmp.lt.s32.totalorder %v6007_v14, 1  ;;  %vm5394_vm9 = vcmp.eq.s32.totalorder %v15495_v54, 0  ;;  %v5890_v38 = vsel %vm5886_vm12, %v5870_v46, %v5873_v56  ;;  %v6019_v20 = vor.u32 %v6018_v3, %v6017_v25 }
 0x559   :  { %v6024_v27 = vshrl.u32 %v17658_v60, %v6009_v9  ;;  %vm6029_vm4 = vcmp.lt.s32.totalorder %v6007_v14, 4  ;;  %vm5404_vm1 = vcmp.lt.s32.totalorder %v17736_v24, 0  ;;  %v5892_v61 = vsel %vm5888_vm6, %v5876_v4, %v5891_v23 }
 0x55a   :  { %v6022_v15 = vor.u32 %v6021_v63, %v6020_v18  ;;  %vm6028_vm8 = vcmp.lt.s32.totalorder %v6007_v14, 3  ;;  %v7571_v45 = vadd.s32 4294967169, %v6102_v62  ;;  %v6010_v37 = vshrl.u32 %v17401_v1, %v6009_v9 }
 0x55b   :  { %v6025_v44 = vor.u32 %v6024_v27, %v6023_v10  ;;  %vm6027_vm0 = vcmp.lt.s32.totalorder %v6007_v14, 2  ;;  %v6034_v21 = vsel %vm6026_vm5, %v6013_v30, %v6016_v29  ;;  %v5624_v56 = vcvt.s32.f32 %v15567_v17 }
 0x55c   :  { %v6031_v3 = vsel %vm6029_vm4, %v6019_v20, 2102212464  ;;  %v6035_v46 = vsel %vm6029_vm4, %v6022_v15, 920167782  ;;  %v6042_v12 = vshll.u32 %v6002_v34, 8  ;;  %v5717_v4 = vsel %vm7557_vm14, 0, %v15548_v32 }
 0x55d   :  { %v5818_v23 = vclz %v15581_v13  ;;  %v6036_v25 = vsel %vm6028_vm8, %v6019_v20, %v6035_v46  ;;  %v6038_v10 = vsel %vm6026_vm5, %v6016_v29, %v6019_v20  ;;  %v5893_v9 = vsel %vm5887_vm15, %v5890_v38, %v5892_v61 }
 0x55e   :  { %v6037_v17 = vsel %vm6027_vm0, %v6034_v21, %v6036_v25  ;;  %v6039_v18 = vsel %vm6029_vm4, %v6025_v44, 1326507024  ;;  %v6108_v62 = vadd.s32 1, %v7571_v45  ;;  %v5912_v34 = vadd.s32 1, %v15596_v48 }
 0x55f   :  { %v6030_v22 = vsel %vm6026_vm5, %v6010_v37, %v6013_v30  ;;  %v6032_v32 = vsel %vm6028_vm8, %v6016_v29, %v6031_v3  ;;  %v6040_v13 = vsel %vm6028_vm8, %v6022_v15, %v6039_v18  ;;  %v5702_v38 = vadd.s32 %v15249_v28, %v15262_v31  ;;  %v17737_v37 = vld [vmem:[#allocation17_spill] sm:$0xff] }
 0x560   :  { %v6041_v63 = vsel %vm6027_vm0, %v6038_v10, %v6040_v13  ;;  %v15636_v27 = vmul.u32.u64.low %v6042_v12, %v6037_v17  ;;  %v15637_v20 = vmul.u32.u64.high %v6042_v12, %v6037_v17, %v15636_v27  ;;  %vm6109_vm2 = vcmp.gt.s32.totalorder %v6108_v62, 0 }
 0x561   :  { %vm5911_vm10 = vc.u32 %v15605_v50, %v15595_v57  ;;  %v15644_v43 = vmul.u32.u64.low %v6042_v12, %v6041_v63  ;;  %v15645_v61 = vmul.u32.u64.high %v6042_v12, %v6041_v63, %v15644_v43  ;;  %v5718_v30 = vsub.s32 32, %v5717_v4 }
 0x562   :  { %v5722_v29 = vsub.s32 4294967266, %v5717_v4  ;;  %v6033_v15 = vsel %vm6027_vm0, %v6030_v22, %v6032_v32  ;;  %v6110_v45 = vsel %vm6109_vm2, %v6108_v62, 0  ;;  %vm5544_vm3 = vcmp.lt.s32.totalorder %v17737_v37, 0 }
 0x563   :  { %v17738_v44 = vand.u32 2147483647, %v15546_v47  ;;  %v7560_v3 = vadd.s32 4294967294, %v5818_v23  ;;  %v5909_v46 = vmul.u32 %v15574_v16, %v5893_v9  ;;  %v17348_v28 = vand.u32 2147483647, %v15553_v49 }
 0x564   :  { %v17739_v31 = vxor.u32 2147483648, %v15481_v52  ;;  %v5913_v14 = vsel %vm5911_vm10, %v5912_v34, %v15596_v48  ;;  %v6052_v10 = vadd.s32 1, %v15637_v20  ;;  %v6112_v17 = vand.u32 31, %v6110_v45  ;;  %v5979_v34 = vld [vmem:[#allocation7 + $0x1b0] sm:$0xff] }
 0x565   :  { %v5625_v21 = vmul.f32 %v5624_v56, %v17738_v44  ;;  %v17740_v47 = vxor.u32 2147483648, %v15530_v6  ;;  %v5719_v56 = vshll.u32 %v15458_v59, %v5717_v4  ;;  %v6049_v52 = vmul.u32 %v6042_v12, %v6033_v15 }
 0x566   :  { %v15658_v25 = vsel %vm5394_vm9, %v15467_v0, %v17739_v31  ;;  %vm6051_vm11 = vc.u32 %v15645_v61, %v15636_v27  ;;  %v5720_v0 = vshrl.u32 %v5702_v38, %v5718_v30  ;;  %v5723_v23 = vadd.s32 127, %v5722_v29 }
 0x567   :  { %v15667_v16 = vsel %vm5404_vm1, %v17740_v47, %v15530_v6  ;;  %v6053_v48 = vsel %vm6051_vm11, %v6052_v10, %v15637_v20  ;;  %v6113_v9 = vsub.s32 32, %v6112_v17  ;;  %v5626_v18 = vxor.u32 2147483648, %v5625_v21 }
 0x568   :  { %vm7561_vm7 = vcmp.lt.s32.totalorder %v7560_v3, 0  ;;  %v15673_v62 = vadd.s32 %v5913_v14, %v5909_v46  ;;  %v6105_v6 = vand.u32 8388607, %v17348_v28  ;;  %v6115_v22 = vshll.u32 %v17401_v1, %v6112_v17 }
 0x569   :  { %v6116_v59 = vshrl.u32 %v17733_v42, %v6113_v9  ;;  %v6118_v12 = vshll.u32 %v17733_v42, %v6112_v17  ;;  %v6119_v4 = vshrl.u32 %v17734_v8, %v6113_v9  ;;  %v15681_v32 = vadd.s32 %v6053_v48, %v6049_v52 }
 0x56a   :  { %v15683_v13 = vshrl.u32 %v6110_v45, 5  ;;  %v6121_v63 = vshll.u32 %v17734_v8, %v6112_v17  ;;  %v6122_v20 = vshrl.u32 %v17656_v40, %v6113_v9  ;;  %v17741_v38 = vand.u32 2147483647, %v17736_v24 }
 0x56b   :  { %v5721_v30 = vor.u32 %v5720_v0, %v5719_v56  ;;  %v5724_v29 = vshll.u32 %v5723_v23, 23  ;;  %v5983_v15 = vmul.f32 %v15446_v7, %v5979_v34  ;;  %v6124_v44 = vshll.u32 %v17656_v40, %v6112_v17 }
 0x56c   :  { %vm15689_vm12 = vcmp.le.f32.partialorder %v17741_v38, 0.7853982  ;;  %v17744_v46 = vand.u32 2147483647, %v17737_v37  ;;  %v15702_v31 = vsel %vm7561_vm7, 0, %v7560_v3  ;;  %v5915_v14 = vadd.s32 536870912, %v15673_v62 }
 0x56d   :  { %v6106_v10 = vor.u32 8388608, %v6105_v6  ;;  %v6125_v47 = vshrl.u32 %v17657_v41, %v6113_v9  ;;  %v6117_v56 = vor.u32 %v6116_v59, %v6115_v22  ;;  %v6120_v52 = vor.u32 %v6119_v4, %v6118_v12 }
 0x56e   :  { %vm15697_vm6 = vcmp.le.f32.partialorder %v17744_v46, 0.7853982  ;;  %v6127_v0 = vshll.u32 %v17657_v41, %v6112_v17  ;;  %v6128_v23 = vshrl.u32 %v17658_v60, %v6113_v9  ;;  %v6055_v48 = vadd.s32 536870912, %v15681_v32  ;;  %v5988_v46 = vld [vmem:[#allocation8 + $0x1b0] sm:$0xff] }
 0x56f   :  { %v6123_v34 = vor.u32 %v6122_v20, %v6121_v63  ;;  %v6126_v38 = vor.u32 %v6125_v47, %v6124_v44  ;;  %vm6130_vm13 = vcmp.lt.s32.totalorder %v15683_v13, 1  ;;  %vm5286_vm15 = vweird.f32 %v14405_v11 }
 0x570   :  { %v5627_v3 = vsel %vm5544_vm3, %v5626_v18, %v5625_v21  ;;  %v5725_v6 = vor.u32 4788187, %v5724_v29  ;;  %v6129_v28 = vor.u32 %v6128_v23, %v6127_v0  ;;  %vm6132_vm14 = vcmp.lt.s32.totalorder %v15683_v13, 3  ;;  %v17748_v0 = vld [vmem:[#allocation23_spill] sm:$0xff] }
 0x571   :  { %vm5393_vm5 = vcmp.lt.s32.totalorder %v15495_v54, 2  ;;  %v5826_v17 = vsub.s32 4294967266, %v15702_v31  ;;  %v15716_v22 = vshrl.u32 %v5915_v14, 30  ;;  %vm6131_vm9 = vcmp.lt.s32.totalorder %v15683_v13, 2 }
 0x572   :  { %vm6133_vm4 = vcmp.lt.s32.totalorder %v15683_v13, 4  ;;  %v5806_v59 = vadd.s32 %v15353_v36, %v15364_v19  ;;  %v6138_v21 = vsel %vm6130_vm13, %v6117_v56, %v6120_v52  ;;  %v15726_v12 = vshll.u32 %v6106_v10, 8 }
 0x573   :  { %v6139_v18 = vsel %vm6133_vm4, %v6126_v38, 920167782  ;;  %v5728_v4 = vcvt.s32.f32 %v5721_v30  ;;  %v15728_v63 = vadd.f32 %v5988_v46, %v5983_v15  ;;  %v15730_v20 = vshrl.u32 %v6055_v48, 30 }
 0x574   :  { %v6140_v29 = vsel %vm6132_vm14, %v6123_v34, %v6139_v18  ;;  %v5726_v44 = vand.u32 2147483647, %v5725_v6  ;;  %v6142_v19 = vsel %vm6130_vm13, %v6120_v52, %v6123_v34  ;;  %v6143_v14 = vsel %vm6133_vm4, %v6129_v28, 1326507024 }
 0x575   :  { %17747 = vst [vmem:[#allocation20_spill] sm:$0xff] %v15730_v20  ;;  %v6141_v36 = vsel %vm6131_vm9, %v6138_v21, %v6140_v29  ;;  %v5822_v10 = vsub.s32 32, %v15702_v31  ;;  %v5827_v30 = vadd.s32 127, %v5826_v17  ;;  %v5917_v15 = vshll.u32 %v15716_v22, 30 }
 0x576   :  { %v6144_v47 = vsel %vm6132_vm14, %v6126_v38, %v6143_v14  ;;  %vm5390_vm8 = vweird.f32 %v17717_v55  ;;  %vm5648_vm0 = vcmp.lt.s32.totalorder %v17748_v0, 0  ;;  %v6114_v23 = vshrl.u32 %v17401_v1, %v6113_v9 }
 0x577   :  { %v6145_v48 = vsel %vm6131_vm9, %v6142_v19, %v6144_v47  ;;  %v15750_v6 = vmul.u32.u64.low %v15726_v12, %v6141_v36  ;;  %v15751_v28 = vmul.u32.u64.high %v15726_v12, %v6141_v36, %v15750_v6  ;;  %v5490_v46 = vsel %vm15689_vm12, %v17736_v24, %v15667_v16 }
 0x578   :  { %v5628_v38 = vsub.s32 4, %v15238_v39  ;;  %v6057_v17 = vshll.u32 %v15730_v20, 30  ;;  %v6135_v9 = vsel %vm6133_vm4, %v6123_v34, 2102212464  ;;  %v5630_v21 = vsel %vm15697_vm6, %v17737_v37, %v5627_v3 }
 0x579   :  { %v15766_v18 = vmul.u32.u64.low %v15726_v12, %v6145_v48  ;;  %v15767_v29 = vmul.u32.u64.high %v15726_v12, %v6145_v48, %v15766_v18  ;;  %v6205_v36 = vand.u32 2139095040, %v15728_v63  ;;  %v5729_v19 = vmul.f32 %v5728_v4, %v5726_v44 }
 0x57a   :  { %v5823_v16 = vshll.u32 %v15539_v35, %v15702_v31  ;;  %v5824_v14 = vshrl.u32 %v5806_v59, %v5822_v10  ;;  %v5828_v47 = vshll.u32 %v5827_v30, 23  ;;  %v15773_v49 = vsub.s32 %v15673_v62, %v5917_v15  ;;  %v5069_v31 = vld [vmem:[#allocation5 + $0x168] sm:$0xff]  ;;  %v4619_v18 = vld [vmem:[#allocation5 + $0x158] sm:$0xff] }
 0x57b   :  { %v6134_v34 = vsel %vm6130_vm13, %v6114_v23, %v6117_v56  ;;  %v6136_v3 = vsel %vm6132_vm14, %v6120_v52, %v6135_v9  ;;  %v6206_v20 = vshrl.u32 %v6205_v36, 23  ;;  %v5297_v48 = vsel %vm5286_vm15, nan, %v15493_v51  ;;  %v5070_v36 = vld [vmem:[#allocation5 + $0x170] sm:$0xff] }
 0x57c   :  { %v17749_v4 = vsub.s32 4, %v17731_v26  ;;  %8075 = vcosq.f32 %v5490_v46  ;;  %v15788_v62 = vsub.s32 %v15681_v32, %v6057_v17  ;;  %v5400_v56 = vsel %vm5393_vm5, %v15658_v25, %v15564_v33 }
 0x57d   :  { %v5629_v11 = vsel %vm5544_vm3, %v5628_v38, %v15238_v39  ;;  %8077 = vcosq.f32 %v5630_v21  ;;  %v7575_v51 = vadd.s32 4294967169, %v6206_v20  ;;  %v5730_v52 = vxor.u32 2147483648, %v5729_v19 }
 0x57e   :  { %v5489_v35 = vsel %vm5404_vm1, %v17749_v4, %v17731_v26  ;;  %v5825_v59 = vor.u32 %v5824_v14, %v5823_v16  ;;  %v6137_v26 = vsel %vm6131_vm9, %v6134_v34, %v6136_v3  ;;  %v6156_v32 = vadd.s32 1, %v15751_v28  ;;  %v17756_v4 = vld [vmem:[#allocation25_spill] sm:$0xff] }
 0x57f   :  { %v5829_v44 = vor.u32 4788187, %v5828_v47  ;;  %v5920_v10 = vsub.s32 0, %v15773_v49  ;;  %vm6155_vm1 = vc.u32 %v15767_v29, %v15750_v6  ;;  %v6212_v54 = vadd.s32 1, %v7575_v51 }
 0x580   :  { %v5507_v33 = vmul.f32 %v5297_v48, %v5069_v31  ;;  %v17750_v25 = vand.u32 2147483647, %v17748_v0  ;;  %v5732_v20 = vsub.s32 4, %v15412_v53  ;;  %v6060_v13 = vsub.s32 0, %v15788_v62 }
 0x581   :  { %v5491_v30 = vsel %vm15689_vm12, 0, %v5489_v35  ;;  %v5631_v15 = vsel %vm15697_vm6, 0, %v5629_v11  ;;  %v6153_v23 = vmul.u32 %v15726_v12, %v6137_v26  ;;  %vm6213_vm10 = vcmp.gt.s32.totalorder %v6212_v54, 0  ;;  %v5980_v11 = vld [vmem:[#allocation7 + $0x1b8] sm:$0xff]  ;;  %v17759_v26 = vld [vmem:[#allocation16_spill] sm:$0xff] }
 0x582   :  { %vm15805_vm2 = vcmp.le.f32.partialorder %v17750_v25, 0.7853982  ;;  %v5401_v38 = vsel %vm5390_vm8, nan, %v5400_v56  ;;  %8079 = vsinq.f32 %v5490_v46  ;;  %v5731_v17 = vsel %vm5648_vm0, %v5730_v52, %v5729_v19  ;;  %v17753_v46 = vld [vmem:[#allocation26_spill] sm:$0xff]  ;;  %v17757_v52 = vld [vmem:[#allocation21_spill] sm:$0xff]  ;;  %v17760_v25 = vld [vmem:[#allocation28_spill] sm:$0xff] }
 0x583   :  { %v6157_v9 = vsel %vm6155_vm1, %v6156_v32, %v15751_v28  ;;  %v5830_v16 = vand.u32 2147483647, %v5829_v44  ;;  %v5832_v43 = vcvt.s32.f32 %v5825_v59  ;;  %v7563_v14 = vmin.u32 %v5920_v10, %v15773_v49  ;;  %v17758_v59 = vld [vmem:[#allocation19_spill] sm:$0xff] }
 0x584   :  { %v6214_v45 = vsel %vm6213_vm10, %v6212_v54, 0  ;;  %8081 = vsinq.f32 %v5630_v21  ;;  %v5635_v47 = vadd.s32 3, %v5631_v15  ;;  %v5733_v55 = vsel %vm5648_vm0, %v5732_v20, %v15412_v53 }
 0x585   :  { %v7568_v12 = vmin.u32 %v6060_v13, %v15788_v62  ;;  %v15828_v19 = vadd.f32 %v15470_v2, %v17753_v46  ;;  %v5495_v28 = vadd.s32 3, %v5491_v30  ;;  %v15830_v34 = vadd.s32 %v6157_v9, %v6153_v23  ;;  %v5989_v46 = vld [vmem:[#allocation8 + $0x1b8] sm:$0xff] }
 0x586   :  { %v6216_v3 = vand.u32 31, %v6214_v45  ;;  %v15833_v48 = vmul.f32 %v15485_v58, %v4619_v18  ;;  %v5060_v21 = vadd.f32 %v15472_v5, %v17756_v4  ;;  %v5508_v35 = vmul.f32 %v5401_v38, %v5070_v36 }
 0x587   :  { %17754 = vst [vmem:[#allocation17_spill] sm:$0xff] %v15828_v19  ;;  %v5734_v53 = vsel %vm15805_vm2, %v17748_v0, %v5731_v17  ;;  %v5735_v31 = vsel %vm15805_vm2, 0, %v5733_v55  ;;  %v5833_v2 = vmul.f32 %v5832_v43, %v5830_v16  ;;  %v5922_v56 = vclz %v7563_v14 }
 0x588   :  { %17755 = vst [vmem:[#allocation23_spill] sm:$0xff] %v15833_v48  ;;  %v15842_v51 = vsub.s32 32, %v6216_v3  ;;  %v15846_v58 = vadd.f32 %v17758_v59, %v17757_v52  ;;  %v15849_v32 = vadd.f32 %v5507_v33, %v17759_v26  ;;  %v15851_v5 = vand.u32 3, %v5635_v47 }
 0x589   :  { %v6062_v44 = vclz %v7568_v12  ;;  %v15853_v10 = vpop.eup %8075  ;;  %v15855_v54 = vand.u32 3, %v5495_v28  ;;  %8083 = vcosq.f32 %v5734_v53  ;;  %vm5752_vm3 = vcmp.lt.s32.totalorder %v17760_v25, 0 }
 0x58a   :  { %v6159_v39 = vadd.s32 536870912, %v15830_v34  ;;  %v15859_v20 = vpop.eup %8077  ;;  %v15861_v13 = vadd.f32 %v5508_v35, %v5060_v21  ;;  %8085 = vsinq.f32 %v5734_v53  ;;  %v5739_v30 = vadd.s32 3, %v5735_v31 }
 0x58b   :  { %v17762_v33 = vand.u32 2147483647, %v17760_v25  ;;  %v5984_v23 = vmul.f32 %v15446_v7, %v5980_v11  ;;  %v5834_v38 = vxor.u32 2147483648, %v5833_v2  ;;  %v7564_v17 = vadd.s32 4294967294, %v5922_v56 }
 0x58c   :  { %17761 = vst [vmem:[#allocation26_spill] sm:$0xff] %v15861_v13  ;;  %v6228_v9 = vshll.u32 %v17656_v40, %v6216_v3  ;;  %v6229_v18 = vshrl.u32 %v17657_v41, %v15842_v51  ;;  %vm5641_vm7 = vcmp.eq.s32.totalorder %v15851_v5, 2  ;;  %v7569_v36 = vadd.s32 4294967294, %v6062_v44  ;;  %v17765_v44 = vld [vmem:[#allocation29_spill] sm:$0xff] }
 0x58d   :  { %vm15865_vm11 = vcmp.le.f32.partialorder %v17762_v33, 0.7853982  ;;  %v17353_v16 = vand.u32 2147483647, %v15728_v63  ;;  %v15875_v43 = vshrl.u32 %v6214_v45, 5  ;;  %v6231_v14 = vshll.u32 %v17657_v41, %v6216_v3 }
 0x58e   :  { %vm5638_vm12 = vcmp.eq.s32.totalorder %v15851_v5, 0  ;;  %v15879_v47 = vshrl.u32 %v6159_v39, 30  ;;  %v6219_v7 = vshll.u32 %v17401_v1, %v6216_v3  ;;  %v6222_v55 = vshll.u32 %v17733_v42, %v6216_v3 }
 0x58f   :  { %v6232_v12 = vshrl.u32 %v17658_v60, %v15842_v51  ;;  %v6220_v28 = vshrl.u32 %v17733_v42, %v15842_v51  ;;  %v6223_v45 = vshrl.u32 %v17734_v8, %v15842_v51  ;;  %v6225_v4 = vshll.u32 %v17734_v8, %v6216_v3  ;;  %v15892_v35 = vpop.eup %8079 }
 0x590   :  { %v6226_v21 = vshrl.u32 %v17656_v40, %v15842_v51  ;;  %v5642_v31 = vxor.u32 2147483648, %v15859_v20  ;;  %v15896_v56 = vand.u32 3, %v5739_v30  ;;  %v6230_v11 = vor.u32 %v6229_v18, %v6228_v9 }
 0x591   :  { %vm7570_vm6 = vcmp.lt.s32.totalorder %v7569_v36, 0  ;;  %v6209_v52 = vand.u32 8388607, %v17353_v16  ;;  %v6233_v59 = vor.u32 %v6232_v12, %v6231_v14  ;;  %vm6237_vm13 = vcmp.lt.s32.totalorder %v15875_v43, 4  ;;  %v8082_v3 = vpop.eup %8081 }
 0x592   :  { %v5835_v26 = vsel %vm5752_vm3, %v5834_v38, %v5833_v2  ;;  %v5836_v39 = vsub.s32 4, %v17765_v44  ;;  %v15904_v33 = vadd.f32 %v5989_v46, %v5984_v23  ;;  %v6161_v53 = vshll.u32 %v15879_v47, 30 }
 0x593   :  { %vm7565_vm15 = vcmp.lt.s32.totalorder %v7564_v17, 0  ;;  %v15907_v30 = vor.u32 %v6220_v28, %v6219_v7  ;;  %v15909_v9 = vor.u32 %v6223_v45, %v6222_v55  ;;  %v6227_v18 = vor.u32 %v6226_v21, %v6225_v4 }
 0x594   :  { %17766 = vst [vmem:[#allocation25_spill] sm:$0xff] %v15904_v33  ;;  %v15911_v16 = vsel %vm7570_vm6, 0, %v7569_v36  ;;  %vm6234_vm14 = vcmp.lt.s32.totalorder %v15875_v43, 1  ;;  %vm6236_vm5 = vcmp.lt.s32.totalorder %v15875_v43, 3  ;;  %v6243_v2 = vsel %vm6237_vm13, %v6230_v11, 920167782 }
 0x595   :  { %vm5498_vm9 = vcmp.eq.s32.totalorder %v15855_v54, 0  ;;  %v5499_v23 = vxor.u32 2147483648, %v15892_v35  ;;  %vm5501_vm4 = vcmp.eq.s32.totalorder %v15855_v54, 2  ;;  %v5639_v38 = vxor.u32 2147483648, %v8082_v3 }
 0x596   :  { %v6210_v14 = vor.u32 8388608, %v6209_v52  ;;  %v6247_v7 = vsel %vm6237_vm13, %v6233_v59, 1326507024  ;;  %vm5637_vm8 = vcmp.lt.s32.totalorder %v15851_v5, 2  ;;  %vm5742_vm0 = vcmp.eq.s32.totalorder %v15896_v56, 0  ;;  %v8084_v28 = vpop.eup %8083 }
 0x597   :  { %vm5745_vm1 = vcmp.eq.s32.totalorder %v15896_v56, 2  ;;  %v5837_v36 = vsel %vm5752_vm3, %v5836_v39, %v17765_v44  ;;  %v5838_v55 = vsel %vm15865_vm11, %v17760_v25, %v5835_v26  ;;  %v15932_v12 = vsel %vm7565_vm15, 0, %v7564_v17  ;;  %v8086_v52 = vpop.eup %8085 }
 0x598   :  { %v15935_v46 = vsub.s32 %v15830_v34, %v6161_v53  ;;  %v6070_v45 = vsub.s32 4294967266, %v15911_v16  ;;  %vm6235_vm2 = vcmp.lt.s32.totalorder %v15875_v43, 2  ;;  %v6242_v4 = vsel %vm6234_vm14, %v15907_v30, %v15909_v9  ;;  %v17773_v43 = vld [vmem:[#allocation20_spill] sm:$0xff] }
 0x599   :  { %v6244_v21 = vsel %vm6236_vm5, %v6227_v18, %v6243_v2  ;;  %v5643_v17 = vsel %vm5641_vm7, %v5642_v31, %v8082_v3  ;;  %v6246_v34 = vsel %vm6234_vm14, %v15909_v9, %v6227_v18  ;;  %v6248_v53 = vsel %vm6236_vm5, %v6230_v11, %v6247_v7 }
 0x59a   :  { %v6309_v59 = vand.u32 2139095040, %v15904_v33  ;;  %vm5497_vm10 = vcmp.lt.s32.totalorder %v15855_v54, 2  ;;  %v5640_v26 = vsel %vm5638_vm12, %v15859_v20, %v5639_v38  ;;  %v5839_v44 = vsel %vm15865_vm11, 0, %v5837_v36 }
 0x59b   :  { %v5930_v31 = vsub.s32 4294967266, %v15932_v12  ;;  %v15960_v3 = vshll.u32 %v6210_v14, 8  ;;  %vm5634_vm3 = vweird.f32 %v17737_v37  ;;  %8087 = vcosq.f32 %v5838_v55 }
 0x59c   :  { %v5910_v11 = vadd.s32 %v15595_v57, %v15605_v50  ;;  %v6164_v39 = vsub.s32 0, %v15935_v46  ;;  %v6245_v2 = vsel %vm6235_vm2, %v6242_v4, %v6244_v21  ;;  %v6050_v20 = vadd.s32 %v15636_v27, %v15645_v61 }
 0x59d   :  { %v6066_v15 = vsub.s32 32, %v15911_v16  ;;  %v6071_v38 = vadd.s32 127, %v6070_v45  ;;  %v6249_v14 = vsel %vm6235_vm2, %v6246_v34, %v6248_v53  ;;  %v5743_v7 = vxor.u32 2147483648, %v8086_v52 }
 0x59e   :  { %v5746_v36 = vxor.u32 2147483648, %v8084_v28  ;;  %8089 = vsinq.f32 %v5838_v55  ;;  %v6310_v48 = vshrl.u32 %v6309_v59, 23  ;;  %v5926_v50 = vsub.s32 32, %v15932_v12 }
 0x59f   :  { %v5931_v57 = vadd.s32 127, %v5930_v31  ;;  %v15975_v19 = vmul.u32.u64.low %v15960_v3, %v6245_v2  ;;  %v15976_v13 = vmul.u32.u64.high %v15960_v3, %v6245_v2, %v15975_v19  ;;  %v7572_v27 = vmin.u32 %v6164_v39, %v15935_v46 }
 0x5a0   :  { %v6218_v61 = vshrl.u32 %v17401_v1, %v15842_v51  ;;  %v15983_v45 = vmul.u32.u64.low %v15960_v3, %v6249_v14  ;;  %v15984_v4 = vmul.u32.u64.high %v15960_v3, %v6249_v14, %v15983_v45  ;;  %vm5738_vm11 = vweird.f32 %v17748_v0 }
 0x5a1   :  { %v6067_v55 = vshll.u32 %v15788_v62, %v15911_v16  ;;  %v6068_v21 = vshrl.u32 %v6050_v20, %v6066_v15  ;;  %v6072_v34 = vshll.u32 %v6071_v38, 23  ;;  %v6239_v53 = vsel %vm6237_vm13, %v6227_v18, 2102212464 }
 0x5a2   :  { %v5500_v59 = vsel %vm5498_vm9, %v15853_v10, %v5499_v23  ;;  %v17767_v51 = vxor.u32 2147483648, %v15853_v10  ;;  %v5843_v39 = vadd.s32 3, %v5839_v44  ;;  %v7579_v2 = vadd.s32 4294967169, %v6310_v48  ;;  %v17768_v23 = vld [vmem:[#allocation27_spill] sm:$0xff] }
 0x5a3   :  { %v5644_v62 = vsel %vm5637_vm8, %v5640_v26, %v5643_v17  ;;  %vm5741_vm7 = vcmp.lt.s32.totalorder %v15896_v56, 2  ;;  %v5744_v16 = vsel %vm5742_vm0, %v8084_v28, %v5743_v7  ;;  %v5747_v18 = vsel %vm5745_vm1, %v5746_v36, %v8086_v52  ;;  %v16015_v44 = vld [vmem:[#allocation2 + $0xe] ss:$0 sm:$0xff]  ;;  %v6429_v52 = vld [vmem:[#allocation7 + $0x1c0] sm:$0xff] }
 0x5a4   :  { %v5503_v31 = vsel %vm5501_vm4, %v17767_v51, %v15892_v35  ;;  %vm5856_vm12 = vcmp.lt.s32.totalorder %v17768_v23, 0  ;;  %v5927_v10 = vshll.u32 %v15773_v49, %v15932_v12  ;;  %v6166_v20 = vclz %v7572_v27  ;;  %v6438_v56 = vld [vmem:[#allocation8 + $0x1c0] sm:$0xff] }
 0x5a5   :  { %v6238_v48 = vsel %vm6234_vm14, %v6218_v61, %v15907_v30  ;;  %v6240_v5 = vsel %vm6236_vm5, %v15909_v9, %v6239_v53  ;;  %v5928_v35 = vshrl.u32 %v5910_v11, %v5926_v50  ;;  %v5932_v17 = vshll.u32 %v5931_v57, 23  ;;  %v5520_v53 = vld [vmem:[#allocation5 + $0x180] sm:$0xff] }
 0x5a6   :  { %v6069_v28 = vor.u32 %v6068_v21, %v6067_v55  ;;  %v6073_v26 = vor.u32 4788187, %v6072_v34  ;;  %v16019_v15 = vsel %vm5497_vm10, %v5500_v59, %v5503_v31  ;;  %v16021_v49 = vand.u32 3, %v5843_v39  ;;  %v17774_v59 = vld [vmem:[#allocation24_spill] sm:$0xff]  ;;  %v5521_v39 = vld [vmem:[#allocation5 + $0x188] sm:$0xff] }
 0x5a7   :  { %17769 = vst [vmem:[#allocation21_spill] sm:$0xff] %v16019_v15  ;;  %v17770_v12 = vand.u32 2147483647, %v17768_v23  ;;  %v6316_v9 = vadd.s32 1, %v7579_v2  ;;  %v5645_v11 = vsel %vm5634_vm3, nan, %v5644_v62  ;;  %v5748_v38 = vsel %vm5741_vm7, %v5744_v16, %v5747_v18 }
 0x5a8   :  { %v6241_v54 = vsel %vm6235_vm2, %v6238_v48, %v6240_v5  ;;  %v6260_v14 = vadd.s32 1, %v15976_v13  ;;  %v5940_v7 = vsub.s32 4, %v15716_v22  ;;  %v7573_v36 = vadd.s32 4294967294, %v6166_v20  ;;  %v8088_v57 = vpop.eup %8087 }
 0x5a9   :  { %vm16025_vm6 = vcmp.le.f32.partialorder %v17770_v12, 0.7853982  ;;  %vm6259_vm13 = vc.u32 %v15984_v4, %v15975_v19  ;;  %v6433_v50 = vmul.f32 %v16015_v44, %v6429_v52  ;;  %v5929_v27 = vor.u32 %v5928_v35, %v5927_v10 }
 0x5aa   :  { %v5933_v37 = vor.u32 4788187, %v5932_v17  ;;  %v6074_v61 = vand.u32 2147483647, %v6073_v26  ;;  %v6076_v45 = vcvt.s32.f32 %v6069_v28  ;;  %vm5846_vm15 = vcmp.eq.s32.totalorder %v16021_v49, 0 }
 0x5ab   :  { %v6080_v55 = vsub.s32 4, %v17773_v43  ;;  %v6257_v21 = vmul.u32 %v15960_v3, %v6241_v54  ;;  %vm6317_vm14 = vcmp.gt.s32.totalorder %v6316_v9, 0  ;;  %v8090_v34 = vpop.eup %8089  ;;  %vm5849_vm5 = vcmp.eq.s32.totalorder %v16021_v49, 2 }
 0x5ac   :  { %vm5996_vm9 = vcmp.lt.s32.totalorder %v17774_v59, 0  ;;  %v6261_v51 = vsel %vm6259_vm13, %v6260_v14, %v15976_v13  ;;  %v17354_v31 = vand.u32 2147483647, %v15904_v33  ;;  %v5749_v2 = vsel %vm5738_vm11, nan, %v5748_v38 }
 0x5ad   :  { %v5941_v3 = vsel %vm5856_vm12, %v5940_v7, %v15716_v22  ;;  %vm7574_vm4 = vcmp.lt.s32.totalorder %v7573_v36, 0  ;;  %v16055_v62 = vadd.f32 %v6438_v56, %v6433_v50  ;;  %v5934_v16 = vand.u32 2147483647, %v5933_v37 }
 0x5ae   :  { %v5936_v18 = vcvt.s32.f32 %v5929_v27  ;;  %v6077_v10 = vmul.f32 %v6076_v45, %v6074_v61  ;;  %v6318_v20 = vsel %vm6317_vm14, %v6316_v9, 0  ;;  %v5958_v48 = vmul.f32 %v5645_v11, %v5520_v53 }
 0x5af   :  { %v17775_v13 = vand.u32 2147483647, %v17774_v59  ;;  %v6081_v0 = vsel %vm5996_vm9, %v6080_v55, %v17773_v43  ;;  %v16066_v35 = vadd.s32 %v6261_v51, %v6257_v21  ;;  %v5943_v22 = vsel %vm16025_vm6, 0, %v5941_v3  ;;  %v6430_v3 = vld [vmem:[#allocation7 + $0x1c8] sm:$0xff] }
 0x5b0   :  { %v5959_v17 = vmul.f32 %v5749_v2, %v5521_v39  ;;  %v6169_v28 = vsel %vm7574_vm4, 0, %v7573_v36  ;;  %v6313_v26 = vand.u32 8388607, %v17354_v31  ;;  %v5847_v52 = vxor.u32 2147483648, %v8090_v34 }
 0x5b1   :  { %vm16059_vm8 = vcmp.le.f32.partialorder %v17775_v13, 0.7853982  ;;  %v5850_v12 = vxor.u32 2147483648, %v8088_v57  ;;  %v6320_v9 = vand.u32 31, %v6318_v20  ;;  %v6449_v11 = vand.u32 2139095040, %v16055_v62 }
 0x5b2   :  { %v16073_v38 = vmul.f32 %v5936_v18, %v5934_v16  ;;  %v6078_v54 = vxor.u32 2147483648, %v6077_v10  ;;  %v6083_v14 = vsel %vm16059_vm8, 0, %v6081_v0  ;;  %v6154_v7 = vadd.s32 %v15750_v6, %v15767_v29 }
 0x5b3   :  { %v6170_v50 = vsub.s32 32, %v6169_v28  ;;  %v6174_v27 = vsub.s32 4294967266, %v6169_v28  ;;  %v6263_v36 = vadd.s32 536870912, %v16066_v35  ;;  %v6450_v37 = vshrl.u32 %v6449_v11, 23 }
 0x5b4   :  { %v16080_v61 = vadd.s32 3, %v5943_v22  ;;  %v16083_v45 = vadd.f32 %v5958_v48, %v15846_v58  ;;  %v16086_v56 = vadd.f32 %v5959_v17, %v15849_v32  ;;  %v6314_v43 = vor.u32 8388608, %v6313_v26 }
 0x5b5   :  { %v16090_v55 = vsel %vm5846_vm15, %v8088_v57, %v5847_v52  ;;  %v16094_v6 = vsel %vm5849_vm5, %v5850_v12, %v8090_v34  ;;  %v6321_v29 = vsub.s32 32, %v6320_v9  ;;  %v7584_v21 = vadd.s32 4294967169, %v6450_v37 }
 0x5b6   :  { %v6079_v58 = vsel %vm5996_vm9, %v6078_v54, %v6077_v10  ;;  %v16099_v51 = vadd.s32 3, %v6083_v14  ;;  %v6171_v32 = vshll.u32 %v15935_v46, %v6169_v28  ;;  %v6172_v39 = vshrl.u32 %v6154_v7, %v6170_v50  ;;  %v6439_v54 = vld [vmem:[#allocation8 + $0x1c8] sm:$0xff] }
 0x5b7   :  { %v16102_v2 = vadd.s32 127, %v6174_v27  ;;  %v16104_v57 = vshrl.u32 %v6263_v36, 30  ;;  %v6456_v16 = vadd.s32 1, %v7584_v21  ;;  %v6323_v34 = vshll.u32 %v17401_v1, %v6320_v9 }
 0x5b8   :  { %v6326_v18 = vshll.u32 %v17733_v42, %v6320_v9  ;;  %v6332_v48 = vshll.u32 %v17656_v40, %v6320_v9  ;;  %v16109_v13 = vshll.u32 %v6314_v43, 8  ;;  %v6324_v10 = vshrl.u32 %v17733_v42, %v6321_v29 }
 0x5b9   :  { %v6327_v0 = vshrl.u32 %v17734_v8, %v6321_v29  ;;  %v6333_v46 = vshrl.u32 %v17657_v41, %v6321_v29  ;;  %vm6457_vm0 = vcmp.gt.s32.totalorder %v6456_v16, 0  ;;  %v16117_v22 = vsel %vm16059_vm8, %v17774_v59, %v6079_v58 }
 0x5ba   :  { %v16119_v17 = vshrl.u32 %v6318_v20, 5  ;;  %v6434_v28 = vmul.f32 %v16015_v44, %v6430_v3  ;;  %v6458_v26 = vsel %vm6457_vm0, %v6456_v16, 0  ;;  %v16122_v52 = vor.u32 %v6172_v39, %v6171_v32 }
 0x5bb   :  { %v6265_v11 = vshll.u32 %v16104_v57, 30  ;;  %v17355_v14 = vand.u32 2147483647, %v16055_v62  ;;  %v16128_v7 = vshrl.u32 %v17401_v1, %v6321_v29  ;;  %v6329_v5 = vshll.u32 %v17734_v8, %v6320_v9 }
 0x5bc   :  { %v6330_v20 = vshrl.u32 %v17656_v40, %v6321_v29  ;;  %v6460_v50 = vand.u32 31, %v6458_v26  ;;  %v16132_v27 = vor.u32 %v6324_v10, %v6323_v34  ;;  %v16134_v36 = vor.u32 %v6327_v0, %v6326_v18 }
 0x5bd   :  { %v6334_v37 = vor.u32 %v6333_v46, %v6332_v48  ;;  %v6335_v43 = vshll.u32 %v17657_v41, %v6320_v9  ;;  %v6336_v21 = vshrl.u32 %v17658_v60, %v6321_v29  ;;  %vm6338_vm1 = vcmp.lt.s32.totalorder %v16119_v17, 1 }
 0x5be   :  { %v16139_v58 = vadd.f32 %v6439_v54, %v6434_v28  ;;  %v6461_v32 = vsub.s32 32, %v6460_v50  ;;  %v16142_v39 = vsub.s32 %v16066_v35, %v6265_v11  ;;  %vm6341_vm2 = vcmp.lt.s32.totalorder %v16119_v17, 4 }
 0x5bf   :  { %v6453_v3 = vand.u32 8388607, %v17355_v14  ;;  %v6459_v16 = vshrl.u32 %v6458_v26, 5  ;;  %v6463_v34 = vshll.u32 %v17401_v1, %v6460_v50  ;;  %v6466_v29 = vshll.u32 %v17733_v42, %v6460_v50 }
 0x5c0   :  { %v6464_v9 = vshrl.u32 %v17733_v42, %v6461_v32  ;;  %v6467_v18 = vshrl.u32 %v17734_v8, %v6461_v32  ;;  %v6331_v48 = vor.u32 %v6330_v20, %v6329_v5  ;;  %vm6339_vm10 = vcmp.lt.s32.totalorder %v16119_v17, 2 }
 0x5c1   :  { %v6469_v35 = vshll.u32 %v17734_v8, %v6460_v50  ;;  %v6470_v10 = vshrl.u32 %v17656_v40, %v6461_v32  ;;  %v6337_v0 = vor.u32 %v6336_v21, %v6335_v43  ;;  %vm6340_vm3 = vcmp.lt.s32.totalorder %v16119_v17, 3 }
 0x5c2   :  { %v6472_v46 = vshll.u32 %v17656_v40, %v6460_v50  ;;  %v6553_v28 = vand.u32 2139095040, %v16139_v58  ;;  %v6268_v26 = vsub.s32 0, %v16142_v39  ;;  %v6346_v11 = vsel %vm6338_vm1, %v16132_v27, %v16134_v36 }
 0x5c3   :  { %v6347_v54 = vsel %vm6341_vm2, %v6334_v37, 920167782  ;;  %v6454_v5 = vor.u32 8388608, %v6453_v3  ;;  %v6465_v20 = vor.u32 %v6464_v9, %v6463_v34  ;;  %v6468_v31 = vor.u32 %v6467_v18, %v6466_v29 }
 0x5c4   :  { %v6473_v43 = vshrl.u32 %v17657_v41, %v6461_v32  ;;  %vm6478_vm11 = vcmp.lt.s32.totalorder %v6459_v16, 1  ;;  %v6462_v21 = vshrl.u32 %v17401_v1, %v6461_v32  ;;  %v6471_v14 = vor.u32 %v6470_v10, %v6469_v35 }
 0x5c5   :  { %v6475_v53 = vshll.u32 %v17657_v41, %v6460_v50  ;;  %v6476_v12 = vshrl.u32 %v17658_v60, %v6461_v32  ;;  %v6348_v15 = vsel %vm6340_vm3, %v6331_v48, %v6347_v54  ;;  %vm6481_vm7 = vcmp.lt.s32.totalorder %v6459_v16, 4 }
 0x5c6   :  { %v6474_v24 = vor.u32 %v6473_v43, %v6472_v46  ;;  %v6554_v25 = vshrl.u32 %v6553_v28, 23  ;;  %v6351_v3 = vsel %vm6341_vm2, %v6337_v0, 1326507024  ;;  %vm6480_vm13 = vcmp.lt.s32.totalorder %v6459_v16, 3  ;;  %v6431_v0 = vld [vmem:[#allocation7 + $0x1d0] sm:$0xff] }
 0x5c7   :  { %v6477_v34 = vor.u32 %v6476_v12, %v6475_v53  ;;  %v6483_v9 = vsel %vm6481_vm7, %v6471_v14, 2102212464  ;;  %vm5845_vm15 = vcmp.lt.s32.totalorder %v16021_v49, 2  ;;  %vm6479_vm14 = vcmp.lt.s32.totalorder %v6459_v16, 2 }
 0x5c8   :  { %v6486_v50 = vsel %vm6478_vm11, %v6465_v20, %v6468_v31  ;;  %v6487_v32 = vsel %vm6481_vm7, %v6474_v24, 920167782  ;;  %v6494_v29 = vshll.u32 %v6454_v5, 8  ;;  %v6350_v18 = vsel %vm6338_vm1, %v16134_v36, %v6331_v48 }
 0x5c9   :  { %v6482_v35 = vsel %vm6478_vm11, %v6462_v21, %v6465_v20  ;;  %v6484_v10 = vsel %vm6480_vm13, %v6468_v31, %v6483_v9  ;;  %v6490_v53 = vsel %vm6478_vm11, %v6468_v31, %v6471_v14  ;;  %v7576_v12 = vmin.u32 %v6268_v26, %v16142_v39 }
 0x5ca   :  { %v6488_v46 = vsel %vm6480_vm13, %v6471_v14, %v6487_v32  ;;  %v6491_v28 = vsel %vm6481_vm7, %v6477_v34, 1326507024  ;;  %v7588_v54 = vadd.s32 4294967169, %v6554_v25  ;;  %v6349_v5 = vsel %vm6339_vm10, %v6346_v11, %v6348_v15 }
 0x5cb   :  { %v6352_v43 = vsel %vm6340_vm3, %v6334_v37, %v6351_v3  ;;  %v6489_v20 = vsel %vm6479_vm14, %v6486_v50, %v6488_v46  ;;  %v6492_v21 = vsel %vm6480_vm13, %v6474_v24, %v6491_v28  ;;  %v6485_v31 = vsel %vm6479_vm14, %v6482_v35, %v6484_v10 }
 0x5cc   :  { %v6493_v26 = vsel %vm6479_vm14, %v6490_v53, %v6492_v21  ;;  %v16193_v9 = vmul.u32.u64.low %v6494_v29, %v6489_v20  ;;  %v16194_v33 = vmul.u32.u64.high %v6494_v29, %v6489_v20, %v16193_v9  ;;  %v6343_v25 = vsel %vm6341_vm2, %v6331_v48, 2102212464 }
 0x5cd   :  { %v6435_v15 = vmul.f32 %v16015_v44, %v6431_v0  ;;  %v16200_v14 = vmul.u32.u64.low %v6494_v29, %v6493_v26  ;;  %v16201_v11 = vmul.u32.u64.high %v6494_v29, %v6493_v26, %v16200_v14  ;;  %v17778_v37 = vshll.u32 %v16102_v2, 23  ;;  %v6440_v0 = vld [vmem:[#allocation8 + $0x1d0] sm:$0xff] }
 0x5ce   :  { %v6180_v24 = vcvt.s32.f32 %v16122_v52  ;;  %v6353_v16 = vsel %vm6339_vm10, %v6350_v18, %v6352_v43  ;;  %v6560_v34 = vadd.s32 1, %v7588_v54  ;;  %v6342_v50 = vsel %vm6338_vm1, %v16128_v7, %v16132_v27 }
 0x5cf   :  { %v6177_v3 = vor.u32 4788187, %v17778_v37  ;;  %v16213_v48 = vmul.u32.u64.low %v16109_v13, %v6349_v5  ;;  %v16214_v32 = vmul.u32.u64.high %v16109_v13, %v6349_v5, %v16213_v48  ;;  %v6501_v35 = vmul.u32 %v6494_v29, %v6485_v31 }
 0x5d0   :  { %v6270_v10 = vclz %v7576_v12  ;;  %v6344_v2 = vsel %vm6340_vm3, %v16134_v36, %v6343_v25  ;;  %v6504_v52 = vadd.s32 1, %v16194_v33  ;;  %vm6561_vm5 = vcmp.gt.s32.totalorder %v6560_v34, 0 }
 0x5d1   :  { %v16222_v18 = vmul.u32.u64.low %v16109_v13, %v6353_v16  ;;  %v16223_v53 = vmul.u32.u64.high %v16109_v13, %v6353_v16, %v16222_v18  ;;  %vm6503_vm9 = vc.u32 %v16201_v11, %v16193_v9  ;;  %v6562_v7 = vsel %vm6561_vm5, %v6560_v34, 0 }
 0x5d2   :  { %v6178_v27 = vand.u32 2147483647, %v6177_v3  ;;  %v6505_v29 = vsel %vm6503_vm9, %v6504_v52, %v16194_v33  ;;  %v17361_v12 = vand.u32 2147483647, %v16139_v58  ;;  %v6564_v46 = vand.u32 31, %v6562_v7 }
 0x5d3   :  { %v16233_v36 = vsel %vm5845_vm15, %v16090_v55, %v16094_v6  ;;  %v17779_v28 = vxor.u32 2147483648, %v16073_v38  ;;  %v16243_v5 = vand.u32 3, %v16080_v61  ;;  %v6506_v33 = vadd.s32 %v6505_v29, %v6501_v35 }
 0x5d4   :  { %8091 = vcosq.f32 %v16117_v22  ;;  %v16247_v43 = vand.u32 3, %v16099_v51  ;;  %v6345_v49 = vsel %vm6339_vm10, %v6342_v50, %v6344_v2  ;;  %v6565_v55 = vsub.s32 32, %v6564_v46 }
 0x5d5   :  { %v16240_v54 = vsel %vm5856_vm12, %v17779_v28, %v16073_v38  ;;  %17780 = vst [vmem:[#allocation19_spill] sm:$0xff] %v16243_v5  ;;  %8093 = vsinq.f32 %v16117_v22  ;;  %v7577_v6 = vadd.s32 4294967294, %v6270_v10  ;;  %v16252_v20 = vadd.f32 %v6440_v0, %v6435_v15  ;;  %v17781_v10 = vld [vmem:[#allocation22_spill] sm:$0xff] }
 0x5d6   :  { %v6507_v38 = vadd.s32 536870912, %v6506_v33  ;;  %v16254_v21 = vmul.f32 %v6180_v24, %v6178_v27  ;;  %v6557_v61 = vand.u32 8388607, %v17361_v12  ;;  %v6567_v31 = vshll.u32 %v17401_v1, %v6564_v46 }
 0x5d7   :  { %v6568_v51 = vshrl.u32 %v17733_v42, %v6565_v55  ;;  %v6361_v26 = vmul.u32 %v16109_v13, %v6345_v49  ;;  %v6570_v25 = vshll.u32 %v17733_v42, %v6564_v46  ;;  %v6571_v22 = vshrl.u32 %v17734_v8, %v6565_v55 }
 0x5d8   :  { %v16261_v17 = vshrl.u32 %v6507_v38, 30  ;;  %v6364_v15 = vadd.s32 1, %v16214_v32  ;;  %v6563_v14 = vshrl.u32 %v6562_v7, 5  ;;  %v6573_v37 = vshll.u32 %v17734_v8, %v6564_v46 }
 0x5d9   :  { %v6574_v3 = vshrl.u32 %v17656_v40, %v6565_v55  ;;  %vm7578_vm12 = vcmp.lt.s32.totalorder %v7577_v6, 0  ;;  %vm6363_vm4 = vc.u32 %v16223_v53, %v16213_v48  ;;  %v6657_v13 = vand.u32 2139095040, %v16252_v20 }
 0x5da   :  { %v6509_v24 = vshll.u32 %v16261_v17, 30  ;;  %v6558_v16 = vor.u32 8388608, %v6557_v61  ;;  %v6569_v34 = vor.u32 %v6568_v51, %v6567_v31  ;;  %v6576_v50 = vshll.u32 %v17656_v40, %v6564_v46 }
 0x5db   :  { %v6577_v35 = vshrl.u32 %v17657_v41, %v6565_v55  ;;  %vm6100_vm8 = vcmp.lt.s32.totalorder %v17781_v10, 0  ;;  %v6572_v52 = vor.u32 %v6571_v22, %v6570_v25  ;;  %v6579_v18 = vshll.u32 %v17657_v41, %v6564_v46 }
 0x5dc   :  { %v16275_v2 = vsub.s32 %v6506_v33, %v6509_v24  ;;  %v6580_v7 = vshrl.u32 %v17658_v60, %v6565_v55  ;;  %v16279_v27 = vsel %vm7578_vm12, 0, %v7577_v6  ;;  %v6575_v0 = vor.u32 %v6574_v3, %v6573_v37 }
 0x5dd   :  { %v6578_v29 = vor.u32 %v6577_v35, %v6576_v50  ;;  %vm6582_vm0 = vcmp.lt.s32.totalorder %v6563_v14, 1  ;;  %v6566_v28 = vshrl.u32 %v17401_v1, %v6565_v55  ;;  %vm6584_vm1 = vcmp.lt.s32.totalorder %v6563_v14, 3 }
 0x5de   :  { %v6581_v49 = vor.u32 %v6580_v7, %v6579_v18  ;;  %v6658_v38 = vshrl.u32 %v6657_v13, 23  ;;  %v17782_v61 = vand.u32 2147483647, %v17781_v10  ;;  %v6365_v46 = vsel %vm6363_vm4, %v6364_v15, %v16214_v32 }
 0x5df   :  { %vm6583_vm10 = vcmp.lt.s32.totalorder %v6563_v14, 2  ;;  %vm6585_vm3 = vcmp.lt.s32.totalorder %v6563_v14, 4  ;;  %v6598_v6 = vshll.u32 %v6558_v16, 8  ;;  %v6512_v31 = vsub.s32 0, %v16275_v2 }
 0x5e0   :  { %vm16284_vm2 = vcmp.le.f32.partialorder %v17782_v61, 0.7853982  ;;  %v6587_v55 = vsel %vm6585_vm3, %v6575_v0, 2102212464  ;;  %v6590_v51 = vsel %vm6582_vm0, %v6569_v34, %v6572_v52  ;;  %v6591_v25 = vsel %vm6585_vm3, %v6578_v29, 920167782 }
 0x5e1   :  { %v6184_v22 = vsub.s32 4, %v15879_v47  ;;  %v6592_v37 = vsel %vm6584_vm1, %v6575_v0, %v6591_v25  ;;  %v6594_v3 = vsel %vm6582_vm0, %v6572_v52, %v6575_v0  ;;  %v6595_v24 = vsel %vm6585_vm3, %v6581_v49, 1326507024  ;;  %v8092_v13 = vpop.eup %8091 }
 0x5e2   :  { %v16297_v50 = vadd.s32 %v6365_v46, %v6361_v26  ;;  %v6586_v32 = vsel %vm6582_vm0, %v6566_v28, %v6569_v34  ;;  %v6588_v15 = vsel %vm6584_vm1, %v6572_v52, %v6587_v55  ;;  %v7592_v16 = vadd.s32 4294967169, %v6658_v38  ;;  %v8094_v35 = vpop.eup %8093  ;;  %v6432_v55 = vld [vmem:[#allocation7 + $0x1d8] sm:$0xff] }
 0x5e3   :  { %v6182_v18 = vxor.u32 2147483648, %v16254_v21  ;;  %v6278_v7 = vsub.s32 4294967266, %v16279_v27  ;;  %v6593_v61 = vsel %vm6583_vm10, %v6590_v51, %v6592_v37  ;;  %v6596_v25 = vsel %vm6584_vm1, %v6578_v29, %v6595_v24 }
 0x5e4   :  { %v7585_v0 = vmin.u32 %v6512_v31, %v16275_v2  ;;  %v6597_v49 = vsel %vm6583_vm10, %v6594_v3, %v6596_v25  ;;  %v16307_v26 = vmul.u32.u64.low %v6598_v6, %v6593_v61  ;;  %v16308_v46 = vmul.u32.u64.high %v6598_v6, %v6593_v61, %v16307_v26  ;;  %v6441_v61 = vld [vmem:[#allocation8 + $0x1d8] sm:$0xff] }
 0x5e5   :  { %v6185_v34 = vsel %vm6100_vm8, %v6184_v22, %v15879_v47  ;;  %v6589_v52 = vsel %vm6583_vm10, %v6586_v32, %v6588_v15  ;;  %v16315_v28 = vmul.u32.u64.low %v6598_v6, %v6597_v49  ;;  %v16316_v38 = vmul.u32.u64.high %v6598_v6, %v6597_v49, %v16315_v28 }
 0x5e6   :  { %v16322_v29 = vsel %vm16025_vm6, %v17768_v23, %v16240_v54  ;;  %vm6090_vm11 = vcmp.eq.s32.totalorder %v16247_v43, 0  ;;  %v6367_v31 = vadd.s32 536870912, %v16297_v50  ;;  %v6664_v51 = vadd.s32 1, %v7592_v16 }
 0x5e7   :  { %vm6093_vm7 = vcmp.eq.s32.totalorder %v16247_v43, 2  ;;  %v6183_v47 = vsel %vm6100_vm8, %v6182_v18, %v16254_v21  ;;  %v6258_v14 = vadd.s32 %v15975_v19, %v15984_v4  ;;  %v6274_v22 = vsub.s32 32, %v16279_v27 }
 0x5e8   :  { %v6187_v30 = vsel %vm16284_vm2, 0, %v6185_v34  ;;  %v6279_v54 = vadd.s32 127, %v6278_v7  ;;  %v6514_v37 = vclz %v7585_v0  ;;  %v6605_v3 = vmul.u32 %v6598_v6, %v6589_v52 }
 0x5e9   :  { %v6094_v24 = vxor.u32 2147483648, %v8092_v13  ;;  %v6436_v32 = vmul.f32 %v16015_v44, %v6432_v55  ;;  %vm6607_vm6 = vc.u32 %v16316_v38, %v16307_v26  ;;  %v6608_v15 = vadd.s32 1, %v16308_v46 }
 0x5ea   :  { %v6091_v21 = vxor.u32 2147483648, %v8094_v35  ;;  %v6186_v19 = vsel %vm16284_vm2, %v17781_v10, %v6183_v47  ;;  %v16342_v4 = vshrl.u32 %v6367_v31, 30  ;;  %vm6665_vm13 = vcmp.gt.s32.totalorder %v6664_v51, 0 }
 0x5eb   :  { %v6275_v16 = vshll.u32 %v16142_v39, %v16279_v27  ;;  %v6276_v6 = vshrl.u32 %v6258_v14, %v6274_v22  ;;  %v6609_v18 = vsel %vm6607_vm6, %v6608_v15, %v16308_v46  ;;  %v6666_v44 = vsel %vm6665_vm13, %v6664_v51, 0 }
 0x5ec   :  { %v6280_v7 = vshll.u32 %v6279_v54, 23  ;;  %v7586_v25 = vadd.s32 4294967294, %v6514_v37  ;;  %v6610_v0 = vadd.s32 %v6609_v18, %v6605_v3  ;;  %v17360_v49 = vand.u32 2147483647, %v16252_v20 }
 0x5ed   :  { %v16350_v33 = vsel %vm6093_vm7, %v6094_v24, %v8094_v35  ;;  %v16352_v34 = vadd.s32 3, %v6187_v30  ;;  %vm6204_vm15 = vcmp.lt.s32.totalorder %v15728_v63, 0  ;;  %v6668_v52 = vand.u32 31, %v6666_v44 }
 0x5ee   :  { %v16357_v39 = vsel %vm6090_vm11, %v8092_v13, %v6091_v21  ;;  %v6288_v27 = vsub.s32 4, %v16104_v57  ;;  %v6369_v46 = vshll.u32 %v16342_v4, 30  ;;  %v6611_v28 = vadd.s32 536870912, %v6610_v0 }
 0x5ef   :  { %8095 = vcosq.f32 %v6186_v19  ;;  %v6277_v31 = vor.u32 %v6276_v6, %v6275_v16  ;;  %v16361_v55 = vadd.f32 %v6441_v61, %v6436_v32  ;;  %v6669_v35 = vsub.s32 32, %v6668_v52 }
 0x5f0   :  { %v6281_v51 = vor.u32 4788187, %v6280_v7  ;;  %vm7587_vm14 = vcmp.lt.s32.totalorder %v7586_v25, 0  ;;  %v6661_v47 = vand.u32 8388607, %v17360_v49  ;;  %v6671_v14 = vshll.u32 %v17401_v1, %v6668_v52 }
 0x5f1   :  { %v6672_v13 = vshrl.u32 %v17733_v42, %v6669_v35  ;;  %v6674_v22 = vshll.u32 %v17733_v42, %v6668_v52  ;;  %v6675_v30 = vshrl.u32 %v17734_v8, %v6669_v35  ;;  %v6680_v54 = vshll.u32 %v17656_v40, %v6668_v52 }
 0x5f2   :  { %v16371_v37 = vsub.s32 %v16297_v50, %v6369_v46  ;;  %v16373_v3 = vshrl.u32 %v6611_v28, 30  ;;  %v16375_v24 = vshrl.u32 %v6666_v44, 5  ;;  %v6681_v32 = vshrl.u32 %v17657_v41, %v6669_v35 }
 0x5f3   :  { %v6284_v15 = vcvt.s32.f32 %v6277_v31  ;;  %v6677_v21 = vshll.u32 %v17734_v8, %v6668_v52  ;;  %v6678_v16 = vshrl.u32 %v17656_v40, %v6669_v35  ;;  %v6683_v6 = vshll.u32 %v17657_v41, %v6668_v52 }
 0x5f4   :  { %v6282_v18 = vand.u32 2147483647, %v6281_v51  ;;  %v16382_v7 = vsel %vm7587_vm14, 0, %v7586_v25  ;;  %v6662_v61 = vor.u32 8388608, %v6661_v47  ;;  %v6761_v50 = vand.u32 2139095040, %v16361_v55 }
 0x5f5   :  { %vm6089_vm5 = vcmp.lt.s32.totalorder %v16247_v43, 2  ;;  %v6673_v44 = vor.u32 %v6672_v13, %v6671_v14  ;;  %v6676_v46 = vor.u32 %v6675_v30, %v6674_v22  ;;  %v6682_v28 = vor.u32 %v6681_v32, %v6680_v54 }
 0x5f6   :  { %v6684_v31 = vshrl.u32 %v17658_v60, %v6669_v35  ;;  %v6289_v49 = vsel %vm6204_vm15, %v6288_v27, %v16104_v57  ;;  %v6372_v52 = vsub.s32 0, %v16371_v37  ;;  %v6613_v51 = vshll.u32 %v16373_v3, 30 }
 0x5f7   :  { %vm6686_vm9 = vcmp.lt.s32.totalorder %v16375_v24, 1  ;;  %8097 = vsinq.f32 %v6186_v19  ;;  %v17785_v25 = vand.u32 2147483647, %v15728_v63  ;;  %v6679_v14 = vor.u32 %v6678_v16, %v6677_v21 }
 0x5f8   :  { %v6685_v13 = vor.u32 %v6684_v31, %v6683_v6  ;;  %vm6689_vm4 = vcmp.lt.s32.totalorder %v16375_v24, 4  ;;  %v6285_v22 = vmul.f32 %v6284_v15, %v6282_v18  ;;  %v6522_v57 = vsub.s32 4294967266, %v16382_v7 }
 0x5f9   :  { %vm16395_vm12 = vcmp.le.f32.partialorder %v17785_v25, 0.7853982  ;;  %vm6688_vm8 = vcmp.lt.s32.totalorder %v16375_v24, 3  ;;  %v16402_v27 = vshll.u32 %v6662_v61, 8  ;;  %vm6086_vm0 = vweird.f32 %v17774_v59 }
 0x5fa   :  { %vm6687_vm1 = vcmp.lt.s32.totalorder %v16375_v24, 2  ;;  %v6694_v19 = vsel %vm6686_vm9, %v6673_v44, %v6676_v46  ;;  %v6695_v30 = vsel %vm6689_vm4, %v6682_v28, 920167782  ;;  %v6762_v54 = vshrl.u32 %v6761_v50, 23 }
 0x5fb   :  { %v7580_v32 = vmin.u32 %v6372_v52, %v16371_v37  ;;  %v6502_v15 = vadd.s32 %v16193_v9, %v16201_v11  ;;  %v6518_v21 = vsub.s32 32, %v16382_v7  ;;  %v16414_v16 = vsub.s32 %v6610_v0, %v6613_v51 }
 0x5fc   :  { %v6670_v6 = vshrl.u32 %v17401_v1, %v6669_v35  ;;  %v6696_v18 = vsel %vm6688_vm8, %v6679_v14, %v6695_v30  ;;  %v6698_v61 = vsel %vm6686_vm9, %v6676_v46, %v6679_v14  ;;  %v6699_v50 = vsel %vm6689_vm4, %v6685_v13, 1326507024  ;;  %v16423_v31 = vpop.eup %8095 }
 0x5fd   :  { %v6523_v52 = vadd.s32 127, %v6522_v57  ;;  %v6691_v9 = vsel %vm6689_vm4, %v6679_v14, 2102212464  ;;  %v6697_v11 = vsel %vm6687_vm1, %v6694_v19, %v6696_v18  ;;  %v6700_v0 = vsel %vm6688_vm8, %v6682_v28, %v6699_v50 }
 0x5fe   :  { %v6701_v35 = vsel %vm6687_vm1, %v6698_v61, %v6700_v0  ;;  %v16434_v51 = vmul.u32.u64.low %v16402_v27, %v6697_v11  ;;  %v16435_v25 = vmul.u32.u64.high %v16402_v27, %v6697_v11, %v16434_v51  ;;  %v7596_v13 = vadd.s32 4294967169, %v6762_v54 }
 0x5ff   :  { %v6374_v30 = vclz %v7580_v32  ;;  %v6616_v57 = vsub.s32 0, %v16414_v16  ;;  %v16440_v14 = vmul.u32.u64.low %v16402_v27, %v6701_v35  ;;  %v16441_v12 = vmul.u32.u64.high %v16402_v27, %v6701_v35, %v16440_v14 }
 0x600   :  { %8099 = vcosq.f32 %v16322_v29  ;;  %v6690_v28 = vsel %vm6686_vm9, %v6670_v6, %v6673_v44  ;;  %v6692_v19 = vsel %vm6688_vm8, %v6676_v46, %v6691_v9  ;;  %v6768_v18 = vadd.s32 1, %v7596_v13 }
 0x601   :  { %v6096_v54 = vsel %vm6089_vm5, %v16357_v39, %v16350_v33  ;;  %v16453_v32 = vand.u32 3, %v16352_v34  ;;  %v6286_v61 = vxor.u32 2147483648, %v6285_v22  ;;  %v6291_v50 = vsel %vm16395_vm12, 0, %v6289_v49 }
 0x602   :  { %v6519_v11 = vshll.u32 %v16275_v2, %v16382_v7  ;;  %v6520_v44 = vshrl.u32 %v6502_v15, %v6518_v21  ;;  %v6524_v6 = vshll.u32 %v6523_v52, 23  ;;  %vm6769_vm2 = vcmp.gt.s32.totalorder %v6768_v18, 0  ;;  %v5972_v2 = vld [vmem:[#allocation5 + $0x1a0] sm:$0xff] }
 0x603   :  { %v7581_v46 = vadd.s32 4294967294, %v6374_v30  ;;  %v7589_v9 = vmin.u32 %v6616_v57, %v16414_v16  ;;  %v6693_v43 = vsel %vm6687_vm1, %v6690_v28, %v6692_v19  ;;  %v6712_v33 = vadd.s32 1, %v16435_v25 }
 0x604   :  { %8101 = vsinq.f32 %v16322_v29  ;;  %v6295_v34 = vadd.s32 3, %v6291_v50  ;;  %vm6711_vm10 = vc.u32 %v16441_v12, %v16434_v51  ;;  %v6770_v49 = vsel %vm6769_vm2, %v6768_v18, 0  ;;  %v8098_v39 = vpop.eup %8097 }
 0x605   :  { %v6097_v7 = vsel %vm6086_vm0, nan, %v6096_v54  ;;  %vm6197_vm3 = vcmp.eq.s32.totalorder %v16453_v32, 2  ;;  %v6198_v15 = vxor.u32 2147483648, %v16423_v31  ;;  %v6287_v24 = vsel %vm6204_vm15, %v6286_v61, %v6285_v22 }
 0x606   :  { %v6521_v21 = vor.u32 %v6520_v44, %v6519_v11  ;;  %v6525_v52 = vor.u32 4788187, %v6524_v6  ;;  %v6709_v29 = vmul.u32 %v16402_v27, %v6693_v43  ;;  %v6772_v0 = vand.u32 31, %v6770_v49 }
 0x607   :  { %vm7582_vm11 = vcmp.lt.s32.totalorder %v7581_v46, 0  ;;  %v6618_v35 = vclz %v7589_v9  ;;  %v6713_v13 = vsel %vm6711_vm10, %v6712_v33, %v16435_v25  ;;  %v17362_v30 = vand.u32 2147483647, %v16361_v55 }
 0x608   :  { %vm6194_vm7 = vcmp.eq.s32.totalorder %v16453_v32, 0  ;;  %v16476_v59 = vand.u32 3, %v6295_v34  ;;  %v16478_v57 = vmul.f32 %v6097_v7, %v5972_v2  ;;  %v16480_v14 = vsub.s32 32, %v6772_v0 }
 0x609   :  { %v6195_v22 = vxor.u32 2147483648, %v8098_v39  ;;  %v16484_v28 = vsel %vm6197_vm3, %v6198_v15, %v8098_v39  ;;  %v6290_v27 = vsel %vm16395_vm12, %v15728_v63, %v6287_v24  ;;  %v16491_v25 = vadd.s32 %v16213_v48, %v16223_v53  ;;  %v16523_v24 = vld [vmem:[#allocation2 + $0xf] ss:$0 sm:$0xff] }
 0x60a   :  { %v16493_v19 = vsel %vm7582_vm11, 0, %v7581_v46  ;;  %v6526_v18 = vand.u32 2147483647, %v6525_v52  ;;  %v6528_v54 = vcvt.s32.f32 %v6521_v21  ;;  %v16495_v61 = vadd.s32 %v6713_v13, %v6709_v29  ;;  %v6881_v21 = vld [vmem:[#allocation7 + $0x1e0] sm:$0xff] }
 0x60b   :  { %v7590_v50 = vadd.s32 4294967294, %v6618_v35  ;;  %v6765_v11 = vand.u32 8388607, %v17362_v30  ;;  %v6775_v44 = vshll.u32 %v17401_v1, %v6772_v0  ;;  %v6778_v6 = vshll.u32 %v17733_v42, %v6772_v0 }
 0x60c   :  { %v6776_v47 = vshrl.u32 %v17733_v42, %v16480_v14  ;;  %v6779_v48 = vshrl.u32 %v17734_v8, %v16480_v14  ;;  %v6781_v53 = vshll.u32 %v17734_v8, %v6772_v0  ;;  %v6782_v46 = vshrl.u32 %v17656_v40, %v16480_v14 }
 0x60d   :  { %v16508_v9 = vpop.eup %8099  ;;  %vm6193_vm6 = vcmp.lt.s32.totalorder %v16453_v32, 2  ;;  %v6196_v43 = vsel %vm6194_vm7, %v16423_v31, %v6195_v22  ;;  %8103 = vcosq.f32 %v6290_v27  ;;  %v16514_v33 = vshrl.u32 %v6770_v49, 5 }
 0x60e   :  { %17788 = vst [vmem:[#allocation16_spill] sm:$0xff] %v16508_v9  ;;  %v6784_v34 = vshll.u32 %v17656_v40, %v6772_v0  ;;  %v6382_v39 = vsub.s32 4294967266, %v16493_v19  ;;  %vm6448_vm13 = vcmp.lt.s32.totalorder %v16055_v62, 0  ;;  %v6715_v2 = vadd.s32 536870912, %v16495_v61 }
 0x60f   :  { %v6785_v7 = vshrl.u32 %v17657_v41, %v16480_v14  ;;  %v6787_v15 = vshll.u32 %v17657_v41, %v6772_v0  ;;  %v6529_v31 = vmul.f32 %v6528_v54, %v6526_v18  ;;  %vm7591_vm15 = vcmp.lt.s32.totalorder %v7590_v50, 0 }
 0x610   :  { %v6766_v49 = vor.u32 8388608, %v6765_v11  ;;  %v6788_v52 = vshrl.u32 %v17658_v60, %v16480_v14  ;;  %vm6190_vm14 = vweird.f32 %v17781_v10  ;;  %v6777_v29 = vor.u32 %v6776_v47, %v6775_v44 }
 0x611   :  { %v6780_v35 = vor.u32 %v6779_v48, %v6778_v6  ;;  %v6783_v13 = vor.u32 %v6782_v46, %v6781_v53  ;;  %v6786_v22 = vor.u32 %v6785_v7, %v6784_v34  ;;  %v16528_v30 = vpop.eup %8101  ;;  %8105 = vsinq.f32 %v6290_v27  ;;  %v6890_v27 = vld [vmem:[#allocation8 + $0x1e0] sm:$0xff] }
 0x612   :  { %17789 = vst [vmem:[#allocation29_spill] sm:$0xff] %v16528_v30  ;;  %v17790_v0 = vand.u32 2147483647, %v16055_v62  ;;  %v6789_v18 = vor.u32 %v6788_v52, %v6787_v15  ;;  %vm6790_vm9 = vcmp.lt.s32.totalorder %v16514_v33, 1  ;;  %v6885_v54 = vmul.f32 %v16523_v24, %v6881_v21 }
 0x613   :  { %v16538_v11 = vsel %vm7591_vm15, 0, %v7590_v50  ;;  %v16540_v44 = vshrl.u32 %v6715_v2, 30  ;;  %vm6792_vm12 = vcmp.lt.s32.totalorder %v16514_v33, 3  ;;  %vm6793_vm4 = vcmp.lt.s32.totalorder %v16514_v33, 4 }
 0x614   :  { %vm16532_vm5 = vcmp.le.f32.partialorder %v17790_v0, 0.7853982  ;;  %v6378_v6 = vsub.s32 32, %v16493_v19  ;;  %v6383_v47 = vadd.s32 127, %v6382_v39  ;;  %vm6791_vm8 = vcmp.lt.s32.totalorder %v16514_v33, 2 }
 0x615   :  { %v16546_v48 = vshll.u32 %v6766_v49, 8  ;;  %v6530_v53 = vxor.u32 2147483648, %v6529_v31  ;;  %v6798_v46 = vsel %vm6790_vm9, %v6777_v29, %v6780_v35  ;;  %v6799_v50 = vsel %vm6793_vm4, %v6786_v22, 920167782 }
 0x616   :  { %v6802_v34 = vsel %vm6790_vm9, %v6780_v35, %v6783_v13  ;;  %v6626_v2 = vsub.s32 4294967266, %v16538_v11  ;;  %v6800_v7 = vsel %vm6792_vm12, %v6783_v13, %v6799_v50  ;;  %v6803_v39 = vsel %vm6793_vm4, %v6789_v18, 1326507024 }
 0x617   :  { %v16559_v15 = vadd.f32 %v6890_v27, %v6885_v54  ;;  %v6717_v21 = vshll.u32 %v16540_v44, 30  ;;  %v6774_v49 = vshrl.u32 %v17401_v1, %v16480_v14  ;;  %v6801_v52 = vsel %vm6791_vm8, %v6798_v46, %v6800_v7 }
 0x618   :  { %v6804_v0 = vsel %vm6792_vm12, %v6786_v22, %v6803_v39  ;;  %v6795_v9 = vsel %vm6793_vm4, %v6783_v13, 2102212464  ;;  %v16573_v18 = vmul.u32.u64.low %v16546_v48, %v6801_v52  ;;  %v16574_v54 = vmul.u32.u64.high %v16546_v48, %v6801_v52, %v16573_v18 }
 0x619   :  { %v6805_v50 = vsel %vm6791_vm8, %v6802_v34, %v6804_v0  ;;  %v6200_v14 = vsel %vm6193_vm6, %v6196_v43, %v16484_v28  ;;  %v6532_v27 = vsub.s32 4, %v16261_v17  ;;  %vm6552_vm0 = vcmp.lt.s32.totalorder %v16139_v58, 0 }
 0x61a   :  { %v16583_v22 = vmul.u32.u64.low %v16546_v48, %v6805_v50  ;;  %v16584_v46 = vmul.u32.u64.high %v16546_v48, %v6805_v50, %v16583_v22  ;;  %v6531_v13 = vsel %vm6448_vm13, %v6530_v53, %v6529_v31  ;;  %v6606_v34 = vadd.s32 %v16307_v26, %v16316_v38  ;;  %v16591_v52 = vpop.eup %8103 }
 0x61b   :  { %v6622_v7 = vsub.s32 32, %v16538_v11  ;;  %v6627_v39 = vadd.s32 127, %v6626_v2  ;;  %v16594_v32 = vsub.s32 %v16495_v61, %v6717_v21  ;;  %v6794_v28 = vsel %vm6790_vm9, %v6774_v49, %v6777_v29  ;;  %v5973_v2 = vld [vmem:[#allocation5 + $0x1a8] sm:$0xff] }
 0x61c   :  { %v6796_v43 = vsel %vm6792_vm12, %v6780_v35, %v6795_v9  ;;  %v6901_v0 = vand.u32 2139095040, %v16559_v15  ;;  %v6201_v31 = vsel %vm6190_vm14, nan, %v6200_v14  ;;  %v6379_v26 = vshll.u32 %v16371_v37, %v16493_v19  ;;  %v6882_v35 = vld [vmem:[#allocation7 + $0x1e8] sm:$0xff] }
 0x61d   :  { %v6380_v38 = vshrl.u32 %v16491_v25, %v6378_v6  ;;  %v6384_v53 = vshll.u32 %v6383_v47, 23  ;;  %v6533_v61 = vsel %vm6448_vm13, %v6532_v27, %v16261_v17  ;;  %v6534_v9 = vsel %vm16532_vm5, %v16055_v62, %v6531_v13  ;;  %v6891_v22 = vld [vmem:[#allocation8 + $0x1e8] sm:$0xff] }
 0x61e   :  { %v6636_v29 = vsub.s32 4, %v16373_v3  ;;  %v6902_v10 = vshrl.u32 %v6901_v0, 23  ;;  %v6623_v21 = vshll.u32 %v16414_v16, %v16538_v11  ;;  %v6624_v37 = vshrl.u32 %v6606_v34, %v6622_v7  ;;  %v16618_v6 = vpop.eup %8105 }
 0x61f   :  { %v6797_v25 = vsel %vm6791_vm8, %v6794_v28, %v6796_v43  ;;  %v6816_v19 = vadd.s32 1, %v16574_v54  ;;  %v6628_v17 = vshll.u32 %v6627_v39, 23  ;;  %v6720_v47 = vsub.s32 0, %v16594_v32 }
 0x620   :  { %vm6815_vm1 = vc.u32 %v16584_v46, %v16573_v18  ;;  %v7601_v49 = vadd.s32 4294967169, %v6902_v10  ;;  %v16623_v50 = vor.u32 %v6380_v38, %v6379_v26  ;;  %v16625_v14 = vor.u32 4788187, %v6384_v53  ;;  %v6883_v10 = vld [vmem:[#allocation7 + $0x1f0] sm:$0xff] }
 0x621   :  { %v6411_v16 = vmul.f32 %v6201_v31, %v5973_v2  ;;  %v6886_v11 = vmul.f32 %v16523_v24, %v6882_v35  ;;  %v6535_v33 = vsel %vm16532_vm5, 0, %v6533_v61  ;;  %8107 = vcosq.f32 %v6534_v9 }
 0x622   :  { %v6813_v27 = vmul.u32 %v16546_v48, %v6797_v25  ;;  %v6908_v13 = vadd.s32 1, %v7601_v49  ;;  %8109 = vsinq.f32 %v6534_v9  ;;  %v6625_v34 = vor.u32 %v6624_v37, %v6623_v21 }
 0x623   :  { %v6637_v7 = vsel %vm6552_vm0, %v6636_v29, %v16373_v3  ;;  %v6817_v39 = vsel %vm6815_vm1, %v6816_v19, %v16574_v54  ;;  %v6629_v28 = vor.u32 4788187, %v6628_v17  ;;  %v7593_v43 = vmin.u32 %v6720_v47, %v16594_v32 }
 0x624   :  { %v17365_v0 = vand.u32 2147483647, %v16559_v15  ;;  %vm6909_vm2 = vcmp.gt.s32.totalorder %v6908_v13, 0  ;;  %v16639_v23 = vadd.f32 %v16478_v57, %v16083_v45  ;;  %v6539_v48 = vadd.s32 3, %v6535_v33 }
 0x625   :  { %v16641_v31 = vadd.f32 %v6891_v22, %v6886_v11  ;;  %v6910_v26 = vsel %vm6909_vm2, %v6908_v13, 0  ;;  %v16645_v3 = vadd.f32 %v6411_v16, %v16086_v56  ;;  %v17793_v54 = vand.u32 2147483647, %v16139_v58 }
 0x626   :  { %v16653_v2 = vadd.s32 %v6817_v39, %v6813_v27  ;;  %v6912_v9 = vand.u32 31, %v6910_v26  ;;  %v6630_v29 = vand.u32 2147483647, %v6629_v28  ;;  %v6632_v35 = vcvt.s32.f32 %v6625_v34 }
 0x627   :  { %vm16649_vm10 = vcmp.le.f32.partialorder %v17793_v54, 0.7853982  ;;  %v6722_v56 = vclz %v7593_v43  ;;  %v6905_v21 = vand.u32 8388607, %v17365_v0  ;;  %v16662_v25 = vand.u32 3, %v6539_v48 }
 0x628   :  { %v6639_v61 = vsel %vm16649_vm10, 0, %v6637_v7  ;;  %v6913_v19 = vsub.s32 32, %v6912_v9  ;;  %v7005_v17 = vand.u32 2139095040, %v16641_v31  ;;  %v6819_v49 = vadd.s32 536870912, %v16653_v2 }
 0x629   :  { %v16665_v47 = vadd.s32 3, %v6639_v61  ;;  %v6911_v16 = vshrl.u32 %v6910_v26, 5  ;;  %v6915_v11 = vshll.u32 %v17401_v1, %v6912_v9  ;;  %v16671_v33 = vadd.s32 %v16434_v51, %v16441_v12 }
 0x62a   :  { %v16674_v27 = vmul.f32 %v16523_v24, %v6883_v10  ;;  %v6916_v22 = vshrl.u32 %v17733_v42, %v6913_v19  ;;  %v6918_v13 = vshll.u32 %v17733_v42, %v6912_v9  ;;  %v6633_v34 = vmul.f32 %v6632_v35, %v6630_v29 }
 0x62b   :  { %v7594_v7 = vadd.s32 4294967294, %v6722_v56  ;;  %v6906_v39 = vor.u32 8388608, %v6905_v21  ;;  %v6919_v28 = vshrl.u32 %v17734_v8, %v6913_v19  ;;  %vm6542_vm3 = vcmp.eq.s32.totalorder %v16662_v25, 0 }
 0x62c   :  { %vm6545_vm11 = vcmp.eq.s32.totalorder %v16662_v25, 2  ;;  %v6921_v43 = vshll.u32 %v17734_v8, %v6912_v9  ;;  %v6922_v12 = vshrl.u32 %v17656_v40, %v6913_v19  ;;  %v6924_v51 = vshll.u32 %v17656_v40, %v6912_v9 }
 0x62d   :  { %v7006_v48 = vshrl.u32 %v7005_v17, 23  ;;  %v16684_v26 = vshrl.u32 %v6819_v49, 30  ;;  %v6914_v54 = vshrl.u32 %v17401_v1, %v6913_v19  ;;  %v6917_v61 = vor.u32 %v6916_v22, %v6915_v11 }
 0x62e   :  { %vm6930_vm7 = vcmp.lt.s32.totalorder %v6911_v16, 1  ;;  %v8108_v29 = vpop.eup %8107  ;;  %v6920_v35 = vor.u32 %v6919_v28, %v6918_v13  ;;  %v6923_v56 = vor.u32 %v6922_v12, %v6921_v43  ;;  %v6925_v10 = vshrl.u32 %v17657_v41, %v6913_v19 }
 0x62f   :  { %v6927_v21 = vshll.u32 %v17657_v41, %v6912_v9  ;;  %v8110_v45 = vpop.eup %8109  ;;  %v6634_v37 = vxor.u32 2147483648, %v6633_v34  ;;  %vm7595_vm6 = vcmp.lt.s32.totalorder %v7594_v7, 0  ;;  %v6928_v38 = vshrl.u32 %v17658_v60, %v6913_v19 }
 0x630   :  { %vm6933_vm13 = vcmp.lt.s32.totalorder %v6911_v16, 4  ;;  %vm6541_vm15 = vcmp.lt.s32.totalorder %v16662_v25, 2  ;;  %v6926_v17 = vor.u32 %v6925_v10, %v6924_v51  ;;  %vm6932_vm14 = vcmp.lt.s32.totalorder %v6911_v16, 3 }
 0x631   :  { %v6935_v49 = vsel %vm6933_vm13, %v6923_v56, 2102212464  ;;  %v7605_v11 = vadd.s32 4294967169, %v7006_v48  ;;  %v6821_v22 = vshll.u32 %v16684_v26, 30  ;;  %v6929_v13 = vor.u32 %v6928_v38, %v6927_v21 }
 0x632   :  { %vm6931_vm5 = vcmp.lt.s32.totalorder %v6911_v16, 2  ;;  %v6938_v28 = vsel %vm6930_vm7, %v6917_v61, %v6920_v35  ;;  %v6934_v9 = vsel %vm6930_vm7, %v6914_v54, %v6917_v61  ;;  %v6936_v43 = vsel %vm6932_vm14, %v6920_v35, %v6935_v49 }
 0x633   :  { %v6939_v19 = vsel %vm6933_vm13, %v6926_v17, 920167782  ;;  %v6946_v12 = vshll.u32 %v6906_v39, 8  ;;  %v6543_v57 = vxor.u32 2147483648, %v8110_v45  ;;  %v6546_v0 = vxor.u32 2147483648, %v8108_v29 }
 0x634   :  { %v6940_v51 = vsel %vm6932_vm14, %v6923_v56, %v6939_v19  ;;  %v6942_v10 = vsel %vm6930_vm7, %v6920_v35, %v6923_v56  ;;  %v6635_v48 = vsel %vm6552_vm0, %v6634_v37, %v6633_v34  ;;  %v6943_v21 = vsel %vm6933_vm13, %v6929_v13, 1326507024 }
 0x635   :  { %v6941_v38 = vsel %vm6931_vm5, %v6938_v28, %v6940_v51  ;;  %v7012_v30 = vadd.s32 1, %v7605_v11  ;;  %vm6538_vm9 = vweird.f32 %v16055_v62  ;;  %v6725_v54 = vsel %vm7595_vm6, 0, %v7594_v7  ;;  %v6884_v11 = vld [vmem:[#allocation7 + $0x1f8] sm:$0xff] }
 0x636   :  { %v16706_v39 = vsub.s32 %v16653_v2, %v6821_v22  ;;  %v6937_v61 = vsel %vm6931_vm5, %v6934_v9, %v6936_v43  ;;  %v6944_v49 = vsel %vm6932_vm14, %v6926_v17, %v6943_v21  ;;  %v6544_v34 = vsel %vm6542_vm3, %v8108_v29, %v6543_v57  ;;  %v6892_v2 = vld [vmem:[#allocation8 + $0x1f0] sm:$0xff] }
 0x637   :  { %v6945_v35 = vsel %vm6931_vm5, %v6942_v10, %v6944_v49  ;;  %v16711_v56 = vmul.u32.u64.low %v6946_v12, %v6941_v38  ;;  %v16712_v37 = vmul.u32.u64.high %v6946_v12, %v6941_v38, %v16711_v56  ;;  %vm7013_vm12 = vcmp.gt.s32.totalorder %v7012_v30, 0 }
 0x638   :  { %v6547_v7 = vsel %vm6545_vm11, %v6546_v0, %v8110_v45  ;;  %v16719_v22 = vmul.u32.u64.low %v6946_v12, %v6945_v35  ;;  %v16720_v13 = vmul.u32.u64.high %v6946_v12, %v6945_v35, %v16719_v22  ;;  %v6638_v16 = vsel %vm16649_vm10, %v16139_v58, %v6635_v48 }
 0x639   :  { %v6726_v17 = vsub.s32 32, %v6725_v54  ;;  %v6730_v28 = vsub.s32 4294967266, %v6725_v54  ;;  %v7014_v9 = vsel %vm7013_vm12, %v7012_v30, 0  ;;  %v16726_v43 = vand.u32 3, %v16665_v47  ;;  %v6424_v22 = vld [vmem:[#allocation5 + $0x1c0] sm:$0xff] }
 0x63a   :  { %v6824_v57 = vsub.s32 0, %v16706_v39  ;;  %v6953_v29 = vmul.u32 %v6946_v12, %v6937_v61  ;;  %v17367_v0 = vand.u32 2147483647, %v16641_v31  ;;  %v16731_v45 = vmul.f32 %v16523_v24, %v6884_v11 }
 0x63b   :  { %v16734_v19 = vadd.f32 %v6892_v2, %v16674_v27  ;;  %v6956_v53 = vadd.s32 1, %v16712_v37  ;;  %v7016_v51 = vand.u32 31, %v7014_v9  ;;  %v6548_v30 = vsel %vm6541_vm15, %v6544_v34, %v6547_v7 }
 0x63c   :  { %8111 = vcosq.f32 %v6638_v16  ;;  %v6727_v47 = vshll.u32 %v16594_v32, %v6725_v54  ;;  %vm6955_vm4 = vc.u32 %v16720_v13, %v16711_v56  ;;  %v6728_v12 = vshrl.u32 %v16671_v33, %v6726_v17 }
 0x63d   :  { %v6731_v10 = vadd.s32 127, %v6730_v28  ;;  %v6957_v24 = vsel %vm6955_vm4, %v6956_v53, %v16712_v37  ;;  %v7017_v48 = vsub.s32 32, %v7016_v51  ;;  %8113 = vsinq.f32 %v6638_v16 }
 0x63e   :  { %v7597_v27 = vmin.u32 %v6824_v57, %v16706_v39  ;;  %v6958_v38 = vadd.s32 %v6957_v24, %v6953_v29  ;;  %v7009_v25 = vand.u32 8388607, %v17367_v0  ;;  %v7019_v21 = vshll.u32 %v17401_v1, %v7016_v51 }
 0x63f   :  { %v7020_v32 = vshrl.u32 %v17733_v42, %v7017_v48  ;;  %v7022_v54 = vshll.u32 %v17733_v42, %v7016_v51  ;;  %v7023_v61 = vshrl.u32 %v17734_v8, %v7017_v48  ;;  %v7015_v49 = vshrl.u32 %v7014_v9, 5 }
 0x640   :  { %v6959_v33 = vadd.s32 536870912, %v6958_v38  ;;  %v7025_v35 = vshll.u32 %v17734_v8, %v7016_v51  ;;  %v7026_v37 = vshrl.u32 %v17656_v40, %v7017_v48  ;;  %v6549_v34 = vsel %vm6538_vm9, nan, %v6548_v30 }
 0x641   :  { %v6729_v7 = vor.u32 %v6728_v12, %v6727_v47  ;;  %v6732_v11 = vshll.u32 %v6731_v10, 23  ;;  %v7028_v2 = vshll.u32 %v17656_v40, %v7016_v51  ;;  %v6826_v16 = vclz %v7597_v27 }
 0x642   :  { %v6960_v17 = vshrl.u32 %v6959_v33, 30  ;;  %v7010_v28 = vor.u32 8388608, %v7009_v25  ;;  %v7029_v57 = vshrl.u32 %v17657_v41, %v7017_v48  ;;  %v7021_v29 = vor.u32 %v7020_v32, %v7019_v21 }
 0x643   :  { %v7024_v53 = vor.u32 %v7023_v61, %v7022_v54  ;;  %v7031_v9 = vshll.u32 %v17657_v41, %v7016_v51  ;;  %v7032_v24 = vshrl.u32 %v17658_v60, %v7017_v48  ;;  %v7027_v5 = vor.u32 %v7026_v37, %v7025_v35 }
 0x644   :  { %v6961_v0 = vshll.u32 %v6960_v17, 30  ;;  %v7030_v62 = vor.u32 %v7029_v57, %v7028_v2  ;;  %vm7034_vm8 = vcmp.lt.s32.totalorder %v7015_v49, 1  ;;  %v6733_v30 = vor.u32 4788187, %v6732_v11 }
 0x645   :  { %v6862_v47 = vmul.f32 %v6549_v34, %v6424_v22  ;;  %v7033_v12 = vor.u32 %v7032_v24, %v7031_v9  ;;  %vm7036_vm0 = vcmp.lt.s32.totalorder %v7015_v49, 3  ;;  %v7018_v27 = vshrl.u32 %v17401_v1, %v7017_v48 }
 0x646   :  { %v16759_v10 = vsub.s32 %v6958_v38, %v6961_v0  ;;  %vm7035_vm1 = vcmp.lt.s32.totalorder %v7015_v49, 2  ;;  %vm7037_vm2 = vcmp.lt.s32.totalorder %v7015_v49, 4  ;;  %v7042_v21 = vsel %vm7034_vm8, %v7021_v29, %v7024_v53 }
 0x647   :  { %v7039_v25 = vsel %vm7037_vm2, %v7027_v5, 2102212464  ;;  %v7043_v51 = vsel %vm7037_vm2, %v7030_v62, 920167782  ;;  %v7050_v32 = vshll.u32 %v7010_v28, 8  ;;  %vm6649_vm10 = vcmp.eq.s32.totalorder %v16726_v43, 2 }
 0x648   :  { %v6736_v54 = vcvt.s32.f32 %v6729_v7  ;;  %v7598_v61 = vadd.s32 4294967294, %v6826_v16  ;;  %v6964_v33 = vsub.s32 0, %v16759_v10  ;;  %v7044_v35 = vsel %vm7036_vm0, %v7027_v5, %v7043_v51 }
 0x649   :  { %v8112_v37 = vpop.eup %8111  ;;  %vm6646_vm3 = vcmp.eq.s32.totalorder %v16726_v43, 0  ;;  %v6734_v0 = vand.u32 2147483647, %v6733_v30  ;;  %v7045_v48 = vsel %vm7035_vm1, %v7042_v21, %v7044_v35  ;;  %v7046_v38 = vsel %vm7034_vm8, %v7024_v53, %v7027_v5 }
 0x64a   :  { %v7047_v34 = vsel %vm7037_vm2, %v7033_v12, 1326507024  ;;  %v7602_v11 = vmin.u32 %v6964_v33, %v16759_v10  ;;  %v7038_v2 = vsel %vm7034_vm8, %v7018_v27, %v7021_v29  ;;  %v7040_v7 = vsel %vm7036_vm0, %v7024_v53, %v7039_v25  ;;  %v8114_v16 = vpop.eup %8113 }
 0x64b   :  { %v7048_v22 = vsel %vm7036_vm0, %v7030_v62, %v7047_v34  ;;  %v6984_v28 = vsub.s32 4, %v6960_v17  ;;  %v16774_v9 = vmul.u32.u64.low %v7050_v32, %v7045_v48  ;;  %v16775_v24 = vmul.u32.u64.high %v7050_v32, %v7045_v48, %v16774_v9 }
 0x64c   :  { %v7049_v57 = vsel %vm7035_vm1, %v7046_v38, %v7048_v22  ;;  %vm7599_vm11 = vcmp.lt.s32.totalorder %v7598_v61, 0  ;;  %v16779_v5 = vadd.f32 %v6862_v47, %v16639_v23  ;;  %vm6900_vm7 = vcmp.lt.s32.totalorder %v16559_v15, 0  ;;  %v6893_v38 = vld [vmem:[#allocation8 + $0x1f8] sm:$0xff] }
 0x64d   :  { %v6966_v30 = vclz %v7602_v11  ;;  %vm6645_vm6 = vcmp.lt.s32.totalorder %v16726_v43, 2  ;;  %v7041_v29 = vsel %vm7035_vm1, %v7038_v2, %v7040_v7  ;;  %v7109_v12 = vand.u32 2139095040, %v16734_v19 }
 0x64e   :  { %v16784_v53 = vmul.u32.u64.low %v7050_v32, %v7049_v57  ;;  %v16785_v62 = vmul.u32.u64.high %v7050_v32, %v7049_v57, %v16784_v53  ;;  %v6647_v27 = vxor.u32 2147483648, %v8114_v16  ;;  %v6650_v25 = vxor.u32 2147483648, %v8112_v37 }
 0x64f   :  { %vm6656_vm13 = vcmp.lt.s32.totalorder %v16252_v20, 0  ;;  %v17796_v21 = vand.u32 2147483647, %v16559_v15  ;;  %v7603_v47 = vadd.s32 4294967294, %v6966_v30  ;;  %v6737_v51 = vmul.f32 %v6736_v54, %v6734_v0 }
 0x650   :  { %v6985_v49 = vsel %vm6900_vm7, %v6984_v28, %v6960_v17  ;;  %v7060_v33 = vadd.s32 1, %v16775_v24  ;;  %v7110_v35 = vshrl.u32 %v7109_v12, 23  ;;  %v16799_v48 = vsel %vm7599_vm11, 0, %v7598_v61 }
 0x651   :  { %vm16791_vm15 = vcmp.le.f32.partialorder %v17796_v21, 0.7853982  ;;  %v6954_v34 = vadd.s32 %v16711_v56, %v16720_v13  ;;  %vm7604_vm14 = vcmp.lt.s32.totalorder %v7603_v47, 0  ;;  %v7057_v11 = vmul.u32 %v7050_v32, %v7041_v29 }
 0x652   :  { %v6969_v2 = vsel %vm7604_vm14, 0, %v7603_v47  ;;  %vm7059_vm5 = vc.u32 %v16785_v62, %v16774_v9  ;;  %v17370_v54 = vand.u32 2147483647, %v16734_v19  ;;  %v7609_v0 = vadd.s32 4294967169, %v7110_v35 }
 0x653   :  { %v6970_v17 = vsub.s32 32, %v6969_v2  ;;  %v6971_v7 = vshll.u32 %v16759_v10, %v6969_v2  ;;  %v6974_v22 = vsub.s32 4294967266, %v6969_v2  ;;  %v6987_v61 = vsel %vm16791_vm15, 0, %v6985_v49 }
 0x654   :  { %v6651_v28 = vsel %vm6649_vm10, %v6650_v25, %v8114_v16  ;;  %v16812_v56 = vadd.f32 %v6893_v38, %v16731_v45  ;;  %v7061_v13 = vsel %vm7059_vm5, %v7060_v33, %v16775_v24  ;;  %v7116_v32 = vadd.s32 1, %v7609_v0 }
 0x655   :  { %v6648_v57 = vsel %vm6646_vm3, %v8112_v37, %v6647_v27  ;;  %v6972_v30 = vshrl.u32 %v6954_v34, %v6970_v17  ;;  %v6975_v29 = vadd.s32 127, %v6974_v22  ;;  %v7062_v53 = vadd.s32 %v7061_v13, %v7057_v11 }
 0x656   :  { %17799 = vst [vmem:[#allocation20_spill] sm:$0xff] %v16812_v56  ;;  %v6738_v10 = vxor.u32 2147483648, %v6737_v51  ;;  %v6834_v12 = vsub.s32 4294967266, %v16799_v48  ;;  %v6991_v21 = vadd.s32 3, %v6987_v61  ;;  %vm7117_vm9 = vcmp.gt.s32.totalorder %v7116_v32, 0 }
 0x657   :  { %v6973_v47 = vor.u32 %v6972_v30, %v6971_v7  ;;  %v6976_v49 = vshll.u32 %v6975_v29, 23  ;;  %v7063_v16 = vadd.s32 536870912, %v7062_v53  ;;  %v7113_v45 = vand.u32 8388607, %v17370_v54 }
 0x658   :  { %v16822_v24 = vadd.s32 %v16573_v18, %v16584_v46  ;;  %v7118_v25 = vsel %vm7117_vm9, %v7116_v32, 0  ;;  %v17369_v37 = vand.u32 2147483647, %v16812_v56  ;;  %v7213_v27 = vand.u32 2139095040, %v16812_v56 }
 0x659   :  { %v16828_v33 = vsel %vm6645_vm6, %v6648_v57, %v6651_v28  ;;  %v6977_v35 = vor.u32 4788187, %v6976_v49  ;;  %v6980_v38 = vcvt.s32.f32 %v6973_v47  ;;  %v16830_v34 = vshrl.u32 %v7063_v16, 30 }
 0x65a   :  { %v16834_v11 = vsel %vm6656_vm13, %v6738_v10, %v6737_v51  ;;  %v16837_v46 = vadd.s32 127, %v6834_v12  ;;  %v7120_v2 = vand.u32 31, %v7118_v25  ;;  %v16839_v17 = vand.u32 3, %v6991_v21 }
 0x65b   :  { %v6978_v0 = vand.u32 2147483647, %v6977_v35  ;;  %v7065_v43 = vshll.u32 %v16830_v34, 30  ;;  %v7114_v7 = vor.u32 8388608, %v7113_v45  ;;  %v7058_v22 = vadd.s32 %v16774_v9, %v16785_v62 }
 0x65c   :  { %v7121_v61 = vsub.s32 32, %v7120_v2  ;;  %v7214_v28 = vshrl.u32 %v7213_v27, 23  ;;  %v16846_v51 = vand.u32 8388607, %v17369_v37  ;;  %v7123_v57 = vshll.u32 %v17401_v1, %v7120_v2 }
 0x65d   :  { %v6981_v13 = vmul.f32 %v6980_v38, %v6978_v0  ;;  %v16848_v32 = vsub.s32 %v7062_v53, %v7065_v43  ;;  %v7126_v30 = vshll.u32 %v17733_v42, %v7120_v2  ;;  %v7129_v12 = vshll.u32 %v17734_v8, %v7120_v2 }
 0x65e   :  { %v7124_v29 = vshrl.u32 %v17733_v42, %v7121_v61  ;;  %v7127_v10 = vshrl.u32 %v17734_v8, %v7121_v61  ;;  %v7132_v9 = vshll.u32 %v17656_v40, %v7120_v2  ;;  %v7119_v47 = vshrl.u32 %v7118_v25, 5 }
 0x65f   :  { %v6982_v62 = vxor.u32 2147483648, %v6981_v13  ;;  %v7068_v21 = vsub.s32 0, %v16848_v32  ;;  %v7130_v49 = vshrl.u32 %v17656_v40, %v7121_v61  ;;  %v7122_v53 = vshrl.u32 %v17401_v1, %v7121_v61 }
 0x660   :  { %v7133_v16 = vshrl.u32 %v17657_v41, %v7121_v61  ;;  %v7135_v45 = vshll.u32 %v17657_v41, %v7120_v2  ;;  %v7613_v27 = vadd.s32 4294967169, %v7214_v28  ;;  %v7125_v0 = vor.u32 %v7124_v29, %v7123_v57 }
 0x661   :  { %v6983_v35 = vsel %vm6900_vm7, %v6982_v62, %v6981_v13  ;;  %v7606_v38 = vmin.u32 %v7068_v21, %v16848_v32  ;;  %v7128_v43 = vor.u32 %v7127_v10, %v7126_v30  ;;  %v7131_v37 = vor.u32 %v7130_v49, %v7129_v12 }
 0x662   :  { %v6986_v25 = vsel %vm16791_vm15, %v16559_v15, %v6983_v35  ;;  %v7134_v54 = vor.u32 %v7133_v16, %v7132_v9  ;;  %v7136_v18 = vshrl.u32 %v17658_v60, %v7121_v61  ;;  %vm7138_vm12 = vcmp.lt.s32.totalorder %v7119_v47, 1 }
 0x663   :  { %8115 = vcosq.f32 %v6986_v25  ;;  %v7070_v56 = vclz %v7606_v38  ;;  %v7154_v2 = vshll.u32 %v7114_v7, 8  ;;  %vm7139_vm4 = vcmp.lt.s32.totalorder %v7119_v47, 2 }
 0x664   :  { %8117 = vsinq.f32 %v6986_v25  ;;  %v7137_v28 = vor.u32 %v7136_v18, %v7135_v45  ;;  %v7220_v13 = vadd.s32 1, %v7613_v27  ;;  %vm7140_vm8 = vcmp.lt.s32.totalorder %v7119_v47, 3 }
 0x665   :  { %v7607_v62 = vadd.s32 4294967294, %v7070_v56  ;;  %vm7141_vm0 = vcmp.lt.s32.totalorder %v7119_v47, 4  ;;  %v7142_v57 = vsel %vm7138_vm12, %v7122_v53, %v7125_v0  ;;  %v7146_v29 = vsel %vm7138_vm12, %v7125_v0, %v7128_v43 }
 0x666   :  { %v7143_v30 = vsel %vm7141_vm0, %v7131_v37, 2102212464  ;;  %v7147_v23 = vsel %vm7141_vm0, %v7134_v54, 920167782  ;;  %v7150_v10 = vsel %vm7138_vm12, %v7128_v43, %v7131_v37  ;;  %v7151_v61 = vsel %vm7141_vm0, %v7137_v28, 1326507024 }
 0x667   :  { %vm7608_vm1 = vcmp.lt.s32.totalorder %v7607_v62, 0  ;;  %v7144_v12 = vsel %vm7140_vm8, %v7128_v43, %v7143_v30  ;;  %v7148_v9 = vsel %vm7140_vm8, %v7131_v37, %v7147_v23  ;;  %v7152_v18 = vsel %vm7140_vm8, %v7134_v54, %v7151_v61 }
 0x668   :  { %v7073_v21 = vsel %vm7608_vm1, 0, %v7607_v62  ;;  %v7145_v49 = vsel %vm7139_vm4, %v7142_v57, %v7144_v12  ;;  %v7149_v7 = vsel %vm7139_vm4, %v7146_v29, %v7148_v9  ;;  %v7153_v53 = vsel %vm7139_vm4, %v7150_v10, %v7152_v18 }
 0x669   :  { %v7074_v16 = vsub.s32 32, %v7073_v21  ;;  %v7075_v56 = vshll.u32 %v16848_v32, %v7073_v21  ;;  %v7078_v45 = vsub.s32 4294967266, %v7073_v21  ;;  %v6831_v37 = vshll.u32 %v16706_v39, %v16799_v48 }
 0x66a   :  { %v16872_v27 = vmul.u32.u64.low %v7154_v2, %v7153_v53  ;;  %v16873_v35 = vmul.u32.u64.high %v7154_v2, %v7153_v53, %v16872_v27  ;;  %v16875_v38 = vmul.u32.u64.low %v7154_v2, %v7149_v7  ;;  %v16876_v0 = vmul.u32.u64.high %v7154_v2, %v7149_v7, %v16875_v38 }
 0x66b   :  { %vm7004_vm2 = vcmp.lt.s32.totalorder %v16641_v31, 0  ;;  %v7076_v43 = vshrl.u32 %v7058_v22, %v7074_v16  ;;  %v7079_v54 = vadd.s32 127, %v7078_v45  ;;  %vm7221_vm10 = vcmp.gt.s32.totalorder %v7220_v13, 0 }
 0x66c   :  { %v17800_v32 = vsub.s32 32, %v16799_v48  ;;  %v6836_v25 = vshll.u32 %v16837_v46, 23  ;;  %v7218_v28 = vor.u32 8388608, %v16846_v51  ;;  %v7222_v62 = vsel %vm7221_vm10, %v7220_v13, 0 }
 0x66d   :  { %v17801_v57 = vand.u32 2147483647, %v16641_v31  ;;  %v7077_v29 = vor.u32 %v7076_v43, %v7075_v56  ;;  %v7080_v22 = vshll.u32 %v7079_v54, 23  ;;  %v7161_v23 = vmul.u32 %v7154_v2, %v7145_v49 }
 0x66e   :  { %v16885_v47 = vshrl.u32 %v16822_v24, %v17800_v32  ;;  %v7224_v10 = vand.u32 31, %v7222_v62  ;;  %vm6993_vm11 = vcmp.lt.s32.totalorder %v16839_v17, 2  ;;  %vm6994_vm7 = vcmp.eq.s32.totalorder %v16839_v17, 0 }
 0x66f   :  { %vm16891_vm3 = vcmp.le.f32.partialorder %v17801_v57, 0.7853982  ;;  %vm7163_vm6 = vc.u32 %v16873_v35, %v16875_v38  ;;  %v7164_v24 = vadd.s32 1, %v16876_v0  ;;  %vm6997_vm15 = vcmp.eq.s32.totalorder %v16839_v17, 2 }
 0x670   :  { %v7081_v51 = vor.u32 4788187, %v7080_v22  ;;  %v7084_v13 = vcvt.s32.f32 %v7077_v29  ;;  %v7225_v12 = vsub.s32 32, %v7224_v10  ;;  %v8116_v9 = vpop.eup %8115  ;;  %v7088_v61 = vsub.s32 4, %v16830_v34 }
 0x671   :  { %v7165_v2 = vsel %vm7163_vm6, %v7164_v24, %v16876_v0  ;;  %v16903_v21 = vshrl.u32 %v7222_v62, 5  ;;  %v16905_v49 = vshll.u32 %v7218_v28, 8  ;;  %v8118_v7 = vpop.eup %8117  ;;  %v6998_v18 = vxor.u32 2147483648, %v8116_v9 }
 0x672   :  { %v7082_v16 = vand.u32 2147483647, %v7081_v51  ;;  %v7166_v56 = vadd.s32 %v7165_v2, %v7161_v23  ;;  %v7227_v45 = vshll.u32 %v17401_v1, %v7224_v10  ;;  %vm6990_vm14 = vweird.f32 %v16559_v15 }
 0x673   :  { %v6995_v53 = vxor.u32 2147483648, %v8118_v7  ;;  %v7228_v27 = vshrl.u32 %v17733_v42, %v7225_v12  ;;  %v7230_v43 = vshll.u32 %v17733_v42, %v7224_v10  ;;  %v7231_v54 = vshrl.u32 %v17734_v8, %v7225_v12 }
 0x674   :  { %v7085_v0 = vmul.f32 %v7084_v13, %v7082_v16  ;;  %v7167_v32 = vadd.s32 536870912, %v7166_v56  ;;  %v7236_v28 = vshll.u32 %v17656_v40, %v7224_v10  ;;  %v7237_v62 = vshrl.u32 %v17657_v41, %v7225_v12 }
 0x675   :  { %v7089_v57 = vsel %vm7004_vm2, %v7088_v61, %v16830_v34  ;;  %v7226_v29 = vshrl.u32 %v17401_v1, %v7225_v12  ;;  %v7233_v22 = vshll.u32 %v17734_v8, %v7224_v10  ;;  %v7234_v23 = vshrl.u32 %v17656_v40, %v7225_v12 }
 0x676   :  { %v17804_v42 = vand.u32 2147483647, %v16252_v20  ;;  %v6996_v51 = vsel %vm6994_vm7, %v8116_v9, %v6995_v53  ;;  %v6999_v13 = vsel %vm6997_vm15, %v6998_v18, %v8118_v7  ;;  %v7086_v2 = vxor.u32 2147483648, %v7085_v0 }
 0x677   :  { %v16930_v34 = vshrl.u32 %v7167_v32, 30  ;;  %vm6642_vm9 = vweird.f32 %v16139_v58  ;;  %v7229_v1 = vor.u32 %v7228_v27, %v7227_v45  ;;  %v7232_v8 = vor.u32 %v7231_v54, %v7230_v43  ;;  %v6876_v32 = vld [vmem:[#allocation5 + $0x1e0] sm:$0xff] }
 0x678   :  { %vm16922_vm5 = vcmp.le.f32.partialorder %v17804_v42, 0.7853982  ;;  %v7239_v40 = vshll.u32 %v17657_v41, %v7224_v10  ;;  %v7240_v61 = vshrl.u32 %v17658_v60, %v7225_v12  ;;  %v7087_v16 = vsel %vm7004_vm2, %v7086_v2, %v7085_v0 }
 0x679   :  { %v7169_v42 = vshll.u32 %v16930_v34, 30  ;;  %v7238_v9 = vor.u32 %v7237_v62, %v7236_v28  ;;  %vm7242_vm12 = vcmp.lt.s32.totalorder %v16903_v21, 1  ;;  %v7090_v7 = vsel %vm16891_vm3, %v16641_v31, %v7087_v16 }
 0x67a   :  { %v7235_v18 = vor.u32 %v7234_v23, %v7233_v22  ;;  %v7241_v53 = vor.u32 %v7240_v61, %v7239_v40  ;;  %vm7245_vm4 = vcmp.lt.s32.totalorder %v16903_v21, 4  ;;  %v7000_v41 = vsel %vm6993_vm11, %v6996_v51, %v6999_v13 }
 0x67b   :  { %8119 = vcosq.f32 %v7090_v7  ;;  %v16945_v60 = vsub.s32 %v7166_v56, %v7169_v42  ;;  %vm7244_vm8 = vcmp.lt.s32.totalorder %v16903_v21, 3  ;;  %vm7243_vm0 = vcmp.lt.s32.totalorder %v16903_v21, 2 }
 0x67c   :  { %8121 = vsinq.f32 %v7090_v7  ;;  %v7247_v10 = vsel %vm7245_vm4, %v7235_v18, 2102212464  ;;  %v7250_v12 = vsel %vm7242_vm12, %v7229_v1, %v7232_v8  ;;  %v7091_v45 = vsel %vm16891_vm3, 0, %v7089_v57  ;;  %v17809_v7 = vld [vmem:[#allocation25_spill] sm:$0xff] }
 0x67d   :  { %v7172_v17 = vsub.s32 0, %v16945_v60  ;;  %v7246_v56 = vsel %vm7242_vm12, %v7226_v29, %v7229_v1  ;;  %v7251_v27 = vsel %vm7245_vm4, %v7238_v9, 920167782  ;;  %v7248_v43 = vsel %vm7244_vm8, %v7232_v8, %v7247_v10 }
 0x67e   :  { %v7252_v54 = vsel %vm7244_vm8, %v7235_v18, %v7251_v27  ;;  %v7254_v0 = vsel %vm7242_vm12, %v7232_v8, %v7235_v18  ;;  %v7255_v30 = vsel %vm7245_vm4, %v7241_v53, 1326507024  ;;  %v7001_v28 = vsel %vm6990_vm14, nan, %v7000_v41 }
 0x67f   :  { %v7610_v62 = vmin.u32 %v7172_v17, %v16945_v60  ;;  %v7253_v57 = vsel %vm7243_vm0, %v7250_v12, %v7252_v54  ;;  %v7256_v29 = vsel %vm7244_vm8, %v7238_v9, %v7255_v30  ;;  %v7095_v22 = vadd.s32 3, %v7091_v45 }
 0x680   :  { %v7257_v23 = vsel %vm7243_vm0, %v7254_v0, %v7256_v29  ;;  %v16978_v51 = vmul.u32.u64.low %v16905_v49, %v7253_v57  ;;  %v16979_v13 = vmul.u32.u64.high %v16905_v49, %v7253_v57, %v16978_v51  ;;  %v17807_v15 = vand.u32 2147483647, %v16625_v14  ;;  %v6877_v29 = vld [vmem:[#allocation5 + $0x1e8] sm:$0xff] }
 0x681   :  { %v17808_v2 = vcvt.s32.f32 %v16623_v50  ;;  %v6740_v8 = vsub.s32 4, %v16540_v44  ;;  %v7174_v40 = vclz %v7610_v62  ;;  %v7249_v61 = vsel %vm7243_vm0, %v7246_v56, %v7248_v43  ;;  %v6425_v50 = vld [vmem:[#allocation5 + $0x1c8] sm:$0xff] }
 0x682   :  { %v6742_v16 = vsel %vm16922_vm5, %v16252_v20, %v16834_v11  ;;  %v16996_v42 = vmul.u32.u64.low %v16905_v49, %v7257_v23  ;;  %v16997_v9 = vmul.u32.u64.high %v16905_v49, %v7257_v23, %v16996_v42  ;;  %v7314_v14 = vmul.f32 %v7001_v28, %v6876_v32 }
 0x683   :  { %v16986_v1 = vmul.f32 %v17808_v2, %v17807_v15  ;;  %vm6308_vm1 = vcmp.lt.s32.totalorder %v17809_v7, 0  ;;  %v6653_v18 = vsel %vm6642_vm9, nan, %v16828_v33  ;;  %v6833_v21 = vor.u32 %v16885_v47, %v6831_v37 }
 0x684   :  { %v6837_v11 = vor.u32 4788187, %v6836_v25  ;;  %v7611_v53 = vadd.s32 4294967294, %v7174_v40  ;;  %v7096_v41 = vand.u32 3, %v7095_v22  ;;  %v7265_v10 = vmul.u32 %v16905_v49, %v7249_v61 }
 0x685   :  { %v7268_v12 = vadd.s32 1, %v16979_v13  ;;  %v7318_v45 = vadd.f32 %v7314_v14, %v16779_v5  ;;  %vm6298_vm2 = vcmp.eq.s32.totalorder %v16476_v59, 0  ;;  %vm6301_vm10 = vcmp.eq.s32.totalorder %v16476_v59, 2 }
 0x686   :  { %v6741_v58 = vsel %vm6656_vm13, %v6740_v8, %v16540_v44  ;;  %8123 = vcosq.f32 %v6742_v16  ;;  %v7162_v39 = vadd.s32 %v16875_v38, %v16873_v35  ;;  %vm7612_vm3 = vcmp.lt.s32.totalorder %v7611_v53, 0  ;;  %v17810_v44 = vld [vmem:[#allocation28_spill] sm:$0xff] }
 0x687   :  { %8125 = vsinq.f32 %v6742_v16  ;;  %v6863_v48 = vmul.f32 %v6653_v18, %v6425_v50  ;;  %v7177_v33 = vsel %vm7612_vm3, 0, %v7611_v53  ;;  %vm7267_vm11 = vc.u32 %v16997_v9, %v16978_v51  ;;  %7322 = vst [vmem:[#allocation11] sm:$0xff] %v7318_v45 }
 0x688   :  { %v7178_v5 = vsub.s32 32, %v7177_v33  ;;  %v7179_v46 = vshll.u32 %v16945_v60, %v7177_v33  ;;  %v7182_v37 = vsub.s32 4294967266, %v7177_v33  ;;  %v7269_v47 = vsel %vm7267_vm11, %v7268_v12, %v16979_v13  ;;  %v8120_v25 = vpop.eup %8119 }
 0x689   :  { %vm5842_vm13 = vweird.f32 %v17810_v44  ;;  %v6838_v49 = vand.u32 2147483647, %v6837_v11  ;;  %v6840_v17 = vcvt.s32.f32 %v6833_v21  ;;  %vm7101_vm7 = vcmp.eq.s32.totalorder %v7096_v41, 2  ;;  %v8122_v38 = vpop.eup %8121 }
 0x68a   :  { %v7270_v35 = vadd.s32 %v7269_v47, %v7265_v10  ;;  %vm7098_vm6 = vcmp.eq.s32.totalorder %v7096_v41, 0  ;;  %v7102_v56 = vxor.u32 2147483648, %v8120_v25  ;;  %v7180_v27 = vshrl.u32 %v7162_v39, %v7178_v5 }
 0x68b   :  { %v7183_v43 = vadd.s32 127, %v7182_v37  ;;  %v6390_v54 = vxor.u32 2147483648, %v16986_v1  ;;  %vm7097_vm15 = vcmp.lt.s32.totalorder %v7096_v41, 2  ;;  %v7099_v0 = vxor.u32 2147483648, %v8122_v38 }
 0x68c   :  { %v7271_v60 = vadd.s32 536870912, %v7270_v35  ;;  %vm7094_vm14 = vweird.f32 %v16641_v31  ;;  %v7103_v30 = vsel %vm7101_vm7, %v7102_v56, %v8122_v38  ;;  %v7181_v32 = vor.u32 %v7180_v27, %v7179_v46  ;;  %v17822_v27 = vld [vmem:[#allocation18_spill] sm:$0xff]  ;;  %v17823_v31 = vld [vmem:[#allocation19_spill] sm:$0xff] }
 0x68d   :  { %v7184_v28 = vshll.u32 %v7183_v43, 23  ;;  %v6743_v62 = vsel %vm16922_vm5, 0, %v6741_v58  ;;  %v6867_v57 = vadd.f32 %v6863_v48, %v16645_v3  ;;  %v7100_v22 = vsel %vm7098_vm6, %v8120_v25, %v7099_v0 }
 0x68e   :  { %v17029_v23 = vshrl.u32 %v7271_v60, 30  ;;  %v6841_v13 = vmul.f32 %v6840_v17, %v6838_v49  ;;  %v7104_v15 = vsel %vm7097_vm15, %v7100_v22, %v7103_v30  ;;  %v7188_v8 = vcvt.s32.f32 %v7181_v32 }
 0x68f   :  { %v7185_v2 = vor.u32 4788187, %v7184_v28  ;;  %v17811_v40 = vand.u32 2147483647, %v17809_v7  ;;  %v6391_v24 = vsel %vm6308_vm1, %v6390_v54, %v16986_v1  ;;  %v7105_v61 = vsel %vm7094_vm14, nan, %v7104_v15 }
 0x690   :  { %v7273_v3 = vshll.u32 %v17029_v23, 30  ;;  %vm6297_vm5 = vcmp.lt.s32.totalorder %v16476_v59, 2  ;;  %v6747_v16 = vadd.s32 3, %v6743_v62  ;;  %v7315_v14 = vmul.f32 %v7105_v61, %v6877_v29 }
 0x691   :  { %vm17033_vm9 = vcmp.le.f32.partialorder %v17811_v40, 0.7853982  ;;  %v7186_v42 = vand.u32 2147483647, %v7185_v2  ;;  %v17814_v50 = vxor.u32 2147483648, %v16618_v6  ;;  %v17815_v21 = vxor.u32 2147483648, %v16591_v52 }
 0x692   :  { %v6392_v11 = vsub.s32 4, %v16342_v4  ;;  %v17053_v53 = vsub.s32 %v7270_v35, %v7273_v3  ;;  %v6394_v41 = vsel %vm17033_vm9, %v17809_v7, %v6391_v24  ;;  %v6842_v10 = vxor.u32 2147483648, %v6841_v13  ;;  %v5522_v35 = vld [vmem:[#allocation5 + $0x190] sm:$0xff]  ;;  %v17826_v3 = vld [vmem:[#allocation16_spill] sm:$0xff] }
 0x693   :  { %v6300_v18 = vsel %vm6298_vm2, %v16591_v52, %v17814_v50  ;;  %v6303_v1 = vsel %vm6301_vm10, %v17815_v21, %v16618_v6  ;;  %v7189_v12 = vmul.f32 %v7188_v8, %v7186_v42  ;;  %v7319_v45 = vadd.f32 %v7315_v14, %v6867_v57  ;;  %v8124_v58 = vpop.eup %8123  ;;  %v17824_v24 = vld [vmem:[#allocation26_spill] sm:$0xff] }
 0x694   :  { %vm6760_vm12 = vcmp.lt.s32.totalorder %v16361_v55, 0  ;;  %vm7108_vm4 = vcmp.lt.s32.totalorder %v16734_v19, 0  ;;  %v7192_v52 = vsub.s32 4, %v16930_v34  ;;  %v7276_v6 = vsub.s32 0, %v17053_v53  ;;  %v8126_v39 = vpop.eup %8125 }
 0x695   :  { %v5853_v48 = vsel %vm5842_vm13, nan, %v16233_v36  ;;  %v6748_v33 = vand.u32 3, %v6747_v16  ;;  %v17816_v5 = vand.u32 2147483647, %v16734_v19  ;;  %v7190_v37 = vxor.u32 2147483648, %v7189_v12  ;;  %7323 = vst [vmem:[#allocation11 + $0x8] sm:$0xff] %v7319_v45 }
 0x696   :  { %vm6294_vm0 = vweird.f32 %v15728_v63  ;;  %v6304_v47 = vsel %vm6297_vm5, %v6300_v18, %v6303_v1  ;;  %v6393_v25 = vsel %vm6308_vm1, %v6392_v11, %v16342_v4  ;;  %v7614_v36 = vmin.u32 %v7276_v6, %v17053_v53  ;;  %v5974_v63 = vld [vmem:[#allocation5 + $0x1b0] sm:$0xff] }
 0x697   :  { %vm17067_vm8 = vcmp.le.f32.partialorder %v17816_v5, 0.7853982  ;;  %8127 = vcosq.f32 %v6394_v41  ;;  %v17819_v44 = vand.u32 2147483647, %v16361_v55  ;;  %v6843_v17 = vsel %vm6760_vm12, %v6842_v10, %v6841_v13  ;;  %v17827_v10 = vld [vmem:[#allocation17_spill] sm:$0xff] }
 0x698   :  { %v7191_v59 = vsel %vm7108_vm4, %v7190_v37, %v7189_v12  ;;  %8129 = vsinq.f32 %v6394_v41  ;;  %v7193_v4 = vsel %vm7108_vm4, %v7192_v52, %v16930_v34  ;;  %v7278_v56 = vclz %v7614_v36  ;;  %v17828_v12 = vld [vmem:[#allocation23_spill] sm:$0xff]  ;;  %v17829_v52 = vld [vmem:[#allocation21_spill] sm:$0xff] }
 0x699   :  { %vm17080_vm2 = vcmp.le.f32.partialorder %v17819_v44, 0.7853982  ;;  %v7194_v38 = vsel %vm17067_vm8, %v16734_v19, %v7191_v59  ;;  %vm5494_vm1 = vweird.f32 %v17822_v27  ;;  %vm6750_vm10 = vcmp.eq.s32.totalorder %v6748_v33, 0 }
 0x69a   :  { %v6751_v43 = vxor.u32 2147483648, %v8126_v39  ;;  %v6754_v54 = vxor.u32 2147483648, %v8124_v58  ;;  %8131 = vcosq.f32 %v7194_v38  ;;  %vm6753_vm3 = vcmp.eq.s32.totalorder %v6748_v33, 2 }
 0x69b   :  { %v6846_v0 = vsel %vm17080_vm2, %v16361_v55, %v6843_v17  ;;  %8133 = vsinq.f32 %v7194_v38  ;;  %v7615_v60 = vadd.s32 4294967294, %v7278_v56  ;;  %v5960_v30 = vmul.f32 %v5853_v48, %v5522_v35 }
 0x69c   :  { %v6305_v34 = vsel %vm6294_vm0, nan, %v6304_v47  ;;  %v6395_v32 = vsel %vm17033_vm9, 0, %v6393_v25  ;;  %v7195_v28 = vsel %vm17067_vm8, 0, %v7193_v4  ;;  %vm6749_vm11 = vcmp.lt.s32.totalorder %v6748_v33, 2 }
 0x69d   :  { %v6844_v62 = vsub.s32 4, %v16684_v26  ;;  %v7266_v57 = vadd.s32 %v16978_v51, %v16997_v9  ;;  %vm7616_vm13 = vcmp.lt.s32.totalorder %v7615_v60, 0  ;;  %v6752_v29 = vsel %vm6750_vm10, %v8124_v58, %v6751_v43  ;;  %v17825_v51 = vld [vmem:[#allocation29_spill] sm:$0xff] }
 0x69e   :  { %v6755_v22 = vsel %vm6753_vm3, %v6754_v54, %v8126_v39  ;;  %8135 = vcosq.f32 %v6846_v0  ;;  %v7281_v13 = vsel %vm7616_vm13, 0, %v7615_v60  ;;  %v7199_v15 = vadd.s32 3, %v7195_v28  ;;  %v6426_v39 = vld [vmem:[#allocation5 + $0x1d0] sm:$0xff]  ;;  %v17830_v54 = vld [vmem:[#allocation20_spill] sm:$0xff] }
 0x69f   :  { %v7282_v2 = vsub.s32 32, %v7281_v13  ;;  %v7283_v8 = vshll.u32 %v17053_v53, %v7281_v13  ;;  %v7286_v40 = vsub.s32 4294967266, %v7281_v13  ;;  %vm5950_vm7 = vcmp.eq.s32.totalorder %v17823_v31, 0  ;;  %v17834_v13 = vld [vmem:[#allocation27_spill] sm:$0xff] }
 0x6a0   :  { %vm5953_vm6 = vcmp.eq.s32.totalorder %v17823_v31, 2  ;;  %v5964_v61 = vadd.f32 %v5960_v30, %v17824_v24  ;;  %8137 = vsinq.f32 %v6846_v0  ;;  %v5951_v9 = vxor.u32 2147483648, %v17825_v51  ;;  %v6878_v30 = vld [vmem:[#allocation5 + $0x1f0] sm:$0xff] }
 0x6a1   :  { %v5954_v16 = vxor.u32 2147483648, %v17826_v3  ;;  %v7284_v42 = vshrl.u32 %v7266_v57, %v7282_v2  ;;  %v7287_v14 = vadd.s32 127, %v7286_v40  ;;  %v6399_v50 = vadd.s32 3, %v6395_v32 }
 0x6a2   :  { %v6412_v18 = vmul.f32 %v6305_v34, %v5974_v63  ;;  %vm6746_vm15 = vweird.f32 %v16252_v20  ;;  %v6756_v21 = vsel %vm6749_vm11, %v6752_v29, %v6755_v22  ;;  %v6845_v1 = vsel %vm6760_vm12, %v6844_v62, %v16684_v26 }
 0x6a3   :  { %v7200_v11 = vand.u32 3, %v7199_v15  ;;  %v7285_v53 = vor.u32 %v7284_v42, %v7283_v8  ;;  %v7288_v41 = vshll.u32 %v7287_v14, 23  ;;  %v17121_v45 = vadd.f32 %v17828_v12, %v17827_v10  ;;  %v5071_v8 = vld [vmem:[#allocation5 + $0x178] sm:$0xff] }
 0x6a4   :  { %v8128_v58 = vpop.eup %8127  ;;  %v5505_v6 = vsel %vm5494_vm1, nan, %v17829_v52  ;;  %v6757_v20 = vsel %vm6746_vm15, nan, %v6756_v21  ;;  %vm5949_vm14 = vcmp.lt.s32.totalorder %v17823_v31, 2  ;;  %v5952_v26 = vsel %vm5950_vm7, %v17826_v3, %v5951_v9  ;;  %v5975_v10 = vld [vmem:[#allocation5 + $0x1b8] sm:$0xff] }
 0x6a5   :  { %v7289_v48 = vor.u32 4788187, %v7288_v41  ;;  %v7292_v33 = vcvt.s32.f32 %v7285_v53  ;;  %v8130_v5 = vpop.eup %8129  ;;  %v5955_v46 = vsel %vm5953_vm6, %v5954_v16, %v17825_v51  ;;  %v6847_v37 = vsel %vm17080_vm2, 0, %v6845_v1 }
 0x6a6   :  { %v6400_v25 = vand.u32 3, %v6399_v50  ;;  %v6416_v36 = vadd.f32 %v6412_v18, %v5964_v61  ;;  %vm7205_vm9 = vcmp.eq.s32.totalorder %v7200_v11, 2  ;;  %v6406_v59 = vxor.u32 2147483648, %v8128_v58 }
 0x6a7   :  { %v8132_v47 = vpop.eup %8131  ;;  %v7290_v44 = vand.u32 2147483647, %v7289_v48  ;;  %v6864_v35 = vmul.f32 %v6757_v20, %v6426_v39  ;;  %vm7202_vm5 = vcmp.eq.s32.totalorder %v7200_v11, 0  ;;  %v6851_v38 = vadd.s32 3, %v6847_v37  ;;  %v6427_v20 = vld [vmem:[#allocation5 + $0x1d8] sm:$0xff] }
 0x6a8   :  { %v8134_v17 = vpop.eup %8133  ;;  %v7206_v4 = vxor.u32 2147483648, %v8132_v47  ;;  %vm7201_vm12 = vcmp.lt.s32.totalorder %v7200_v11, 2  ;;  %vm7198_vm4 = vweird.f32 %v16734_v19  ;;  %vm7212_vm8 = vcmp.lt.s32.totalorder %v17830_v54, 0 }
 0x6a9   :  { %v7203_v56 = vxor.u32 2147483648, %v8134_v17  ;;  %v7293_v27 = vmul.f32 %v7292_v33, %v7290_v44  ;;  %v7296_v49 = vsub.s32 4, %v17029_v23  ;;  %v6403_v60 = vxor.u32 2147483648, %v8130_v5 }
 0x6aa   :  { %v7207_v43 = vsel %vm7205_vm9, %v7206_v4, %v8134_v17  ;;  %v17831_v32 = vand.u32 2147483647, %v17830_v54  ;;  %vm6402_vm2 = vcmp.eq.s32.totalorder %v6400_v25, 0  ;;  %vm6405_vm1 = vcmp.eq.s32.totalorder %v6400_v25, 2 }
 0x6ab   :  { %v8136_v0 = vpop.eup %8135  ;;  %v7204_v34 = vsel %vm7202_vm5, %v8132_v47, %v7203_v56  ;;  %v7294_v62 = vxor.u32 2147483648, %v7293_v27  ;;  %v6868_v57 = vadd.f32 %v6864_v35, %v6416_v36  ;;  %vm5946_vm10 = vweird.f32 %v17834_v13  ;;  %v6879_v47 = vld [vmem:[#allocation5 + $0x1f8] sm:$0xff] }
 0x6ac   :  { %vm17140_vm0 = vcmp.le.f32.partialorder %v17831_v32, 0.7853982  ;;  %v7208_v29 = vsel %vm7201_vm12, %v7204_v34, %v7207_v43  ;;  %v6852_v63 = vand.u32 3, %v6851_v38  ;;  %v5956_v40 = vsel %vm5949_vm14, %v5952_v26, %v5955_v46 }
 0x6ad   :  { %v8138_v22 = vpop.eup %8137  ;;  %v7209_v15 = vsel %vm7198_vm4, nan, %v7208_v29  ;;  %v7295_v2 = vsel %vm7212_vm8, %v7294_v62, %v7293_v27  ;;  %v7297_v24 = vsel %vm7212_vm8, %v7296_v49, %v17029_v23  ;;  %vm6401_vm3 = vcmp.lt.s32.totalorder %v6400_v25, 2  ;;  %v5523_v23 = vld [vmem:[#allocation5 + $0x198] sm:$0xff] }
 0x6ae   :  { %v7298_v61 = vsel %vm17140_vm0, %v17830_v54, %v7295_v2  ;;  %v7316_v51 = vmul.f32 %v7209_v15, %v6878_v30  ;;  %v6404_v9 = vsel %vm6402_vm2, %v8128_v58, %v6403_v60  ;;  %v6407_v19 = vsel %vm6405_vm1, %v6406_v59, %v8130_v5 }
 0x6af   :  { %8139 = vcosq.f32 %v7298_v61  ;;  %v6855_v3 = vxor.u32 2147483648, %v8138_v22  ;;  %v6858_v16 = vxor.u32 2147483648, %v8136_v0  ;;  %v5509_v14 = vmul.f32 %v5505_v6, %v5071_v8 }
 0x6b0   :  { %8141 = vsinq.f32 %v7298_v61  ;;  %v7320_v42 = vadd.f32 %v7316_v51, %v6868_v57  ;;  %vm6854_vm11 = vcmp.eq.s32.totalorder %v6852_v63, 0  ;;  %vm6857_vm13 = vcmp.eq.s32.totalorder %v6852_v63, 2 }
 0x6b1   :  { %v7299_v31 = vsel %vm17140_vm0, 0, %v7297_v24  ;;  %v5957_v50 = vsel %vm5946_vm10, nan, %v5956_v40  ;;  %vm6398_vm7 = vweird.f32 %v17809_v7  ;;  %v6408_v18 = vsel %vm6401_vm3, %v6404_v9, %v6407_v19 }
 0x6b2   :  { %7324 = vst [vmem:[#allocation11 + $0x10] sm:$0xff] %v7320_v42  ;;  %vm6853_vm6 = vcmp.lt.s32.totalorder %v6852_v63, 2  ;;  %v6856_v21 = vsel %vm6854_vm11, %v8136_v0, %v6855_v3  ;;  %v6859_v1 = vsel %vm6857_vm13, %v6858_v16, %v8138_v22  ;;  %v7303_v11 = vadd.s32 3, %v7299_v31 }
 0x6b3   :  { %v5513_v53 = vadd.f32 %v5509_v14, %v17121_v45  ;;  %v5961_v41 = vmul.f32 %v5957_v50, %v5523_v23  ;;  %v6409_v12 = vsel %vm6398_vm7, nan, %v6408_v18  ;;  %vm6850_vm15 = vweird.f32 %v16361_v55 }
 0x6b4   :  { %v6860_v58 = vsel %vm6853_vm6, %v6856_v21, %v6859_v1  ;;  %v7304_v52 = vand.u32 3, %v7303_v11  ;;  %v6413_v39 = vmul.f32 %v6409_v12, %v5975_v10  ;;  %vm7302_vm12 = vweird.f32 %v17830_v54 }
 0x6b5   :  { %v5965_v6 = vadd.f32 %v5961_v41, %v5513_v53  ;;  %v6861_v48 = vsel %vm6850_vm15, nan, %v6860_v58 }
 0x6b6   :  { %vm7309_vm14 = vcmp.eq.s32.totalorder %v7304_v52, 2  ;;  %v6865_v26 = vmul.f32 %v6861_v48, %v6427_v20  ;;  %vm7306_vm9 = vcmp.eq.s32.totalorder %v7304_v52, 0  ;;  %vm7305_vm5 = vcmp.lt.s32.totalorder %v7304_v52, 2 }
 0x6b7   :  { %v6417_v5 = vadd.f32 %v6413_v39, %v5965_v6 }
 0x6b9   :  { %v6869_v25 = vadd.f32 %v6865_v26, %v6417_v5 }
 0x6bc   :  { %v8140_v7 = vpop.eup %8139 }
 0x6bd   :  { %v8142_v33 = vpop.eup %8141  ;;  %v7310_v46 = vxor.u32 2147483648, %v8140_v7 }
 0x6be   :  { %v7307_v45 = vxor.u32 2147483648, %v8142_v33 }
 0x6bf   :  { %v7311_v37 = vsel %vm7309_vm14, %v7310_v46, %v8142_v33 }
 0x6c0   :  { %v7308_v55 = vsel %vm7306_vm9, %v8140_v7, %v7307_v45 }
 0x6c1   :  { %v7312_v36 = vsel %vm7305_vm5, %v7308_v55, %v7311_v37 }
 0x6c2   :  { %v7313_v44 = vsel %vm7302_vm12, nan, %v7312_v36 }
 0x6c3   :  { %v7317_v17 = vmul.f32 %v7313_v44, %v6879_v47 }
 0x6c5   :  { %v7321_v59 = vadd.f32 %v7317_v17, %v6869_v25 }
 0x6c7   :  { %7325 = vst [vmem:[#allocation11 + $0x18] sm:$0xff] %v7321_v59 }
 0x6c8   :  { %8254 = shalt.err (!%p8251_p1)
}
 0x6c9   :  { %7337 = dma.vmem_to_hbm [thread:$0]  %s7332_s4, 512, %s17178_s5, [#allocation4], %s8273_s23, %s8273_s23, %s8274_s24  }
 0x6ca   :  { %8269 = dma.done.wait [#allocation4], 512  }
 0x6cb   :  { %8270 = vsyncadd [#allocation4], 4294966784 }
 0x6cc   :  { %7341 = vsyncpa [#allocation3], 1 }
 0x6cd   :  { %7342 = vsyncpa [#allocation6], 1 }
 0x6ce   :  { %7343 = vsyncpa [#allocation9], 1 }
 0x6cf   :  { %7344 = vsyncpa [#allocation4], 1 }

</bundles_post_ra>
